<compile_context>
chip_gen: v5e
topology: v5e:2x2
jax: 0.10.0
libtpu: 0.0.40
codegen_flags: <defaults>
</compile_context>

<pallas_src>
import functools

import jax
import jax.numpy as jnp
from jax.experimental import pallas as pl
from jax.experimental.pallas import tpu as pltpu

# ---------------- module hyper-parameters ----------------
CHANNELS1 = 32                    # conv1 out-channels
CHANNELS2 = 8                     # the original script's global `batch_size`
NUM_CLASSES = 7
IMG = 48                          # input spatial size implied by fc1 = Linear(8*12*12, 128)
HIDDEN = 128

POOL1 = IMG // 2                  # 24
POOL2 = POOL1 // 2                # 12
K1 = 3 * IMG                      # 144  : conv1 contraction (3 merged H taps)
L1 = IMG * CHANNELS1              # 1536 : conv1 lanes, (parity_w, w', c1)
L1H = POOL1 * CHANNELS1           # 768  : pool-1 lanes, (w', c1)
L2 = 256                          # conv2 lanes, parity_w'' * 128 + (w''*8 + c2), rest zero
L2H = 128                         # pool-2 lanes, (w''*8 + c2) padded to 128


# ---------------- fused Pallas kernel ----------------
def _cnn_fused_kernel(x_ref, w1_ref, b1_ref, w2_ref, b2_ref,
                      w3_ref, b3_ref, w4_ref, b4_ref, out_ref, *, b_blk):
    r2 = POOL1 * b_blk                                          # rows after pool-1

    # ---- conv1 (+bias, ReLU): single bf16 matmul, K = 144 (3 merged H taps) ----
    # rows = (parity_h, h', img), lanes = (parity_w, w', c1)
    a1 = jnp.dot(x_ref[...], w1_ref[...], preferred_element_type=jnp.float32)
    a1 = jnp.maximum(a1 + b1_ref[...], 0.0)                     # (48*b, 1536) f32

    # ---- 2x2 max pool #1: two tile-aligned half maxima (lanes, then rows) ----
    t1 = jnp.maximum(a1[:, :L1H], a1[:, L1H:])                  # w pairs  (48*b, 768)
    p1 = jnp.maximum(t1[:r2, :], t1[r2:, :])                    # h pairs  (24*b, 768)
    p1 = p1.astype(jnp.bfloat16)                                # rows = (h', img)

    # ---- conv2 (+bias, ReLU): 3 H taps as shifted row blocks (zero H padding) ----
    zrow = jnp.zeros((b_blk, L1H), jnp.bfloat16)
    pm = jnp.concatenate([zrow, p1[:r2 - b_blk, :]], axis=0)    # row h'-1
    pp = jnp.concatenate([p1[b_blk:, :], zrow], axis=0)         # row h'+1
    a2 = jnp.dot(pm, w2_ref[0], preferred_element_type=jnp.float32)
    a2 = a2 + jnp.dot(p1, w2_ref[1], preferred_element_type=jnp.float32)
    a2 = a2 + jnp.dot(pp, w2_ref[2], preferred_element_type=jnp.float32)
    a2 = jnp.maximum(a2 + b2_ref[...], 0.0)                     # (24*b, 256) f32

    # ---- 2x2 max pool #2 (w pairs = aligned lane halves) ----
    m2 = jnp.maximum(a2[:, :L2H], a2[:, L2H:])                  # (24*b, 128)

    # ---- pool-2 h pairs + flatten + fc1: 12 aligned accumulating matmuls ----
    # (dropout = eval-mode identity)
    acc = jnp.zeros((b_blk, HIDDEN), jnp.float32)
    for hh in range(POOL2):
        lo = (2 * hh) * b_blk
        p2 = jnp.maximum(m2[lo:lo + b_blk, :], m2[lo + b_blk:lo + 2 * b_blk, :])
        acc = acc + jnp.dot(p2, w3_ref[hh], preferred_element_type=jnp.float32)
    h1 = jnp.maximum(acc + b3_ref[...], 0.0)                    # (b, 128)

    # ---- fc2 ----
    out_ref[...] = jnp.dot(h1, w4_ref[...],
                           preferred_element_type=jnp.float32) + b4_ref[...]


# ---------------- wrapper-side constant preprocessing ----------------
def _prep_operands(params):
    """Banded conv weights + permuted fc1 weight.  Stride-2 pooling decimation,
    'same' zero padding and the PyTorch (C,H,W) flatten order are all folded
    into these constant matrices (built once per compile, fused by XLA)."""
    f32, bf16 = jnp.float32, jnp.bfloat16
    w1, b1 = params["conv1_w"], params["conv1_b"]               # (3,3,1,32), (32,)
    w2, b2 = params["conv2_w"], params["conv2_b"]               # (3,3,32,8), (8,)

    par = jnp.arange(2)[:, None, None]

    # conv1 output lane order: lane = parity_w*768 + w'*32 + c1   (w = 2w' + parity)
    wp = jnp.arange(POOL1)[None, :, None]
    c1 = jnp.arange(CHANNELS1)[None, None, :]
    perm1 = ((2 * wp + par) * CHANNELS1 + c1).reshape(L1)

    # banded conv1 weight, 3 H taps stacked along K:
    #   B1[dy*48 + p, lane(w, c)] = w1[dy, p - w + 1, 0, c]
    b1band = jnp.concatenate([
        sum(jnp.kron(jnp.eye(IMG, k=1 - dx, dtype=f32), w1[dy, dx, 0][None, :])
            for dx in range(3))
        for dy in range(3)], axis=0)                            # (144, 1536) std lanes
    b1band = b1band[:, perm1].astype(bf16)
    b1bias = jnp.tile(b1.astype(f32), IMG)[perm1][None, :]      # (1, 1536)

    # conv2 output lane order: lane = parity_w''*128 + (w''*8 + c2); lanes 96..127
    # of each half are structural zeros.  Input lanes are pool-1's (w', c1).
    up = jnp.arange(POOL2)[None, :, None]
    c2 = jnp.arange(CHANNELS2)[None, None, :]
    src2 = ((2 * up + par) * CHANNELS2 + c2).reshape(POOL1 * CHANNELS2)
    dst2 = (par * L2H + up * CHANNELS2 + c2).reshape(POOL1 * CHANNELS2)

    def band2(dy):
        std = sum(jnp.kron(jnp.eye(POOL1, k=1 - dx, dtype=f32), w2[dy, dx].astype(f32))
                  for dx in range(3))                           # (768, 192)
        return jnp.zeros((L1H, L2), f32).at[:, dst2].set(std[:, src2])
    b2band = jnp.stack([band2(dy) for dy in range(3)]).astype(bf16)   # (3, 768, 256)
    b2bias = jnp.zeros((L2,), f32).at[dst2].set(
        jnp.tile(b2.astype(f32), POOL1)[src2])[None, :]         # (1, 256)

    # fc1 weight gathered into 12 (128, 128) blocks indexed by h''; rows 96..127 zero.
    hh = jnp.arange(POOL2)[:, None, None]
    ww = jnp.arange(POOL2)[None, :, None]
    cc = jnp.arange(CHANNELS2)[None, None, :]
    src_rows = (cc * POOL2 * POOL2 + hh * POOL2 + ww).reshape(POOL2, POOL2 * CHANNELS2)
    fc1w = jnp.zeros((POOL2, L2H, HIDDEN), f32).at[:, :POOL2 * CHANNELS2, :].set(
        params["fc1_w"].astype(f32)[src_rows])                  # (12, 128, 128)
    fc1b = params["fc1_b"].astype(f32)[None, :]
    fc2w = params["fc2_w"].astype(f32)
    fc2b = params["fc2_b"].astype(f32)[None, :]
    return b1band, b1bias, b2band, b2bias, fc1w, fc1b, fc2w, fc2b


def _stage_input(x, b_blk):
    """(n_pad, 48, 48) f32 -> (n_pad*48, 144) bf16 im2col-over-H rows, ordered per
    block as (parity_h, h', img) so both 2x2 pools reduce to aligned half-maxima."""
    n_pad = x.shape[0]
    xm = jnp.pad(x, ((0, 0), (1, 0), (0, 0)))[:, :IMG, :]       # row h-1 (zero at top)
    xp = jnp.pad(x, ((0, 0), (0, 1), (0, 0)))[:, 1:, :]         # row h+1 (zero at bottom)
    lhs = jnp.concatenate([xm, x, xp], axis=2)                  # (n_pad, 48, 144)
    lhs = lhs.reshape(n_pad // b_blk, b_blk, POOL1, 2, K1)      # [blk, img, h', par, :]
    lhs = lhs.transpose(0, 3, 2, 1, 4)                          # [blk, par, h', img, :]
    return lhs.reshape(n_pad * IMG, K1).astype(jnp.bfloat16)


@jax.jit
def cnn_forward(params, x_nchw):
    """x_nchw: (N, 1, 48, 48) float32 -> logits (N, NUM_CLASSES)."""
    n = x_nchw.shape[0]
    x = x_nchw[:, 0, :, :].astype(jnp.float32)                  # (N, 48, 48)

    # images per grid step (conv matmul M = 48*b_blk / 24*b_blk rows)
    if n >= 64:
        b_blk = 16
    elif n >= 16:
        b_blk = 8
    else:
        b_blk = n
    n_pad = -(-n // b_blk) * b_blk
    if n_pad != n:
        x = jnp.pad(x, ((0, n_pad - n), (0, 0), (0, 0)))

    x_in = _stage_input(x, b_blk)
    (b1band, b1bias, b2band, b2bias,
     fc1w, fc1b, fc2w, fc2b) = _prep_operands(params)

    def _const(shape):
        """Full-array, grid-invariant operand; single-buffered when supported."""
        idx = lambda i: (0,) * len(shape)
        try:
            return pl.BlockSpec(shape, idx, pipeline_mode=pl.Buffered(1))
        except (TypeError, AttributeError):
            return pl.BlockSpec(shape, idx)

    out = pl.pallas_call(
        functools.partial(_cnn_fused_kernel, b_blk=b_blk),
        out_shape=jax.ShapeDtypeStruct((n_pad, NUM_CLASSES), jnp.float32),
        grid_spec=pltpu.PrefetchScalarGridSpec(
            num_scalar_prefetch=0,
            grid=(n_pad // b_blk,),
            in_specs=[
                pl.BlockSpec((IMG * b_blk, K1), lambda i: (i, 0)),   # staged images
                _const((K1, L1)),                                    # conv1 banded W
                _const((1, L1)),                                     # conv1 bias
                _const((3, L1H, L2)),                                # conv2 banded W
                _const((1, L2)),                                     # conv2 bias
                _const((POOL2, L2H, HIDDEN)),                        # fc1 W (12 blocks)
                _const((1, HIDDEN)),                                 # fc1 bias
                _const((HIDDEN, NUM_CLASSES)),                       # fc2 W
                _const((1, NUM_CLASSES)),                            # fc2 bias
            ],
            out_specs=pl.BlockSpec((b_blk, NUM_CLASSES), lambda i: (i, 0)),
        ),
        compiler_params=pltpu.CompilerParams(
            dimension_semantics=("parallel",),
            vmem_limit_bytes=32 * 1024 * 1024),
    )(x_in, b1band, b1bias, b2band, b2bias, fc1w, fc1b, fc2w, fc2b)

    return out[:n]


# ---------------- parameters & pure-JAX reference ----------------
def init_params(key):
    k1, k2, k3, k4, k5, k6 = jax.random.split(key, 6)
    p = {}
    p["conv1_w"] = 0.1 * jax.random.normal(k1, (3, 3, 1, CHANNELS1), jnp.float32)   # HWIO
    p["conv1_b"] = 0.01 * jax.random.normal(k5, (CHANNELS1,), jnp.float32)
    p["conv2_w"] = 0.1 * jax.random.normal(k2, (3, 3, CHANNELS1, CHANNELS2), jnp.float32)
    p["conv2_b"] = 0.01 * jax.random.normal(k6, (CHANNELS2,), jnp.float32)
    fc1_in = CHANNELS2 * POOL2 * POOL2
    p["fc1_w"] = 0.05 * jax.random.normal(k3, (fc1_in, HIDDEN), jnp.float32)
    p["fc1_b"] = jnp.zeros((HIDDEN,), jnp.float32)
    p["fc2_w"] = 0.05 * jax.random.normal(k4, (HIDDEN, NUM_CLASSES), jnp.float32)
    p["fc2_b"] = jnp.zeros((NUM_CLASSES,), jnp.float32)
    return p


def _reference_forward(params, x_nchw):
    """Pure-JAX reference with PyTorch semantics (validation only)."""
    hp = jax.lax.Precision.HIGHEST
    x = jnp.transpose(x_nchw, (0, 2, 3, 1))
    y = jax.lax.conv_general_dilated(x, params["conv1_w"], (1, 1), "SAME",
                                     dimension_numbers=("NHWC", "HWIO", "NHWC"),
                                     precision=hp)
    y = jax.nn.relu(y + params["conv1_b"])
    y = jax.lax.reduce_window(y, -jnp.inf, jax.lax.max, (1, 2, 2, 1), (1, 2, 2, 1), "VALID")
    y = jax.lax.conv_general_dilated(y, params["conv2_w"], (1, 1), "SAME",
                                     dimension_numbers=("NHWC", "HWIO", "NHWC"),
                                     precision=hp)
    y = jax.nn.relu(y + params["conv2_b"])
    y = jax.lax.reduce_window(y, -jnp.inf, jax.lax.max, (1, 2, 2, 1), (1, 2, 2, 1), "VALID")
    y = jnp.transpose(y, (0, 3, 1, 2)).reshape(y.shape[0], -1)   # PyTorch flatten order
    y = jax.nn.relu(jnp.dot(y, params["fc1_w"], precision=hp) + params["fc1_b"])
    return jnp.dot(y, params["fc2_w"], precision=hp) + params["fc2_b"]


if __name__ == "__main__":
    key = jax.random.PRNGKey(0)
    pkey, xkey = jax.random.split(key)
    params = init_params(pkey)
    x = jax.random.normal(xkey, (2, 1, IMG, IMG), jnp.float32)   # NCHW input

    out = jax.block_until_ready(cnn_forward(params, x))
    assert out.shape == (2, NUM_CLASSES), out.shape
    assert bool(jnp.all(jnp.isfinite(out)))

    ref = jax.block_until_ready(_reference_forward(params, x))
    assert bool(jnp.allclose(out, ref, rtol=5e-2, atol=5e-2)), \
        float(jnp.max(jnp.abs(out - ref)))

    print("KERNEL_OK")
</pallas_src>

<mosaic_0001>
module attributes {stable_mosaic.version = 11 : i64} {
  func.func @_cnn_fused_kernel(%arg0: i32, %arg1: memref<96x144xbf16, #tpu.memory_space<vmem>>, %arg2: memref<144x1536xbf16, #tpu.memory_space<vmem>>, %arg3: memref<1x1536xf32, #tpu.memory_space<vmem>>, %arg4: memref<3x768x256xbf16, #tpu.memory_space<vmem>>, %arg5: memref<1x256xf32, #tpu.memory_space<vmem>>, %arg6: memref<12x128x128xf32, #tpu.memory_space<vmem>>, %arg7: memref<1x128xf32, #tpu.memory_space<vmem>>, %arg8: memref<128x7xf32, #tpu.memory_space<vmem>>, %arg9: memref<1x7xf32, #tpu.memory_space<vmem>>, %arg10: memref<2x7xf32, #tpu.memory_space<vmem>>) attributes {dimension_semantics = [#tpu.dimension_semantics<parallel>], iteration_bounds = array<i64: 1>, scalar_prefetch = 0 : i64, scratch_operands = 0 : i64, tpu.core_type = #tpu.core_type<tc>, window_params = [{transform_indices = @transform_0, window_bounds = array<i64: 96, 144>}, {pipeline_mode = #tpu.pipeline_mode<synchronous>, transform_indices = @transform_1, window_bounds = array<i64: 144, 1536>}, {pipeline_mode = #tpu.pipeline_mode<synchronous>, transform_indices = @transform_2, window_bounds = array<i64: 1, 1536>}, {pipeline_mode = #tpu.pipeline_mode<synchronous>, transform_indices = @transform_3, window_bounds = array<i64: 3, 768, 256>}, {pipeline_mode = #tpu.pipeline_mode<synchronous>, transform_indices = @transform_4, window_bounds = array<i64: 1, 256>}, {pipeline_mode = #tpu.pipeline_mode<synchronous>, transform_indices = @transform_5, window_bounds = array<i64: 12, 128, 128>}, {pipeline_mode = #tpu.pipeline_mode<synchronous>, transform_indices = @transform_6, window_bounds = array<i64: 1, 128>}, {pipeline_mode = #tpu.pipeline_mode<synchronous>, transform_indices = @transform_7, window_bounds = array<i64: 128, 7>}, {pipeline_mode = #tpu.pipeline_mode<synchronous>, transform_indices = @transform_8, window_bounds = array<i64: 1, 7>}, {transform_indices = @transform_9, window_bounds = array<i64: 2, 7>}]} {
    %c0 = arith.constant 0 : index
    %c0_0 = arith.constant 0 : index
    %0 = vector.load %arg1[%c0, %c0_0] : memref<96x144xbf16, #tpu.memory_space<vmem>>, vector<96x144xbf16>
    %c0_1 = arith.constant 0 : index
    %c0_2 = arith.constant 0 : index
    %1 = vector.load %arg2[%c0_1, %c0_2] : memref<144x1536xbf16, #tpu.memory_space<vmem>>, vector<144x1536xbf16>
    %cst = arith.constant dense<0.000000e+00> : vector<96x1536xf32>
    %2 = tpu.matmul %0, %1, %cst {dimension_numbers = #tpu.dot_dimension_numbers<[1], [0], [0], [1], [0, 0, 1, 1], [], []>} : vector<96x144xbf16>, vector<144x1536xbf16>, vector<96x1536xf32> -> vector<96x1536xf32>
    %c0_3 = arith.constant 0 : index
    %c0_4 = arith.constant 0 : index
    %3 = vector.load %arg3[%c0_3, %c0_4] : memref<1x1536xf32, #tpu.memory_space<vmem>>, vector<1x1536xf32>
    %4 = vector.broadcast %3 : vector<1x1536xf32> to vector<96x1536xf32>
    %5 = arith.addf %2, %4 : vector<96x1536xf32>
    %cst_5 = arith.constant 0.000000e+00 : f32
    %6 = vector.broadcast %cst_5 : f32 to vector<96x1536xf32>
    %7 = arith.maximumf %5, %6 : vector<96x1536xf32>
    %8 = vector.extract_strided_slice %7 {offsets = [0, 0], sizes = [96, 768], strides = [1, 1]} : vector<96x1536xf32> to vector<96x768xf32>
    %9 = vector.extract_strided_slice %7 {offsets = [0, 768], sizes = [96, 768], strides = [1, 1]} : vector<96x1536xf32> to vector<96x768xf32>
    %10 = arith.maximumf %8, %9 : vector<96x768xf32>
    %11 = vector.extract_strided_slice %10 {offsets = [0, 0], sizes = [48, 768], strides = [1, 1]} : vector<96x768xf32> to vector<48x768xf32>
    %12 = vector.extract_strided_slice %10 {offsets = [48, 0], sizes = [48, 768], strides = [1, 1]} : vector<96x768xf32> to vector<48x768xf32>
    %13 = arith.maximumf %11, %12 : vector<48x768xf32>
    %14 = arith.truncf %13 : vector<48x768xf32> to vector<48x768xbf16>
    %cst_6 = arith.constant 0.000000e+00 : bf16
    %15 = vector.broadcast %cst_6 : bf16 to vector<2x768xbf16>
    %16 = vector.extract_strided_slice %14 {offsets = [0, 0], sizes = [46, 768], strides = [1, 1]} : vector<48x768xbf16> to vector<46x768xbf16>
    %17 = tpu.concatenate %15, %16 in 0 : vector<2x768xbf16>, vector<46x768xbf16> -> vector<48x768xbf16>
    %18 = vector.extract_strided_slice %14 {offsets = [2, 0], sizes = [46, 768], strides = [1, 1]} : vector<48x768xbf16> to vector<46x768xbf16>
    %19 = tpu.concatenate %18, %15 in 0 : vector<46x768xbf16>, vector<2x768xbf16> -> vector<48x768xbf16>
    %c0_7 = arith.constant 0 : index
    %c0_8 = arith.constant 0 : index
    %c0_9 = arith.constant 0 : index
    %20 = vector.load %arg4[%c0_7, %c0_8, %c0_9] : memref<3x768x256xbf16, #tpu.memory_space<vmem>>, vector<1x768x256xbf16>
    %21 = vector.shape_cast %20 : vector<1x768x256xbf16> to vector<768x256xbf16>
    %cst_10 = arith.constant dense<0.000000e+00> : vector<48x256xf32>
    %22 = tpu.matmul %17, %21, %cst_10 {dimension_numbers = #tpu.dot_dimension_numbers<[1], [0], [0], [1], [0, 0, 1, 1], [], []>} : vector<48x768xbf16>, vector<768x256xbf16>, vector<48x256xf32> -> vector<48x256xf32>
    %c1 = arith.constant 1 : index
    %c0_11 = arith.constant 0 : index
    %c0_12 = arith.constant 0 : index
    %23 = vector.load %arg4[%c1, %c0_11, %c0_12] : memref<3x768x256xbf16, #tpu.memory_space<vmem>>, vector<1x768x256xbf16>
    %24 = vector.shape_cast %23 : vector<1x768x256xbf16> to vector<768x256xbf16>
    %cst_13 = arith.constant dense<0.000000e+00> : vector<48x256xf32>
    %25 = tpu.matmul %14, %24, %cst_13 {dimension_numbers = #tpu.dot_dimension_numbers<[1], [0], [0], [1], [0, 0, 1, 1], [], []>} : vector<48x768xbf16>, vector<768x256xbf16>, vector<48x256xf32> -> vector<48x256xf32>
    %26 = arith.addf %22, %25 : vector<48x256xf32>
    %c2 = arith.constant 2 : index
    %c0_14 = arith.constant 0 : index
    %c0_15 = arith.constant 0 : index
    %27 = vector.load %arg4[%c2, %c0_14, %c0_15] : memref<3x768x256xbf16, #tpu.memory_space<vmem>>, vector<1x768x256xbf16>
    %28 = vector.shape_cast %27 : vector<1x768x256xbf16> to vector<768x256xbf16>
    %cst_16 = arith.constant dense<0.000000e+00> : vector<48x256xf32>
    %29 = tpu.matmul %19, %28, %cst_16 {dimension_numbers = #tpu.dot_dimension_numbers<[1], [0], [0], [1], [0, 0, 1, 1], [], []>} : vector<48x768xbf16>, vector<768x256xbf16>, vector<48x256xf32> -> vector<48x256xf32>
    %30 = arith.addf %26, %29 : vector<48x256xf32>
    %c0_17 = arith.constant 0 : index
    %c0_18 = arith.constant 0 : index
    %31 = vector.load %arg5[%c0_17, %c0_18] : memref<1x256xf32, #tpu.memory_space<vmem>>, vector<1x256xf32>
    %32 = vector.broadcast %31 : vector<1x256xf32> to vector<48x256xf32>
    %33 = arith.addf %30, %32 : vector<48x256xf32>
    %cst_19 = arith.constant 0.000000e+00 : f32
    %34 = vector.broadcast %cst_19 : f32 to vector<48x256xf32>
    %35 = arith.maximumf %33, %34 : vector<48x256xf32>
    %36 = vector.extract_strided_slice %35 {offsets = [0, 0], sizes = [48, 128], strides = [1, 1]} : vector<48x256xf32> to vector<48x128xf32>
    %37 = vector.extract_strided_slice %35 {offsets = [0, 128], sizes = [48, 128], strides = [1, 1]} : vector<48x256xf32> to vector<48x128xf32>
    %38 = arith.maximumf %36, %37 : vector<48x128xf32>
    %cst_20 = arith.constant 0.000000e+00 : f32
    %39 = vector.broadcast %cst_20 : f32 to vector<2x128xf32>
    %40 = vector.extract_strided_slice %38 {offsets = [0, 0], sizes = [2, 128], strides = [1, 1]} : vector<48x128xf32> to vector<2x128xf32>
    %41 = vector.extract_strided_slice %38 {offsets = [2, 0], sizes = [2, 128], strides = [1, 1]} : vector<48x128xf32> to vector<2x128xf32>
    %42 = arith.maximumf %40, %41 : vector<2x128xf32>
    %c0_21 = arith.constant 0 : index
    %c0_22 = arith.constant 0 : index
    %c0_23 = arith.constant 0 : index
    %43 = vector.load %arg6[%c0_21, %c0_22, %c0_23] : memref<12x128x128xf32, #tpu.memory_space<vmem>>, vector<1x128x128xf32>
    %44 = vector.shape_cast %43 : vector<1x128x128xf32> to vector<128x128xf32>
    %cst_24 = arith.constant dense<0.000000e+00> : vector<2x128xf32>
    %45 = tpu.matmul %42, %44, %cst_24 {dimension_numbers = #tpu.dot_dimension_numbers<[1], [0], [0], [1], [0, 0, 1, 1], [], []>} : vector<2x128xf32>, vector<128x128xf32>, vector<2x128xf32> -> vector<2x128xf32>
    %46 = arith.addf %39, %45 : vector<2x128xf32>
    %47 = vector.extract_strided_slice %38 {offsets = [4, 0], sizes = [2, 128], strides = [1, 1]} : vector<48x128xf32> to vector<2x128xf32>
    %48 = vector.extract_strided_slice %38 {offsets = [6, 0], sizes = [2, 128], strides = [1, 1]} : vector<48x128xf32> to vector<2x128xf32>
    %49 = arith.maximumf %47, %48 : vector<2x128xf32>
    %c1_25 = arith.constant 1 : index
    %c0_26 = arith.constant 0 : index
    %c0_27 = arith.constant 0 : index
    %50 = vector.load %arg6[%c1_25, %c0_26, %c0_27] : memref<12x128x128xf32, #tpu.memory_space<vmem>>, vector<1x128x128xf32>
    %51 = vector.shape_cast %50 : vector<1x128x128xf32> to vector<128x128xf32>
    %cst_28 = arith.constant dense<0.000000e+00> : vector<2x128xf32>
    %52 = tpu.matmul %49, %51, %cst_28 {dimension_numbers = #tpu.dot_dimension_numbers<[1], [0], [0], [1], [0, 0, 1, 1], [], []>} : vector<2x128xf32>, vector<128x128xf32>, vector<2x128xf32> -> vector<2x128xf32>
    %53 = arith.addf %46, %52 : vector<2x128xf32>
    %54 = vector.extract_strided_slice %38 {offsets = [8, 0], sizes = [2, 128], strides = [1, 1]} : vector<48x128xf32> to vector<2x128xf32>
    %55 = vector.extract_strided_slice %38 {offsets = [10, 0], sizes = [2, 128], strides = [1, 1]} : vector<48x128xf32> to vector<2x128xf32>
    %56 = arith.maximumf %54, %55 : vector<2x128xf32>
    %c2_29 = arith.constant 2 : index
    %c0_30 = arith.constant 0 : index
    %c0_31 = arith.constant 0 : index
    %57 = vector.load %arg6[%c2_29, %c0_30, %c0_31] : memref<12x128x128xf32, #tpu.memory_space<vmem>>, vector<1x128x128xf32>
    %58 = vector.shape_cast %57 : vector<1x128x128xf32> to vector<128x128xf32>
    %cst_32 = arith.constant dense<0.000000e+00> : vector<2x128xf32>
    %59 = tpu.matmul %56, %58, %cst_32 {dimension_numbers = #tpu.dot_dimension_numbers<[1], [0], [0], [1], [0, 0, 1, 1], [], []>} : vector<2x128xf32>, vector<128x128xf32>, vector<2x128xf32> -> vector<2x128xf32>
    %60 = arith.addf %53, %59 : vector<2x128xf32>
    %61 = vector.extract_strided_slice %38 {offsets = [12, 0], sizes = [2, 128], strides = [1, 1]} : vector<48x128xf32> to vector<2x128xf32>
    %62 = vector.extract_strided_slice %38 {offsets = [14, 0], sizes = [2, 128], strides = [1, 1]} : vector<48x128xf32> to vector<2x128xf32>
    %63 = arith.maximumf %61, %62 : vector<2x128xf32>
    %c3 = arith.constant 3 : index
    %c0_33 = arith.constant 0 : index
    %c0_34 = arith.constant 0 : index
    %64 = vector.load %arg6[%c3, %c0_33, %c0_34] : memref<12x128x128xf32, #tpu.memory_space<vmem>>, vector<1x128x128xf32>
    %65 = vector.shape_cast %64 : vector<1x128x128xf32> to vector<128x128xf32>
    %cst_35 = arith.constant dense<0.000000e+00> : vector<2x128xf32>
    %66 = tpu.matmul %63, %65, %cst_35 {dimension_numbers = #tpu.dot_dimension_numbers<[1], [0], [0], [1], [0, 0, 1, 1], [], []>} : vector<2x128xf32>, vector<128x128xf32>, vector<2x128xf32> -> vector<2x128xf32>
    %67 = arith.addf %60, %66 : vector<2x128xf32>
    %68 = vector.extract_strided_slice %38 {offsets = [16, 0], sizes = [2, 128], strides = [1, 1]} : vector<48x128xf32> to vector<2x128xf32>
    %69 = vector.extract_strided_slice %38 {offsets = [18, 0], sizes = [2, 128], strides = [1, 1]} : vector<48x128xf32> to vector<2x128xf32>
    %70 = arith.maximumf %68, %69 : vector<2x128xf32>
    %c4 = arith.constant 4 : index
    %c0_36 = arith.constant 0 : index
    %c0_37 = arith.constant 0 : index
    %71 = vector.load %arg6[%c4, %c0_36, %c0_37] : memref<12x128x128xf32, #tpu.memory_space<vmem>>, vector<1x128x128xf32>
    %72 = vector.shape_cast %71 : vector<1x128x128xf32> to vector<128x128xf32>
    %cst_38 = arith.constant dense<0.000000e+00> : vector<2x128xf32>
    %73 = tpu.matmul %70, %72, %cst_38 {dimension_numbers = #tpu.dot_dimension_numbers<[1], [0], [0], [1], [0, 0, 1, 1], [], []>} : vector<2x128xf32>, vector<128x128xf32>, vector<2x128xf32> -> vector<2x128xf32>
    %74 = arith.addf %67, %73 : vector<2x128xf32>
    %75 = vector.extract_strided_slice %38 {offsets = [20, 0], sizes = [2, 128], strides = [1, 1]} : vector<48x128xf32> to vector<2x128xf32>
    %76 = vector.extract_strided_slice %38 {offsets = [22, 0], sizes = [2, 128], strides = [1, 1]} : vector<48x128xf32> to vector<2x128xf32>
    %77 = arith.maximumf %75, %76 : vector<2x128xf32>
    %c5 = arith.constant 5 : index
    %c0_39 = arith.constant 0 : index
    %c0_40 = arith.constant 0 : index
    %78 = vector.load %arg6[%c5, %c0_39, %c0_40] : memref<12x128x128xf32, #tpu.memory_space<vmem>>, vector<1x128x128xf32>
    %79 = vector.shape_cast %78 : vector<1x128x128xf32> to vector<128x128xf32>
    %cst_41 = arith.constant dense<0.000000e+00> : vector<2x128xf32>
    %80 = tpu.matmul %77, %79, %cst_41 {dimension_numbers = #tpu.dot_dimension_numbers<[1], [0], [0], [1], [0, 0, 1, 1], [], []>} : vector<2x128xf32>, vector<128x128xf32>, vector<2x128xf32> -> vector<2x128xf32>
    %81 = arith.addf %74, %80 : vector<2x128xf32>
    %82 = vector.extract_strided_slice %38 {offsets = [24, 0], sizes = [2, 128], strides = [1, 1]} : vector<48x128xf32> to vector<2x128xf32>
    %83 = vector.extract_strided_slice %38 {offsets = [26, 0], sizes = [2, 128], strides = [1, 1]} : vector<48x128xf32> to vector<2x128xf32>
    %84 = arith.maximumf %82, %83 : vector<2x128xf32>
    %c6 = arith.constant 6 : index
    %c0_42 = arith.constant 0 : index
    %c0_43 = arith.constant 0 : index
    %85 = vector.load %arg6[%c6, %c0_42, %c0_43] : memref<12x128x128xf32, #tpu.memory_space<vmem>>, vector<1x128x128xf32>
    %86 = vector.shape_cast %85 : vector<1x128x128xf32> to vector<128x128xf32>
    %cst_44 = arith.constant dense<0.000000e+00> : vector<2x128xf32>
    %87 = tpu.matmul %84, %86, %cst_44 {dimension_numbers = #tpu.dot_dimension_numbers<[1], [0], [0], [1], [0, 0, 1, 1], [], []>} : vector<2x128xf32>, vector<128x128xf32>, vector<2x128xf32> -> vector<2x128xf32>
    %88 = arith.addf %81, %87 : vector<2x128xf32>
    %89 = vector.extract_strided_slice %38 {offsets = [28, 0], sizes = [2, 128], strides = [1, 1]} : vector<48x128xf32> to vector<2x128xf32>
    %90 = vector.extract_strided_slice %38 {offsets = [30, 0], sizes = [2, 128], strides = [1, 1]} : vector<48x128xf32> to vector<2x128xf32>
    %91 = arith.maximumf %89, %90 : vector<2x128xf32>
    %c7 = arith.constant 7 : index
    %c0_45 = arith.constant 0 : index
    %c0_46 = arith.constant 0 : index
    %92 = vector.load %arg6[%c7, %c0_45, %c0_46] : memref<12x128x128xf32, #tpu.memory_space<vmem>>, vector<1x128x128xf32>
    %93 = vector.shape_cast %92 : vector<1x128x128xf32> to vector<128x128xf32>
    %cst_47 = arith.constant dense<0.000000e+00> : vector<2x128xf32>
    %94 = tpu.matmul %91, %93, %cst_47 {dimension_numbers = #tpu.dot_dimension_numbers<[1], [0], [0], [1], [0, 0, 1, 1], [], []>} : vector<2x128xf32>, vector<128x128xf32>, vector<2x128xf32> -> vector<2x128xf32>
    %95 = arith.addf %88, %94 : vector<2x128xf32>
    %96 = vector.extract_strided_slice %38 {offsets = [32, 0], sizes = [2, 128], strides = [1, 1]} : vector<48x128xf32> to vector<2x128xf32>
    %97 = vector.extract_strided_slice %38 {offsets = [34, 0], sizes = [2, 128], strides = [1, 1]} : vector<48x128xf32> to vector<2x128xf32>
    %98 = arith.maximumf %96, %97 : vector<2x128xf32>
    %c8 = arith.constant 8 : index
    %c0_48 = arith.constant 0 : index
    %c0_49 = arith.constant 0 : index
    %99 = vector.load %arg6[%c8, %c0_48, %c0_49] : memref<12x128x128xf32, #tpu.memory_space<vmem>>, vector<1x128x128xf32>
    %100 = vector.shape_cast %99 : vector<1x128x128xf32> to vector<128x128xf32>
    %cst_50 = arith.constant dense<0.000000e+00> : vector<2x128xf32>
    %101 = tpu.matmul %98, %100, %cst_50 {dimension_numbers = #tpu.dot_dimension_numbers<[1], [0], [0], [1], [0, 0, 1, 1], [], []>} : vector<2x128xf32>, vector<128x128xf32>, vector<2x128xf32> -> vector<2x128xf32>
    %102 = arith.addf %95, %101 : vector<2x128xf32>
    %103 = vector.extract_strided_slice %38 {offsets = [36, 0], sizes = [2, 128], strides = [1, 1]} : vector<48x128xf32> to vector<2x128xf32>
    %104 = vector.extract_strided_slice %38 {offsets = [38, 0], sizes = [2, 128], strides = [1, 1]} : vector<48x128xf32> to vector<2x128xf32>
    %105 = arith.maximumf %103, %104 : vector<2x128xf32>
    %c9 = arith.constant 9 : index
    %c0_51 = arith.constant 0 : index
    %c0_52 = arith.constant 0 : index
    %106 = vector.load %arg6[%c9, %c0_51, %c0_52] : memref<12x128x128xf32, #tpu.memory_space<vmem>>, vector<1x128x128xf32>
    %107 = vector.shape_cast %106 : vector<1x128x128xf32> to vector<128x128xf32>
    %cst_53 = arith.constant dense<0.000000e+00> : vector<2x128xf32>
    %108 = tpu.matmul %105, %107, %cst_53 {dimension_numbers = #tpu.dot_dimension_numbers<[1], [0], [0], [1], [0, 0, 1, 1], [], []>} : vector<2x128xf32>, vector<128x128xf32>, vector<2x128xf32> -> vector<2x128xf32>
    %109 = arith.addf %102, %108 : vector<2x128xf32>
    %110 = vector.extract_strided_slice %38 {offsets = [40, 0], sizes = [2, 128], strides = [1, 1]} : vector<48x128xf32> to vector<2x128xf32>
    %111 = vector.extract_strided_slice %38 {offsets = [42, 0], sizes = [2, 128], strides = [1, 1]} : vector<48x128xf32> to vector<2x128xf32>
    %112 = arith.maximumf %110, %111 : vector<2x128xf32>
    %c10 = arith.constant 10 : index
    %c0_54 = arith.constant 0 : index
    %c0_55 = arith.constant 0 : index
    %113 = vector.load %arg6[%c10, %c0_54, %c0_55] : memref<12x128x128xf32, #tpu.memory_space<vmem>>, vector<1x128x128xf32>
    %114 = vector.shape_cast %113 : vector<1x128x128xf32> to vector<128x128xf32>
    %cst_56 = arith.constant dense<0.000000e+00> : vector<2x128xf32>
    %115 = tpu.matmul %112, %114, %cst_56 {dimension_numbers = #tpu.dot_dimension_numbers<[1], [0], [0], [1], [0, 0, 1, 1], [], []>} : vector<2x128xf32>, vector<128x128xf32>, vector<2x128xf32> -> vector<2x128xf32>
    %116 = arith.addf %109, %115 : vector<2x128xf32>
    %117 = vector.extract_strided_slice %38 {offsets = [44, 0], sizes = [2, 128], strides = [1, 1]} : vector<48x128xf32> to vector<2x128xf32>
    %118 = vector.extract_strided_slice %38 {offsets = [46, 0], sizes = [2, 128], strides = [1, 1]} : vector<48x128xf32> to vector<2x128xf32>
    %119 = arith.maximumf %117, %118 : vector<2x128xf32>
    %c11 = arith.constant 11 : index
    %c0_57 = arith.constant 0 : index
    %c0_58 = arith.constant 0 : index
    %120 = vector.load %arg6[%c11, %c0_57, %c0_58] : memref<12x128x128xf32, #tpu.memory_space<vmem>>, vector<1x128x128xf32>
    %121 = vector.shape_cast %120 : vector<1x128x128xf32> to vector<128x128xf32>
    %cst_59 = arith.constant dense<0.000000e+00> : vector<2x128xf32>
    %122 = tpu.matmul %119, %121, %cst_59 {dimension_numbers = #tpu.dot_dimension_numbers<[1], [0], [0], [1], [0, 0, 1, 1], [], []>} : vector<2x128xf32>, vector<128x128xf32>, vector<2x128xf32> -> vector<2x128xf32>
    %123 = arith.addf %116, %122 : vector<2x128xf32>
    %c0_60 = arith.constant 0 : index
    %c0_61 = arith.constant 0 : index
    %124 = vector.load %arg7[%c0_60, %c0_61] : memref<1x128xf32, #tpu.memory_space<vmem>>, vector<1x128xf32>
    %125 = vector.broadcast %124 : vector<1x128xf32> to vector<2x128xf32>
    %126 = arith.addf %123, %125 : vector<2x128xf32>
    %cst_62 = arith.constant 0.000000e+00 : f32
    %127 = vector.broadcast %cst_62 : f32 to vector<2x128xf32>
    %128 = arith.maximumf %126, %127 : vector<2x128xf32>
    %c0_63 = arith.constant 0 : index
    %c0_64 = arith.constant 0 : index
    %129 = vector.load %arg8[%c0_63, %c0_64] : memref<128x7xf32, #tpu.memory_space<vmem>>, vector<128x7xf32>
    %cst_65 = arith.constant dense<0.000000e+00> : vector<2x7xf32>
    %130 = tpu.matmul %128, %129, %cst_65 {dimension_numbers = #tpu.dot_dimension_numbers<[1], [0], [0], [1], [0, 0, 1, 1], [], []>} : vector<2x128xf32>, vector<128x7xf32>, vector<2x7xf32> -> vector<2x7xf32>
    %c0_66 = arith.constant 0 : index
    %c0_67 = arith.constant 0 : index
    %131 = vector.load %arg9[%c0_66, %c0_67] : memref<1x7xf32, #tpu.memory_space<vmem>>, vector<1x7xf32>
    %132 = vector.broadcast %131 : vector<1x7xf32> to vector<2x7xf32>
    %133 = arith.addf %130, %132 : vector<2x7xf32>
    %c0_68 = arith.constant 0 : index
    %c0_69 = arith.constant 0 : index
    %134 = vector.load %arg10[%c0_68, %c0_69] : memref<2x7xf32, #tpu.memory_space<vmem>>, vector<2x7xf32>
    tpu.vector_store %arg10[%c0_68, %c0_69], %133 {strides = array<i32>} : memref<2x7xf32, #tpu.memory_space<vmem>>, vector<2x7xf32>,
    return
  }
  func.func @transform_0(%arg0: i32) -> (i32, i32) {
    %c0_i32 = arith.constant 0 : i32
    %c0_i32_0 = arith.constant 0 : i32
    return %arg0, %c0_i32 : i32, i32
  }
  func.func @transform_1(%arg0: i32) -> (i32, i32) {
    %c0_i32 = arith.constant 0 : i32
    %c0_i32_0 = arith.constant 0 : i32
    %c0_i32_1 = arith.constant 0 : i32
    return %c0_i32, %c0_i32_0 : i32, i32
  }
  func.func @transform_2(%arg0: i32) -> (i32, i32) {
    %c0_i32 = arith.constant 0 : i32
    %c0_i32_0 = arith.constant 0 : i32
    %c0_i32_1 = arith.constant 0 : i32
    return %c0_i32, %c0_i32_0 : i32, i32
  }
  func.func @transform_3(%arg0: i32) -> (i32, i32, i32) {
    %c0_i32 = arith.constant 0 : i32
    %c0_i32_0 = arith.constant 0 : i32
    %c0_i32_1 = arith.constant 0 : i32
    %c0_i32_2 = arith.constant 0 : i32
    return %c0_i32, %c0_i32_0, %c0_i32_1 : i32, i32, i32
  }
  func.func @transform_4(%arg0: i32) -> (i32, i32) {
    %c0_i32 = arith.constant 0 : i32
    %c0_i32_0 = arith.constant 0 : i32
    %c0_i32_1 = arith.constant 0 : i32
    return %c0_i32, %c0_i32_0 : i32, i32
  }
  func.func @transform_5(%arg0: i32) -> (i32, i32, i32) {
    %c0_i32 = arith.constant 0 : i32
    %c0_i32_0 = arith.constant 0 : i32
    %c0_i32_1 = arith.constant 0 : i32
    %c0_i32_2 = arith.constant 0 : i32
    return %c0_i32, %c0_i32_0, %c0_i32_1 : i32, i32, i32
  }
  func.func @transform_6(%arg0: i32) -> (i32, i32) {
    %c0_i32 = arith.constant 0 : i32
    %c0_i32_0 = arith.constant 0 : i32
    %c0_i32_1 = arith.constant 0 : i32
    return %c0_i32, %c0_i32_0 : i32, i32
  }
  func.func @transform_7(%arg0: i32) -> (i32, i32) {
    %c0_i32 = arith.constant 0 : i32
    %c0_i32_0 = arith.constant 0 : i32
    %c0_i32_1 = arith.constant 0 : i32
    return %c0_i32, %c0_i32_0 : i32, i32
  }
  func.func @transform_8(%arg0: i32) -> (i32, i32) {
    %c0_i32 = arith.constant 0 : i32
    %c0_i32_0 = arith.constant 0 : i32
    %c0_i32_1 = arith.constant 0 : i32
    return %c0_i32, %c0_i32_0 : i32, i32
  }
  func.func @transform_9(%arg0: i32) -> (i32, i32) {
    %c0_i32 = arith.constant 0 : i32
    %c0_i32_0 = arith.constant 0 : i32
    return %arg0, %c0_i32 : i32, i32
  }
}

</mosaic_0001>

<bundles_post_ra>
// kernel: tile.18
= control target key start
LH: loop header
LB: loop body
LE: loop exit
PB: predicated region body
PF: predicated region fallthrough
CT: control target
= control target key end

     0   :  { %s34_s0 = inlined_call_operand.vmem [shape: f32[8], index: 0, kind: input, shape index: {}]   ;;  %s35_s1 = inlined_call_operand.vmem [shape: f32[24,8], index: 1, kind: output, shape index: {}]  }
   0x1   :  { %v4_v0 = vld [vmem:[%s34_s0] ss:$0 sm:$0xff] }
   0x2   :  { %5 = vst [vmem:[%s35_s1] sm:$0xff] %v4_v0 }
   0x3   :  { %10 = vst [vmem:[%s35_s1 + $0x8] sm:$0xff] %v4_v0 }
   0x4   :  { %11 = vst [vmem:[%s35_s1 + $0x10] sm:$0xff] %v4_v0 }

// kernel: tile.19
= control target key start
LH: loop header
LB: loop body
LE: loop exit
PB: predicated region body
PF: predicated region fallthrough
CT: control target
= control target key end

     0   :  { %s139_s10 = smov 120   ;;  %s140_s11 = smov 104   ;;  %vm4_vm0 = vcmask 64512   ;;  %vm10_vm1 = vcmask 1048512   ;;  %vm16_vm2 = vcmask 982912   ;;  %vm22_vm3 = vcmask 917312   ;;  %s215_s0 = inlined_call_operand.vmem [shape: f32[24,8], index: 0, kind: input, shape index: {}]   ;;  %s216_s1 = inlined_call_operand.vmem [shape: f32[192], index: 1, kind: output, shape index: {}]  }
   0x1   :  { %v109_v0 = vld [vmem:[%s215_s0 + $0xf] sm:$0x1]   ;;  %v111_v1 = vld [vmem:[%s215_s0 + $0xd] sm:$0x1]   ;;  %v113_v2 = vld [vmem:[%s215_s0 + $0xb] sm:$0x1]  }
   0x2   :  { %8 = vrot.lane.b32.xlu0 %v109_v0, %s139_s10  ;;  %20 = vrot.lane.b32.xlu1 %v111_v1, %s140_s11  ;;  %v110_v3 = vld [vmem:[%s215_s0 + $0xe] sm:$0x1]   ;;  %v112_v4 = vld [vmem:[%s215_s0 + $0xc] sm:$0x1]   ;;  %s141_s18 = smov 88   ;;  %s142_s19 = smov 112  }
   0x3   :  { %32 = vrot.lane.b32.xlu2 %v113_v2, %s141_s18  ;;  %s143_s20 = smov 96   ;;  %v114_v5 = vld [vmem:[%s215_s0 + $0xa] sm:$0x1]   ;;  %v115_v6 = vld [vmem:[%s215_s0 + $0x9] sm:$0x1]   ;;  %s144_s27 = smov 80  }
   0x4   :  { %v116_v7 = vld [vmem:[%s215_s0 + $0x8] sm:$0x1]   ;;  %s55_s28 = smov 3  ;;  %s145_s29 = smov 72   ;;  %vm28_vm4 = vcmask 851712   ;;  %vm34_vm5 = vcmask 786112  }
   0x5   :  { %s146_s30 = smov 64   ;;  %s62_s2 = smov 3  ;;  %v117_v8 = vld [vmem:[%s215_s0 + $0x7] ss:$16 sm:%s55_s28]   ;;  %vm40_vm6 = vcmask 720512   ;;  %vm46_vm7 = vcmask 654912  }
   0x6   :  { %s69_s3 = smov 3  ;;  %v118_v9 = vld [vmem:[%s215_s0 + $0x6] ss:$16 sm:%s62_s2]   ;;  %s147_s10 = smov 56   ;;  %vm52_vm8 = vcmask 589312   ;;  %vm59_vm9 = vcmask 523712  }
   0x7   :  { %v119_v10 = vld [vmem:[%s215_s0 + $0x5] ss:$16 sm:%s69_s3]   ;;  %s76_s11 = smov 3  ;;  %s148_s12 = smov 48   ;;  %vm66_vm10 = vcmask 458112   ;;  %vm73_vm11 = vcmask 392512  }
   0x8   :  { %s149_s13 = smov 40   ;;  %s83_s14 = smov 3  ;;  %v120_v11 = vld [vmem:[%s215_s0 + $0x4] ss:$16 sm:%s76_s11]   ;;  %vm80_vm12 = vcmask 326912   ;;  %vm87_vm13 = vcmask 261312  }
   0x9   :  { %s90_s15 = smov 3  ;;  %v121_v12 = vld [vmem:[%s215_s0 + $0x3] ss:$16 sm:%s83_s14]   ;;  %s150_s22 = smov 32   ;;  %vm94_vm14 = vcmask 195712   ;;  %vm101_vm15 = vcmask 130112  }
   0xa   :  { %14 = vrot.lane.b32.xlu0 %v110_v3, %s142_s19  ;;  %26 = vrot.lane.b32.xlu1 %v112_v4, %s143_s20  ;;  %v122_v13 = vld [vmem:[%s215_s0 + $0x2] ss:$16 sm:%s90_s15]   ;;  %s97_s23 = smov 3  ;;  %s151_s24 = smov 24  }
   0xb   :  { %38 = vrot.lane.b32.xlu2 %v114_v5, %s144_s27  ;;  %s152_s25 = smov 16   ;;  %v123_v14 = vld [vmem:[%s215_s0 + $0x1] ss:$16 sm:%s97_s23]   ;;  %s153_s28 = smov 8  }
  0x12   :  { %44 = vrot.lane.b32.xlu0 %v115_v6, %s145_s29  ;;  %50 = vrot.lane.b32.xlu1 %v116_v7, %s146_s30  ;;  %s2_s29 = smov 3 }
  0x13   :  { %57 = vrot.lane.b32.xlu2 %v117_v8, %s147_s10  ;;  %v3_v15 = vld [vmem:[%s215_s0] ss:$16 sm:%s2_s29]  }
  0x14   :  { %5 = vst.msk [vmem:[#allocation0] sm:$0x3] %vm4_vm0, %v3_v15  }
  0x1a   :  { %64 = vrot.lane.b32.xlu0 %v118_v9, %s148_s12  ;;  %71 = vrot.lane.b32.xlu1 %v119_v10, %s149_s13 }
  0x1b   :  { %78 = vrot.lane.b32.xlu2 %v120_v11, %s150_s22 }
  0x22   :  { %85 = vrot.lane.b32.xlu0 %v121_v12, %s151_s24  ;;  %92 = vrot.lane.b32.xlu1 %v122_v13, %s152_s25 }
  0x23   :  { %99 = vrot.lane.b32.xlu2 %v123_v14, %s153_s28 }
  0x5d   :  { %v33_v16 = vpop.permute.xlu2 %32  }
  0x65   :  { %v39_v17 = vpop.permute.xlu2 %38  }
  0x6d   :  { %v58_v18 = vpop.permute.xlu2 %57  }
  0x74   :  { %v9_v19 = vpop.permute.xlu0 %8   ;;  %v21_v20 = vpop.permute.xlu1 %20  }
  0x75   :  { %11 = vst.msk [vmem:[#allocation0] sm:$0x1] %vm10_vm1, %v9_v19   ;;  %v79_v21 = vpop.permute.xlu2 %78  }
  0x7c   :  { %v15_v22 = vpop.permute.xlu0 %14   ;;  %v27_v23 = vpop.permute.xlu1 %26  }
  0x7d   :  { %17 = vst.msk [vmem:[#allocation0] sm:$0x1] %vm16_vm2, %v15_v22   ;;  %v100_v24 = vpop.permute.xlu2 %99  }
  0x7e   :  { %23 = vst.msk [vmem:[#allocation0] sm:$0x1] %vm22_vm3, %v21_v20  }
  0x7f   :  { %29 = vst.msk [vmem:[#allocation0] sm:$0x1] %vm28_vm4, %v27_v23  }
  0x80   :  { %35 = vst.msk [vmem:[#allocation0] sm:$0x1] %vm34_vm5, %v33_v16  }
  0x81   :  { %41 = vst.msk [vmem:[#allocation0] sm:$0x1] %vm40_vm6, %v39_v17  }
  0x84   :  { %v45_v25 = vpop.permute.xlu0 %44   ;;  %v51_v26 = vpop.permute.xlu1 %50  }
  0x85   :  { %47 = vst.msk [vmem:[#allocation0] sm:$0x1] %vm46_vm7, %v45_v25  }
  0x86   :  { %53 = vst.msk [vmem:[#allocation0] sm:$0x1] %vm52_vm8, %v51_v26  }
  0x87   :  { %60 = vst.msk [vmem:[#allocation0] sm:$0x3] %vm59_vm9, %v58_v18  }
  0x8c   :  { %v65_v27 = vpop.permute.xlu0 %64   ;;  %v72_v28 = vpop.permute.xlu1 %71  }
  0x8d   :  { %67 = vst.msk [vmem:[#allocation0] sm:$0x3] %vm66_vm10, %v65_v27  }
  0x8e   :  { %74 = vst.msk [vmem:[#allocation0] sm:$0x3] %vm73_vm11, %v72_v28  }
  0x8f   :  { %81 = vst.msk [vmem:[#allocation0] sm:$0x3] %vm80_vm12, %v79_v21  }
  0x94   :  { %v86_v29 = vpop.permute.xlu0 %85   ;;  %v93_v30 = vpop.permute.xlu1 %92  }
  0x95   :  { %88 = vst.msk [vmem:[#allocation0] sm:$0x3] %vm87_vm13, %v86_v29  }
  0x96   :  { %95 = vst.msk [vmem:[#allocation0] sm:$0x3] %vm94_vm14, %v93_v30  }
  0x97   :  { %102 = vst.msk [vmem:[#allocation0] sm:$0x3] %vm101_vm15, %v100_v24  }
  0x9e   :  { %v105_v31 = vld [vmem:[#allocation0] sm:$0x3] }
  0x9f   :  { %108 = vst [vmem:[%s216_s1] sm:$0x3] %v105_v31 }

// kernel: cnn_forward.1
= control target key start
LH: loop header
LB: loop body
LE: loop exit
PB: predicated region body
PF: predicated region fallthrough
CT: control target
= control target key end

     0   :  { %vm776_vm0 = vcmask 130048   ;;  %s12801_s0 = inlined_call_operand.vmem [shape: bf16[96,144], index: 0, kind: input, shape index: {}]   ;;  %s12802_s1 = inlined_call_operand.vmem [shape: bf16[144,1536], index: 1, kind: input, shape index: {}]   ;;  %s12803_s2 = inlined_call_operand.vmem [shape: f32[1,1536], index: 2, kind: input, shape index: {}]   ;;  %s12804_s3 = inlined_call_operand.vmem [shape: bf16[3,768,256], index: 3, kind: input, shape index: {}]   ;;  %s12805_s4 = inlined_call_operand.vmem [shape: f32[1,256], index: 4, kind: input, shape index: {}]   ;;  %s12806_s5 = inlined_call_operand.vmem [shape: f32[12,128,128], index: 5, kind: input, shape index: {}]   ;;  %s12807_s6 = inlined_call_operand.vmem [shape: f32[1,128], index: 6, kind: input, shape index: {}]   ;;  %s12808_s7 = inlined_call_operand.vmem [shape: f32[128,7], index: 7, kind: input, shape index: {}]   ;;  %s12809_s8 = inlined_call_operand.vmem [shape: f32[1,7], index: 8, kind: input, shape index: {}]   ;;  %s12810_s9 = inlined_call_operand.hbm [shape: f32[2,7], index: 9, kind: output, shape index: {}]  }
   0x1   :  { %v5803_v0 = vld [vmem:[%s12802_s1 + $0x2a0] sm:$0xf]  ;;  %v7627_v1 = vld [vmem:[%s12802_s1 + $0x2cc] sm:$0xf0]  ;;  %v7621_v5 = vld [vmem:[%s12802_s1 + $0x2a4] sm:$0xf] }
   0x2   :  { %v5851_v2 = vld [vmem:[%s12802_s1 + $0x300] sm:$0xf]  ;;  %v5804_v3 = vor.u32 %v7627_v1, %v5803_v0  ;;  %v7639_v4 = vld [vmem:[%s12802_s1 + $0x32c] sm:$0xf0]  ;;  %v5805_v6 = vld [vmem:[%s12802_s1 + $0x2d0] sm:$0xf0] }
   0x3   :  { %v5852_v7 = vor.u32 %v7639_v4, %v5851_v2  ;;  %v5808_v8 = vor.u32 %v7621_v5, %v5805_v6  ;;  %v7633_v9 = vld [vmem:[%s12802_s1 + $0x304] sm:$0xf]  ;;  %v5853_v10 = vld [vmem:[%s12802_s1 + $0x330] sm:$0xf0]  ;;  %v5421_v13 = vld [vmem:[%s12801_s0 + $0x8] sm:$0xf0] }
   0x4   :  { %v7525_v11 = vld [vmem:[%s12801_s0 + $0x4] sm:$0xf]  ;;  %795 = vmatpush.bf16.msra.mxu0 %v5804_v3  ;;  %v5856_v12 = vor.u32 %v7633_v9, %v5853_v10  ;;  %v5755_v14 = vld [vmem:[%s12802_s1 + $0x240] sm:$0xf]  ;;  %v7615_v16 = vld [vmem:[%s12802_s1 + $0x26c] sm:$0xf0] }
   0x5   :  { %841 = vmatpush.bf16.msra.mxu1 %v5852_v7  ;;  %873 = vmatpush.bf16.msra.mxu2 %v5808_v8  ;;  %v8047_v15 = vor.u32 %v7525_v11, %v5421_v13  ;;  %v7609_v17 = vld [vmem:[%s12802_s1 + $0x244] sm:$0xf]  ;;  %v5757_v18 = vld [vmem:[%s12802_s1 + $0x270] sm:$0xf0]  ;;  %v5756_v19 = vor.u32 %v7615_v16, %v5755_v14  ;;  %v5707_v21 = vld [vmem:[%s12802_s1 + $0x1e0] sm:$0xf] }
   0x6   :  { %919 = vmatpush.bf16.msra.mxu3 %v5856_v12  ;;  %v5760_v20 = vor.u32 %v7609_v17, %v5757_v18  ;;  %v7603_v22 = vld [vmem:[%s12802_s1 + $0x20c] sm:$0xf0]  ;;  %v7597_v23 = vld [vmem:[%s12802_s1 + $0x1e4] sm:$0xf]  ;;  %v5709_v24 = vld [vmem:[%s12802_s1 + $0x210] sm:$0xf0] }
   0x7   :  { %v5708_v25 = vor.u32 %v7603_v22, %v5707_v21  ;;  %v5712_v26 = vor.u32 %v7597_v23, %v5709_v24  ;;  %v5659_v27 = vld [vmem:[%s12802_s1 + $0x180] sm:$0xf]  ;;  %v7591_v28 = vld [vmem:[%s12802_s1 + $0x1ac] sm:$0xf0]  ;;  %v7585_v29 = vld [vmem:[%s12802_s1 + $0x184] sm:$0xf] }
   0x8   :  { %5897 = vmatmul.msk.bf16.vlgmr.msra.gmra.mxu1 %vm776_vm0, %v8047_v15  ;;  %796 = vmatpush.bf16.msra.mxu0 %v5756_v19  ;;  %v5661_v30 = vld [vmem:[%s12802_s1 + $0x1b0] sm:$0xf0]  ;;  %v5660_v31 = vor.u32 %v7591_v28, %v5659_v27  ;;  %v5611_v33 = vld [vmem:[%s12802_s1 + $0x120] sm:$0xf]  ;;  %v7579_v34 = vld [vmem:[%s12802_s1 + $0x14c] sm:$0xf0] }
   0x9   :  { %5903 = vmatmul.msk.bf16.vlgmr.msra.gmra.mxu3 %vm776_vm0, %v8047_v15  ;;  %874 = vmatpush.bf16.msra.mxu2 %v5760_v20  ;;  %v5664_v32 = vor.u32 %v7585_v29, %v5661_v30  ;;  %v7573_v35 = vld [vmem:[%s12802_s1 + $0x124] sm:$0xf]  ;;  %v5613_v36 = vld [vmem:[%s12802_s1 + $0x150] sm:$0xf0]  ;;  %v5859_v37 = vld [vmem:[%s12802_s1 + $0x308] sm:$0xf]  ;;  %v5612_v39 = vor.u32 %v7579_v34, %v5611_v33 }
   0xa   :  { %v7640_v38 = vld [vmem:[%s12802_s1 + $0x334] sm:$0xf0]  ;;  %v7527_v40 = vld [vmem:[%s12801_s0 + $0x14] sm:$0xf]  ;;  %v5429_v41 = vld [vmem:[%s12801_s0 + $0x18] sm:$0xf0]  ;;  %v5616_v44 = vor.u32 %v7573_v35, %v5613_v36 }
   0xb   :  { %v5563_v42 = vld [vmem:[%s12802_s1 + $0xc0] sm:$0xf]  ;;  %v5860_v43 = vor.u32 %v7640_v38, %v5859_v37  ;;  %v7567_v45 = vld [vmem:[%s12802_s1 + $0xec] sm:$0xf0]  ;;  %v5811_v46 = vld [vmem:[%s12802_s1 + $0x2a8] sm:$0xf]  ;;  %v8128_v51 = vor.u32 %v7527_v40, %v5429_v41 }
   0xc   :  { %797 = vmatpush.bf16.msra.mxu0 %v5708_v25  ;;  %v7628_v47 = vld [vmem:[%s12802_s1 + $0x2d4] sm:$0xf0]  ;;  %v7561_v48 = vld [vmem:[%s12802_s1 + $0xc4] sm:$0xf]  ;;  %v5565_v49 = vld [vmem:[%s12802_s1 + $0xf0] sm:$0xf0]  ;;  %v5564_v52 = vor.u32 %v7567_v45, %v5563_v42 }
   0xd   :  { %875 = vmatpush.bf16.msra.mxu2 %v5712_v26  ;;  %997 = vmatpush.bf16.msrb.mxu3 %v5860_v43  ;;  %v5812_v50 = vor.u32 %v7628_v47, %v5811_v46  ;;  %v5763_v53 = vld [vmem:[%s12802_s1 + $0x248] sm:$0xf]  ;;  %v7616_v54 = vld [vmem:[%s12802_s1 + $0x274] sm:$0xf0]  ;;  %v5568_v55 = vor.u32 %v7561_v48, %v5565_v49  ;;  %v5515_v56 = vld [vmem:[%s12802_s1 + $0x60] sm:$0xf] }
   0xe   :  { %v7555_v57 = vld [vmem:[%s12802_s1 + $0x8c] sm:$0xf0]  ;;  %v7549_v58 = vld [vmem:[%s12802_s1 + $0x64] sm:$0xf]  ;;  %v5517_v59 = vld [vmem:[%s12802_s1 + $0x90] sm:$0xf0]  ;;  %v5764_v60 = vor.u32 %v7616_v54, %v5763_v53 }
   0xf   :  { %951 = vmatpush.bf16.msrb.mxu1 %v5812_v50 }
  0x10   :  { %798 = vmatpush.bf16.msra.mxu0 %v5660_v31 }
  0x11   :  { %876 = vmatpush.bf16.msra.mxu2 %v5664_v32 }
  0x14   :  { %799 = vmatpush.bf16.msra.mxu0 %v5612_v39 }
  0x15   :  { %877 = vmatpush.bf16.msra.mxu2 %v5616_v44 }
  0x16   :  { %14 = vsyncpa [#allocation3], 0  ;;  %v5516_v61 = vor.u32 %v7555_v57, %v5515_v56  ;;  %v5467_v62 = vld [vmem:[%s12802_s1] sm:$0xf]  ;;  %v7543_v63 = vld [vmem:[%s12802_s1 + $0x2c] sm:$0xf0]  ;;  %v5520_v0 = vor.u32 %v7549_v58, %v5517_v59  ;;  %952 = vmatpush.bf16.msrb.mxu1 %v5764_v60 }
  0x17   :  { %v7537_v1 = vld [vmem:[%s12802_s1 + $0x4] sm:$0xf]  ;;  %v5715_v2 = vld [vmem:[%s12802_s1 + $0x1e8] sm:$0xf]  ;;  %v7604_v3 = vld [vmem:[%s12802_s1 + $0x214] sm:$0xf0]  ;;  %v5468_v10 = vor.u32 %v7543_v63, %v5467_v62 }
  0x18   :  { %5898 = vmatmul.msk.bf16.gmra.mxu1 %vm776_vm0, %v8128_v51  ;;  %800 = vmatpush.bf16.msra.mxu0 %v5564_v52  ;;  %v5469_v4 = vld [vmem:[%s12802_s1 + $0x30] sm:$0xf0]  ;;  %v7622_v5 = vld [vmem:[%s12802_s1 + $0x2ac] sm:$0xf]  ;;  %v5813_v6 = vld [vmem:[%s12802_s1 + $0x2d8] sm:$0xf0]  ;;  %v5716_v7 = vor.u32 %v7604_v3, %v5715_v2 }
  0x19   :  { %5904 = vmatmul.msk.bf16.gmra.mxu3 %vm776_vm0, %v8128_v51  ;;  %878 = vmatpush.bf16.msra.mxu2 %v5568_v55  ;;  %v7634_v8 = vld [vmem:[%s12802_s1 + $0x30c] sm:$0xf]  ;;  %v5861_v9 = vld [vmem:[%s12802_s1 + $0x338] sm:$0xf0]  ;;  %v5419_v11 = vld [vmem:[%s12801_s0] sm:$0xf]  ;;  %v5472_v13 = vor.u32 %v7537_v1, %v5469_v4  ;;  %v5816_v14 = vor.u32 %v7622_v5, %v5813_v6 }
  0x1a   :  { %v7526_v12 = vld [vmem:[%s12801_s0 + $0x4] sm:$0xf0]  ;;  %v5864_v16 = vor.u32 %v7634_v8, %v5861_v9  ;;  %v7610_v17 = vld [vmem:[%s12802_s1 + $0x24c] sm:$0xf]  ;;  %v5765_v18 = vld [vmem:[%s12802_s1 + $0x278] sm:$0xf0]  ;;  %953 = vmatpush.bf16.msrb.mxu1 %v5716_v7 }
  0x1b   :  { %v8194_v19 = vor.u32 %v7526_v12, %v5419_v11  ;;  %v7529_v20 = vld [vmem:[%s12801_s0 + $0x24] sm:$0xf]  ;;  %v5437_v21 = vld [vmem:[%s12801_s0 + $0x28] sm:$0xf0]  ;;  %v5768_v22 = vor.u32 %v7610_v17, %v5765_v18  ;;  %v5717_v24 = vld [vmem:[%s12802_s1 + $0x218] sm:$0xf0] }
  0x1c   :  { %801 = vmatpush.bf16.msra.mxu0 %v5516_v61  ;;  %v7598_v23 = vld [vmem:[%s12802_s1 + $0x1ec] sm:$0xf]  ;;  %v8210_v25 = vor.u32 %v7529_v20, %v5437_v21  ;;  %v5667_v27 = vld [vmem:[%s12802_s1 + $0x188] sm:$0xf]  ;;  %v7592_v28 = vld [vmem:[%s12802_s1 + $0x1b4] sm:$0xf0] }
  0x1d   :  { %879 = vmatpush.bf16.msra.mxu2 %v5520_v0  ;;  %v5720_v26 = vor.u32 %v7598_v23, %v5717_v24  ;;  %v7586_v29 = vld [vmem:[%s12802_s1 + $0x18c] sm:$0xf]  ;;  %v5668_v30 = vor.u32 %v7592_v28, %v5667_v27  ;;  %v5669_v31 = vld [vmem:[%s12802_s1 + $0x1b8] sm:$0xf0]  ;;  %v5427_v33 = vld [vmem:[%s12801_s0 + $0x10] sm:$0xf] }
  0x1e   :  { %v5672_v32 = vor.u32 %v7586_v29, %v5669_v31  ;;  %v7528_v34 = vld [vmem:[%s12801_s0 + $0x14] sm:$0xf0]  ;;  %v7531_v36 = vld [vmem:[%s12801_s0 + $0x34] sm:$0xf]  ;;  %v5445_v37 = vld [vmem:[%s12801_s0 + $0x38] sm:$0xf0] }
  0x1f   :  { %954 = vmatpush.bf16.msrb.mxu1 %v5668_v30  ;;  %v8234_v35 = vor.u32 %v7528_v34, %v5427_v33  ;;  %v8244_v38 = vor.u32 %v7531_v36, %v5445_v37  ;;  %v5619_v39 = vld [vmem:[%s12802_s1 + $0x128] sm:$0xf]  ;;  %v7580_v40 = vld [vmem:[%s12802_s1 + $0x154] sm:$0xf0]  ;;  %v7574_v42 = vld [vmem:[%s12802_s1 + $0x12c] sm:$0xf] }
  0x20   :  { %802 = vmatpush.bf16.msra.mxu0 %v5468_v10  ;;  %v5620_v41 = vor.u32 %v7580_v40, %v5619_v39  ;;  %v5621_v43 = vld [vmem:[%s12802_s1 + $0x158] sm:$0xf0]  ;;  %v5571_v44 = vld [vmem:[%s12802_s1 + $0xc8] sm:$0xf]  ;;  %v7568_v46 = vld [vmem:[%s12802_s1 + $0xf4] sm:$0xf0] }
  0x21   :  { %880 = vmatpush.bf16.msra.mxu2 %v5472_v13  ;;  %v5624_v45 = vor.u32 %v7574_v42, %v5621_v43  ;;  %v5572_v47 = vor.u32 %v7568_v46, %v5571_v44  ;;  %v5523_v48 = vld [vmem:[%s12802_s1 + $0x68] sm:$0xf]  ;;  %v7556_v49 = vld [vmem:[%s12802_s1 + $0x94] sm:$0xf0]  ;;  %v5435_v50 = vld [vmem:[%s12801_s0 + $0x20] sm:$0xf] }
  0x22   :  { %v7530_v52 = vld [vmem:[%s12801_s0 + $0x24] sm:$0xf0]  ;;  %v5524_v53 = vor.u32 %v7556_v49, %v5523_v48  ;;  %v7533_v55 = vld [vmem:[%s12801_s0 + $0x44] sm:$0xf]  ;;  %v5453_v56 = vld [vmem:[%s12801_s0 + $0x48] sm:$0xf0] }
  0x23   :  { %803 = vmatmul.bf16.vlgmr.msra.gmra.mxu0 %v8194_v19  ;;  %955 = vmatpush.bf16.msrb.mxu1 %v5620_v41  ;;  %v8280_v54 = vor.u32 %v7530_v52, %v5435_v50  ;;  %v5475_v57 = vld [vmem:[%s12802_s1 + $0x8] sm:$0xf]  ;;  %v7544_v58 = vld [vmem:[%s12802_s1 + $0x34] sm:$0xf0]  ;;  %v8296_v59 = vor.u32 %v7533_v55, %v5453_v56  ;;  %v7562_v60 = vld [vmem:[%s12802_s1 + $0xcc] sm:$0xf] }
  0x24   :  { %1029 = vmatpush.bf16.msrb.mxu0 %v5816_v14  ;;  %881 = vmatmul.bf16.vlgmr.msra.gmra.mxu2 %v8194_v19  ;;  %v5573_v61 = vld [vmem:[%s12802_s1 + $0xf8] sm:$0xf0]  ;;  %v5476_v62 = vor.u32 %v7544_v58, %v5475_v57  ;;  %v7550_v0 = vld [vmem:[%s12802_s1 + $0x6c] sm:$0xf]  ;;  %v5443_v3 = vld [vmem:[%s12801_s0 + $0x30] sm:$0xf] }
  0x25   :  { %1075 = vmatpush.bf16.msrb.mxu2 %v5864_v16  ;;  %v5576_v63 = vor.u32 %v7562_v60, %v5573_v61  ;;  %v5525_v1 = vld [vmem:[%s12802_s1 + $0x98] sm:$0xf0]  ;;  %v7532_v4 = vld [vmem:[%s12801_s0 + $0x34] sm:$0xf0]  ;;  %v7535_v6 = vld [vmem:[%s12801_s0 + $0x54] sm:$0xf] }
  0x26   :  { %v5528_v2 = vor.u32 %v7550_v0, %v5525_v1  ;;  %v8320_v5 = vor.u32 %v7532_v4, %v5443_v3  ;;  %v5461_v7 = vld [vmem:[%s12801_s0 + $0x58] sm:$0xf0]  ;;  %v7538_v9 = vld [vmem:[%s12802_s1 + $0xc] sm:$0xf]  ;;  %v5451_v12 = vld [vmem:[%s12801_s0 + $0x40] sm:$0xf] }
  0x27   :  { %956 = vmatpush.bf16.msrb.mxu1 %v5572_v47  ;;  %v8330_v8 = vor.u32 %v7535_v6, %v5461_v7  ;;  %v5477_v10 = vld [vmem:[%s12802_s1 + $0x38] sm:$0xf0]  ;;  %v7534_v13 = vld [vmem:[%s12801_s0 + $0x44] sm:$0xf0]  ;;  %v5867_v16 = vld [vmem:[%s12802_s1 + $0x310] sm:$0xf] }
  0x28   :  { %1030 = vmatpush.bf16.msrb.mxu0 %v5768_v22  ;;  %5899 = vmatmul.msk.bf16.gmra.mxu1 %vm776_vm0, %v8210_v25  ;;  %v5480_v11 = vor.u32 %v7538_v9, %v5477_v10  ;;  %v8348_v14 = vor.u32 %v7534_v13, %v5451_v12  ;;  %v7641_v17 = vld [vmem:[%s12802_s1 + $0x33c] sm:$0xf0]  ;;  %v7635_v18 = vld [vmem:[%s12802_s1 + $0x314] sm:$0xf]  ;;  %v5869_v21 = vld [vmem:[%s12802_s1 + $0x340] sm:$0xf0] }
  0x29   :  { %5905 = vmatmul.msk.bf16.gmra.mxu3 %vm776_vm0, %v8210_v25  ;;  %v5868_v20 = vor.u32 %v7641_v17, %v5867_v16  ;;  %v5872_v22 = vor.u32 %v7635_v18, %v5869_v21  ;;  %v5819_v23 = vld [vmem:[%s12802_s1 + $0x2b0] sm:$0xf]  ;;  %v7629_v24 = vld [vmem:[%s12802_s1 + $0x2dc] sm:$0xf0]  ;;  %v5821_v28 = vld [vmem:[%s12802_s1 + $0x2e0] sm:$0xf0] }
  0x2a   :  { %v5820_v27 = vor.u32 %v7629_v24, %v5819_v23  ;;  %v5459_v30 = vld [vmem:[%s12801_s0 + $0x50] sm:$0xf]  ;;  %v7536_v31 = vld [vmem:[%s12801_s0 + $0x54] sm:$0xf0]  ;;  %v7617_v34 = vld [vmem:[%s12802_s1 + $0x27c] sm:$0xf0] }
  0x2b   :  { %957 = vmatpush.bf16.msrb.mxu1 %v5524_v53  ;;  %1153 = vmatpush.bf16.msra.mxu3 %v5868_v20  ;;  %v5771_v33 = vld [vmem:[%s12802_s1 + $0x250] sm:$0xf]  ;;  %v7611_v36 = vld [vmem:[%s12802_s1 + $0x254] sm:$0xf]  ;;  %v5773_v39 = vld [vmem:[%s12802_s1 + $0x280] sm:$0xf0] }
  0x2c   :  { %1031 = vmatpush.bf16.msrb.mxu0 %v5720_v26  ;;  %1231 = vmatpush.bf16.msra.mxu2 %v5872_v22  ;;  %v7623_v26 = vld [vmem:[%s12802_s1 + $0x2b4] sm:$0xf]  ;;  %v5772_v37 = vor.u32 %v7617_v34, %v5771_v33  ;;  %v5776_v40 = vor.u32 %v7611_v36, %v5773_v39  ;;  %v5723_v41 = vld [vmem:[%s12802_s1 + $0x1f0] sm:$0xf]  ;;  %v7605_v42 = vld [vmem:[%s12802_s1 + $0x21c] sm:$0xf0] }
  0x2d   :  { %v5824_v29 = vor.u32 %v7623_v26, %v5821_v28  ;;  %v7599_v43 = vld [vmem:[%s12802_s1 + $0x1f4] sm:$0xf]  ;;  %v5724_v44 = vor.u32 %v7605_v42, %v5723_v41  ;;  %v5675_v50 = vld [vmem:[%s12802_s1 + $0x190] sm:$0xf]  ;;  %v7593_v52 = vld [vmem:[%s12802_s1 + $0x1bc] sm:$0xf0] }
  0x2e   :  { %v7587_v53 = vld [vmem:[%s12802_s1 + $0x194] sm:$0xf]  ;;  %v5676_v55 = vor.u32 %v7593_v52, %v5675_v50  ;;  %v5677_v56 = vld [vmem:[%s12802_s1 + $0x1c0] sm:$0xf0]  ;;  %v5627_v61 = vld [vmem:[%s12802_s1 + $0x130] sm:$0xf] }
  0x2f   :  { %958 = vmatpush.bf16.msrb.mxu1 %v5476_v62  ;;  %v5680_v57 = vor.u32 %v7587_v53, %v5677_v56  ;;  %v7581_v62 = vld [vmem:[%s12802_s1 + $0x15c] sm:$0xf0]  ;;  %v5579_v1 = vld [vmem:[%s12802_s1 + $0xd0] sm:$0xf]  ;;  %v7575_v4 = vld [vmem:[%s12802_s1 + $0x134] sm:$0xf] }
  0x30   :  { %1032 = vmatpush.bf16.msrb.mxu0 %v5672_v32  ;;  %v8385_v32 = vor.u32 %v7536_v31, %v5459_v30  ;;  %v8449_v0 = vld [vmem:[%s12803_s2] sm:$0xff]  ;;  %v5531_v12 = vld [vmem:[%s12802_s1 + $0x70] sm:$0xf]  ;;  %v7563_v28 = vld [vmem:[%s12802_s1 + $0xd4] sm:$0xf]  ;;  %vm2073_vm1 = vcmask 1040384  }
  0x31   :  { %v5629_v6 = vld [vmem:[%s12802_s1 + $0x160] sm:$0xf0]  ;;  %v8464_v10 = vperm.slane %v8449_v0, 0  ;;  %v7557_v13 = vld [vmem:[%s12802_s1 + $0x9c] sm:$0xf0]  ;;  %v8485_v24 = vperm.slane %v8449_v0, 1  ;;  %vm10684_vm3 = vmneg %vm2073_vm1 }
  0x32   :  { %v5532_v17 = vor.u32 %v7557_v13, %v5531_v12  ;;  %v5483_v21 = vld [vmem:[%s12802_s1 + $0x10] sm:$0xf]  ;;  %v7545_v22 = vld [vmem:[%s12802_s1 + $0x3c] sm:$0xf0]  ;;  %vm2136_vm2 = vcmask 1046528   ;;  %s7963_s11 = smov [#allocation2]  }
  0x33   :  { %808 = vmatmul.bf16.gmra.mxu0 %v8234_v35  ;;  %1107 = vmatpush.bf16.msra.mxu1 %v5820_v27  ;;  %v5484_v26 = vor.u32 %v7545_v22, %v5483_v21  ;;  %v7636_v22 = vld [vmem:[%s12802_s1 + $0x31c] sm:$0xf]  ;;  %s5406_s12 = sshll.u32 %s7963_s11, 4  ;;  %s5408_s14 = sshll.u32 %s12810_s9, 4  ;;  %vm5399_vm4 = vcmask 50176   ;;  %s5407_s12 = int_to_ptr.vmem [resolvable:$true] %s5406_s12  ;;  %s5409_s14 = int_to_ptr.hbm [resolvable:$true] %s5408_s14 }
  0x34   :  { %886 = vmatmul.bf16.gmra.mxu2 %v8234_v35  ;;  %1033 = vmatpush.bf16.msrb.mxu0 %v5624_v45  ;;  %v5725_v45 = vld [vmem:[%s12802_s1 + $0x220] sm:$0xf0] }
  0x35   :  { %v5728_v46 = vor.u32 %v7599_v43, %v5725_v45 }
  0x37   :  { %1108 = vmatpush.bf16.msra.mxu1 %v5772_v37 }
  0x38   :  { %5900 = vmatmul.msk.bf16.gmra.mxu1 %vm776_vm0, %v8244_v38  ;;  %1034 = vmatpush.bf16.msrb.mxu0 %v5576_v63  ;;  %v5628_v63 = vor.u32 %v7581_v62, %v5627_v61 }
  0x39   :  { %5906 = vmatmul.msk.bf16.gmra.mxu3 %vm776_vm0, %v8244_v38 }
  0x3b   :  { %1109 = vmatpush.bf16.msra.mxu1 %v5724_v44 }
  0x3c   :  { %1035 = vmatpush.bf16.msrb.mxu0 %v5528_v2  ;;  %v7569_v2 = vld [vmem:[%s12802_s1 + $0xfc] sm:$0xf0] }
  0x3d   :  { %v5580_v7 = vor.u32 %v7569_v2, %v5579_v1  ;;  %v7539_v1 = vld [vmem:[%s12802_s1 + $0x14] sm:$0xf]  ;;  %v5485_v2 = vld [vmem:[%s12802_s1 + $0x40] sm:$0xf0] }
  0x3f   :  { %1110 = vmatpush.bf16.msra.mxu1 %v5676_v55 }
  0x40   :  { %1036 = vmatpush.bf16.msrb.mxu0 %v5480_v11  ;;  %v5632_v11 = vor.u32 %v7575_v4, %v5629_v6  ;;  %v5488_v4 = vor.u32 %v7539_v1, %v5485_v2 }
  0x43   :  { %813 = vmatmul.bf16.gmra.mxu0 %v8280_v54  ;;  %1111 = vmatpush.bf16.msra.mxu1 %v5628_v63 }
  0x44   :  { %891 = vmatmul.bf16.gmra.mxu2 %v8280_v54  ;;  %1185 = vmatpush.bf16.msra.mxu0 %v5824_v29  ;;  %v5581_v29 = vld [vmem:[%s12802_s1 + $0x100] sm:$0xf0] }
  0x45   :  { %v5584_v30 = vor.u32 %v7563_v28, %v5581_v29 }
  0x47   :  { %1112 = vmatpush.bf16.msra.mxu1 %v5580_v7 }
  0x48   :  { %5901 = vmatmul.msk.bf16.gmra.mxu1 %vm776_vm0, %v8296_v59  ;;  %1186 = vmatpush.bf16.msra.mxu0 %v5776_v40 }
  0x49   :  { %5907 = vmatmul.msk.bf16.gmra.mxu3 %vm776_vm0, %v8296_v59 }
  0x4b   :  { %1113 = vmatpush.bf16.msra.mxu1 %v5532_v17  ;;  %v5875_v17 = vld [vmem:[%s12802_s1 + $0x318] sm:$0xf] }
  0x4c   :  { %1187 = vmatpush.bf16.msra.mxu0 %v5728_v46 }
  0x4f   :  { %1114 = vmatpush.bf16.msra.mxu1 %v5484_v26 }
  0x50   :  { %1188 = vmatpush.bf16.msra.mxu0 %v5680_v57 }
  0x53   :  { %818 = vmatmul.bf16.gmra.mxu0 %v8320_v5 }
  0x54   :  { %896 = vmatmul.bf16.gmra.mxu2 %v8320_v5  ;;  %1189 = vmatpush.bf16.msra.mxu0 %v5632_v11 }
  0x58   :  { %5902 = vmatmul.msk.bf16.gmra.mxu1 %vm776_vm0, %v8330_v8  ;;  %1190 = vmatpush.bf16.msra.mxu0 %v5584_v30 }
  0x59   :  { %5908 = vmatmul.msk.bf16.gmra.mxu3 %vm776_vm0, %v8330_v8 }
  0x63   :  { %823 = vmatmul.bf16.gmra.mxu0 %v8348_v14 }
  0x64   :  { %901 = vmatmul.bf16.gmra.mxu2 %v8348_v14 }
  0x68   :  { %959 = vmatmul.bf16.vlgmr.msrb.gmra.mxu1 %v8194_v19 }
  0x69   :  { %5909 = vmatmul.msk.bf16.vlgmr.msrb.gmra.mxu3 %vm776_vm0, %v8047_v15 }
  0x73   :  { %828 = vmatmul.bf16.gmra.mxu0 %v8385_v32 }
  0x74   :  { %906 = vmatmul.bf16.gmra.mxu2 %v8385_v32 }
  0x78   :  { %964 = vmatmul.bf16.gmra.mxu1 %v8234_v35 }
  0x79   :  { %5910 = vmatmul.msk.bf16.gmra.mxu3 %vm776_vm0, %v8128_v51 }
  0x83   :  { %1037 = vmatmul.bf16.vlgmr.msrb.gmra.mxu0 %v8194_v19 }
  0x84   :  { %5915 = vmatmul.msk.bf16.vlgmr.msrb.gmra.mxu2 %vm776_vm0, %v8047_v15 }
  0x85   :  { %v843_v47 = vpop.f32.mrf.mxu1 }
  0x88   :  { %969 = vmatmul.bf16.gmra.mxu1 %v8280_v54 }
  0x89   :  { %5911 = vmatmul.msk.bf16.gmra.mxu3 %vm776_vm0, %v8210_v25 }
  0x8c   :  { %v921_v48 = vpop.f32.mrf.mxu3 }
  0x8d   :  { %v845_v49 = vpop.f32.mrf.mxu1 }
  0x93   :  { %1042 = vmatmul.bf16.gmra.mxu0 %v8234_v35 }
  0x94   :  { %v923_v58 = vpop.f32.mrf.mxu3  ;;  %5916 = vmatmul.msk.bf16.gmra.mxu2 %vm776_vm0, %v8128_v51 }
  0x95   :  { %v848_v60 = vpop.f32.mrf.mxu1 }
  0x98   :  { %974 = vmatmul.bf16.gmra.mxu1 %v8320_v5 }
  0x99   :  { %5912 = vmatmul.msk.bf16.gmra.mxu3 %vm776_vm0, %v8244_v38 }
  0x9c   :  { %v926_v3 = vpop.f32.mrf.mxu3 }
  0x9d   :  { %v850_v9 = vpop.f32.mrf.mxu1 }
  0xa0   :  { %v804_v16 = vpop.f32.mrf.mxu0 }
  0xa1   :  { %v805_v18 = vadd.f32 %v804_v16, %v8464_v10 }
  0xa3   :  { %v8473_v20 = vadd.f32 %v843_v47, %v805_v18  ;;  %1047 = vmatmul.bf16.gmra.mxu0 %v8280_v54  ;;  %v7642_v18 = vld [vmem:[%s12802_s1 + $0x344] sm:$0xf0] }
  0xa4   :  { %v928_v23 = vpop.f32.mrf.mxu3  ;;  %5917 = vmatmul.msk.bf16.gmra.mxu2 %vm776_vm0, %v8210_v25  ;;  %v5876_v21 = vor.u32 %v7642_v18, %v5875_v17 }
  0xa5   :  { %v853_v27 = vpop.f32.mrf.mxu1 }
  0xa6   :  { %1309 = vmatpush.bf16.msrb.mxu3 %v5876_v21 }
  0xa7   :  { %v882_v31 = vpop.f32.mrf.mxu2 }
  0xa8   :  { %v883_v33 = vadd.f32 %v882_v31, %v8485_v24  ;;  %979 = vmatmul.bf16.gmra.mxu1 %v8348_v14  ;;  %v806_v34 = vpop.f32.mrf.mxu0 }
  0xa9   :  { %5913 = vmatmul.msk.bf16.gmra.mxu3 %vm776_vm0, %v8296_v59  ;;  %v807_v36 = vadd.f32 %v806_v34, %v8464_v10 }
  0xaa   :  { %v8498_v37 = vadd.f32 %v921_v48, %v883_v33  ;;  %v7551_v48 = vld [vmem:[%s12802_s1 + $0x74] sm:$0xf] }
  0xab   :  { %v8500_v39 = vadd.f32 %v845_v49, %v807_v36  ;;  %v5533_v49 = vld [vmem:[%s12802_s1 + $0xa0] sm:$0xf0]  ;;  %v5827_v36 = vld [vmem:[%s12802_s1 + $0x2b8] sm:$0xf] }
  0xac   :  { %v931_v40 = vpop.f32.mrf.mxu3  ;;  %v5536_v53 = vor.u32 %v7551_v48, %v5533_v49 }
  0xad   :  { %v855_v41 = vpop.f32.mrf.mxu1 }
  0xae   :  { %1191 = vmatpush.bf16.msra.mxu0 %v5536_v53 }
  0xaf   :  { %v884_v42 = vpop.f32.mrf.mxu2 }
  0xb0   :  { %v885_v43 = vadd.f32 %v884_v42, %v8485_v24  ;;  %v809_v44 = vpop.f32.mrf.mxu0  ;;  %v7630_v42 = vld [vmem:[%s12802_s1 + $0x2e4] sm:$0xf0] }
  0xb1   :  { %v810_v45 = vadd.f32 %v809_v44, %v8464_v10  ;;  %v5828_v44 = vor.u32 %v7630_v42, %v5827_v36 }
  0xb2   :  { %v8504_v46 = vadd.f32 %v923_v58, %v885_v43  ;;  %1192 = vmatpush.bf16.msra.mxu0 %v5488_v4  ;;  %v5779_v4 = vld [vmem:[%s12802_s1 + $0x258] sm:$0xf] }
  0xb3   :  { %v8506_v47 = vadd.f32 %v848_v60, %v810_v45  ;;  %1052 = vmatmul.bf16.gmra.mxu0 %v8320_v5  ;;  %v7624_v45 = vld [vmem:[%s12802_s1 + $0x2bc] sm:$0xf]  ;;  %1263 = vmatpush.bf16.msrb.mxu1 %v5828_v44  ;;  %v7606_v44 = vld [vmem:[%s12802_s1 + $0x224] sm:$0xf0] }
  0xb4   :  { %v933_v50 = vpop.f32.mrf.mxu3  ;;  %5918 = vmatmul.msk.bf16.gmra.mxu2 %vm776_vm0, %v8244_v38 }
  0xb5   :  { %v858_v52 = vpop.f32.mrf.mxu1 }
  0xb7   :  { %v887_v55 = vpop.f32.mrf.mxu2 }
  0xb8   :  { %v888_v56 = vadd.f32 %v887_v55, %v8485_v24  ;;  %984 = vmatmul.bf16.gmra.mxu1 %v8385_v32  ;;  %v811_v57 = vpop.f32.mrf.mxu0 }
  0xb9   :  { %5914 = vmatmul.msk.bf16.gmra.mxu3 %vm776_vm0, %v8330_v8  ;;  %v812_v58 = vadd.f32 %v811_v57, %v8464_v10 }
  0xba   :  { %v8522_v60 = vadd.f32 %v926_v3, %v888_v56 }
  0xbb   :  { %v8524_v61 = vadd.f32 %v850_v9, %v812_v58 }
  0xbc   :  { %v8526_v62 = vpop.f32.mrf.mxu3 }
  0xbd   :  { %v8528_v63 = vpop.f32.mrf.mxu1 }
  0xbf   :  { %v889_v6 = vpop.f32.mrf.mxu2 }
  0xc0   :  { %v890_v7 = vadd.f32 %v889_v6, %v8485_v24  ;;  %v814_v3 = vpop.f32.mrf.mxu0 }
  0xc1   :  { %v815_v9 = vadd.f32 %v814_v3, %v8464_v10 }
  0xc2   :  { %v8538_v11 = vadd.f32 %v928_v23, %v890_v7  ;;  %v5877_v23 = vld [vmem:[%s12802_s1 + $0x348] sm:$0xf0] }
  0xc3   :  { %v8540_v12 = vadd.f32 %v853_v27, %v815_v9  ;;  %1057 = vmatmul.bf16.gmra.mxu0 %v8348_v14  ;;  %v5880_v27 = vor.u32 %v7636_v22, %v5877_v23  ;;  %v5781_v9 = vld [vmem:[%s12802_s1 + $0x288] sm:$0xf0] }
  0xc4   :  { %v938_v13 = vpop.f32.mrf.mxu3  ;;  %5919 = vmatmul.msk.bf16.gmra.mxu2 %vm776_vm0, %v8296_v59 }
  0xc5   :  { %v863_v16 = vpop.f32.mrf.mxu1  ;;  %1387 = vmatpush.bf16.msrb.mxu2 %v5880_v27 }
  0xc7   :  { %v892_v26 = vpop.f32.mrf.mxu2 }
  0xc8   :  { %v893_v28 = vadd.f32 %v892_v26, %v8485_v24  ;;  %1115 = vmatmul.bf16.vlgmr.msra.gmra.mxu1 %v8194_v19  ;;  %v816_v29 = vpop.f32.mrf.mxu0 }
  0xc9   :  { %5921 = vmatmul.msk.bf16.vlgmr.msra.gmra.mxu3 %vm776_vm0, %v8047_v15  ;;  %v817_v30 = vadd.f32 %v816_v29, %v8464_v10 }
  0xca   :  { %v8562_v31 = vadd.f32 %v931_v40, %v893_v28  ;;  %v5829_v40 = vld [vmem:[%s12802_s1 + $0x2e8] sm:$0xf0] }
  0xcb   :  { %v8564_v33 = vadd.f32 %v855_v41, %v817_v30  ;;  %v5832_v41 = vor.u32 %v7624_v45, %v5829_v40  ;;  %v7600_v40 = vld [vmem:[%s12802_s1 + $0x1fc] sm:$0xf] }
  0xcc   :  { %v8566_v34 = vpop.f32.mrf.mxu3 }
  0xcd   :  { %v865_v43 = vpop.f32.mrf.mxu1  ;;  %1341 = vmatpush.bf16.msrb.mxu0 %v5832_v41  ;;  %v5733_v41 = vld [vmem:[%s12802_s1 + $0x228] sm:$0xf0] }
  0xcf   :  { %v894_v48 = vpop.f32.mrf.mxu2 }
  0xd0   :  { %v895_v49 = vadd.f32 %v894_v48, %v8485_v24  ;;  %v819_v53 = vpop.f32.mrf.mxu0  ;;  %v5736_v48 = vor.u32 %v7600_v40, %v5733_v41 }
  0xd1   :  { %v820_v55 = vadd.f32 %v819_v53, %v8464_v10 }
  0xd2   :  { %v8582_v56 = vadd.f32 %v933_v50, %v895_v49  ;;  %v7618_v50 = vld [vmem:[%s12802_s1 + $0x284] sm:$0xf0] }
  0xd3   :  { %v8584_v57 = vadd.f32 %v858_v52, %v820_v55  ;;  %1062 = vmatmul.bf16.gmra.mxu0 %v8385_v32  ;;  %v7612_v52 = vld [vmem:[%s12802_s1 + $0x25c] sm:$0xf]  ;;  %v5780_v3 = vor.u32 %v7618_v50, %v5779_v4 }
  0xd4   :  { %v8587_v58 = vpop.f32.mrf.mxu3  ;;  %5920 = vmatmul.msk.bf16.gmra.mxu2 %vm776_vm0, %v8330_v8  ;;  %v5784_v18 = vor.u32 %v7612_v52, %v5781_v9 }
  0xd5   :  { %v8591_v1 = vpop.f32.mrf.mxu1  ;;  %1264 = vmatpush.bf16.msrb.mxu1 %v5780_v3 }
  0xd6   :  { %1342 = vmatpush.bf16.msrb.mxu0 %v5784_v18  ;;  %v7594_v18 = vld [vmem:[%s12802_s1 + $0x1c4] sm:$0xf0] }
  0xd7   :  { %v897_v2 = vpop.f32.mrf.mxu2 }
  0xd8   :  { %v898_v6 = vadd.f32 %v897_v2, %v8485_v24  ;;  %1120 = vmatmul.bf16.gmra.mxu1 %v8234_v35  ;;  %v821_v7 = vpop.f32.mrf.mxu0 }
  0xd9   :  { %5922 = vmatmul.msk.bf16.gmra.mxu3 %vm776_vm0, %v8128_v51  ;;  %v822_v17 = vadd.f32 %v821_v7, %v8464_v10 }
  0xda   :  { %v8611_v21 = vadd.f32 %v8526_v62, %v898_v6  ;;  %1343 = vmatpush.bf16.msrb.mxu0 %v5736_v48 }
  0xdb   :  { %v8614_v22 = vadd.f32 %v8528_v63, %v822_v17  ;;  %v5731_v63 = vld [vmem:[%s12802_s1 + $0x1f8] sm:$0xf] }
  0xdc   :  { %v8616_v23 = vpop.f32.mrf.mxu3  ;;  %v5732_v45 = vor.u32 %v7606_v44, %v5731_v63  ;;  %v5683_v17 = vld [vmem:[%s12802_s1 + $0x198] sm:$0xf] }
  0xdd   :  { %v8618_v26 = vpop.f32.mrf.mxu1 }
  0xde   :  { %1265 = vmatpush.bf16.msrb.mxu1 %v5732_v45 }
  0xdf   :  { %v899_v27 = vpop.f32.mrf.mxu2 }
  0xe0   :  { %v900_v28 = vadd.f32 %v899_v27, %v8485_v24  ;;  %v824_v29 = vpop.f32.mrf.mxu0 }
  0xe1   :  { %v825_v30 = vadd.f32 %v824_v29, %v8464_v10  ;;  %v5685_v29 = vld [vmem:[%s12802_s1 + $0x1c8] sm:$0xf0] }
  0xe2   :  { %v8622_v36 = vadd.f32 %v938_v13, %v900_v28  ;;  %v8638_v13 = vperm.slane %v8449_v0, 2 }
  0xe3   :  { %v8624_v42 = vadd.f32 %v863_v16, %v825_v30  ;;  %1193 = vmatmul.bf16.vlgmr.msra.gmra.mxu0 %v8194_v19 }
  0xe4   :  { %v8627_v62 = vpop.f32.mrf.mxu3  ;;  %5927 = vmatmul.msk.bf16.vlgmr.msra.gmra.mxu2 %vm776_vm0, %v8047_v15 }
  0xe5   :  { %v960_v16 = vpop.f32.mrf.mxu1 }
  0xe6   :  { %v961_v2 = vadd.f32 %v960_v16, %v8638_v13 }
  0xe7   :  { %v902_v49 = vpop.f32.mrf.mxu2 }
  0xe8   :  { %v903_v53 = vadd.f32 %v902_v49, %v8485_v24  ;;  %1125 = vmatmul.bf16.gmra.mxu1 %v8280_v54  ;;  %v826_v55 = vpop.f32.mrf.mxu0 }
  0xe9   :  { %5923 = vmatmul.msk.bf16.gmra.mxu3 %vm776_vm0, %v8210_v25  ;;  %v827_v4 = vadd.f32 %v826_v55, %v8464_v10 }
  0xea   :  { %v8653_v50 = vadd.f32 %v8566_v34, %v903_v53  ;;  %v5684_v34 = vor.u32 %v7594_v18, %v5683_v17  ;;  %v5637_v17 = vld [vmem:[%s12802_s1 + $0x168] sm:$0xf0] }
  0xeb   :  { %v8655_v52 = vadd.f32 %v865_v43, %v827_v4  ;;  %v7588_v43 = vld [vmem:[%s12802_s1 + $0x19c] sm:$0xf] }
  0xec   :  { %v999_v6 = vpop.f32.mrf.mxu3  ;;  %v5688_v44 = vor.u32 %v7588_v43, %v5685_v29  ;;  %1266 = vmatpush.bf16.msrb.mxu1 %v5684_v34 }
  0xed   :  { %v8657_v7 = vadd.f32 %v999_v6, %v961_v2  ;;  %v962_v3 = vpop.f32.mrf.mxu1 }
  0xee   :  { %v963_v30 = vadd.f32 %v962_v3, %v8638_v13  ;;  %1344 = vmatpush.bf16.msrb.mxu0 %v5688_v44 }
  0xef   :  { %v904_v9 = vpop.f32.mrf.mxu2 }
  0xf0   :  { %v905_v27 = vadd.f32 %v904_v9, %v8485_v24  ;;  %v829_v28 = vpop.f32.mrf.mxu0  ;;  %v7576_v9 = vld [vmem:[%s12802_s1 + $0x13c] sm:$0xf] }
  0xf1   :  { %v830_v63 = vadd.f32 %v829_v28, %v8464_v10 }
  0xf2   :  { %v8675_v16 = vadd.f32 %v8587_v58, %v905_v27  ;;  %v5635_v58 = vld [vmem:[%s12802_s1 + $0x138] sm:$0xf]  ;;  %v5640_v27 = vor.u32 %v7576_v9, %v5637_v17  ;;  %v7564_v17 = vld [vmem:[%s12802_s1 + $0xdc] sm:$0xf] }
  0xf3   :  { %v8678_v45 = vadd.f32 %v8591_v1, %v830_v63  ;;  %1198 = vmatmul.bf16.gmra.mxu0 %v8234_v35  ;;  %v7582_v1 = vld [vmem:[%s12802_s1 + $0x164] sm:$0xf0] }
  0xf4   :  { %v1001_v40 = vpop.f32.mrf.mxu3  ;;  %5928 = vmatmul.msk.bf16.gmra.mxu2 %vm776_vm0, %v8128_v51  ;;  %v5636_v2 = vor.u32 %v7582_v1, %v5635_v58  ;;  %1345 = vmatpush.bf16.msrb.mxu0 %v5640_v27  ;;  %v7558_v63 = vld [vmem:[%s12802_s1 + $0xa4] sm:$0xf0]  ;;  %v5589_v27 = vld [vmem:[%s12802_s1 + $0x108] sm:$0xf0] }
  0xf5   :  { %v8683_v41 = vadd.f32 %v1001_v40, %v963_v30  ;;  %v965_v48 = vpop.f32.mrf.mxu1  ;;  %v8725_v40 = vperm.slane %v8449_v0, 3 }
  0xf6   :  { %v966_v4 = vadd.f32 %v965_v48, %v8638_v13  ;;  %1267 = vmatpush.bf16.msrb.mxu1 %v5636_v2 }
  0xf7   :  { %v907_v49 = vpop.f32.mrf.mxu2 }
  0xf8   :  { %v908_v53 = vadd.f32 %v907_v49, %v8485_v24  ;;  %1130 = vmatmul.bf16.gmra.mxu1 %v8320_v5  ;;  %v831_v55 = vpop.f32.mrf.mxu0 }
  0xf9   :  { %5924 = vmatmul.msk.bf16.gmra.mxu3 %vm776_vm0, %v8244_v38  ;;  %v832_v6 = vadd.f32 %v831_v55, %v8464_v10  ;;  %v5587_v10 = vld [vmem:[%s12802_s1 + $0xd8] sm:$0xf] }
  0xfa   :  { %v8698_v3 = vadd.f32 %v8616_v23, %v908_v53  ;;  %v7570_v23 = vld [vmem:[%s12802_s1 + $0x104] sm:$0xf0]  ;;  %v5491_v53 = vld [vmem:[%s12802_s1 + $0x18] sm:$0xf] }
  0xfb   :  { %v8707_v18 = vadd.f32 %v8618_v26, %v832_v6  ;;  %v5588_v34 = vor.u32 %v7570_v23, %v5587_v10  ;;  %v5539_v26 = vld [vmem:[%s12802_s1 + $0x78] sm:$0xf] }
  0xfc   :  { %v1004_v28 = vpop.f32.mrf.mxu3  ;;  %v5540_v49 = vor.u32 %v7558_v63, %v5539_v26 }
  0xfd   :  { %v8715_v43 = vadd.f32 %v1004_v28, %v966_v4  ;;  %v967_v29 = vpop.f32.mrf.mxu1  ;;  %1268 = vmatpush.bf16.msrb.mxu1 %v5588_v34  ;;  %v5592_v28 = vor.u32 %v7564_v17, %v5589_v27 }
  0xfe   :  { %v968_v58 = vadd.f32 %v967_v29, %v8638_v13 }
  0xff   :  { %v909_v30 = vpop.f32.mrf.mxu2  ;;  %1346 = vmatpush.bf16.msrb.mxu0 %v5592_v28 }
 0x100   :  { %v910_v44 = vadd.f32 %v909_v30, %v8485_v24  ;;  %v1038_v48 = vpop.f32.mrf.mxu0  ;;  %v7546_v24 = vld [vmem:[%s12802_s1 + $0x44] sm:$0xf0] }
 0x101   :  { %1269 = vmatpush.bf16.msrb.mxu1 %v5540_v49  ;;  %v1039_v55 = vadd.f32 %v1038_v48, %v8725_v40  ;;  %v5492_v4 = vor.u32 %v7546_v24, %v5491_v53  ;;  %v7552_v53 = vld [vmem:[%s12802_s1 + $0x7c] sm:$0xf]  ;;  %v5541_v24 = vld [vmem:[%s12802_s1 + $0xa8] sm:$0xf0] }
 0x102   :  { %v8729_v1 = vadd.f32 %v8627_v62, %v910_v44 }
 0x103   :  { %1203 = vmatmul.bf16.gmra.mxu0 %v8280_v54 }
 0x104   :  { %v1006_v2 = vpop.f32.mrf.mxu3  ;;  %5929 = vmatmul.msk.bf16.gmra.mxu2 %vm776_vm0, %v8210_v25 }
 0x105   :  { %v8741_v62 = vadd.f32 %v1006_v2, %v968_v58  ;;  %v970_v6 = vpop.f32.mrf.mxu1  ;;  %1270 = vmatpush.bf16.msrb.mxu1 %v5492_v4 }
 0x106   :  { %v971_v34 = vadd.f32 %v970_v6, %v8638_v13 }
 0x107   :  { %v1077_v9 = vpop.f32.mrf.mxu2 }
 0x108   :  { %v8749_v10 = vadd.f32 %v1077_v9, %v1039_v55  ;;  %1135 = vmatmul.bf16.gmra.mxu1 %v8348_v14  ;;  %v1040_v23 = vpop.f32.mrf.mxu0  ;;  %v5544_v55 = vor.u32 %v7552_v53, %v5541_v24 }
 0x109   :  { %5925 = vmatmul.msk.bf16.gmra.mxu3 %vm776_vm0, %v8296_v59  ;;  %v1041_v63 = vadd.f32 %v1040_v23, %v8725_v40 }
 0x10a   :  { %12814 = vst [vmem:[#allocation5_spill] sm:$0xff] %v8749_v10  ;;  %1347 = vmatpush.bf16.msrb.mxu0 %v5544_v55  ;;  %v7560_v10 = vld [vmem:[%s12802_s1 + $0xb4] sm:$0xf0] }
 0x10c   :  { %v1009_v29 = vpop.f32.mrf.mxu3 }
 0x10d   :  { %v8755_v30 = vadd.f32 %v1009_v29, %v971_v34  ;;  %v972_v26 = vpop.f32.mrf.mxu1 }
 0x10e   :  { %v973_v58 = vadd.f32 %v972_v26, %v8638_v13 }
 0x10f   :  { %12815 = vst [vmem:[#allocation6_spill] sm:$0xff] %v8755_v30  ;;  %v1079_v44 = vpop.f32.mrf.mxu2 }
 0x110   :  { %v8758_v48 = vadd.f32 %v1079_v44, %v1041_v63  ;;  %v1043_v49 = vpop.f32.mrf.mxu0 }
 0x111   :  { %v1044_v2 = vadd.f32 %v1043_v49, %v8725_v40  ;;  %v7540_v49 = vld [vmem:[%s12802_s1 + $0x1c] sm:$0xf] }
 0x112   :  { %12816 = vst [vmem:[#allocation7_spill] sm:$0xff] %v8758_v48 }
 0x113   :  { %1208 = vmatmul.bf16.gmra.mxu0 %v8320_v5 }
 0x114   :  { %v1011_v4 = vpop.f32.mrf.mxu3  ;;  %5930 = vmatmul.msk.bf16.gmra.mxu2 %vm776_vm0, %v8244_v38 }
 0x115   :  { %v8771_v6 = vadd.f32 %v1011_v4, %v973_v58  ;;  %v975_v9 = vpop.f32.mrf.mxu1  ;;  %v5493_v58 = vld [vmem:[%s12802_s1 + $0x48] sm:$0xf0] }
 0x116   :  { %v976_v28 = vadd.f32 %v975_v9, %v8638_v13  ;;  %v5496_v55 = vor.u32 %v7540_v49, %v5493_v58  ;;  %v7637_v58 = vld [vmem:[%s12802_s1 + $0x324] sm:$0xf] }
 0x117   :  { %12817 = vst [vmem:[#allocation8_spill] sm:$0xff] %v8771_v6  ;;  %v1082_v17 = vpop.f32.mrf.mxu2 }
 0x118   :  { %v8773_v27 = vadd.f32 %v1082_v17, %v1044_v2  ;;  %1140 = vmatmul.bf16.gmra.mxu1 %v8385_v32  ;;  %v1045_v23 = vpop.f32.mrf.mxu0  ;;  %1348 = vmatpush.bf16.msrb.mxu0 %v5496_v55 }
 0x119   :  { %5926 = vmatmul.msk.bf16.gmra.mxu3 %vm776_vm0, %v8330_v8  ;;  %v1046_v63 = vadd.f32 %v1045_v23, %v8725_v40 }
 0x11a   :  { %12818 = vst [vmem:[#allocation9_spill] sm:$0xff] %v8773_v27 }
 0x11c   :  { %v1014_v34 = vpop.f32.mrf.mxu3 }
 0x11d   :  { %v8779_v29 = vadd.f32 %v1014_v34, %v976_v28  ;;  %v977_v26 = vpop.f32.mrf.mxu1  ;;  %v5883_v34 = vld [vmem:[%s12802_s1 + $0x320] sm:$0xf] }
 0x11e   :  { %v978_v2 = vadd.f32 %v977_v26, %v8638_v13  ;;  %v7643_v26 = vld [vmem:[%s12802_s1 + $0x34c] sm:$0xf0] }
 0x11f   :  { %v1084_v44 = vpop.f32.mrf.mxu2  ;;  %v5884_v49 = vor.u32 %v7643_v26, %v5883_v34  ;;  %v7625_v34 = vld [vmem:[%s12802_s1 + $0x2c4] sm:$0xf] }
 0x120   :  { %v8788_v53 = vadd.f32 %v1084_v44, %v1046_v63  ;;  %v1048_v24 = vpop.f32.mrf.mxu0 }
 0x121   :  { %v1049_v4 = vadd.f32 %v1048_v24, %v8725_v40  ;;  %v5885_v24 = vld [vmem:[%s12802_s1 + $0x350] sm:$0xf0]  ;;  %1465 = vmatpush.bf16.msra.mxu3 %v5884_v49 }
 0x122   :  { %12819 = vst [vmem:[#allocation10_spill] sm:$0xff] %v8788_v53 }
 0x123   :  { %1213 = vmatmul.bf16.gmra.mxu0 %v8348_v14 }
 0x124   :  { %v1016_v9 = vpop.f32.mrf.mxu3  ;;  %5931 = vmatmul.msk.bf16.gmra.mxu2 %vm776_vm0, %v8296_v59 }
 0x125   :  { %v8795_v17 = vadd.f32 %v1016_v9, %v978_v2  ;;  %v980_v23 = vpop.f32.mrf.mxu1  ;;  %v5888_v2 = vor.u32 %v7637_v58, %v5885_v24  ;;  %v7631_v9 = vld [vmem:[%s12802_s1 + $0x2ec] sm:$0xf0] }
 0x126   :  { %v981_v55 = vadd.f32 %v980_v23, %v8638_v13  ;;  %v5837_v23 = vld [vmem:[%s12802_s1 + $0x2f0] sm:$0xf0] }
 0x127   :  { %v1087_v28 = vpop.f32.mrf.mxu2  ;;  %1543 = vmatpush.bf16.msra.mxu2 %v5888_v2  ;;  %v5840_v49 = vor.u32 %v7625_v34, %v5837_v23 }
 0x128   :  { %v8803_v63 = vadd.f32 %v1087_v28, %v1049_v4  ;;  %1271 = vmatmul.bf16.vlgmr.msrb.gmra.mxu1 %v8194_v19  ;;  %v1050_v44 = vpop.f32.mrf.mxu0  ;;  %v5835_v4 = vld [vmem:[%s12802_s1 + $0x2c0] sm:$0xf] }
 0x129   :  { %5933 = vmatmul.msk.bf16.vlgmr.msrb.gmra.mxu3 %vm776_vm0, %v8047_v15  ;;  %v5836_v28 = vor.u32 %v7631_v9, %v5835_v4  ;;  %1497 = vmatpush.bf16.msra.mxu0 %v5840_v49  ;;  %v5789_v49 = vld [vmem:[%s12802_s1 + $0x290] sm:$0xf0] }
 0x12a   :  { %12820 = vst [vmem:[#allocation11_spill] sm:$0xff] %v8803_v63  ;;  %v1051_v63 = vadd.f32 %v1050_v44, %v8725_v40 }
 0x12b   :  { %1419 = vmatpush.bf16.msra.mxu1 %v5836_v28 }
 0x12c   :  { %v1019_v26 = vpop.f32.mrf.mxu3 }
 0x12d   :  { %v8827_v58 = vadd.f32 %v1019_v26, %v981_v55  ;;  %v982_v24 = vpop.f32.mrf.mxu1 }
 0x12e   :  { %v983_v9 = vadd.f32 %v982_v24, %v8638_v13 }
 0x12f   :  { %v1089_v53 = vpop.f32.mrf.mxu2 }
 0x130   :  { %v8830_v2 = vadd.f32 %v1089_v53, %v1051_v63  ;;  %v1053_v4 = vpop.f32.mrf.mxu0  ;;  %v5787_v53 = vld [vmem:[%s12802_s1 + $0x260] sm:$0xf]  ;;  %v7619_v63 = vld [vmem:[%s12802_s1 + $0x28c] sm:$0xf0] }
 0x131   :  { %v1054_v27 = vadd.f32 %v1053_v4, %v8725_v40  ;;  %v5788_v26 = vor.u32 %v7619_v63, %v5787_v53 }
 0x132   :  { %12821 = vst [vmem:[#allocation12_spill] sm:$0xff] %v8830_v2 }
 0x133   :  { %1218 = vmatmul.bf16.gmra.mxu0 %v8385_v32  ;;  %1420 = vmatpush.bf16.msra.mxu1 %v5788_v26  ;;  %v7607_v26 = vld [vmem:[%s12802_s1 + $0x22c] sm:$0xf0] }
 0x134   :  { %v1021_v6 = vpop.f32.mrf.mxu3  ;;  %5932 = vmatmul.msk.bf16.gmra.mxu2 %vm776_vm0, %v8330_v8 }
 0x135   :  { %v8837_v55 = vadd.f32 %v1021_v6, %v983_v9  ;;  %v985_v28 = vpop.f32.mrf.mxu1  ;;  %v7613_v6 = vld [vmem:[%s12802_s1 + $0x264] sm:$0xf] }
 0x136   :  { %v986_v24 = vadd.f32 %v985_v28, %v8638_v13  ;;  %v5792_v4 = vor.u32 %v7613_v6, %v5789_v49  ;;  %v5739_v28 = vld [vmem:[%s12802_s1 + $0x200] sm:$0xf]  ;;  %v5741_v49 = vld [vmem:[%s12802_s1 + $0x230] sm:$0xf0] }
 0x137   :  { %v1092_v34 = vpop.f32.mrf.mxu2  ;;  %v5740_v6 = vor.u32 %v7607_v26, %v5739_v28 }
 0x138   :  { %v8845_v44 = vadd.f32 %v1092_v34, %v1054_v27  ;;  %1276 = vmatmul.bf16.gmra.mxu1 %v8234_v35  ;;  %v1055_v23 = vpop.f32.mrf.mxu0  ;;  %1498 = vmatpush.bf16.msra.mxu0 %v5792_v4 }
 0x139   :  { %5934 = vmatmul.msk.bf16.gmra.mxu3 %vm776_vm0, %v8128_v51  ;;  %v1056_v53 = vadd.f32 %v1055_v23, %v8725_v40  ;;  %v7601_v23 = vld [vmem:[%s12802_s1 + $0x204] sm:$0xf]  ;;  %1421 = vmatpush.bf16.msra.mxu1 %v5740_v6  ;;  %v5691_v6 = vld [vmem:[%s12802_s1 + $0x1a0] sm:$0xf] }
 0x13a   :  { %12822 = vst [vmem:[#allocation13_spill] sm:$0xff] %v8845_v44  ;;  %v5744_v4 = vor.u32 %v7601_v23, %v5741_v49  ;;  %v5555_v44 = vld [vmem:[%s12802_s1 + $0x88] sm:$0xf] }
 0x13c   :  { %v1024_v27 = vpop.f32.mrf.mxu3  ;;  %1499 = vmatpush.bf16.msra.mxu0 %v5744_v4 }
 0x13d   :  { %v8857_v9 = vadd.f32 %v1024_v27, %v986_v24  ;;  %v987_v34 = vpop.f32.mrf.mxu1 }
 0x13e   :  { %v988_v30 = vadd.f32 %v987_v34, %v8638_v13  ;;  %v8882_v34 = vperm.slane %v8449_v0, 4 }
 0x13f   :  { %12823 = vst [vmem:[#allocation14_spill] sm:$0xff] %v8857_v9  ;;  %v1094_v63 = vpop.f32.mrf.mxu2 }
 0x140   :  { %v8860_v2 = vadd.f32 %v1094_v63, %v1056_v53  ;;  %v1058_v48 = vpop.f32.mrf.mxu0 }
 0x141   :  { %v1059_v13 = vadd.f32 %v1058_v48, %v8725_v40 }
 0x142   :  { %12824 = vst [vmem:[#allocation15_spill] sm:$0xff] %v8860_v2 }
 0x143   :  { %1349 = vmatmul.bf16.vlgmr.msrb.gmra.mxu0 %v8194_v19 }
 0x144   :  { %v1026_v24 = vpop.f32.mrf.mxu3  ;;  %5939 = vmatmul.msk.bf16.vlgmr.msrb.gmra.mxu2 %vm776_vm0, %v8047_v15 }
 0x145   :  { %v8879_v27 = vadd.f32 %v1026_v24, %v988_v30  ;;  %v1116_v53 = vpop.f32.mrf.mxu1 }
 0x146   :  { %v1117_v48 = vadd.f32 %v1116_v53, %v8882_v34 }
 0x147   :  { %12825 = vst [vmem:[#allocation16_spill] sm:$0xff] %v8879_v27  ;;  %v1097_v63 = vpop.f32.mrf.mxu2 }
 0x148   :  { %v8884_v28 = vadd.f32 %v1097_v63, %v1059_v13  ;;  %1281 = vmatmul.bf16.gmra.mxu1 %v8280_v54  ;;  %v1060_v26 = vpop.f32.mrf.mxu0  ;;  %v7595_v13 = vld [vmem:[%s12802_s1 + $0x1cc] sm:$0xf0] }
 0x149   :  { %5935 = vmatmul.msk.bf16.gmra.mxu3 %vm776_vm0, %v8210_v25  ;;  %v1061_v24 = vadd.f32 %v1060_v26, %v8725_v40  ;;  %v5692_v63 = vor.u32 %v7595_v13, %v5691_v6  ;;  %v5693_v26 = vld [vmem:[%s12802_s1 + $0x1d0] sm:$0xf0] }
 0x14a   :  { %12826 = vst [vmem:[#allocation17_spill] sm:$0xff] %v8884_v28 }
 0x14b   :  { %1422 = vmatpush.bf16.msra.mxu1 %v5692_v63 }
 0x14c   :  { %v1155_v23 = vpop.f32.mrf.mxu3 }
 0x14d   :  { %v8890_v30 = vadd.f32 %v1155_v23, %v1117_v48  ;;  %v1118_v49 = vpop.f32.mrf.mxu1  ;;  %v7589_v48 = vld [vmem:[%s12802_s1 + $0x1a4] sm:$0xf] }
 0x14e   :  { %v1119_v23 = vadd.f32 %v1118_v49, %v8882_v34  ;;  %v7583_v49 = vld [vmem:[%s12802_s1 + $0x16c] sm:$0xf0] }
 0x14f   :  { %12827 = vst [vmem:[#allocation18_spill] sm:$0xff] %v8890_v30  ;;  %v1099_v27 = vpop.f32.mrf.mxu2  ;;  %v5696_v30 = vor.u32 %v7589_v48, %v5693_v26  ;;  %v7577_v26 = vld [vmem:[%s12802_s1 + $0x144] sm:$0xf] }
 0x150   :  { %v8899_v4 = vadd.f32 %v1099_v27, %v1061_v24  ;;  %v1063_v53 = vpop.f32.mrf.mxu0 }
 0x151   :  { %v1064_v28 = vadd.f32 %v1063_v53, %v8725_v40  ;;  %1500 = vmatpush.bf16.msra.mxu0 %v5696_v30 }
 0x152   :  { %12828 = vst [vmem:[#allocation19_spill] sm:$0xff] %v8899_v4  ;;  %v5643_v4 = vld [vmem:[%s12802_s1 + $0x140] sm:$0xf] }
 0x153   :  { %1354 = vmatmul.bf16.gmra.mxu0 %v8234_v35  ;;  %v5644_v48 = vor.u32 %v7583_v49, %v5643_v4  ;;  %v7571_v4 = vld [vmem:[%s12802_s1 + $0x10c] sm:$0xf0] }
 0x154   :  { %v1157_v27 = vpop.f32.mrf.mxu3  ;;  %5940 = vmatmul.msk.bf16.gmra.mxu2 %vm776_vm0, %v8128_v51 }
 0x155   :  { %v8912_v24 = vadd.f32 %v1157_v27, %v1119_v23  ;;  %v1121_v6 = vpop.f32.mrf.mxu1  ;;  %1423 = vmatpush.bf16.msra.mxu1 %v5644_v48  ;;  %v5645_v23 = vld [vmem:[%s12802_s1 + $0x170] sm:$0xf0]  ;;  %v5595_v27 = vld [vmem:[%s12802_s1 + $0xe0] sm:$0xf] }
 0x156   :  { %v1122_v30 = vadd.f32 %v1121_v6, %v8882_v34 }
 0x157   :  { %12829 = vst [vmem:[#allocation20_spill] sm:$0xff] %v8912_v24  ;;  %v1102_v13 = vpop.f32.mrf.mxu2 }
 0x158   :  { %v8920_v63 = vadd.f32 %v1102_v13, %v1064_v28  ;;  %1286 = vmatmul.bf16.gmra.mxu1 %v8320_v5  ;;  %v1065_v53 = vpop.f32.mrf.mxu0  ;;  %v5648_v28 = vor.u32 %v7577_v26, %v5645_v23  ;;  %v5596_v13 = vor.u32 %v7571_v4, %v5595_v27  ;;  %v5547_v26 = vld [vmem:[%s12802_s1 + $0x80] sm:$0xf]  ;;  %v7559_v23 = vld [vmem:[%s12802_s1 + $0xac] sm:$0xf0]  ;;  %v8950_v27 = vperm.slane %v8449_v0, 5 }
 0x159   :  { %5936 = vmatmul.msk.bf16.gmra.mxu3 %vm776_vm0, %v8244_v38  ;;  %v1066_v24 = vadd.f32 %v1065_v53, %v8725_v40  ;;  %v5548_v4 = vor.u32 %v7559_v23, %v5547_v26  ;;  %v5499_v40 = vld [vmem:[%s12802_s1 + $0x20] sm:$0xf]  ;;  %v7547_v53 = vld [vmem:[%s12802_s1 + $0x4c] sm:$0xf0]  ;;  %v7565_v26 = vld [vmem:[%s12802_s1 + $0xe4] sm:$0xf] }
 0x15a   :  { %12830 = vst [vmem:[#allocation21_spill] sm:$0xff] %v8920_v63  ;;  %1501 = vmatpush.bf16.msra.mxu0 %v5648_v28  ;;  %1424 = vmatpush.bf16.msra.mxu1 %v5596_v13  ;;  %v5500_v0 = vor.u32 %v7547_v53, %v5499_v40  ;;  %v5597_v23 = vld [vmem:[%s12802_s1 + $0x110] sm:$0xf0] }
 0x15c   :  { %v1160_v6 = vpop.f32.mrf.mxu3 }
 0x15d   :  { %v8938_v49 = vadd.f32 %v1160_v6, %v1122_v30  ;;  %v1123_v48 = vpop.f32.mrf.mxu1 }
 0x15e   :  { %v1124_v28 = vadd.f32 %v1123_v48, %v8882_v34  ;;  %1425 = vmatpush.bf16.msra.mxu1 %v5548_v4 }
 0x15f   :  { %12831 = vst [vmem:[#allocation22_spill] sm:$0xff] %v8938_v49  ;;  %v1104_v63 = vpop.f32.mrf.mxu2  ;;  %v5600_v49 = vor.u32 %v7565_v26, %v5597_v23 }
 0x160   :  { %v8947_v2 = vadd.f32 %v1104_v63, %v1066_v24  ;;  %v1194_v30 = vpop.f32.mrf.mxu0 }
 0x161   :  { %v1195_v24 = vadd.f32 %v1194_v30, %v8950_v27  ;;  %1502 = vmatpush.bf16.msra.mxu0 %v5600_v49  ;;  %v5549_v49 = vld [vmem:[%s12802_s1 + $0xb0] sm:$0xf0] }
 0x162   :  { %12832 = vst [vmem:[#allocation23_spill] sm:$0xff] %v8947_v2  ;;  %1426 = vmatpush.bf16.msra.mxu1 %v5500_v0 }
 0x163   :  { %1359 = vmatmul.bf16.gmra.mxu0 %v8280_v54 }
 0x164   :  { %v1162_v63 = vpop.f32.mrf.mxu3  ;;  %5941 = vmatmul.msk.bf16.gmra.mxu2 %vm776_vm0, %v8210_v25 }
 0x165   :  { %v8963_v6 = vadd.f32 %v1162_v63, %v1124_v28  ;;  %v1126_v13 = vpop.f32.mrf.mxu1 }
 0x166   :  { %v1127_v28 = vadd.f32 %v1126_v13, %v8882_v34  ;;  %v7553_v13 = vld [vmem:[%s12802_s1 + $0x84] sm:$0xf] }
 0x167   :  { %12833 = vst [vmem:[#allocation24_spill] sm:$0xff] %v8963_v6  ;;  %v1233_v48 = vpop.f32.mrf.mxu2  ;;  %v5552_v26 = vor.u32 %v7553_v13, %v5549_v49 }
 0x168   :  { %v8971_v4 = vadd.f32 %v1233_v48, %v1195_v24  ;;  %1291 = vmatmul.bf16.gmra.mxu1 %v8348_v14  ;;  %v1196_v30 = vpop.f32.mrf.mxu0 }
 0x169   :  { %5937 = vmatmul.msk.bf16.gmra.mxu3 %vm776_vm0, %v8296_v59  ;;  %v1197_v0 = vadd.f32 %v1196_v30, %v8950_v27  ;;  %1503 = vmatpush.bf16.msra.mxu0 %v5552_v26  ;;  %v7541_v26 = vld [vmem:[%s12802_s1 + $0x24] sm:$0xf] }
 0x16a   :  { %12834 = vst [vmem:[#allocation25_spill] sm:$0xff] %v8971_v4 }
 0x16c   :  { %v1165_v40 = vpop.f32.mrf.mxu3 }
 0x16d   :  { %v8977_v53 = vadd.f32 %v1165_v40, %v1127_v28  ;;  %v1128_v63 = vpop.f32.mrf.mxu1 }
 0x16e   :  { %v1129_v48 = vadd.f32 %v1128_v63, %v8882_v34 }
 0x16f   :  { %12835 = vst [vmem:[#allocation26_spill] sm:$0xff] %v8977_v53  ;;  %v1235_v6 = vpop.f32.mrf.mxu2 }
 0x170   :  { %v8980_v2 = vadd.f32 %v1235_v6, %v1197_v0  ;;  %v1199_v24 = vpop.f32.mrf.mxu0 }
 0x171   :  { %v1200_v23 = vadd.f32 %v1199_v24, %v8950_v27 }
 0x172   :  { %12836 = vst [vmem:[#allocation27_spill] sm:$0xff] %v8980_v2 }
 0x173   :  { %1364 = vmatmul.bf16.gmra.mxu0 %v8320_v5 }
 0x174   :  { %v1167_v30 = vpop.f32.mrf.mxu3  ;;  %5942 = vmatmul.msk.bf16.gmra.mxu2 %vm776_vm0, %v8244_v38 }
 0x175   :  { %v8993_v6 = vadd.f32 %v1167_v30, %v1129_v48  ;;  %v1131_v28 = vpop.f32.mrf.mxu1 }
 0x176   :  { %v1132_v2 = vadd.f32 %v1131_v28, %v8882_v34 }
 0x177   :  { %12837 = vst [vmem:[#allocation28_spill] sm:$0xff] %v8993_v6  ;;  %v1238_v40 = vpop.f32.mrf.mxu2 }
 0x178   :  { %v8995_v63 = vadd.f32 %v1238_v40, %v1200_v23  ;;  %1296 = vmatmul.bf16.gmra.mxu1 %v8385_v32  ;;  %v1201_v0 = vpop.f32.mrf.mxu0  ;;  %v5501_v23 = vld [vmem:[%s12802_s1 + $0x50] sm:$0xf0] }
 0x179   :  { %5938 = vmatmul.msk.bf16.gmra.mxu3 %vm776_vm0, %v8330_v8  ;;  %v1202_v48 = vadd.f32 %v1201_v0, %v8950_v27 }
 0x17a   :  { %12838 = vst [vmem:[#allocation29_spill] sm:$0xff] %v8995_v63  ;;  %v5504_v63 = vor.u32 %v7541_v26, %v5501_v23  ;;  %v5893_v23 = vld [vmem:[%s12802_s1 + $0x358] sm:$0xf0] }
 0x17c   :  { %v1170_v24 = vpop.f32.mrf.mxu3  ;;  %1504 = vmatpush.bf16.msra.mxu0 %v5504_v63  ;;  %v7644_v63 = vld [vmem:[%s12802_s1 + $0x354] sm:$0xf0] }
 0x17d   :  { %v9001_v13 = vadd.f32 %v1170_v24, %v1132_v2  ;;  %v1133_v49 = vpop.f32.mrf.mxu1 }
 0x17e   :  { %v1134_v6 = vadd.f32 %v1133_v49, %v8882_v34 }
 0x17f   :  { %12839 = vst [vmem:[#allocation30_spill] sm:$0xff] %v9001_v13  ;;  %v1240_v30 = vpop.f32.mrf.mxu2 }
 0x180   :  { %v9010_v40 = vadd.f32 %v1240_v30, %v1202_v48  ;;  %v1204_v28 = vpop.f32.mrf.mxu0  ;;  %v5891_v48 = vld [vmem:[%s12802_s1 + $0x328] sm:$0xf] }
 0x181   :  { %v1205_v2 = vadd.f32 %v1204_v28, %v8950_v27  ;;  %v5892_v26 = vor.u32 %v7644_v63, %v5891_v48  ;;  %v7626_v63 = vld [vmem:[%s12802_s1 + $0x2cc] sm:$0xf] }
 0x182   :  { %12840 = vst [vmem:[#allocation31_spill] sm:$0xff] %v9010_v40 }
 0x183   :  { %1369 = vmatmul.bf16.gmra.mxu0 %v8348_v14  ;;  %1621 = vmatpush.bf16.msrb.mxu3 %v5892_v26 }
 0x184   :  { %v1172_v0 = vpop.f32.mrf.mxu3  ;;  %5943 = vmatmul.msk.bf16.gmra.mxu2 %vm776_vm0, %v8296_v59 }
 0x185   :  { %v9017_v24 = vadd.f32 %v1172_v0, %v1134_v6  ;;  %v1136_v53 = vpop.f32.mrf.mxu1  ;;  %v7638_v6 = vld [vmem:[%s12802_s1 + $0x32c] sm:$0xf] }
 0x186   :  { %v1137_v28 = vadd.f32 %v1136_v53, %v8882_v34  ;;  %v5896_v0 = vor.u32 %v7638_v6, %v5893_v23  ;;  %v5845_v53 = vld [vmem:[%s12802_s1 + $0x2f8] sm:$0xf0] }
 0x187   :  { %12841 = vst [vmem:[#allocation32_spill] sm:$0xff] %v9017_v24  ;;  %v1243_v4 = vpop.f32.mrf.mxu2  ;;  %v5848_v26 = vor.u32 %v7626_v63, %v5845_v53 }
 0x188   :  { %v9025_v49 = vadd.f32 %v1243_v4, %v1205_v2  ;;  %1427 = vmatmul.bf16.vlgmr.msra.gmra.mxu1 %v8194_v19  ;;  %v1206_v30 = vpop.f32.mrf.mxu0  ;;  %v5843_v4 = vld [vmem:[%s12802_s1 + $0x2c8] sm:$0xf]  ;;  %v7632_v2 = vld [vmem:[%s12802_s1 + $0x2f4] sm:$0xf0]  ;;  %1699 = vmatpush.bf16.msrb.mxu2 %v5896_v0 }
 0x189   :  { %5945 = vmatmul.msk.bf16.vlgmr.msra.gmra.mxu3 %vm776_vm0, %v8047_v15  ;;  %v5844_v48 = vor.u32 %v7632_v2, %v5843_v4  ;;  %v1207_v40 = vadd.f32 %v1206_v30, %v8950_v27  ;;  %1653 = vmatpush.bf16.msrb.mxu0 %v5848_v26 }
 0x18a   :  { %12842 = vst [vmem:[#allocation33_spill] sm:$0xff] %v9025_v49 }
 0x18b   :  { %1575 = vmatpush.bf16.msrb.mxu1 %v5844_v48 }
 0x18c   :  { %v1175_v6 = vpop.f32.mrf.mxu3 }
 0x18d   :  { %v9049_v23 = vadd.f32 %v1175_v6, %v1137_v28  ;;  %v1138_v49 = vpop.f32.mrf.mxu1  ;;  %v5797_v6 = vld [vmem:[%s12802_s1 + $0x298] sm:$0xf0] }
 0x18e   :  { %v1139_v2 = vadd.f32 %v1138_v49, %v8882_v34  ;;  %v5795_v49 = vld [vmem:[%s12802_s1 + $0x268] sm:$0xf] }
 0x18f   :  { %12843 = vst [vmem:[#allocation34_spill] sm:$0xff] %v9049_v23  ;;  %v1245_v24 = vpop.f32.mrf.mxu2 }
 0x190   :  { %v9052_v0 = vadd.f32 %v1245_v24, %v1207_v40  ;;  %v1209_v4 = vpop.f32.mrf.mxu0 }
 0x191   :  { %v1210_v13 = vadd.f32 %v1209_v4, %v8950_v27 }
 0x192   :  { %12844 = vst [vmem:[#allocation35_spill] sm:$0xff] %v9052_v0 }
 0x193   :  { %1374 = vmatmul.bf16.gmra.mxu0 %v8385_v32 }
 0x194   :  { %v1177_v9 = vpop.f32.mrf.mxu3  ;;  %5944 = vmatmul.msk.bf16.gmra.mxu2 %vm776_vm0, %v8330_v8 }
 0x195   :  { %v9059_v28 = vadd.f32 %v1177_v9, %v1139_v2  ;;  %v1141_v48 = vpop.f32.mrf.mxu1  ;;  %v7620_v9 = vld [vmem:[%s12802_s1 + $0x294] sm:$0xf0] }
 0x196   :  { %v1142_v24 = vadd.f32 %v1141_v48, %v8882_v34  ;;  %v5796_v53 = vor.u32 %v7620_v9, %v5795_v49  ;;  %v5747_v49 = vld [vmem:[%s12802_s1 + $0x208] sm:$0xf]  ;;  %v7608_v9 = vld [vmem:[%s12802_s1 + $0x234] sm:$0xf0] }
 0x197   :  { %12845 = vst [vmem:[#allocation36_spill] sm:$0xff] %v9059_v28  ;;  %v1248_v63 = vpop.f32.mrf.mxu2 }
 0x198   :  { %v9061_v30 = vadd.f32 %v1248_v63, %v1210_v13  ;;  %1432 = vmatmul.bf16.gmra.mxu1 %v8234_v35  ;;  %v1211_v40 = vpop.f32.mrf.mxu0  ;;  %v7614_v13 = vld [vmem:[%s12802_s1 + $0x26c] sm:$0xf] }
 0x199   :  { %5946 = vmatmul.msk.bf16.gmra.mxu3 %vm776_vm0, %v8128_v51  ;;  %v5800_v26 = vor.u32 %v7614_v13, %v5797_v6  ;;  %1576 = vmatpush.bf16.msrb.mxu1 %v5796_v53  ;;  %v1212_v63 = vadd.f32 %v1211_v40, %v8950_v27  ;;  %v7602_v40 = vld [vmem:[%s12802_s1 + $0x20c] sm:$0xf] }
 0x19a   :  { %12846 = vst [vmem:[#allocation37_spill] sm:$0xff] %v9061_v30 }
 0x19b   :  { %1654 = vmatpush.bf16.msrb.mxu0 %v5800_v26  ;;  %v9106_v26 = vld [vmem:[%s12803_s2] sm:$0xff] }
 0x19c   :  { %v1180_v4 = vpop.f32.mrf.mxu3 }
 0x19d   :  { %v9079_v2 = vadd.f32 %v1180_v4, %v1142_v24  ;;  %v1143_v48 = vpop.f32.mrf.mxu1  ;;  %v5748_v24 = vor.u32 %v7608_v9, %v5747_v49  ;;  %v9109_v4 = vperm.slane %v9106_v26, 6 }
 0x19e   :  { %v1144_v23 = vadd.f32 %v1143_v48, %v8882_v34 }
 0x19f   :  { %12847 = vst [vmem:[#allocation38_spill] sm:$0xff] %v9079_v2  ;;  %v1250_v0 = vpop.f32.mrf.mxu2  ;;  %1577 = vmatpush.bf16.msrb.mxu1 %v5748_v24 }
 0x1a0   :  { %v9082_v30 = vadd.f32 %v1250_v0, %v1212_v63  ;;  %v1214_v28 = vpop.f32.mrf.mxu0  ;;  %v5749_v0 = vld [vmem:[%s12802_s1 + $0x238] sm:$0xf0] }
 0x1a1   :  { %v1215_v34 = vadd.f32 %v1214_v28, %v8950_v27  ;;  %v5752_v53 = vor.u32 %v7602_v40, %v5749_v0 }
 0x1a2   :  { %12848 = vst [vmem:[#allocation39_spill] sm:$0xff] %v9082_v30 }
 0x1a3   :  { %1505 = vmatmul.bf16.vlgmr.msra.gmra.mxu0 %v8194_v19 }
 0x1a4   :  { %v1182_v13 = vpop.f32.mrf.mxu3  ;;  %5951 = vmatmul.msk.bf16.vlgmr.msra.gmra.mxu2 %vm776_vm0, %v8047_v15  ;;  %1655 = vmatpush.bf16.msrb.mxu0 %v5752_v53 }
 0x1a5   :  { %v9101_v6 = vadd.f32 %v1182_v13, %v1144_v23  ;;  %v1272_v48 = vpop.f32.mrf.mxu1 }
 0x1a6   :  { %v1273_v23 = vadd.f32 %v1272_v48, %v9109_v4  ;;  %v5699_v48 = vld [vmem:[%s12802_s1 + $0x1a8] sm:$0xf] }
 0x1a7   :  { %12849 = vst [vmem:[#allocation40_spill] sm:$0xff] %v9101_v6  ;;  %v1253_v63 = vpop.f32.mrf.mxu2  ;;  %v1731_v6 = vmax.f32 %v8473_v20, 0.0  ;;  %v7590_v20 = vld [vmem:[%s12802_s1 + $0x1ac] sm:$0xf] }
 0x1a8   :  { %v9111_v28 = vadd.f32 %v1253_v63, %v1215_v34  ;;  %1437 = vmatmul.bf16.gmra.mxu1 %v8280_v54  ;;  %v1216_v49 = vpop.f32.mrf.mxu0 }
 0x1a9   :  { %5947 = vmatmul.msk.bf16.gmra.mxu3 %vm776_vm0, %v8210_v25  ;;  %v1217_v13 = vadd.f32 %v1216_v49, %v8950_v27 }
 0x1aa   :  { %12850 = vst [vmem:[#allocation41_spill] sm:$0xff] %v9111_v28 }
 0x1ac   :  { %v1311_v9 = vpop.f32.mrf.mxu3 }
 0x1ad   :  { %v1312_v40 = vadd.f32 %v1311_v9, %v1273_v23  ;;  %v1274_v0 = vpop.f32.mrf.mxu1  ;;  %v7596_v23 = vld [vmem:[%s12802_s1 + $0x1d4] sm:$0xf0] }
 0x1ae   :  { %v1275_v28 = vadd.f32 %v1274_v0, %v9109_v4  ;;  %v5700_v49 = vor.u32 %v7596_v23, %v5699_v48 }
 0x1af   :  { %v1737_v24 = vmax.f32 %v1312_v40, 0.0  ;;  %v1255_v53 = vpop.f32.mrf.mxu2 }
 0x1b0   :  { %v9119_v30 = vadd.f32 %v1255_v53, %v1217_v13  ;;  %v1219_v34 = vpop.f32.mrf.mxu0  ;;  %1578 = vmatpush.bf16.msrb.mxu1 %v5700_v49  ;;  %v1743_v53 = vmax.f32 %v8500_v39, 0.0 }
 0x1b1   :  { %v9121_v63 = vmax.f32 %v1731_v6, %v1737_v24  ;;  %v5701_v6 = vld [vmem:[%s12802_s1 + $0x1d8] sm:$0xf0]  ;;  %v1220_v40 = vadd.f32 %v1219_v34, %v8950_v27  ;;  %v7584_v34 = vld [vmem:[%s12802_s1 + $0x174] sm:$0xf0] }
 0x1b2   :  { %12851 = vst [vmem:[#allocation42_spill] sm:$0xff] %v9119_v30  ;;  %v5704_v9 = vor.u32 %v7590_v20, %v5701_v6  ;;  %v5651_v30 = vld [vmem:[%s12802_s1 + $0x148] sm:$0xf] }
 0x1b3   :  { %1510 = vmatmul.bf16.gmra.mxu0 %v8234_v35 }
 0x1b4   :  { %v1313_v0 = vpop.f32.mrf.mxu3  ;;  %5952 = vmatmul.msk.bf16.gmra.mxu2 %vm776_vm0, %v8128_v51  ;;  %1656 = vmatpush.bf16.msrb.mxu0 %v5704_v9  ;;  %v5603_v9 = vld [vmem:[%s12802_s1 + $0xe8] sm:$0xf] }
 0x1b5   :  { %v1314_v13 = vadd.f32 %v1313_v0, %v1275_v28  ;;  %v1277_v24 = vpop.f32.mrf.mxu1  ;;  %v5652_v28 = vor.u32 %v7584_v34, %v5651_v30  ;;  %v7578_v30 = vld [vmem:[%s12802_s1 + $0x14c] sm:$0xf] }
 0x1b6   :  { %v1278_v39 = vadd.f32 %v1277_v24, %v9109_v4 }
 0x1b7   :  { %v1749_v48 = vmax.f32 %v1314_v13, 0.0  ;;  %v1258_v23 = vpop.f32.mrf.mxu2  ;;  %1579 = vmatpush.bf16.msrb.mxu1 %v5652_v28  ;;  %v5653_v13 = vld [vmem:[%s12802_s1 + $0x178] sm:$0xf0]  ;;  %v1755_v28 = vmax.f32 %v8506_v47, 0.0 }
 0x1b8   :  { %v9147_v20 = vadd.f32 %v1258_v23, %v1220_v40  ;;  %1442 = vmatmul.bf16.gmra.mxu1 %v8320_v5  ;;  %v1221_v49 = vpop.f32.mrf.mxu0  ;;  %v7572_v40 = vld [vmem:[%s12802_s1 + $0x114] sm:$0xf0]  ;;  %v5656_v23 = vor.u32 %v7578_v30, %v5653_v13  ;;  %v1767_v13 = vmax.f32 %v8524_v61, 0.0  ;;  %v7566_v61 = vld [vmem:[%s12802_s1 + $0xec] sm:$0xf] }
 0x1b9   :  { %v9150_v6 = vmax.f32 %v1743_v53, %v1749_v48  ;;  %5948 = vmatmul.msk.bf16.gmra.mxu3 %vm776_vm0, %v8244_v38  ;;  %v5604_v24 = vor.u32 %v7572_v40, %v5603_v9  ;;  %v1222_v34 = vadd.f32 %v1221_v49, %v8950_v27  ;;  %v5556_v49 = vor.u32 %v7560_v10, %v5555_v44 }
 0x1ba   :  { %12852 = vst [vmem:[#allocation43_spill] sm:$0xff] %v9147_v20  ;;  %1657 = vmatpush.bf16.msrb.mxu0 %v5656_v23 }
 0x1bb   :  { %1580 = vmatpush.bf16.msrb.mxu1 %v5604_v24 }
 0x1bc   :  { %v1316_v0 = vpop.f32.mrf.mxu3 }
 0x1bd   :  { %v1317_v53 = vadd.f32 %v1316_v0, %v1278_v39  ;;  %v1279_v48 = vpop.f32.mrf.mxu1  ;;  %v9178_v39 = vperm.slane %v9106_v26, 7  ;;  %v5507_v0 = vld [vmem:[%s12802_s1 + $0x28] sm:$0xf] }
 0x1be   :  { %v1280_v47 = vadd.f32 %v1279_v48, %v9109_v4 }
 0x1bf   :  { %v1761_v20 = vmax.f32 %v1317_v53, 0.0  ;;  %v1260_v2 = vpop.f32.mrf.mxu2  ;;  %1581 = vmatpush.bf16.msrb.mxu1 %v5556_v49 }
 0x1c0   :  { %v9175_v9 = vadd.f32 %v1260_v2, %v1222_v34  ;;  %v1350_v27 = vpop.f32.mrf.mxu0  ;;  %v7548_v2 = vld [vmem:[%s12802_s1 + $0x54] sm:$0xf0] }
 0x1c1   :  { %v9180_v40 = vmax.f32 %v1755_v28, %v1761_v20  ;;  %v1351_v26 = vadd.f32 %v1350_v27, %v9178_v39  ;;  %v5508_v10 = vor.u32 %v7548_v2, %v5507_v0  ;;  %v1732_v27 = vmax.f32 %v8498_v37, 0.0 }
 0x1c2   :  { %12853 = vst [vmem:[#allocation44_spill] sm:$0xff] %v9175_v9  ;;  %v1779_v37 = vmax.f32 %v8540_v12, 0.0  ;;  %v7554_v12 = vld [vmem:[%s12802_s1 + $0x8c] sm:$0xf] }
 0x1c3   :  { %1515 = vmatmul.bf16.gmra.mxu0 %v8280_v54  ;;  %1582 = vmatpush.bf16.msrb.mxu1 %v5508_v10 }
 0x1c4   :  { %v1318_v30 = vpop.f32.mrf.mxu3  ;;  %5953 = vmatmul.msk.bf16.gmra.mxu2 %vm776_vm0, %v8210_v25 }
 0x1c5   :  { %v1319_v44 = vadd.f32 %v1318_v30, %v1280_v47  ;;  %v1282_v20 = vpop.f32.mrf.mxu1  ;;  %v5605_v47 = vld [vmem:[%s12802_s1 + $0x118] sm:$0xf0] }
 0x1c6   :  { %v1283_v28 = vadd.f32 %v1282_v20, %v9109_v4 }
 0x1c7   :  { %v1773_v24 = vmax.f32 %v1319_v44, 0.0  ;;  %v1389_v53 = vpop.f32.mrf.mxu2 }
 0x1c8   :  { %v1390_v48 = vadd.f32 %v1389_v53, %v1351_v26  ;;  %1447 = vmatmul.bf16.gmra.mxu1 %v8348_v14  ;;  %v1352_v23 = vpop.f32.mrf.mxu0  ;;  %v5608_v26 = vor.u32 %v7566_v61, %v5605_v47  ;;  %v5557_v47 = vld [vmem:[%s12802_s1 + $0xb8] sm:$0xf0] }
 0x1c9   :  { %v9195_v34 = vmax.f32 %v1767_v13, %v1773_v24  ;;  %5949 = vmatmul.msk.bf16.gmra.mxu3 %vm776_vm0, %v8296_v59  ;;  %v1353_v44 = vadd.f32 %v1352_v23, %v9178_v39 }
 0x1ca   :  { %v1738_v49 = vmax.f32 %v1390_v48, 0.0  ;;  %1658 = vmatpush.bf16.msrb.mxu0 %v5608_v26  ;;  %v5560_v26 = vor.u32 %v7554_v12, %v5557_v47  ;;  %v1803_v12 = vmax.f32 %v8584_v57, 0.0 }
 0x1cc   :  { %v9207_v0 = vmax.f32 %v1732_v27, %v1738_v49  ;;  %v1321_v2 = vpop.f32.mrf.mxu3  ;;  %v1744_v27 = vmax.f32 %v8504_v46, 0.0 }
 0x1cd   :  { %v1322_v30 = vadd.f32 %v1321_v2, %v1283_v28  ;;  %v1284_v10 = vpop.f32.mrf.mxu1 }
 0x1ce   :  { %v1285_v9 = vadd.f32 %v1284_v10, %v9109_v4  ;;  %1659 = vmatpush.bf16.msrb.mxu0 %v5560_v26 }
 0x1cf   :  { %v1785_v20 = vmax.f32 %v1322_v30, 0.0  ;;  %v1391_v13 = vpop.f32.mrf.mxu2  ;;  %v1791_v30 = vmax.f32 %v8564_v33, 0.0 }
 0x1d0   :  { %v1392_v24 = vadd.f32 %v1391_v13, %v1353_v44  ;;  %v1355_v53 = vpop.f32.mrf.mxu0 }
 0x1d1   :  { %v9211_v48 = vmax.f32 %v1779_v37, %v1785_v20  ;;  %v1356_v23 = vadd.f32 %v1355_v53, %v9178_v39 }
 0x1d2   :  { %v1750_v49 = vmax.f32 %v1392_v24, 0.0 }
 0x1d3   :  { %1520 = vmatmul.bf16.gmra.mxu0 %v8320_v5 }
 0x1d4   :  { %v9216_v28 = vmax.f32 %v1744_v27, %v1750_v49  ;;  %v1323_v61 = vpop.f32.mrf.mxu3  ;;  %5954 = vmatmul.msk.bf16.gmra.mxu2 %vm776_vm0, %v8244_v38 }
 0x1d5   :  { %v1324_v46 = vadd.f32 %v1323_v61, %v1285_v9  ;;  %v1287_v2 = vpop.f32.mrf.mxu1  ;;  %v1756_v9 = vmax.f32 %v8522_v60, 0.0  ;;  %v5509_v60 = vld [vmem:[%s12802_s1 + $0x58] sm:$0xf0] }
 0x1d6   :  { %v1288_v24 = vadd.f32 %v1287_v2, %v9109_v4  ;;  %v7542_v2 = vld [vmem:[%s12802_s1 + $0x2c] sm:$0xf] }
 0x1d7   :  { %v1797_v10 = vmax.f32 %v1324_v46, 0.0  ;;  %v1394_v44 = vpop.f32.mrf.mxu2 }
 0x1d8   :  { %v1395_v37 = vadd.f32 %v1394_v44, %v1356_v23  ;;  %1452 = vmatmul.bf16.gmra.mxu1 %v8385_v32  ;;  %v1357_v20 = vpop.f32.mrf.mxu0 }
 0x1d9   :  { %v9229_v13 = vmax.f32 %v1791_v30, %v1797_v10  ;;  %5950 = vmatmul.msk.bf16.gmra.mxu3 %vm776_vm0, %v8330_v8  ;;  %v1358_v23 = vadd.f32 %v1357_v20, %v9178_v39  ;;  %v5512_v10 = vor.u32 %v7542_v2, %v5509_v60  ;;  %v1768_v20 = vmax.f32 %v8538_v11, 0.0 }
 0x1da   :  { %v1762_v53 = vmax.f32 %v1395_v37, 0.0 }
 0x1db   :  { %1660 = vmatpush.bf16.msrb.mxu0 %v5512_v10 }
 0x1dc   :  { %v9235_v27 = vmax.f32 %v1756_v9, %v1762_v53  ;;  %v1326_v33 = vpop.f32.mrf.mxu3 }
 0x1dd   :  { %v1327_v49 = vadd.f32 %v1326_v33, %v1288_v24  ;;  %v1289_v61 = vpop.f32.mrf.mxu1 }
 0x1de   :  { %v1290_v37 = vadd.f32 %v1289_v61, %v9109_v4  ;;  %v1815_v61 = vmax.f32 %v8614_v22, 0.0 }
 0x1df   :  { %v1809_v47 = vmax.f32 %v1327_v49, 0.0  ;;  %v1396_v46 = vpop.f32.mrf.mxu2 }
 0x1e0   :  { %v1397_v26 = vadd.f32 %v1396_v46, %v1358_v23  ;;  %v1360_v30 = vpop.f32.mrf.mxu0 }
 0x1e1   :  { %v9245_v44 = vmax.f32 %v1803_v12, %v1809_v47  ;;  %v1361_v53 = vadd.f32 %v1360_v30, %v9178_v39 }
 0x1e2   :  { %v1774_v57 = vmax.f32 %v1397_v26, 0.0  ;;  %v1780_v26 = vmax.f32 %v8562_v31, 0.0 }
 0x1e3   :  { %v1947_v24 = vmax.f32 %v9121_v63, %v9245_v44  ;;  %1525 = vmatmul.bf16.gmra.mxu0 %v8348_v14 }
 0x1e4   :  { %v9252_v9 = vmax.f32 %v1768_v20, %v1774_v57  ;;  %v1328_v33 = vpop.f32.mrf.mxu3  ;;  %5955 = vmatmul.msk.bf16.gmra.mxu2 %vm776_vm0, %v8296_v59 }
 0x1e5   :  { %v1329_v49 = vadd.f32 %v1328_v33, %v1290_v37  ;;  %v1292_v23 = vpop.f32.mrf.mxu1  ;;  %v1827_v33 = vmax.f32 %v8624_v42, 0.0 }
 0x1e6   :  { %v1293_v60 = vadd.f32 %v1292_v23, %v9109_v4 }
 0x1e7   :  { %v1821_v11 = vmax.f32 %v1329_v49, 0.0  ;;  %v1399_v12 = vpop.f32.mrf.mxu2 }
 0x1e8   :  { %v1400_v47 = vadd.f32 %v1399_v12, %v1361_v53  ;;  %1583 = vmatmul.bf16.vlgmr.msrb.gmra.mxu1 %v8194_v19  ;;  %v1362_v46 = vpop.f32.mrf.mxu0 }
 0x1e9   :  { %v9259_v2 = vmax.f32 %v1815_v61, %v1821_v11  ;;  %5957 = vmatmul.msk.bf16.vlgmr.msrb.gmra.mxu3 %vm776_vm0, %v8047_v15  ;;  %v1363_v53 = vadd.f32 %v1362_v46, %v9178_v39 }
 0x1ea   :  { %v1786_v30 = vmax.f32 %v1400_v47, 0.0  ;;  %v1792_v47 = vmax.f32 %v8582_v56, 0.0 }
 0x1ec   :  { %v9267_v22 = vmax.f32 %v1780_v26, %v1786_v30  ;;  %v1331_v37 = vpop.f32.mrf.mxu3 }
 0x1ed   :  { %v1332_v20 = vadd.f32 %v1331_v37, %v1293_v60  ;;  %v1294_v57 = vpop.f32.mrf.mxu1 }
 0x1ee   :  { %v1295_v31 = vadd.f32 %v1294_v57, %v9109_v4 }
 0x1ef   :  { %v1833_v49 = vmax.f32 %v1332_v20, 0.0  ;;  %v1401_v23 = vpop.f32.mrf.mxu2  ;;  %v1839_v20 = vmax.f32 %v8655_v52, 0.0 }
 0x1f0   :  { %v1402_v61 = vadd.f32 %v1401_v23, %v1363_v53  ;;  %v1365_v11 = vpop.f32.mrf.mxu0  ;;  %v1804_v23 = vmax.f32 %v8611_v21, 0.0 }
 0x1f1   :  { %v9271_v12 = vmax.f32 %v1827_v33, %v1833_v49  ;;  %v1366_v42 = vadd.f32 %v1365_v11, %v9178_v39 }
 0x1f2   :  { %v1798_v10 = vmax.f32 %v1402_v61, 0.0 }
 0x1f3   :  { %1530 = vmatmul.bf16.gmra.mxu0 %v8385_v32 }
 0x1f4   :  { %v9278_v60 = vmax.f32 %v1792_v47, %v1798_v10  ;;  %v1333_v46 = vpop.f32.mrf.mxu3  ;;  %5956 = vmatmul.msk.bf16.gmra.mxu2 %vm776_vm0, %v8330_v8 }
 0x1f5   :  { %v1334_v30 = vadd.f32 %v1333_v46, %v1295_v31  ;;  %v1297_v37 = vpop.f32.mrf.mxu1 }
 0x1f6   :  { %v1298_v10 = vadd.f32 %v1297_v37, %v9109_v4 }
 0x1f7   :  { %v1845_v57 = vmax.f32 %v1334_v30, 0.0  ;;  %v1404_v56 = vpop.f32.mrf.mxu2 }
 0x1f8   :  { %v1405_v53 = vadd.f32 %v1404_v56, %v1366_v42  ;;  %1588 = vmatmul.bf16.gmra.mxu1 %v8234_v35  ;;  %v1367_v33 = vpop.f32.mrf.mxu0 }
 0x1f9   :  { %v9285_v49 = vmax.f32 %v1839_v20, %v1845_v57  ;;  %5958 = vmatmul.msk.bf16.gmra.mxu3 %vm776_vm0, %v8128_v51  ;;  %v1368_v30 = vadd.f32 %v1367_v33, %v9178_v39  ;;  %v1851_v20 = vmax.f32 %v8678_v45, 0.0 }
 0x1fa   :  { %v1810_v61 = vmax.f32 %v1405_v53, 0.0 }
 0x1fb   :  { %v1965_v11 = vmax.f32 %v9195_v34, %v9285_v49 }
 0x1fc   :  { %v1912_v52 = vmax.f32 %v1804_v23, %v1810_v61  ;;  %v1336_v31 = vpop.f32.mrf.mxu3 }
 0x1fd   :  { %v1337_v47 = vadd.f32 %v1336_v31, %v1298_v10  ;;  %v1299_v42 = vpop.f32.mrf.mxu1  ;;  %v1816_v10 = vmax.f32 %v8622_v36, 0.0  ;;  %v1863_v36 = vmax.f32 %v8707_v18, 0.0  ;;  %v6187_v18 = vld [vmem:[%s12804_s3 + $0x3f0] sm:$0xf] }
 0x1fe   :  { %v1948_v46 = vmax.f32 %v9207_v0, %v1912_v52  ;;  %v1300_v23 = vadd.f32 %v1299_v42, %v9109_v4 }
 0x1ff   :  { %v1857_v37 = vmax.f32 %v1337_v47, 0.0  ;;  %v1406_v57 = vpop.f32.mrf.mxu2  ;;  %v7756_v47 = vld [vmem:[%s12804_s3 + $0x374] sm:$0xf0] }
 0x200   :  { %v1983_v21 = vpack.c.bf16 %v1948_v46, %v1947_v24  ;;  %v1407_v56 = vadd.f32 %v1406_v57, %v1368_v30  ;;  %v1370_v53 = vpop.f32.mrf.mxu0 }
 0x201   :  { %v9299_v26 = vmax.f32 %v1851_v20, %v1857_v37  ;;  %v1371_v33 = vadd.f32 %v1370_v53, %v9178_v39  ;;  %v7772_v20 = vld [vmem:[%s12804_s3 + $0x3f4] sm:$0xf0]  ;;  %v1828_v37 = vmax.f32 %v8653_v50, 0.0  ;;  %v6115_v50 = vld [vmem:[%s12804_s3 + $0x360] sm:$0xf] }
 0x202   :  { %v1822_v61 = vmax.f32 %v1407_v56, 0.0  ;;  %v2019_v57 = vunpack.c.l.b16 %v1983_v21 }
 0x203   :  { %v1971_v0 = vmax.f32 %v9211_v48, %v9299_v26  ;;  %1661 = vmatmul.bf16.vlgmr.msrb.gmra.mxu0 %v8194_v19  ;;  %v6123_v19 = vld [vmem:[%s12804_s3 + $0x370] sm:$0xf]  ;;  %v6067_v48 = vld [vmem:[%s12804_s3 + $0x300] sm:$0xf]  ;;  %v7742_v26 = vld [vmem:[%s12804_s3 + $0x304] sm:$0xf0] }
 0x204   :  { %v1918_v45 = vmax.f32 %v1816_v10, %v1822_v61  ;;  %v1338_v52 = vpop.f32.mrf.mxu3  ;;  %5963 = vmatmul.msk.bf16.vlgmr.msrb.gmra.mxu2 %vm776_vm0, %v8047_v15  ;;  %v12854_v15 = vmax.f32 %v9150_v6, %v9259_v2  ;;  %v6124_v30 = vor.u32 %v7756_v47, %v6123_v19  ;;  %v6188_v6 = vor.u32 %v7772_v20, %v6187_v18 }
 0x205   :  { %v1339_v63 = vadd.f32 %v1338_v52, %v1300_v23  ;;  %v9309_v44 = vpop.f32.mrf.mxu1  ;;  %v2020_v2 = vunpack.c.h.b16 %v1983_v21  ;;  %v6179_v21 = vld [vmem:[%s12804_s3 + $0x3e0] sm:$0xf]  ;;  %v12855_v18 = vmax.f32 %v9180_v40, %v9271_v12  ;;  %v7750_v12 = vld [vmem:[%s12804_s3 + $0x344] sm:$0xf0] }
 0x206   :  { %v1954_v4 = vmax.f32 %v9216_v28, %v1918_v45  ;;  %2889 = vmatpush.bf16.msra.mxu1 %v6124_v30  ;;  %2913 = vmatpush.bf16.msra.mxu3 %v6188_v6  ;;  %v7754_v45 = vld [vmem:[%s12804_s3 + $0x364] sm:$0xf0]  ;;  %v7752_v30 = vld [vmem:[%s12804_s3 + $0x354] sm:$0xf0]  ;;  %v6099_v40 = vld [vmem:[%s12804_s3 + $0x340] sm:$0xf] }
 0x207   :  { %v1869_v24 = vmax.f32 %v1339_v63, 0.0  ;;  %v1409_v31 = vpop.f32.mrf.mxu2  ;;  %v6116_v63 = vor.u32 %v7754_v45, %v6115_v50  ;;  %v7768_v6 = vld [vmem:[%s12804_s3 + $0x3d4] sm:$0xf0] }
 0x208   :  { %v1986_v42 = vpack.c.bf16 %v1954_v4, %v12854_v15  ;;  %v1410_v46 = vadd.f32 %v1409_v31, %v1371_v33  ;;  %1593 = vmatmul.bf16.gmra.mxu1 %v8280_v54  ;;  %v1372_v28 = vpop.f32.mrf.mxu0  ;;  %v7770_v4 = vld [vmem:[%s12804_s3 + $0x3e4] sm:$0xf0] }
 0x209   :  { %v9330_v56 = vmax.f32 %v1863_v36, %v1869_v24  ;;  %5959 = vmatmul.msk.bf16.gmra.mxu3 %vm776_vm0, %v8210_v25  ;;  %v6180_v19 = vor.u32 %v7770_v4, %v6179_v21  ;;  %v1373_v15 = vadd.f32 %v1372_v28, %v9178_v39  ;;  %v6171_v28 = vld [vmem:[%s12804_s3 + $0x3d0] sm:$0xf]  ;;  %v7766_v21 = vld [vmem:[%s12804_s3 + $0x3c4] sm:$0xf0] }
 0x20a   :  { %v2025_v53 = vunpack.c.l.b16 %v1986_v42  ;;  %v2026_v23 = vunpack.c.h.b16 %v1986_v42  ;;  %v1834_v10 = vmax.f32 %v1410_v46, 0.0  ;;  %2890 = vmatpush.bf16.msra.mxu1 %v6116_v63  ;;  %v6107_v46 = vld [vmem:[%s12804_s3 + $0x350] sm:$0xf] }
 0x20b   :  { %v1977_v61 = vmax.f32 %v9229_v13, %v9330_v56  ;;  %2914 = vmatpush.bf16.msra.mxu3 %v6180_v19  ;;  %v7788_v13 = vld [vmem:[%s12804_s3 + $0x474] sm:$0xf0] }
 0x20c   :  { %v1924_v33 = vmax.f32 %v1828_v37, %v1834_v10  ;;  %v9345_v52 = vpop.f32.mrf.mxu3  ;;  %v9350_v36 = vpack.c.b16 %v2025_v53, %v2019_v57  ;;  %v9352_v24 = vpack.c.b16 %v2026_v23, %v2020_v2  ;;  %v6172_v2 = vor.u32 %v7768_v6, %v6171_v28  ;;  %v6163_v10 = vld [vmem:[%s12804_s3 + $0x3c0] sm:$0xf] }
 0x20d   :  { %v9354_v31 = vpop.f32.mrf.mxu1  ;;  %v1840_v53 = vmax.f32 %v8675_v16, 0.0  ;;  %v6164_v63 = vor.u32 %v7766_v21, %v6163_v10  ;;  %v6083_v6 = vld [vmem:[%s12804_s3 + $0x320] sm:$0xf] }
 0x20e   :  { %v1960_v47 = vmax.f32 %v9235_v27, %v1924_v33  ;;  %v6108_v27 = vor.u32 %v7752_v30, %v6107_v46  ;;  %v6155_v30 = vld [vmem:[%s12804_s3 + $0x3b0] sm:$0xf] }
 0x20f   :  { %v1411_v42 = vpop.f32.mrf.mxu2  ;;  %2915 = vmatpush.bf16.msra.mxu3 %v6172_v2  ;;  %v7746_v2 = vld [vmem:[%s12804_s3 + $0x324] sm:$0xf0] }
 0x210   :  { %v1989_v20 = vpack.c.bf16 %v1960_v47, %v12855_v18  ;;  %v1412_v37 = vadd.f32 %v1411_v42, %v1373_v15  ;;  %v1375_v57 = vpop.f32.mrf.mxu0  ;;  %2891 = vmatpush.bf16.msra.mxu1 %v6108_v27  ;;  %v6091_v47 = vld [vmem:[%s12804_s3 + $0x330] sm:$0xf]  ;;  %v7764_v18 = vld [vmem:[%s12804_s3 + $0x3b4] sm:$0xf0] }
 0x211   :  { %v1376_v16 = vadd.f32 %v1375_v57, %v9178_v39  ;;  %v6156_v34 = vor.u32 %v7764_v18, %v6155_v30 }
 0x212   :  { %v1846_v23 = vmax.f32 %v1412_v37, 0.0  ;;  %v1852_v37 = vmax.f32 %v8698_v3, 0.0  ;;  %v2031_v57 = vunpack.c.l.b16 %v1989_v20  ;;  %v2032_v49 = vunpack.c.h.b16 %v1989_v20  ;;  %v6147_v3 = vld [vmem:[%s12804_s3 + $0x3a0] sm:$0xf] }
 0x213   :  { %1666 = vmatmul.bf16.gmra.mxu0 %v8234_v35  ;;  %v6100_v35 = vor.u32 %v7750_v12, %v6099_v40  ;;  %2916 = vmatpush.bf16.msra.mxu3 %v6164_v63  ;;  %v6084_v20 = vor.u32 %v7746_v2, %v6083_v6  ;;  %v7762_v40 = vld [vmem:[%s12804_s3 + $0x3a4] sm:$0xf0] }
 0x214   :  { %v1930_v50 = vmax.f32 %v1840_v53, %v1846_v23  ;;  %v9385_v45 = vpop.f32.mrf.mxu3  ;;  %5964 = vmatmul.msk.bf16.gmra.mxu2 %vm776_vm0, %v8128_v51  ;;  %v7748_v51 = vld [vmem:[%s12804_s3 + $0x334] sm:$0xf0] }
 0x215   :  { %v9392_v33 = vpop.f32.mrf.mxu1  ;;  %2892 = vmatpush.bf16.msra.mxu1 %v6100_v35 }
 0x216   :  { %v1966_v4 = vmax.f32 %v9252_v9, %v1930_v50  ;;  %v6092_v9 = vor.u32 %v7748_v51, %v6091_v47 }
 0x217   :  { %v1414_v19 = vpop.f32.mrf.mxu2  ;;  %2917 = vmatpush.bf16.msra.mxu3 %v6156_v34  ;;  %v7758_v34 = vld [vmem:[%s12804_s3 + $0x384] sm:$0xf0] }
 0x218   :  { %v1992_v15 = vpack.c.bf16 %v1966_v4, %v1965_v11  ;;  %v1415_v42 = vadd.f32 %v1414_v19, %v1376_v16  ;;  %1598 = vmatmul.bf16.gmra.mxu1 %v8320_v5  ;;  %v1377_v46 = vpop.f32.mrf.mxu0  ;;  %v6148_v16 = vor.u32 %v7762_v40, %v6147_v3  ;;  %v6075_v4 = vld [vmem:[%s12804_s3 + $0x310] sm:$0xf]  ;;  %v7744_v19 = vld [vmem:[%s12804_s3 + $0x314] sm:$0xf0] }
 0x219   :  { %5960 = vmatmul.msk.bf16.gmra.mxu3 %vm776_vm0, %v8244_v38  ;;  %2893 = vmatpush.bf16.msra.mxu1 %v6092_v9  ;;  %v1378_v21 = vadd.f32 %v1377_v46, %v9178_v39  ;;  %v6139_v39 = vld [vmem:[%s12804_s3 + $0x390] sm:$0xf]  ;;  %v1864_v9 = vmax.f32 %v8729_v1, 0.0  ;;  %v7804_v1 = vld [vmem:[%s12804_s3 + $0x4f4] sm:$0xf0] }
 0x21a   :  { %v1858_v11 = vmax.f32 %v1415_v42, 0.0  ;;  %v2037_v27 = vunpack.c.l.b16 %v1992_v15  ;;  %v2038_v28 = vunpack.c.h.b16 %v1992_v15  ;;  %v7760_v42 = vld [vmem:[%s12804_s3 + $0x394] sm:$0xf0]  ;;  %v6251_v40 = vld [vmem:[%s12804_s3 + $0x470] sm:$0xf] }
 0x21b   :  { %2918 = vmatpush.bf16.msra.mxu3 %v6148_v16  ;;  %v6140_v46 = vor.u32 %v7760_v42, %v6139_v39  ;;  %v6243_v39 = vld [vmem:[%s12804_s3 + $0x460] sm:$0xf] }
 0x21c   :  { %v1936_v53 = vmax.f32 %v1852_v37, %v1858_v11  ;;  %v9423_v23 = vpop.f32.mrf.mxu3  ;;  %v9428_v12 = vpack.c.b16 %v2037_v27, %v2031_v57  ;;  %v9430_v10 = vpack.c.b16 %v2038_v28, %v2032_v49  ;;  %v6068_v57 = vor.u32 %v7742_v26, %v6067_v48 }
 0x21d   :  { %v9432_v50 = vpop.f32.mrf.mxu1  ;;  %2894 = vmatpush.bf16.msra.mxu1 %v6084_v20 }
 0x21e   :  { %v1972_v35 = vmax.f32 %v9267_v22, %v1936_v53  ;;  %v6076_v22 = vor.u32 %v7744_v19, %v6075_v4 }
 0x21f   :  { %v1416_v63 = vpop.f32.mrf.mxu2  ;;  %2919 = vmatpush.bf16.msra.mxu3 %v6140_v46  ;;  %v7786_v46 = vld [vmem:[%s12804_s3 + $0x464] sm:$0xf0] }
 0x220   :  { %v1995_v47 = vpack.c.bf16 %v1972_v35, %v1971_v0  ;;  %v1417_v51 = vadd.f32 %v1416_v63, %v1378_v21  ;;  %v9445_v15 = vpop.f32.mrf.mxu0  ;;  %v6131_v0 = vld [vmem:[%s12804_s3 + $0x380] sm:$0xf]  ;;  %v9505_v21 = vld [vmem:[%s12803_s2 + $0x8] sm:$0xf] }
 0x221   :  { %2895 = vmatpush.bf16.msra.mxu1 %v6076_v22  ;;  %v6132_v27 = vor.u32 %v7758_v34, %v6131_v0  ;;  %v9512_v19 = vperm.slane %v9505_v21, 0  ;;  %v7802_v22 = vld [vmem:[%s12804_s3 + $0x4e4] sm:$0xf0]  ;;  %v6235_v0 = vld [vmem:[%s12804_s3 + $0x450] sm:$0xf] }
 0x222   :  { %v1870_v30 = vmax.f32 %v1417_v51, 0.0  ;;  %v2043_v3 = vunpack.c.l.b16 %v1995_v47  ;;  %v2044_v53 = vunpack.c.h.b16 %v1995_v47  ;;  %v6307_v51 = vld [vmem:[%s12804_s3 + $0x4e0] sm:$0xf] }
 0x223   :  { %1671 = vmatmul.bf16.gmra.mxu0 %v8280_v54  ;;  %v6315_v54 = vld [vmem:[%s12804_s3 + $0x4f0] sm:$0xf]  ;;  %2920 = vmatpush.bf16.msra.mxu3 %v6132_v27  ;;  %v6308_v42 = vor.u32 %v7802_v22, %v6307_v51  ;;  %v6227_v27 = vld [vmem:[%s12804_s3 + $0x440] sm:$0xf]  ;;  %v7780_v22 = vld [vmem:[%s12804_s3 + $0x434] sm:$0xf0] }
 0x224   :  { %v1942_v18 = vmax.f32 %v1864_v9, %v1870_v30  ;;  %v9464_v37 = vpop.f32.mrf.mxu3  ;;  %5965 = vmatmul.msk.bf16.gmra.mxu2 %vm776_vm0, %v8210_v25  ;;  %v6316_v11 = vor.u32 %v7804_v1, %v6315_v54  ;;  %v6244_v9 = vor.u32 %v7786_v46, %v6243_v39  ;;  %v1429_v30 = vadd.f32 %v9309_v44, %v9512_v19  ;;  %v6299_v44 = vld [vmem:[%s12804_s3 + $0x4d0] sm:$0xf] }
 0x225   :  { %v9477_v49 = vpop.f32.mrf.mxu1  ;;  %2896 = vmatpush.bf16.msra.mxu1 %v6068_v57  ;;  %v6219_v51 = vld [vmem:[%s12804_s3 + $0x430] sm:$0xf]  ;;  %v1733_v46 = vmax.f32 %v8657_v7, 0.0  ;;  %v6211_v7 = vld [vmem:[%s12804_s3 + $0x420] sm:$0xf] }
 0x226   :  { %v1978_v28 = vmax.f32 %v9278_v60, %v1942_v18  ;;  %2961 = vmatpush.bf16.msra.mxu2 %v6316_v11  ;;  %v1468_v57 = vadd.f32 %v9345_v52, %v1429_v30  ;;  %v6291_v52 = vld [vmem:[%s12804_s3 + $0x4c0] sm:$0xf]  ;;  %v6283_v39 = vld [vmem:[%s12804_s3 + $0x4b0] sm:$0xf] }
 0x227   :  { %v9480_v25 = vpop.f32.mrf.mxu2 }
 0x228   :  { %v1998_v6 = vpack.c.bf16 %v1978_v28, %v1977_v61  ;;  %1603 = vmatmul.bf16.gmra.mxu1 %v8348_v14  ;;  %v9486_v2 = vpop.f32.mrf.mxu0  ;;  %v6252_v61 = vor.u32 %v7788_v13, %v6251_v40  ;;  %v7782_v28 = vld [vmem:[%s12804_s3 + $0x444] sm:$0xf0] }
 0x229   :  { %5961 = vmatmul.msk.bf16.gmra.mxu3 %vm776_vm0, %v8296_v59 }
 0x22a   :  { %v2049_v20 = vunpack.c.l.b16 %v1998_v6  ;;  %v2050_v60 = vunpack.c.h.b16 %v1998_v6  ;;  %2937 = vmatpush.bf16.msra.mxu0 %v6252_v61  ;;  %2962 = vmatpush.bf16.msra.mxu2 %v6308_v42  ;;  %v6228_v6 = vor.u32 %v7782_v28, %v6227_v27  ;;  %v6220_v42 = vor.u32 %v7780_v22, %v6219_v51 }
 0x22c   :  { %v9496_v56 = vpop.f32.mrf.mxu3  ;;  %v9498_v16 = vpack.c.b16 %v2049_v20, %v2043_v3  ;;  %v9500_v35 = vpack.c.b16 %v2050_v60, %v2044_v53  ;;  %v7798_v3 = vld [vmem:[%s12804_s3 + $0x4c4] sm:$0xf0]  ;;  %v1739_v20 = vmax.f32 %v1468_v57, 0.0  ;;  %v1431_v60 = vadd.f32 %v9354_v31, %v9512_v19  ;;  %v7796_v31 = vld [vmem:[%s12804_s3 + $0x4b4] sm:$0xf0] }
 0x22d   :  { %v9507_v63 = vpop.f32.mrf.mxu1  ;;  %v6292_v53 = vor.u32 %v7798_v3, %v6291_v52  ;;  %v1434_v3 = vadd.f32 %v9392_v33, %v9512_v19  ;;  %v7792_v33 = vld [vmem:[%s12804_s3 + $0x494] sm:$0xf0] }
 0x22e   :  { %2938 = vmatpush.bf16.msra.mxu0 %v6244_v9  ;;  %v1805_v9 = vmax.f32 %v8779_v29, 0.0  ;;  %v7778_v29 = vld [vmem:[%s12804_s3 + $0x424] sm:$0xf0] }
 0x22f   :  { %v9509_v4 = vpop.f32.mrf.mxu2  ;;  %v6212_v57 = vor.u32 %v7778_v29, %v6211_v7 }
 0x230   :  { %v9514_v47 = vpop.f32.mrf.mxu0 }
 0x233   :  { %1676 = vmatmul.bf16.gmra.mxu0 %v8320_v5  ;;  %v7784_v5 = vld [vmem:[%s12804_s3 + $0x454] sm:$0xf0] }
 0x234   :  { %v9531_v48 = vpop.f32.mrf.mxu3  ;;  %5966 = vmatmul.msk.bf16.gmra.mxu2 %vm776_vm0, %v8244_v38  ;;  %v6236_v18 = vor.u32 %v7784_v5, %v6235_v0  ;;  %v7800_v38 = vld [vmem:[%s12804_s3 + $0x4d4] sm:$0xf0]  ;;  %v6284_v0 = vor.u32 %v7796_v31, %v6283_v39  ;;  %v1470_v5 = vadd.f32 %v9385_v45, %v1431_v60  ;;  %v6275_v45 = vld [vmem:[%s12804_s3 + $0x4a0] sm:$0xf]  ;;  %v6203_v60 = vld [vmem:[%s12804_s3 + $0x410] sm:$0xf] }
 0x235   :  { %v1443_v26 = vpop.f32.mrf.mxu1  ;;  %v6300_v1 = vor.u32 %v7800_v38, %v6299_v44 }
 0x236   :  { %v1444_v11 = vadd.f32 %v1443_v26, %v9512_v19  ;;  %2939 = vmatpush.bf16.msra.mxu0 %v6236_v18  ;;  %v9589_v18 = vmax.f32 %v1733_v46, %v1739_v20  ;;  %v1751_v52 = vmax.f32 %v1470_v5, 0.0  ;;  %v7790_v5 = vld [vmem:[%s12804_s3 + $0x484] sm:$0xf0] }
 0x237   :  { %v9547_v54 = vpop.f32.mrf.mxu2  ;;  %2963 = vmatpush.bf16.msra.mxu2 %v6300_v1 }
 0x238   :  { %1608 = vmatmul.bf16.gmra.mxu1 %v8385_v32  ;;  %v9551_v34 = vpop.f32.mrf.mxu0 }
 0x239   :  { %5962 = vmatmul.msk.bf16.gmra.mxu3 %vm776_vm0, %v8330_v8 }
 0x23a   :  { %2940 = vmatpush.bf16.msra.mxu0 %v6228_v6 }
 0x23b   :  { %2964 = vmatpush.bf16.msra.mxu2 %v6292_v53 }
 0x23c   :  { %v1482_v40 = vpop.f32.mrf.mxu3 }
 0x23d   :  { %v1483_v13 = vadd.f32 %v1482_v40, %v1444_v11  ;;  %v1445_v61 = vpop.f32.mrf.mxu1  ;;  %v7794_v11 = vld [vmem:[%s12804_s3 + $0x4a4] sm:$0xf0]  ;;  %v6267_v40 = vld [vmem:[%s12804_s3 + $0x490] sm:$0xf] }
 0x23e   :  { %v1446_v1 = vadd.f32 %v1445_v61, %v9512_v19  ;;  %2941 = vmatpush.bf16.msra.mxu0 %v6220_v42  ;;  %v6276_v28 = vor.u32 %v7794_v11, %v6275_v45  ;;  %v1817_v61 = vmax.f32 %v8795_v17, 0.0  ;;  %v6268_v39 = vor.u32 %v7792_v33, %v6267_v40  ;;  %v6195_v17 = vld [vmem:[%s12804_s3 + $0x400] sm:$0xf] }
 0x23f   :  { %v1811_v30 = vmax.f32 %v1483_v13, 0.0  ;;  %v9584_v26 = vpop.f32.mrf.mxu2  ;;  %2965 = vmatpush.bf16.msra.mxu2 %v6284_v0  ;;  %v1436_v11 = vadd.f32 %v9432_v50, %v9512_v19 }
 0x240   :  { %v9587_v44 = vpop.f32.mrf.mxu0 }
 0x241   :  { %v9591_v38 = vmax.f32 %v1805_v9, %v1811_v30  ;;  %v7774_v30 = vld [vmem:[%s12804_s3 + $0x404] sm:$0xf0] }
 0x242   :  { %2942 = vmatpush.bf16.msra.mxu0 %v6212_v57  ;;  %v6196_v0 = vor.u32 %v7774_v30, %v6195_v17 }
 0x243   :  { %v1949_v27 = vmax.f32 %v9589_v18, %v9591_v38  ;;  %1681 = vmatmul.bf16.gmra.mxu0 %v8348_v14  ;;  %v7776_v14 = vld [vmem:[%s12804_s3 + $0x414] sm:$0xf0]  ;;  %2966 = vmatpush.bf16.msra.mxu2 %v6276_v28  ;;  %v7769_v18 = vld [vmem:[%s12804_s3 + $0x3e4] sm:$0xf] }
 0x244   :  { %v1484_v6 = vpop.f32.mrf.mxu3  ;;  %5967 = vmatmul.msk.bf16.gmra.mxu2 %vm776_vm0, %v8296_v59  ;;  %v1745_v59 = vmax.f32 %v8683_v41, 0.0  ;;  %v6204_v13 = vor.u32 %v7776_v14, %v6203_v60  ;;  %v1473_v41 = vadd.f32 %v9423_v23, %v1434_v3  ;;  %v6259_v23 = vld [vmem:[%s12804_s3 + $0x480] sm:$0xf]  ;;  %v1829_v3 = vmax.f32 %v8827_v58, 0.0  ;;  %v12860_v38 = vld [vmem:[#allocation7_spill] sm:$0xff] }
 0x245   :  { %v1485_v53 = vadd.f32 %v1484_v6, %v1446_v1  ;;  %v1448_v20 = vpop.f32.mrf.mxu1  ;;  %v9652_v1 = vperm.slane %v9505_v21, 1  ;;  %v6260_v29 = vor.u32 %v7790_v5, %v6259_v23  ;;  %v1757_v6 = vmax.f32 %v8715_v43, 0.0  ;;  %v12856_v23 = vld [vmem:[#allocation5_spill] sm:$0xff] }
 0x246   :  { %v9629_v42 = vmax.f32 %v1745_v59, %v1751_v52  ;;  %v1449_v9 = vadd.f32 %v1448_v20, %v9512_v19  ;;  %2943 = vmatpush.bf16.msra.mxu0 %v6204_v13  ;;  %v1763_v57 = vmax.f32 %v1473_v41, 0.0  ;;  %v1475_v59 = vadd.f32 %v9464_v37, %v1436_v11 }
 0x247   :  { %v1823_v51 = vmax.f32 %v1485_v53, 0.0  ;;  %v9627_v22 = vpop.f32.mrf.mxu2  ;;  %2967 = vmatpush.bf16.msra.mxu2 %v6268_v39  ;;  %v1507_v53 = vadd.f32 %v9445_v15, %v9652_v1  ;;  %v1439_v58 = vadd.f32 %v9477_v49, %v9512_v19  ;;  %v1769_v41 = vmax.f32 %v8741_v62, 0.0  ;;  %v12857_v62 = vld [vmem:[#allocation13_spill] sm:$0xff] }
 0x248   :  { %2897 = vmatmul.bf16.vlgmr.msra.gmra.mxu1 %v9350_v36  ;;  %v9632_v31 = vpop.f32.mrf.mxu0  ;;  %v9664_v40 = vmax.f32 %v1757_v6, %v1763_v57  ;;  %v1775_v37 = vmax.f32 %v1475_v59, 0.0  ;;  %v1734_v5 = vmax.f32 %v12856_v23, 0.0  ;;  %v1509_v57 = vadd.f32 %v9486_v2, %v9652_v1  ;;  %v6125_v2 = vld [vmem:[%s12804_s3 + $0x378] sm:$0xf0] }
 0x249   :  { %v9635_v46 = vmax.f32 %v1817_v61, %v1823_v51  ;;  %2921 = vmatmul.bf16.vlgmr.msra.gmra.mxu3 %v9352_v24  ;;  %v1546_v33 = vadd.f32 %v9480_v25, %v1507_v53  ;;  %v1841_v25 = vmax.f32 %v8837_v55, 0.0  ;;  %v1806_v55 = vmax.f32 %v12857_v62, 0.0  ;;  %v7753_v62 = vld [vmem:[%s12804_s3 + $0x364] sm:$0xf] }
 0x24a   :  { %2944 = vmatpush.bf16.msra.mxu0 %v6196_v0  ;;  %v1441_v6 = vadd.f32 %v9507_v63, %v9512_v19 }
 0x24b   :  { %v1955_v7 = vmax.f32 %v9629_v42, %v9635_v46  ;;  %2968 = vmatpush.bf16.msra.mxu2 %v6260_v29  ;;  %v9684_v29 = vmax.f32 %v1769_v41, %v1775_v37  ;;  %v6189_v37 = vld [vmem:[%s12804_s3 + $0x3f8] sm:$0xf0]  ;;  %v1512_v41 = vadd.f32 %v9514_v47, %v9652_v1  ;;  %v7749_v42 = vld [vmem:[%s12804_s3 + $0x344] sm:$0xf]  ;;  %v6101_v46 = vld [vmem:[%s12804_s3 + $0x348] sm:$0xf0] }
 0x24c   :  { %v1487_v45 = vpop.f32.mrf.mxu3 }
 0x24d   :  { %v1488_v28 = vadd.f32 %v1487_v45, %v1449_v9  ;;  %v1450_v52 = vpop.f32.mrf.mxu1  ;;  %v1740_v9 = vmax.f32 %v1546_v33, 0.0  ;;  %v7771_v33 = vld [vmem:[%s12804_s3 + $0x3f4] sm:$0xf] }
 0x24e   :  { %v1451_v13 = vadd.f32 %v1450_v52, %v9512_v19 }
 0x24f   :  { %v1835_v20 = vmax.f32 %v1488_v28, 0.0  ;;  %v9662_v60 = vpop.f32.mrf.mxu2  ;;  %v1878_v11 = vmax.f32 %v1734_v5, %v1740_v9 }
 0x250   :  { %v1521_v14 = vpop.f32.mrf.mxu0 }
 0x251   :  { %v9667_v50 = vmax.f32 %v1829_v3, %v1835_v20  ;;  %v1522_v15 = vadd.f32 %v1521_v14, %v9652_v1  ;;  %v1548_v3 = vadd.f32 %v9509_v4, %v1509_v57 }
 0x253   :  { %v1961_v43 = vmax.f32 %v9664_v40, %v9667_v50  ;;  %1686 = vmatmul.bf16.gmra.mxu0 %v8385_v32  ;;  %v1478_v32 = vadd.f32 %v9496_v56, %v1439_v58  ;;  %v12858_v58 = vld [vmem:[#allocation6_spill] sm:$0xff]  ;;  %v12867_v40 = vld [vmem:[#allocation19_spill] sm:$0xff] }
 0x254   :  { %v1489_v61 = vpop.f32.mrf.mxu3  ;;  %5968 = vmatmul.msk.bf16.gmra.mxu2 %vm776_vm0, %v8330_v8  ;;  %v1781_v63 = vmax.f32 %v12858_v58, 0.0  ;;  %v7751_v58 = vld [vmem:[%s12804_s3 + $0x354] sm:$0xf]  ;;  %v1842_v50 = vmax.f32 %v12867_v40, 0.0 }
 0x255   :  { %v1490_v51 = vadd.f32 %v1489_v61, %v1451_v13  ;;  %v1453_v39 = vpop.f32.mrf.mxu1  ;;  %v1787_v52 = vmax.f32 %v1478_v32, 0.0  ;;  %v7755_v13 = vld [vmem:[%s12804_s3 + $0x374] sm:$0xf]  ;;  %v1480_v32 = vadd.f32 %v9531_v48, %v1441_v6  ;;  %v6117_v48 = vld [vmem:[%s12804_s3 + $0x368] sm:$0xf0] }
 0x256   :  { %v1454_v45 = vadd.f32 %v1453_v39, %v9512_v19  ;;  %v6128_v61 = vor.u32 %v7755_v13, %v6125_v2 }
 0x257   :  { %v1847_v17 = vmax.f32 %v1490_v51, 0.0  ;;  %v1560_v30 = vpop.f32.mrf.mxu2  ;;  %v12859_v51 = vld [vmem:[#allocation14_spill] sm:$0xff]  ;;  %v9721_v5 = vmax.f32 %v1781_v63, %v1787_v52  ;;  %v1551_v52 = vadd.f32 %v9547_v54, %v1512_v41  ;;  %v6109_v54 = vld [vmem:[%s12804_s3 + $0x358] sm:$0xf0] }
 0x258   :  { %v1561_v0 = vadd.f32 %v1560_v30, %v1522_v15  ;;  %2902 = vmatmul.bf16.gmra.mxu1 %v9428_v12  ;;  %v1523_v49 = vpop.f32.mrf.mxu0  ;;  %v1853_v39 = vmax.f32 %v12859_v51, 0.0  ;;  %v1752_v30 = vmax.f32 %v1548_v3, 0.0  ;;  %3033 = vmatpush.bf16.msrb.mxu0 %v6128_v61  ;;  %v12862_v63 = vld [vmem:[#allocation8_spill] sm:$0xff]  ;;  %v6112_v51 = vor.u32 %v7751_v58, %v6109_v54 }
 0x259   :  { %v9686_v8 = vmax.f32 %v1841_v25, %v1847_v17  ;;  %2926 = vmatmul.bf16.gmra.mxu3 %v9430_v10  ;;  %v1524_v4 = vadd.f32 %v1523_v49, %v9652_v1  ;;  %v6192_v17 = vor.u32 %v7771_v33, %v6189_v37  ;;  %v6173_v41 = vld [vmem:[%s12804_s3 + $0x3d8] sm:$0xf0] }
 0x25a   :  { %v1812_v56 = vmax.f32 %v1561_v0, 0.0 }
 0x25b   :  { %v1967_v28 = vmax.f32 %v9684_v29, %v9686_v8  ;;  %3057 = vmatpush.bf16.msrb.mxu2 %v6192_v17  ;;  %v1764_v17 = vmax.f32 %v1551_v52, 0.0  ;;  %v6165_v52 = vld [vmem:[%s12804_s3 + $0x3c8] sm:$0xf0]  ;;  %v7757_v29 = vld [vmem:[%s12804_s3 + $0x384] sm:$0xf] }
 0x25c   :  { %v1914_v53 = vmax.f32 %v1806_v55, %v1812_v56  ;;  %v1492_v20 = vpop.f32.mrf.mxu3  ;;  %v12861_v55 = vld [vmem:[#allocation15_spill] sm:$0xff] }
 0x25d   :  { %v1493_v14 = vadd.f32 %v1492_v20, %v1454_v45  ;;  %v1455_v59 = vpop.f32.mrf.mxu1  ;;  %v1818_v57 = vmax.f32 %v12861_v55, 0.0  ;;  %v1799_v20 = vmax.f32 %v1480_v32, 0.0 }
 0x25e   :  { %v1950_v15 = vmax.f32 %v1878_v11, %v1914_v53  ;;  %v1456_v47 = vadd.f32 %v1455_v59, %v9512_v19  ;;  %v6120_v11 = vor.u32 %v7753_v62, %v6117_v48  ;;  %v6181_v19 = vld [vmem:[%s12804_s3 + $0x3e8] sm:$0xf0] }
 0x25f   :  { %v1859_v25 = vmax.f32 %v1493_v14, 0.0  ;;  %v1562_v9 = vpop.f32.mrf.mxu2  ;;  %v6184_v3 = vor.u32 %v7769_v18, %v6181_v19  ;;  %v6104_v19 = vor.u32 %v7749_v42, %v6101_v46 }
 0x260   :  { %v9719_v0 = vpack.c.bf16 %v1950_v15, %v1949_v27  ;;  %v1563_v49 = vadd.f32 %v1562_v9, %v1524_v4  ;;  %v1526_v23 = vpop.f32.mrf.mxu0  ;;  %v1746_v27 = vmax.f32 %v12860_v38, 0.0  ;;  %3034 = vmatpush.bf16.msrb.mxu0 %v6120_v11  ;;  %v1793_v15 = vmax.f32 %v12862_v63, 0.0  ;;  %v12863_v4 = vld [vmem:[#allocation9_spill] sm:$0xff]  ;;  %v7747_v63 = vld [vmem:[%s12804_s3 + $0x334] sm:$0xf] }
 0x261   :  { %v9723_v45 = vmax.f32 %v1853_v39, %v1859_v25  ;;  %v1527_v59 = vadd.f32 %v1526_v23, %v9652_v1  ;;  %3058 = vmatpush.bf16.msrb.mxu2 %v6184_v3  ;;  %v1758_v61 = vmax.f32 %v12863_v4, 0.0  ;;  %v7767_v39 = vld [vmem:[%s12804_s3 + $0x3d4] sm:$0xf]  ;;  %v12864_v25 = vld [vmem:[#allocation16_spill] sm:$0xff]  ;;  %v12865_v23 = vld [vmem:[#allocation17_spill] sm:$0xff] }
 0x262   :  { %v1824_v56 = vmax.f32 %v1563_v49, 0.0  ;;  %v1884_v53 = vmax.f32 %v1746_v27, %v1752_v30  ;;  %v1865_v9 = vmax.f32 %v12864_v25, 0.0  ;;  %v6176_v49 = vor.u32 %v7767_v39, %v6173_v41 }
 0x263   :  { %v1973_v6 = vmax.f32 %v9721_v5, %v9723_v45  ;;  %v9762_v62 = vmax.f32 %v1793_v15, %v1799_v20  ;;  %v1514_v27 = vadd.f32 %v9551_v34, %v9652_v1  ;;  %v2021_v55 = vunpack.c.l.b16 %v9719_v0  ;;  %v7765_v34 = vld [vmem:[%s12804_s3 + $0x3c4] sm:$0xf]  ;;  %v6093_v15 = vld [vmem:[%s12804_s3 + $0x338] sm:$0xf0] }
 0x264   :  { %v1920_v14 = vmax.f32 %v1818_v57, %v1824_v56  ;;  %v1494_v13 = vpop.f32.mrf.mxu3  ;;  %3035 = vmatpush.bf16.msrb.mxu0 %v6112_v51  ;;  %v2022_v57 = vunpack.c.h.b16 %v9719_v0  ;;  %v1890_v3 = vmax.f32 %v1758_v61, %v1764_v17  ;;  %v6168_v20 = vor.u32 %v7765_v34, %v6165_v52  ;;  %v6157_v51 = vld [vmem:[%s12804_s3 + $0x3b8] sm:$0xf0] }
 0x265   :  { %v1495_v2 = vadd.f32 %v1494_v13, %v1456_v47  ;;  %v9744_v33 = vpop.f32.mrf.mxu1  ;;  %v1830_v47 = vmax.f32 %v12865_v23, 0.0  ;;  %3059 = vmatpush.bf16.msrb.mxu2 %v6176_v49  ;;  %v1517_v39 = vadd.f32 %v9587_v44, %v9652_v1  ;;  %v7745_v49 = vld [vmem:[%s12804_s3 + $0x324] sm:$0xf]  ;;  %v6085_v23 = vld [vmem:[%s12804_s3 + $0x328] sm:$0xf0] }
 0x266   :  { %v1956_v37 = vmax.f32 %v1884_v53, %v1920_v14  ;;  %v1553_v14 = vadd.f32 %v9584_v26, %v1514_v27  ;;  %v7763_v26 = vld [vmem:[%s12804_s3 + $0x3b4] sm:$0xf]  ;;  %v7761_v44 = vld [vmem:[%s12804_s3 + $0x3a4] sm:$0xf] }
 0x267   :  { %v1871_v30 = vmax.f32 %v1495_v2, 0.0  ;;  %v1565_v32 = vpop.f32.mrf.mxu2  ;;  %v6160_v25 = vor.u32 %v7763_v26, %v6157_v51  ;;  %v1556_v27 = vadd.f32 %v9627_v22, %v1517_v39  ;;  %v7759_v22 = vld [vmem:[%s12804_s3 + $0x394] sm:$0xf]  ;;  %v12869_v26 = vld [vmem:[#allocation21_spill] sm:$0xff]  ;;  %v1519_v39 = vadd.f32 %v9632_v31, %v9652_v1  ;;  %v6133_v31 = vld [vmem:[%s12804_s3 + $0x388] sm:$0xf0] }
 0x268   :  { %v1987_v48 = vpack.c.bf16 %v1956_v37, %v1955_v7  ;;  %v1566_v18 = vadd.f32 %v1565_v32, %v1527_v59  ;;  %2907 = vmatmul.bf16.gmra.mxu1 %v9498_v16  ;;  %v1528_v38 = vpop.f32.mrf.mxu0  ;;  %3036 = vmatpush.bf16.msrb.mxu0 %v6104_v19  ;;  %v6096_v37 = vor.u32 %v7747_v63, %v6093_v15  ;;  %v12868_v63 = vld [vmem:[#allocation11_spill] sm:$0xff] }
 0x269   :  { %v9772_v56 = vmax.f32 %v1865_v9, %v1871_v30  ;;  %2931 = vmatmul.bf16.gmra.mxu3 %v9500_v35  ;;  %3060 = vmatpush.bf16.msrb.mxu2 %v6168_v20  ;;  %v1529_v61 = vadd.f32 %v1528_v38, %v9652_v1  ;;  %v1776_v9 = vmax.f32 %v1553_v14, 0.0  ;;  %v6149_v38 = vld [vmem:[%s12804_s3 + $0x3a8] sm:$0xf0]  ;;  %v1788_v20 = vmax.f32 %v1556_v27, 0.0 }
 0x26a   :  { %v2027_v7 = vunpack.c.l.b16 %v1987_v48  ;;  %v2028_v11 = vunpack.c.h.b16 %v1987_v48  ;;  %v1836_v0 = vmax.f32 %v1566_v18, 0.0  ;;  %v6088_v18 = vor.u32 %v7745_v49, %v6085_v23 }
 0x26b   :  { %v1979_v53 = vmax.f32 %v9762_v62, %v9772_v56  ;;  %v1782_v15 = vmax.f32 %v12868_v63, 0.0  ;;  %v6136_v23 = vor.u32 %v7757_v29, %v6133_v31  ;;  %v7832_v31 = vld [vmem:[%s12804_s3 + $0x5d4] sm:$0xf0] }
 0x26c   :  { %v1926_v59 = vmax.f32 %v1830_v47, %v1836_v0  ;;  %v9790_v13 = vpop.f32.mrf.mxu3  ;;  %v9792_v2 = vpack.c.b16 %v2027_v7, %v2021_v55  ;;  %v9794_v58 = vpack.c.b16 %v2028_v11, %v2022_v57  ;;  %3037 = vmatpush.bf16.msrb.mxu0 %v6096_v37  ;;  %v12866_v47 = vld [vmem:[#allocation10_spill] sm:$0xff]  ;;  %v6152_v55 = vor.u32 %v7761_v44, %v6149_v38  ;;  %v7743_v11 = vld [vmem:[%s12804_s3 + $0x314] sm:$0xf]  ;;  %v6077_v0 = vld [vmem:[%s12804_s3 + $0x318] sm:$0xf0] }
 0x26d   :  { %v9796_v54 = vpop.f32.mrf.mxu1  ;;  %3061 = vmatpush.bf16.msrb.mxu2 %v6160_v25  ;;  %v1770_v48 = vmax.f32 %v12866_v47, 0.0  ;;  %v6080_v52 = vor.u32 %v7743_v11, %v6077_v0  ;;  %v1558_v44 = vadd.f32 %v9662_v60, %v1519_v39  ;;  %v12871_v0 = vld [vmem:[#allocation23_spill] sm:$0xff] }
 0x26e   :  { %v1962_v4 = vmax.f32 %v1890_v3, %v1926_v59  ;;  %2945 = vmatmul.bf16.vlgmr.msra.gmra.mxu0 %v9792_v2  ;;  %2969 = vmatmul.bf16.vlgmr.msra.gmra.mxu2 %v9794_v58  ;;  %v6141_v3 = vld [vmem:[%s12804_s3 + $0x398] sm:$0xf0] }
 0x26f   :  { %v1567_v41 = vpop.f32.mrf.mxu2  ;;  %v1896_v57 = vmax.f32 %v1770_v48, %v1776_v9  ;;  %v6144_v59 = vor.u32 %v7759_v22, %v6141_v3  ;;  %v7741_v9 = vld [vmem:[%s12804_s3 + $0x304] sm:$0xf]  ;;  %v1800_v60 = vmax.f32 %v1558_v44, 0.0  ;;  %v1866_v22 = vmax.f32 %v12871_v0, 0.0 }
 0x270   :  { %v1990_v17 = vpack.c.bf16 %v1962_v4, %v1961_v43  ;;  %v1568_v30 = vadd.f32 %v1567_v41, %v1529_v61  ;;  %v1531_v32 = vpop.f32.mrf.mxu0  ;;  %3038 = vmatpush.bf16.msrb.mxu0 %v6088_v18  ;;  %v1854_v4 = vmax.f32 %v12869_v26, 0.0  ;;  %v7833_v0 = vld [vmem:[%s12804_s3 + $0x5e4] sm:$0xf] }
 0x271   :  { %v1532_v46 = vadd.f32 %v1531_v32, %v9652_v1  ;;  %3062 = vmatpush.bf16.msrb.mxu2 %v6152_v55 }
 0x272   :  { %v1848_v43 = vmax.f32 %v1568_v30, 0.0  ;;  %v2033_v41 = vunpack.c.l.b16 %v1990_v17  ;;  %v2034_v25 = vunpack.c.h.b16 %v1990_v17  ;;  %v6069_v30 = vld [vmem:[%s12804_s3 + $0x308] sm:$0xf0]  ;;  %v1902_v17 = vmax.f32 %v1782_v15, %v1788_v20 }
 0x273   :  { %v6072_v49 = vor.u32 %v7741_v9, %v6069_v30  ;;  %v7834_v9 = vld [vmem:[%s12804_s3 + $0x5e4] sm:$0xf0] }
 0x274   :  { %v1932_v42 = vmax.f32 %v1842_v50, %v1848_v43  ;;  %v9834_v34 = vpop.f32.mrf.mxu3  ;;  %3039 = vmatpush.bf16.msrb.mxu0 %v6080_v52  ;;  %v7836_v52 = vld [vmem:[%s12804_s3 + $0x5f4] sm:$0xf0] }
 0x275   :  { %v9836_v7 = vpop.f32.mrf.mxu1  ;;  %3063 = vmatpush.bf16.msrb.mxu2 %v6144_v59 }
 0x276   :  { %v1968_v19 = vmax.f32 %v1896_v57, %v1932_v42 }
 0x277   :  { %v1570_v14 = vpop.f32.mrf.mxu2 }
 0x278   :  { %v1993_v61 = vpack.c.bf16 %v1968_v19, %v1967_v28  ;;  %v1571_v37 = vadd.f32 %v1570_v14, %v1532_v46  ;;  %v1533_v51 = vpop.f32.mrf.mxu0  ;;  %3040 = vmatpush.bf16.msrb.mxu0 %v6072_v49  ;;  %v12870_v46 = vld [vmem:[#allocation12_spill] sm:$0xff] }
 0x279   :  { %3064 = vmatpush.bf16.msrb.mxu2 %v6136_v23  ;;  %v1534_v38 = vadd.f32 %v1533_v51, %v9652_v1  ;;  %v1794_v11 = vmax.f32 %v12870_v46, 0.0  ;;  %v6443_v1 = vld [vmem:[%s12804_s3 + $0x5f0] sm:$0xf]  ;;  %v7820_v14 = vld [vmem:[%s12804_s3 + $0x574] sm:$0xf0] }
 0x27a   :  { %v1860_v8 = vmax.f32 %v1571_v37, 0.0  ;;  %v2039_v28 = vunpack.c.l.b16 %v1993_v61  ;;  %v2040_v32 = vunpack.c.h.b16 %v1993_v61  ;;  %v6444_v45 = vor.u32 %v7836_v52, %v6443_v1  ;;  %v6381_v23 = vld [vmem:[%s12804_s3 + $0x578] sm:$0xf0]  ;;  %v7817_v46 = vld [vmem:[%s12804_s3 + $0x564] sm:$0xf] }
 0x27b   :  { %v1908_v3 = vmax.f32 %v1794_v11, %v1800_v60  ;;  %v6373_v11 = vld [vmem:[%s12804_s3 + $0x568] sm:$0xf0]  ;;  %v6363_v1 = vld [vmem:[%s12804_s3 + $0x550] sm:$0xf]  ;;  %v7816_v52 = vld [vmem:[%s12804_s3 + $0x554] sm:$0xf0] }
 0x27c   :  { %v1938_v47 = vmax.f32 %v1854_v4, %v1860_v8  ;;  %v9870_v48 = vpop.f32.mrf.mxu3  ;;  %v9872_v40 = vpack.c.b16 %v2039_v28, %v2033_v41  ;;  %v9874_v50 = vpack.c.b16 %v2040_v32, %v2034_v25  ;;  %3009 = vmatpush.bf16.msrb.mxu3 %v6444_v45  ;;  %v6435_v25 = vld [vmem:[%s12804_s3 + $0x5e0] sm:$0xf]  ;;  %v7818_v8 = vld [vmem:[%s12804_s3 + $0x564] sm:$0xf0]  ;;  %v6427_v28 = vld [vmem:[%s12804_s3 + $0x5d0] sm:$0xf] }
 0x27d   :  { %v9876_v43 = vpop.f32.mrf.mxu1  ;;  %v6436_v56 = vor.u32 %v7834_v9, %v6435_v25 }
 0x27e   :  { %v1974_v18 = vmax.f32 %v1902_v17, %v1938_v47  ;;  %2950 = vmatmul.bf16.gmra.mxu0 %v9872_v40  ;;  %2974 = vmatmul.bf16.gmra.mxu2 %v9874_v50  ;;  %v7819_v17 = vld [vmem:[%s12804_s3 + $0x574] sm:$0xf] }
 0x27f   :  { %v1572_v27 = vpop.f32.mrf.mxu2  ;;  %v6384_v44 = vor.u32 %v7819_v17, %v6381_v23  ;;  %v7835_v47 = vld [vmem:[%s12804_s3 + $0x5f4] sm:$0xf]  ;;  %v12872_v17 = vld [vmem:[#allocation18_spill] sm:$0xff] }
 0x280   :  { %v1996_v55 = vpack.c.bf16 %v1974_v18, %v1973_v6  ;;  %v1573_v57 = vadd.f32 %v1572_v27, %v1534_v38  ;;  %v9884_v42 = vpop.f32.mrf.mxu0  ;;  %v6379_v6 = vld [vmem:[%s12804_s3 + $0x570] sm:$0xf]  ;;  %v6445_v18 = vld [vmem:[%s12804_s3 + $0x5f8] sm:$0xf0]  ;;  %3010 = vmatpush.bf16.msrb.mxu3 %v6436_v56  ;;  %v6428_v27 = vor.u32 %v7832_v31, %v6427_v28  ;;  %v6355_v28 = vld [vmem:[%s12804_s3 + $0x540] sm:$0xf] }
 0x281   :  { %v6380_v63 = vor.u32 %v7820_v14, %v6379_v6  ;;  %v6448_v60 = vor.u32 %v7835_v47, %v6445_v18  ;;  %3129 = vmatpush.bf16.msra.mxu0 %v6384_v44  ;;  %v6364_v6 = vor.u32 %v7816_v52, %v6363_v1  ;;  %v6419_v14 = vld [vmem:[%s12804_s3 + $0x5c0] sm:$0xf]  ;;  %v7813_v31 = vld [vmem:[%s12804_s3 + $0x544] sm:$0xf]  ;;  %v6357_v44 = vld [vmem:[%s12804_s3 + $0x548] sm:$0xf0] }
 0x282   :  { %v1872_v19 = vmax.f32 %v1573_v57, 0.0  ;;  %v2045_v37 = vunpack.c.l.b16 %v1996_v55  ;;  %v2046_v51 = vunpack.c.h.b16 %v1996_v55  ;;  %v9954_v55 = vperm.slane %v9505_v21, 2  ;;  %v7829_v47 = vld [vmem:[%s12804_s3 + $0x5c4] sm:$0xf]  ;;  %v6411_v18 = vld [vmem:[%s12804_s3 + $0x5b0] sm:$0xf] }
 0x283   :  { %2985 = vmatpush.bf16.msrb.mxu1 %v6380_v63  ;;  %3153 = vmatpush.bf16.msra.mxu2 %v6448_v60  ;;  %v7830_v63 = vld [vmem:[%s12804_s3 + $0x5c4] sm:$0xf0]  ;;  %v6360_v60 = vor.u32 %v7813_v31, %v6357_v44 }
 0x284   :  { %v1944_v20 = vmax.f32 %v1866_v22, %v1872_v19  ;;  %v9894_v5 = vpop.f32.mrf.mxu3  ;;  %v6376_v22 = vor.u32 %v7817_v46, %v6373_v11  ;;  %v6437_v19 = vld [vmem:[%s12804_s3 + $0x5e8] sm:$0xf0]  ;;  %3011 = vmatpush.bf16.msrb.mxu3 %v6428_v27  ;;  %v7828_v27 = vld [vmem:[%s12804_s3 + $0x5b4] sm:$0xf0] }
 0x285   :  { %v9902_v59 = vpop.f32.mrf.mxu1  ;;  %v6421_v46 = vld [vmem:[%s12804_s3 + $0x5c8] sm:$0xf0] }
 0x286   :  { %v1980_v15 = vmax.f32 %v1908_v3, %v1944_v20  ;;  %v6440_v3 = vor.u32 %v7833_v0, %v6437_v19  ;;  %v1585_v20 = vadd.f32 %v9744_v33, %v9954_v55  ;;  %3130 = vmatpush.bf16.msra.mxu0 %v6376_v22  ;;  %v6365_v33 = vld [vmem:[%s12804_s3 + $0x558] sm:$0xf0]  ;;  %v1587_v0 = vadd.f32 %v9796_v54, %v9954_v55 }
 0x287   :  { %v9904_v26 = vpop.f32.mrf.mxu2  ;;  %v6412_v19 = vor.u32 %v7828_v27, %v6411_v18  ;;  %v6424_v1 = vor.u32 %v7829_v47, %v6421_v46  ;;  %v7809_v47 = vld [vmem:[%s12804_s3 + $0x524] sm:$0xf] }
 0x288   :  { %v1999_v4 = vpack.c.bf16 %v1980_v15, %v1979_v53  ;;  %v9909_v61 = vpop.f32.mrf.mxu0  ;;  %v6371_v53 = vld [vmem:[%s12804_s3 + $0x560] sm:$0xf]  ;;  %3154 = vmatpush.bf16.msra.mxu2 %v6440_v3  ;;  %v1624_v56 = vadd.f32 %v9790_v13, %v1585_v20  ;;  %v1735_v13 = vmax.f32 %v12872_v17, 0.0  ;;  %v6347_v20 = vld [vmem:[%s12804_s3 + $0x530] sm:$0xf] }
 0x289   :  { %v6372_v49 = vor.u32 %v7818_v8, %v6371_v53  ;;  %v6403_v17 = vld [vmem:[%s12804_s3 + $0x5a0] sm:$0xf]  ;;  %v7825_v46 = vld [vmem:[%s12804_s3 + $0x5a4] sm:$0xf] }
 0x28a   :  { %v2051_v39 = vunpack.c.l.b16 %v1999_v4  ;;  %v2052_v41 = vunpack.c.h.b16 %v1999_v4  ;;  %v6420_v4 = vor.u32 %v7830_v63, %v6419_v14  ;;  %v1741_v11 = vmax.f32 %v1624_v56, 0.0  ;;  %v7811_v14 = vld [vmem:[%s12804_s3 + $0x534] sm:$0xf]  ;;  %v6349_v63 = vld [vmem:[%s12804_s3 + $0x538] sm:$0xf0] }
 0x28b   :  { %2986 = vmatpush.bf16.msrb.mxu1 %v6372_v49  ;;  %v7814_v49 = vld [vmem:[%s12804_s3 + $0x544] sm:$0xf0]  ;;  %v1626_v56 = vadd.f32 %v9834_v34, %v1587_v0  ;;  %v6339_v34 = vld [vmem:[%s12804_s3 + $0x520] sm:$0xf] }
 0x28c   :  { %v9917_v30 = vpop.f32.mrf.mxu3  ;;  %v9919_v29 = vpack.c.b16 %v2051_v39, %v2045_v37  ;;  %v9921_v62 = vpack.c.b16 %v2052_v41, %v2046_v51  ;;  %v7815_v37 = vld [vmem:[%s12804_s3 + $0x554] sm:$0xf]  ;;  %v6429_v41 = vld [vmem:[%s12804_s3 + $0x5d8] sm:$0xf0]  ;;  %3012 = vmatpush.bf16.msrb.mxu3 %v6420_v4  ;;  %v6356_v23 = vor.u32 %v7814_v49, %v6355_v28  ;;  %v10057_v28 = vmax.f32 %v1735_v13, %v1741_v11  ;;  %v7810_v13 = vld [vmem:[%s12804_s3 + $0x524] sm:$0xf0] }
 0x28d   :  { %v9932_v32 = vpop.f32.mrf.mxu1  ;;  %v7831_v51 = vld [vmem:[%s12804_s3 + $0x5d4] sm:$0xf]  ;;  %v6368_v39 = vor.u32 %v7815_v37, %v6365_v33  ;;  %v6413_v4 = vld [vmem:[%s12804_s3 + $0x5b8] sm:$0xf0]  ;;  %v12873_v37 = vld [vmem:[#allocation30_spill] sm:$0xff]  ;;  %v6340_v27 = vor.u32 %v7810_v13, %v6339_v34 }
 0x28e   :  { %2955 = vmatmul.bf16.gmra.mxu0 %v9919_v29  ;;  %2979 = vmatmul.bf16.gmra.mxu2 %v9921_v62  ;;  %v6432_v9 = vor.u32 %v7831_v51, %v6429_v41  ;;  %v1807_v33 = vmax.f32 %v12873_v37, 0.0  ;;  %v6352_v41 = vor.u32 %v7811_v14, %v6349_v63  ;;  %v6405_v11 = vld [vmem:[%s12804_s3 + $0x5a8] sm:$0xf0]  ;;  %v12874_v0 = vld [vmem:[#allocation20_spill] sm:$0xff]  ;;  %v7807_v37 = vld [vmem:[%s12804_s3 + $0x514] sm:$0xf] }
 0x28f   :  { %v9951_v38 = vpop.f32.mrf.mxu2  ;;  %2987 = vmatpush.bf16.msrb.mxu1 %v6364_v6  ;;  %3131 = vmatpush.bf16.msra.mxu0 %v6368_v39  ;;  %v7812_v6 = vld [vmem:[%s12804_s3 + $0x534] sm:$0xf0]  ;;  %v6397_v34 = vld [vmem:[%s12804_s3 + $0x598] sm:$0xf0] }
 0x290   :  { %v9956_v57 = vpop.f32.mrf.mxu0  ;;  %3155 = vmatpush.bf16.msra.mxu2 %v6432_v9  ;;  %v6348_v54 = vor.u32 %v7812_v6, %v6347_v20  ;;  %3013 = vmatpush.bf16.msrb.mxu3 %v6412_v19  ;;  %v1753_v19 = vmax.f32 %v1626_v56, 0.0  ;;  %v1590_v20 = vadd.f32 %v9836_v7, %v9954_v55  ;;  %v7824_v63 = vld [vmem:[%s12804_s3 + $0x594] sm:$0xf0] }
 0x291   :  { %v7808_v7 = vld [vmem:[%s12804_s3 + $0x514] sm:$0xf0] }
 0x293   :  { %2988 = vmatpush.bf16.msrb.mxu1 %v6356_v23  ;;  %3132 = vmatpush.bf16.msra.mxu0 %v6360_v60  ;;  %v7826_v23 = vld [vmem:[%s12804_s3 + $0x5a4] sm:$0xf0]  ;;  %v6341_v60 = vld [vmem:[%s12804_s3 + $0x528] sm:$0xf0] }
 0x294   :  { %v9978_v45 = vpop.f32.mrf.mxu3  ;;  %3156 = vmatpush.bf16.msra.mxu2 %v6424_v1  ;;  %v6404_v44 = vor.u32 %v7826_v23, %v6403_v17  ;;  %v7823_v23 = vld [vmem:[%s12804_s3 + $0x594] sm:$0xf] }
 0x295   :  { %v1599_v15 = vpop.f32.mrf.mxu1  ;;  %v6400_v13 = vor.u32 %v7823_v23, %v6397_v34 }
 0x296   :  { %v1600_v8 = vadd.f32 %v1599_v15, %v9954_v55  ;;  %v7827_v15 = vld [vmem:[%s12804_s3 + $0x5b4] sm:$0xf]  ;;  %3014 = vmatpush.bf16.msrb.mxu3 %v6404_v44 }
 0x297   :  { %v9998_v25 = vpop.f32.mrf.mxu2  ;;  %v6416_v9 = vor.u32 %v7827_v15, %v6413_v4  ;;  %2989 = vmatpush.bf16.msrb.mxu1 %v6348_v54  ;;  %3133 = vmatpush.bf16.msra.mxu0 %v6352_v41  ;;  %v6395_v54 = vld [vmem:[%s12804_s3 + $0x590] sm:$0xf] }
 0x298   :  { %v10001_v53 = vpop.f32.mrf.mxu0  ;;  %v6331_v15 = vld [vmem:[%s12804_s3 + $0x510] sm:$0xf]  ;;  %v6396_v4 = vor.u32 %v7824_v63, %v6395_v54  ;;  %v6389_v54 = vld [vmem:[%s12804_s3 + $0x588] sm:$0xf0] }
 0x299   :  { %3157 = vmatpush.bf16.msra.mxu2 %v6416_v9 }
 0x29a   :  { %3015 = vmatpush.bf16.msrb.mxu3 %v6396_v4 }
 0x29b   :  { %2990 = vmatpush.bf16.msrb.mxu1 %v6340_v27  ;;  %v1629_v27 = vadd.f32 %v9870_v48, %v1590_v20 }
 0x29c   :  { %v1638_v22 = vpop.f32.mrf.mxu3 }
 0x29d   :  { %v1639_v52 = vadd.f32 %v1638_v22, %v1600_v8  ;;  %v1601_v3 = vpop.f32.mrf.mxu1  ;;  %v1747_v22 = vmax.f32 %v12874_v0, 0.0  ;;  %v7822_v0 = vld [vmem:[%s12804_s3 + $0x584] sm:$0xf0]  ;;  %v1765_v4 = vmax.f32 %v1629_v27, 0.0 }
 0x29e   :  { %3041 = vmatmul.bf16.vlgmr.msrb.gmra.mxu0 %v9350_v36  ;;  %3065 = vmatmul.bf16.vlgmr.msrb.gmra.mxu2 %v9352_v24  ;;  %v1602_v31 = vadd.f32 %v1601_v3, %v9954_v55  ;;  %v6408_v3 = vor.u32 %v7825_v46, %v6405_v11  ;;  %v6387_v11 = vld [vmem:[%s12804_s3 + $0x580] sm:$0xf] }
 0x29f   :  { %v1813_v51 = vmax.f32 %v1639_v52, 0.0  ;;  %v10052_v39 = vpop.f32.mrf.mxu2  ;;  %v6344_v52 = vor.u32 %v7809_v47, %v6341_v60  ;;  %v10120_v47 = vmax.f32 %v1747_v22, %v1753_v19  ;;  %v6323_v22 = vld [vmem:[%s12804_s3 + $0x500] sm:$0xf]  ;;  %v10136_v19 = vperm.slane %v9505_v21, 3  ;;  %v6325_v21 = vld [vmem:[%s12804_s3 + $0x508] sm:$0xf0] }
 0x2a0   :  { %v10055_v8 = vpop.f32.mrf.mxu0  ;;  %3158 = vmatpush.bf16.msra.mxu2 %v6408_v3  ;;  %v6388_v48 = vor.u32 %v7822_v0, %v6387_v11  ;;  %v1592_v3 = vadd.f32 %v9876_v43, %v9954_v55  ;;  %v7803_v0 = vld [vmem:[%s12804_s3 + $0x4f4] sm:$0xf] }
 0x2a1   :  { %v10059_v49 = vmax.f32 %v1807_v33, %v1813_v51  ;;  %3134 = vmatpush.bf16.msra.mxu0 %v6344_v52  ;;  %v6333_v33 = vld [vmem:[%s12804_s3 + $0x518] sm:$0xf0]  ;;  %v7805_v52 = vld [vmem:[%s12804_s3 + $0x504] sm:$0xf] }
 0x2a2   :  { %v12875_v51 = vld [vmem:[#allocation32_spill] sm:$0xff]  ;;  %v6336_v17 = vor.u32 %v7807_v37, %v6333_v33  ;;  %3016 = vmatpush.bf16.msrb.mxu3 %v6388_v48  ;;  %v6328_v43 = vor.u32 %v7805_v52, %v6325_v21  ;;  %v12876_v33 = vld [vmem:[#allocation22_spill] sm:$0xff]  ;;  %v1595_v52 = vadd.f32 %v9902_v59, %v9954_v55 }
 0x2a3   :  { %v1951_v18 = vmax.f32 %v10057_v28, %v10059_v49  ;;  %v1819_v41 = vmax.f32 %v12875_v51, 0.0  ;;  %v1759_v51 = vmax.f32 %v12876_v33, 0.0  ;;  %v12878_v21 = vld [vmem:[#allocation24_spill] sm:$0xff]  ;;  %v1665_v33 = vadd.f32 %v9909_v61, %v10136_v19 }
 0x2a4   :  { %v1640_v1 = vpop.f32.mrf.mxu3  ;;  %3159 = vmatpush.bf16.msra.mxu2 %v6400_v13  ;;  %v1634_v59 = vadd.f32 %v9917_v30, %v1595_v52  ;;  %v1668_v61 = vadd.f32 %v9956_v57, %v10136_v19  ;;  %v6627_v28 = vld [vmem:[%s12804_s3 + $0x160] sm:$0xf] }
 0x2a5   :  { %v1641_v6 = vadd.f32 %v1640_v1, %v1602_v31  ;;  %v1604_v14 = vpop.f32.mrf.mxu1  ;;  %v6332_v31 = vor.u32 %v7808_v7, %v6331_v15  ;;  %3135 = vmatpush.bf16.msra.mxu0 %v6336_v17  ;;  %v7806_v1 = vld [vmem:[%s12804_s3 + $0x504] sm:$0xf0]  ;;  %v1631_v17 = vadd.f32 %v9894_v5, %v1592_v3  ;;  %v10166_v27 = vmax.f32 %v1759_v51, %v1765_v4 }
 0x2a6   :  { %v1605_v46 = vadd.f32 %v1604_v14, %v9954_v55  ;;  %v7821_v14 = vld [vmem:[%s12804_s3 + $0x584] sm:$0xf]  ;;  %v1597_v51 = vadd.f32 %v9932_v32, %v9954_v55  ;;  %v1704_v57 = vadd.f32 %v9951_v38, %v1665_v33  ;;  %v6635_v38 = vld [vmem:[%s12804_s3 + $0x170] sm:$0xf]  ;;  %v12884_v33 = vld [vmem:[#allocation28_spill] sm:$0xff] }
 0x2a7   :  { %v1825_v9 = vmax.f32 %v1641_v6, 0.0  ;;  %v10110_v56 = vpop.f32.mrf.mxu2  ;;  %2991 = vmatpush.bf16.msrb.mxu1 %v6332_v31  ;;  %v6324_v6 = vor.u32 %v7806_v1, %v6323_v22  ;;  %v6392_v15 = vor.u32 %v7821_v14, %v6389_v54  ;;  %v1663_v31 = vadd.f32 %v9884_v42, %v10136_v19  ;;  %v6317_v42 = vld [vmem:[%s12804_s3 + $0x4f8] sm:$0xf0] }
 0x2a8   :  { %v10118_v44 = vpop.f32.mrf.mxu0  ;;  %v1777_v5 = vmax.f32 %v1631_v17, 0.0  ;;  %v6320_v1 = vor.u32 %v7803_v0, %v6317_v42  ;;  %v1771_v14 = vmax.f32 %v12878_v21, 0.0  ;;  %v6253_v17 = vld [vmem:[%s12804_s3 + $0x478] sm:$0xf0]  ;;  %v12880_v0 = vld [vmem:[#allocation25_spill] sm:$0xff]  ;;  %v12883_v21 = vld [vmem:[#allocation27_spill] sm:$0xff] }
 0x2a9   :  { %v10123_v60 = vmax.f32 %v1819_v41, %v1825_v9  ;;  %v12877_v41 = vld [vmem:[#allocation34_spill] sm:$0xff]  ;;  %3136 = vmatpush.bf16.msra.mxu0 %v6328_v43  ;;  %3160 = vmatpush.bf16.msra.mxu2 %v6392_v15  ;;  %v1702_v22 = vadd.f32 %v9904_v26, %v1663_v31  ;;  %v12879_v43 = vld [vmem:[#allocation36_spill] sm:$0xff]  ;;  %v7787_v31 = vld [vmem:[%s12804_s3 + $0x474] sm:$0xf]  ;;  %v1736_v42 = vmax.f32 %v12880_v0, 0.0 }
 0x2aa   :  { %v1831_v9 = vmax.f32 %v12877_v41, 0.0  ;;  %3105 = vmatpush.bf16.msra.mxu3 %v6320_v1  ;;  %v1843_v15 = vmax.f32 %v12879_v43, 0.0  ;;  %v10185_v4 = vmax.f32 %v1771_v14, %v1777_v5  ;;  %v12881_v5 = vld [vmem:[#allocation37_spill] sm:$0xff]  ;;  %v1748_v14 = vmax.f32 %v12883_v21, 0.0 }
 0x2ab   :  { %v1957_v20 = vmax.f32 %v10120_v47, %v10123_v60  ;;  %2992 = vmatpush.bf16.msrb.mxu1 %v6324_v6  ;;  %v1742_v26 = vmax.f32 %v1702_v22, 0.0  ;;  %v1808_v22 = vmax.f32 %v12881_v5, 0.0  ;;  %v1789_v43 = vmax.f32 %v1634_v59, 0.0 }
 0x2ac   :  { %v1643_v63 = vpop.f32.mrf.mxu3  ;;  %v1795_v59 = vmax.f32 %v12884_v33, 0.0 }
 0x2ad   :  { %v1644_v7 = vadd.f32 %v1643_v63, %v1605_v46  ;;  %v1606_v37 = vpop.f32.mrf.mxu1 }
 0x2ae   :  { %3046 = vmatmul.bf16.gmra.mxu0 %v9428_v12  ;;  %3070 = vmatmul.bf16.gmra.mxu2 %v9430_v10  ;;  %v1607_v11 = vadd.f32 %v1606_v37, %v9954_v55 }
 0x2af   :  { %v1837_v23 = vmax.f32 %v1644_v7, 0.0  ;;  %v10164_v34 = vpop.f32.mrf.mxu2 }
 0x2b0   :  { %v1677_v13 = vpop.f32.mrf.mxu0 }
 0x2b1   :  { %v10168_v46 = vmax.f32 %v1831_v9, %v1837_v23  ;;  %v1678_v3 = vadd.f32 %v1677_v13, %v10136_v19  ;;  %v7801_v23 = vld [vmem:[%s12804_s3 + $0x4e4] sm:$0xf]  ;;  %v6256_v13 = vor.u32 %v7787_v31, %v6253_v17 }
 0x2b3   :  { %v1963_v48 = vmax.f32 %v10166_v27, %v10168_v46  ;;  %3081 = vmatpush.bf16.msra.mxu1 %v6256_v13  ;;  %v6659_v27 = vld [vmem:[%s12804_s3 + $0x1a0] sm:$0xf]  ;;  %v12891_v46 = vld [vmem:[#allocation42_spill] sm:$0xff] }
 0x2b4   :  { %v1645_v6 = vpop.f32.mrf.mxu3 }
 0x2b5   :  { %v1646_v54 = vadd.f32 %v1645_v6, %v1607_v11  ;;  %v1609_v63 = vpop.f32.mrf.mxu1  ;;  %v6309_v11 = vld [vmem:[%s12804_s3 + $0x4e8] sm:$0xf0] }
 0x2b6   :  { %v1610_v32 = vadd.f32 %v1609_v63, %v9954_v55  ;;  %v6312_v52 = vor.u32 %v7801_v23, %v6309_v11  ;;  %v1880_v63 = vmax.f32 %v1736_v42, %v1742_v26  ;;  %v7692_v26 = vld [vmem:[%s12804_s3 + $0x174] sm:$0xf0]  ;;  %v1754_v11 = vmax.f32 %v1704_v57, 0.0 }
 0x2b7   :  { %v1849_v7 = vmax.f32 %v1646_v54, 0.0  ;;  %v1716_v37 = vpop.f32.mrf.mxu2  ;;  %v6636_v23 = vor.u32 %v7692_v26, %v6635_v38  ;;  %v7783_v26 = vld [vmem:[%s12804_s3 + $0x454] sm:$0xf] }
 0x2b8   :  { %v1717_v41 = vadd.f32 %v1716_v37, %v1678_v3  ;;  %v1679_v9 = vpop.f32.mrf.mxu0  ;;  %v12882_v3 = vld [vmem:[#allocation26_spill] sm:$0xff]  ;;  %3106 = vmatpush.bf16.msra.mxu3 %v6312_v52 }
 0x2b9   :  { %v10203_v30 = vmax.f32 %v1843_v15, %v1849_v7  ;;  %v1783_v6 = vmax.f32 %v12882_v3, 0.0  ;;  %v10217_v15 = vadd.f32 %v9978_v45, %v1597_v51  ;;  %v6699_v45 = vld [vmem:[%s12804_s3 + $0x1f0] sm:$0xf]  ;;  %3705 = vmatpush.bf16.msrb.mxu0 %v6636_v23 }
 0x2ba   :  { %v1814_v1 = vmax.f32 %v1717_v41, 0.0  ;;  %v10220_v41 = vadd.f32 %v9998_v25, %v1668_v61  ;;  %v1680_v25 = vadd.f32 %v1679_v9, %v10136_v19  ;;  %v7708_v61 = vld [vmem:[%s12804_s3 + $0x1f4] sm:$0xf0] }
 0x2bb   :  { %v1969_v54 = vmax.f32 %v10185_v4, %v10203_v30  ;;  %v6700_v5 = vor.u32 %v7708_v61, %v6699_v45  ;;  %v1801_v52 = vmax.f32 %v10217_v15, 0.0  ;;  %v6245_v15 = vld [vmem:[%s12804_s3 + $0x468] sm:$0xf0]  ;;  %v7690_v45 = vld [vmem:[%s12804_s3 + $0x164] sm:$0xf0] }
 0x2bc   :  { %v1916_v7 = vmax.f32 %v1808_v22, %v1814_v1  ;;  %v1648_v37 = vpop.f32.mrf.mxu3  ;;  %v12886_v22 = vld [vmem:[#allocation39_spill] sm:$0xff]  ;;  %v1766_v49 = vmax.f32 %v10220_v41, 0.0  ;;  %v6237_v41 = vld [vmem:[%s12804_s3 + $0x458] sm:$0xf0]  ;;  %v6628_v23 = vor.u32 %v7690_v45, %v6627_v28  ;;  %v6691_v61 = vld [vmem:[%s12804_s3 + $0x1e0] sm:$0xf]  ;;  %v1670_v45 = vadd.f32 %v10001_v53, %v10136_v19 }
 0x2bd   :  { %v1649_v31 = vadd.f32 %v1648_v37, %v1610_v32  ;;  %v1611_v17 = vpop.f32.mrf.mxu1  ;;  %v12885_v32 = vld [vmem:[#allocation38_spill] sm:$0xff]  ;;  %v1820_v1 = vmax.f32 %v12886_v22, 0.0  ;;  %v7785_v37 = vld [vmem:[%s12804_s3 + $0x464] sm:$0xf]  ;;  %3729 = vmatpush.bf16.msrb.mxu2 %v6700_v5  ;;  %v7688_v5 = vld [vmem:[%s12804_s3 + $0x154] sm:$0xf0] }
 0x2be   :  { %v1952_v51 = vmax.f32 %v1880_v63, %v1916_v7  ;;  %3051 = vmatmul.bf16.gmra.mxu0 %v9498_v16  ;;  %3075 = vmatmul.bf16.gmra.mxu2 %v9500_v35  ;;  %v1855_v13 = vmax.f32 %v12885_v32, 0.0  ;;  %v10246_v63 = vmax.f32 %v1783_v6, %v1789_v43  ;;  %v1612_v57 = vadd.f32 %v1611_v17, %v9954_v55  ;;  %v7799_v55 = vld [vmem:[%s12804_s3 + $0x4d4] sm:$0xf]  ;;  %v6301_v43 = vld [vmem:[%s12804_s3 + $0x4d8] sm:$0xf0] }
 0x2bf   :  { %v1861_v0 = vmax.f32 %v1649_v31, 0.0  ;;  %v1718_v42 = vpop.f32.mrf.mxu2  ;;  %v6248_v6 = vor.u32 %v7785_v37, %v6245_v15  ;;  %v1886_v31 = vmax.f32 %v1748_v14, %v1754_v11  ;;  %v6304_v38 = vor.u32 %v7799_v55, %v6301_v43  ;;  %v7706_v32 = vld [vmem:[%s12804_s3 + $0x1e4] sm:$0xf0]  ;;  %v6683_v22 = vld [vmem:[%s12804_s3 + $0x1d0] sm:$0xf]  ;;  %3706 = vmatpush.bf16.msrb.mxu0 %v6628_v23 }
 0x2c0   :  { %v10244_v9 = vpack.c.bf16 %v1952_v51, %v1951_v18  ;;  %v1719_v3 = vadd.f32 %v1718_v42, %v1680_v25  ;;  %v1682_v21 = vpop.f32.mrf.mxu0  ;;  %v6240_v25 = vor.u32 %v7783_v26, %v6237_v41  ;;  %v6619_v42 = vld [vmem:[%s12804_s3 + $0x150] sm:$0xf]  ;;  %v7704_v28 = vld [vmem:[%s12804_s3 + $0x1d4] sm:$0xf0]  ;;  %v10300_v55 = vmax.f32 %v1795_v59, %v1801_v52  ;;  %v7797_v59 = vld [vmem:[%s12804_s3 + $0x4c4] sm:$0xf] }
 0x2c1   :  { %v10248_v7 = vmax.f32 %v1855_v13, %v1861_v0  ;;  %v1683_v51 = vadd.f32 %v1682_v21, %v10136_v19  ;;  %3082 = vmatpush.bf16.msra.mxu1 %v6248_v6  ;;  %3107 = vmatpush.bf16.msra.mxu3 %v6304_v38  ;;  %v6692_v0 = vor.u32 %v7706_v32, %v6691_v61  ;;  %v12888_v21 = vld [vmem:[#allocation40_spill] sm:$0xff]  ;;  %v6293_v52 = vld [vmem:[%s12804_s3 + $0x4c8] sm:$0xf0] }
 0x2c2   :  { %v1826_v18 = vmax.f32 %v1719_v3, 0.0  ;;  %v1867_v37 = vmax.f32 %v12888_v21, 0.0  ;;  %v6620_v15 = vor.u32 %v7688_v5, %v6619_v42  ;;  %v6684_v26 = vor.u32 %v7704_v28, %v6683_v22  ;;  %v6285_v23 = vld [vmem:[%s12804_s3 + $0x4b8] sm:$0xf0]  ;;  %v7686_v21 = vld [vmem:[%s12804_s3 + $0x144] sm:$0xf0] }
 0x2c3   :  { %v1975_v17 = vmax.f32 %v10246_v63, %v10248_v7  ;;  %3730 = vmatpush.bf16.msrb.mxu2 %v6692_v0  ;;  %v2023_v53 = vunpack.c.l.b16 %v10244_v9  ;;  %v2024_v47 = vunpack.c.h.b16 %v10244_v9  ;;  %v7779_v9 = vld [vmem:[%s12804_s3 + $0x434] sm:$0xf]  ;;  %v6221_v42 = vld [vmem:[%s12804_s3 + $0x438] sm:$0xf0]  ;;  %v1709_v5 = vadd.f32 %v10052_v39, %v1670_v45  ;;  %v6197_v4 = vld [vmem:[%s12804_s3 + $0x408] sm:$0xf0] }
 0x2c4   :  { %v1922_v33 = vmax.f32 %v1820_v1, %v1826_v18  ;;  %v1650_v14 = vpop.f32.mrf.mxu3  ;;  %v12887_v1 = vld [vmem:[#allocation29_spill] sm:$0xff]  ;;  %3707 = vmatpush.bf16.msrb.mxu0 %v6620_v15 }
 0x2c5   :  { %v1651_v13 = vadd.f32 %v1650_v14, %v1612_v57  ;;  %v2898_v11 = vpop.f32.mrf.mxu1  ;;  %v1760_v3 = vmax.f32 %v12887_v1, 0.0  ;;  %v12889_v18 = vld [vmem:[#allocation41_spill] sm:$0xff]  ;;  %3083 = vmatpush.bf16.msra.mxu1 %v6240_v25  ;;  %v7795_v25 = vld [vmem:[%s12804_s3 + $0x4b4] sm:$0xf] }
 0x2c6   :  { %v1958_v57 = vmax.f32 %v1886_v31, %v1922_v33  ;;  %v1832_v6 = vmax.f32 %v12889_v18, 0.0  ;;  %v6288_v1 = vor.u32 %v7795_v25, %v6285_v23  ;;  %v6224_v18 = vor.u32 %v7779_v9, %v6221_v42  ;;  %v7777_v25 = vld [vmem:[%s12804_s3 + $0x424] sm:$0xf]  ;;  %v6213_v23 = vld [vmem:[%s12804_s3 + $0x428] sm:$0xf0] }
 0x2c7   :  { %v1873_v43 = vmax.f32 %v1651_v13, 0.0  ;;  %v1721_v38 = vpop.f32.mrf.mxu2  ;;  %v1892_v41 = vmax.f32 %v1760_v3, %v1766_v49  ;;  %v7781_v49 = vld [vmem:[%s12804_s3 + $0x444] sm:$0xf]  ;;  %3731 = vmatpush.bf16.msrb.mxu2 %v6684_v26  ;;  %v6611_v3 = vld [vmem:[%s12804_s3 + $0x140] sm:$0xf] }
 0x2c8   :  { %v1988_v31 = vpack.c.bf16 %v1958_v57, %v1957_v20  ;;  %v1722_v33 = vadd.f32 %v1721_v38, %v1683_v51  ;;  %v1684_v14 = vpop.f32.mrf.mxu0  ;;  %v6296_v20 = vor.u32 %v7797_v59, %v6293_v52  ;;  %v6229_v51 = vld [vmem:[%s12804_s3 + $0x448] sm:$0xf0]  ;;  %v6612_v26 = vor.u32 %v7686_v21, %v6611_v3  ;;  %v6595_v3 = vld [vmem:[%s12804_s3 + $0x120] sm:$0xf]  ;;  %v7682_v21 = vld [vmem:[%s12804_s3 + $0x124] sm:$0xf0] }
 0x2c9   :  { %v10318_v60 = vmax.f32 %v1867_v37, %v1873_v43  ;;  %v6232_v0 = vor.u32 %v7781_v49, %v6229_v51  ;;  %v6675_v37 = vld [vmem:[%s12804_s3 + $0x1c0] sm:$0xf]  ;;  %v7702_v43 = vld [vmem:[%s12804_s3 + $0x1c4] sm:$0xf0]  ;;  %v1685_v52 = vadd.f32 %v1684_v14, %v10136_v19  ;;  %v1673_v14 = vadd.f32 %v10055_v8, %v10136_v19 }
 0x2ca   :  { %v2029_v61 = vunpack.c.l.b16 %v1988_v31  ;;  %v2030_v32 = vunpack.c.h.b16 %v1988_v31  ;;  %v1838_v13 = vmax.f32 %v1722_v33, 0.0  ;;  %3108 = vmatpush.bf16.msra.mxu3 %v6296_v20  ;;  %v6676_v45 = vor.u32 %v7702_v43, %v6675_v37  ;;  %v7793_v31 = vld [vmem:[%s12804_s3 + $0x4a4] sm:$0xf]  ;;  %v6603_v33 = vld [vmem:[%s12804_s3 + $0x130] sm:$0xf]  ;;  %3708 = vmatpush.bf16.msrb.mxu0 %v6612_v26 }
 0x2cb   :  { %v1981_v22 = vmax.f32 %v10300_v55, %v10318_v60  ;;  %3084 = vmatpush.bf16.msra.mxu1 %v6232_v0  ;;  %v6216_v0 = vor.u32 %v7777_v25, %v6213_v23  ;;  %v7791_v37 = vld [vmem:[%s12804_s3 + $0x494] sm:$0xf]  ;;  %v7698_v43 = vld [vmem:[%s12804_s3 + $0x1a4] sm:$0xf0]  ;;  %v7696_v25 = vld [vmem:[%s12804_s3 + $0x194] sm:$0xf0] }
 0x2cc   :  { %v1928_v57 = vmax.f32 %v1832_v6, %v1838_v13  ;;  %v2922_v39 = vpop.f32.mrf.mxu3  ;;  %v10347_v15 = vpack.c.b16 %v2029_v61, %v2023_v53  ;;  %v10349_v28 = vpack.c.b16 %v2030_v32, %v2024_v47  ;;  %v6277_v6 = vld [vmem:[%s12804_s3 + $0x4a8] sm:$0xf0]  ;;  %v6667_v53 = vld [vmem:[%s12804_s3 + $0x1b0] sm:$0xf]  ;;  %v1778_v47 = vmax.f32 %v1709_v5, 0.0  ;;  %3732 = vmatpush.bf16.msrb.mxu2 %v6676_v45  ;;  %v12892_v26 = vld [vmem:[#allocation33_spill] sm:$0xff] }
 0x2cd   :  { %v10354_v38 = vadd.f32 %v2922_v39, %v2898_v11  ;;  %v10366_v49 = vpop.f32.mrf.mxu1  ;;  %v7684_v11 = vld [vmem:[%s12804_s3 + $0x134] sm:$0xf0]  ;;  %v6280_v51 = vor.u32 %v7793_v31, %v6277_v6  ;;  %v1784_v45 = vmax.f32 %v12892_v26, 0.0  ;;  %v6579_v30 = vld [vmem:[%s12804_s3 + $0x100] sm:$0xf] }
 0x2ce   :  { %v1964_v59 = vmax.f32 %v1892_v41, %v1928_v57  ;;  %2993 = vmatmul.bf16.vlgmr.msrb.gmra.mxu1 %v10347_v15  ;;  %3017 = vmatmul.bf16.vlgmr.msrb.gmra.mxu3 %v10349_v28  ;;  %v7700_v41 = vld [vmem:[%s12804_s3 + $0x1b4] sm:$0xf0]  ;;  %v6604_v42 = vor.u32 %v7684_v11, %v6603_v33  ;;  %v6269_v57 = vld [vmem:[%s12804_s3 + $0x498] sm:$0xf0]  ;;  %v6660_v11 = vor.u32 %v7698_v43, %v6659_v27  ;;  %v6643_v43 = vld [vmem:[%s12804_s3 + $0x180] sm:$0xf] }
 0x2cf   :  { %3137 = vmatmul.bf16.vlgmr.msra.gmra.mxu0 %v10347_v15  ;;  %3161 = vmatmul.bf16.vlgmr.msra.gmra.mxu2 %v10349_v28  ;;  %v1723_v20 = vpop.f32.mrf.mxu2  ;;  %v12890_v61 = vld [vmem:[#allocation31_spill] sm:$0xff]  ;;  %v6668_v5 = vor.u32 %v7700_v41, %v6667_v53  ;;  %v6205_v41 = vld [vmem:[%s12804_s3 + $0x418] sm:$0xf0] }
 0x2d0   :  { %v1772_v32 = vmax.f32 %v12890_v61, 0.0  ;;  %v10393_v8 = vpack.c.bf16 %v1964_v59, %v1963_v48  ;;  %v1724_v13 = vadd.f32 %v1723_v20, %v1685_v52  ;;  %3109 = vmatpush.bf16.msra.mxu3 %v6288_v1  ;;  %3085 = vmatpush.bf16.msra.mxu1 %v6224_v18  ;;  %v1687_v9 = vpop.f32.mrf.mxu0  ;;  %v1844_v48 = vmax.f32 %v12891_v46, 0.0  ;;  %v7775_v53 = vld [vmem:[%s12804_s3 + $0x414] sm:$0xf] }
 0x2d1   :  { %v1712_v18 = vadd.f32 %v10110_v56, %v1673_v14  ;;  %v1688_v6 = vadd.f32 %v1687_v9, %v10136_v19  ;;  %v6272_v59 = vor.u32 %v7791_v37, %v6269_v57  ;;  %v1675_v52 = vadd.f32 %v10118_v44, %v10136_v19  ;;  %3709 = vmatpush.bf16.msrb.mxu0 %v6604_v42  ;;  %v7680_v44 = vld [vmem:[%s12804_s3 + $0x114] sm:$0xf0]  ;;  %v7789_v9 = vld [vmem:[%s12804_s3 + $0x484] sm:$0xf]  ;;  %v6261_v42 = vld [vmem:[%s12804_s3 + $0x488] sm:$0xf0] }
 0x2d2   :  { %v1850_v1 = vmax.f32 %v1724_v13, 0.0  ;;  %v1898_v39 = vmax.f32 %v1772_v32, %v1778_v47  ;;  %3733 = vmatpush.bf16.msrb.mxu2 %v6668_v5  ;;  %v6596_v56 = vor.u32 %v7682_v21, %v6595_v3  ;;  %v6587_v47 = vld [vmem:[%s12804_s3 + $0x110] sm:$0xf]  ;;  %v6208_v20 = vor.u32 %v7775_v53, %v6205_v41  ;;  %v7773_v37 = vld [vmem:[%s12804_s3 + $0x404] sm:$0xf] }
 0x2d3   :  { %v12893_v23 = vld [vmem:[#allocation43_spill] sm:$0xff]  ;;  %v1790_v32 = vmax.f32 %v1712_v18, 0.0  ;;  %v10441_v13 = vadd.f32 %v10164_v34, %v1675_v52  ;;  %v6264_v27 = vor.u32 %v7789_v9, %v6261_v42  ;;  %v2035_v34 = vunpack.c.l.b16 %v10393_v8  ;;  %v7678_v18 = vld [vmem:[%s12804_s3 + $0x104] sm:$0xf0] }
 0x2d4   :  { %v1934_v31 = vmax.f32 %v1844_v48, %v1850_v1  ;;  %v10417_v33 = vpop.f32.mrf.mxu3  ;;  %3110 = vmatpush.bf16.msra.mxu3 %v6280_v51  ;;  %3086 = vmatpush.bf16.msra.mxu1 %v6216_v0  ;;  %v6651_v51 = vld [vmem:[%s12804_s3 + $0x190] sm:$0xf]  ;;  %v1856_v61 = vmax.f32 %v12893_v23, 0.0  ;;  %v2036_v46 = vunpack.c.h.b16 %v10393_v8  ;;  %v6588_v48 = vor.u32 %v7680_v44, %v6587_v47 }
 0x2d5   :  { %v2903_v3 = vpop.f32.mrf.mxu1  ;;  %3710 = vmatpush.bf16.msrb.mxu0 %v6596_v56  ;;  %v6652_v1 = vor.u32 %v7696_v25, %v6651_v51  ;;  %v6200_v8 = vor.u32 %v7773_v37, %v6197_v4  ;;  %v1904_v26 = vmax.f32 %v1784_v45, %v1790_v32  ;;  %v10474_v52 = vrot.slane %v10347_v15, 7  ;;  %v6571_v23 = vld [vmem:[%s12804_s3 + $0xf0] sm:$0xf]  ;;  %v7660_v4 = vld [vmem:[%s12804_s3 + $0x74] sm:$0xf0] }
 0x2d6   :  { %v1970_v14 = vmax.f32 %v1898_v39, %v1934_v31  ;;  %3734 = vmatpush.bf16.msrb.mxu2 %v6660_v11  ;;  %v1802_v31 = vmax.f32 %v10441_v13, 0.0  ;;  %v10481_v45 = vrot.slane %v10349_v28, 7  ;;  %v2149_v44 = vrot.slane %v10347_v15, 1  ;;  %v6507_v37 = vld [vmem:[%s12804_s3 + $0x70] sm:$0xf] }
 0x2d7   :  { %v1726_v0 = vpop.f32.mrf.mxu2  ;;  %v2152_v9 = vrot.slane %v10349_v28, 1  ;;  %v12894_v28 = vld [vmem:[#allocation35_spill] sm:$0xff] }
 0x2d8   :  { %v1994_v5 = vpack.c.bf16 %v1970_v14, %v1969_v54  ;;  %v1727_v21 = vadd.f32 %v1726_v0, %v1688_v6  ;;  %3111 = vmatpush.bf16.msra.mxu3 %v6272_v59  ;;  %3087 = vmatpush.bf16.msra.mxu1 %v6208_v20  ;;  %v1689_v6 = vpop.f32.mrf.mxu0  ;;  %v7694_v59 = vld [vmem:[%s12804_s3 + $0x184] sm:$0xf0]  ;;  %v6580_v14 = vor.u32 %v7678_v18, %v6579_v30 }
 0x2d9   :  { %3711 = vmatpush.bf16.msrb.mxu0 %v6588_v48  ;;  %v6644_v20 = vor.u32 %v7694_v59, %v6643_v43  ;;  %v1690_v25 = vadd.f32 %v1689_v6, %v10136_v19  ;;  %v6508_v30 = vor.u32 %v7660_v4, %v6507_v37  ;;  %v7674_v18 = vld [vmem:[%s12804_s3 + $0xe4] sm:$0xf0]  ;;  %v6499_v43 = vld [vmem:[%s12804_s3 + $0x60] sm:$0xf] }
 0x2da   :  { %v1862_v54 = vmax.f32 %v1727_v21, 0.0  ;;  %v2041_v57 = vunpack.c.l.b16 %v1994_v5  ;;  %v2042_v39 = vunpack.c.h.b16 %v1994_v5  ;;  %3735 = vmatpush.bf16.msrb.mxu2 %v6652_v1  ;;  %v6547_v4 = vld [vmem:[%s12804_s3 + $0xc0] sm:$0xf] }
 0x2dc   :  { %v1940_v56 = vmax.f32 %v1856_v61, %v1862_v54  ;;  %v2927_v11 = vpop.f32.mrf.mxu3  ;;  %v10476_v53 = vpack.c.b16 %v2041_v57, %v2035_v34  ;;  %v10478_v41 = vpack.c.b16 %v2042_v39, %v2036_v46  ;;  %3112 = vmatpush.bf16.msra.mxu3 %v6264_v27  ;;  %3088 = vmatpush.bf16.msra.mxu1 %v6200_v8  ;;  %v7676_v61 = vld [vmem:[%s12804_s3 + $0xf4] sm:$0xf0]  ;;  %v1796_v34 = vmax.f32 %v12894_v28, 0.0  ;;  %v6563_v8 = vld [vmem:[%s12804_s3 + $0xe0] sm:$0xf] }
 0x2dd   :  { %v10483_v47 = vadd.f32 %v2927_v11, %v2903_v3  ;;  %v6572_v15 = vor.u32 %v7676_v61, %v6571_v23  ;;  %3712 = vmatpush.bf16.msrb.mxu0 %v6580_v14  ;;  %v10529_v48 = vpop.f32.mrf.mxu1  ;;  %v7675_v28 = vld [vmem:[%s12804_s3 + $0xf4] sm:$0xf] }
 0x2de   :  { %v1976_v51 = vmax.f32 %v1904_v26, %v1940_v56  ;;  %2998 = vmatmul.bf16.gmra.mxu1 %v10476_v53  ;;  %3022 = vmatmul.bf16.gmra.mxu3 %v10478_v41  ;;  %v2088_v32 = vrot.slane %v10476_v53, 7  ;;  %v2090_v13 = vrot.slane %v10478_v41, 7  ;;  %v2150_v0 = vrot.slane %v10476_v53, 1 }
 0x2df   :  { %3142 = vmatmul.bf16.gmra.mxu0 %v10476_v53  ;;  %3166 = vmatmul.bf16.gmra.mxu2 %v10478_v41  ;;  %v1728_v19 = vpop.f32.mrf.mxu2  ;;  %v2153_v42 = vrot.slane %v10478_v41, 1  ;;  %v1910_v54 = vmax.f32 %v1796_v34, %v1802_v31  ;;  %v6564_v26 = vor.u32 %v7674_v18, %v6563_v8  ;;  %v7658_v31 = vld [vmem:[%s12804_s3 + $0x64] sm:$0xf0]  ;;  %v7656_v34 = vld [vmem:[%s12804_s3 + $0x54] sm:$0xf0] }
 0x2e0   :  { %v1997_v5 = vpack.c.bf16 %v1976_v51, %v1975_v17  ;;  %v1729_v3 = vadd.f32 %v1728_v19, %v1690_v25  ;;  %v10509_v21 = vsel %vm2073_vm1, %v10474_v52, %v2088_v32  ;;  %v10515_v27 = vsel %vm2073_vm1, %v10481_v45, %v2090_v13  ;;  %3736 = vmatpush.bf16.msrb.mxu2 %v6644_v20  ;;  %v12895_v17 = vld [vmem:[#allocation44_spill] sm:$0xff]  ;;  %v6555_v51 = vld [vmem:[%s12804_s3 + $0xd0] sm:$0xf]  ;;  %v7654_v53 = vld [vmem:[%s12804_s3 + $0x44] sm:$0xf0] }
 0x2e1   :  { %v10521_v63 = vsel %vm2136_vm2, %v2149_v44, %v2150_v0  ;;  %v10526_v7 = vsel %vm2136_vm2, %v2152_v9, %v2153_v42  ;;  %v1868_v46 = vmax.f32 %v12895_v17, 0.0  ;;  %3681 = vmatpush.bf16.msrb.mxu3 %v6572_v15  ;;  %3657 = vmatpush.bf16.msrb.mxu1 %v6508_v30  ;;  %v6500_v59 = vor.u32 %v7658_v31, %v6499_v43  ;;  %v7672_v25 = vld [vmem:[%s12804_s3 + $0xd4] sm:$0xf0]  ;;  %v7670_v30 = vld [vmem:[%s12804_s3 + $0xc4] sm:$0xf0] }
 0x2e2   :  { %v1874_v1 = vmax.f32 %v1729_v3, 0.0  ;;  %v2047_v11 = vunpack.c.l.b16 %v1997_v5  ;;  %v2048_v14 = vunpack.c.h.b16 %v1997_v5  ;;  %v6556_v61 = vor.u32 %v7672_v25, %v6555_v51  ;;  %v7659_v5 = vld [vmem:[%s12804_s3 + $0x74] sm:$0xf]  ;;  %v6509_v3 = vld [vmem:[%s12804_s3 + $0x78] sm:$0xf0] }
 0x2e3   :  { %v6512_v17 = vor.u32 %v7659_v5, %v6509_v3  ;;  %v6548_v8 = vor.u32 %v7670_v30, %v6547_v4  ;;  %v7657_v31 = vld [vmem:[%s12804_s3 + $0x64] sm:$0xf]  ;;  %v6557_v5 = vld [vmem:[%s12804_s3 + $0xd8] sm:$0xf0]  ;;  %v6549_v4 = vld [vmem:[%s12804_s3 + $0xc8] sm:$0xf0] }
 0x2e4   :  { %v1946_v57 = vmax.f32 %v1868_v46, %v1874_v1  ;;  %v10537_v39 = vpop.f32.mrf.mxu3  ;;  %v6573_v46 = vld [vmem:[%s12804_s3 + $0xf8] sm:$0xf0] }
 0x2e5   :  { %3682 = vmatpush.bf16.msrb.mxu3 %v6564_v26  ;;  %3658 = vmatpush.bf16.msrb.mxu1 %v6500_v59  ;;  %v2908_v19 = vpop.f32.mrf.mxu1  ;;  %v6576_v37 = vor.u32 %v7675_v28, %v6573_v46  ;;  %v7673_v59 = vld [vmem:[%s12804_s3 + $0xe4] sm:$0xf]  ;;  %v6475_v46 = vld [vmem:[%s12804_s3 + $0x30] sm:$0xf] }
 0x2e6   :  { %v1982_v6 = vmax.f32 %v1910_v54, %v1946_v57  ;;  %3801 = vmatpush.bf16.msra.mxu0 %v6512_v17 }
 0x2e7   :  { %3825 = vmatpush.bf16.msra.mxu2 %v6576_v37 }
 0x2e8   :  { %v2000_v56 = vpack.c.bf16 %v1982_v6, %v1981_v22  ;;  %v6501_v6 = vld [vmem:[%s12804_s3 + $0x68] sm:$0xf0] }
 0x2e9   :  { %3683 = vmatpush.bf16.msrb.mxu3 %v6556_v61  ;;  %v7655_v61 = vld [vmem:[%s12804_s3 + $0x54] sm:$0xf] }
 0x2ea   :  { %v2053_v20 = vunpack.c.l.b16 %v2000_v56  ;;  %v2054_v44 = vunpack.c.h.b16 %v2000_v56 }
 0x2eb   :  { %v2946_v23 = vpop.f32.mrf.mxu0 }
 0x2ec   :  { %v2932_v15 = vpop.f32.mrf.mxu3  ;;  %v2947_v55 = vadd.f32 %v2946_v23, %v10354_v38  ;;  %v2071_v60 = vpack.c.b16 %v2053_v20, %v2047_v11  ;;  %v2072_v22 = vpack.c.b16 %v2054_v44, %v2048_v14  ;;  %v6491_v38 = vld [vmem:[%s12804_s3 + $0x50] sm:$0xf]  ;;  %v6504_v20 = vor.u32 %v7657_v31, %v6501_v6  ;;  %v6565_v44 = vld [vmem:[%s12804_s3 + $0xe8] sm:$0xf0]  ;;  %v6483_v23 = vld [vmem:[%s12804_s3 + $0x40] sm:$0xf] }
 0x2ed   :  { %v10561_v9 = vadd.f32 %v2932_v15, %v2908_v19  ;;  %v6492_v1 = vor.u32 %v7656_v34, %v6491_v38  ;;  %3684 = vmatpush.bf16.msrb.mxu3 %v6548_v8  ;;  %v6568_v25 = vor.u32 %v7673_v59, %v6565_v44  ;;  %v6484_v41 = vor.u32 %v7654_v53, %v6483_v23  ;;  %v6493_v19 = vld [vmem:[%s12804_s3 + $0x58] sm:$0xf0]  ;;  %v7669_v34 = vld [vmem:[%s12804_s3 + $0xc4] sm:$0xf]  ;;  %v6531_v8 = vld [vmem:[%s12804_s3 + $0xa0] sm:$0xf] }
 0x2ee   :  { %3003 = vmatmul.bf16.gmra.mxu1 %v2071_v60  ;;  %3027 = vmatmul.bf16.gmra.mxu3 %v2072_v22  ;;  %v2100_v54 = vrot.slane %v2071_v60, 7  ;;  %v2102_v57 = vrot.slane %v2072_v22, 7  ;;  %v10587_v18 = vrot.slane %v2071_v60, 1  ;;  %v10589_v43 = vrot.slane %v2072_v22, 1  ;;  %v6541_v53 = vld [vmem:[%s12804_s3 + $0xb8] sm:$0xf0] }
 0x2ef   :  { %3147 = vmatmul.bf16.gmra.mxu0 %v2071_v60  ;;  %3171 = vmatmul.bf16.gmra.mxu2 %v2072_v22  ;;  %v2925_v15 = vadd.f32 %v10417_v33, %v10366_v49  ;;  %v6496_v60 = vor.u32 %v7655_v61, %v6493_v19  ;;  %v7671_v22 = vld [vmem:[%s12804_s3 + $0xd4] sm:$0xf]  ;;  %v7653_v49 = vld [vmem:[%s12804_s3 + $0x44] sm:$0xf]  ;;  %v6485_v33 = vld [vmem:[%s12804_s3 + $0x48] sm:$0xf0] }
 0x2f0   :  { %12896 = vst [vmem:[#allocation5_spill] sm:$0xff] %v10589_v43  ;;  %3659 = vmatpush.bf16.msrb.mxu1 %v6492_v1  ;;  %v10603_v56 = vsel %vm2073_vm1, %v2088_v32, %v2100_v54  ;;  %v10608_v11 = vsel %vm2073_vm1, %v2090_v13, %v2102_v57  ;;  %v10619_v51 = vsel %vm2136_vm2, %v2150_v0, %v10587_v18  ;;  %v6539_v0 = vld [vmem:[%s12804_s3 + $0xb0] sm:$0xf]  ;;  %v7652_v1 = vld [vmem:[%s12804_s3 + $0x34] sm:$0xf0]  ;;  %v10681_v6 = vrot.slane %v9792_v2, 7 }
 0x2f1   :  { %v2970_v26 = vpop.f32.mrf.mxu2  ;;  %v10625_v32 = vsel %vm2136_vm2, %v2153_v42, %v10589_v43  ;;  %3802 = vmatpush.bf16.msra.mxu0 %v6504_v20  ;;  %3826 = vmatpush.bf16.msra.mxu2 %v6568_v25  ;;  %v7668_v42 = vld [vmem:[%s12804_s3 + $0xb4] sm:$0xf0]  ;;  %v6560_v3 = vor.u32 %v7671_v22, %v6557_v5  ;;  %v6488_v37 = vor.u32 %v7653_v49, %v6485_v33  ;;  %v10689_v20 = vrot.slane %v9794_v58, 7  ;;  %v7667_v25 = vld [vmem:[%s12804_s3 + $0xb4] sm:$0xf] }
 0x2f2   :  { %v10610_v14 = vadd.f32 %v2970_v26, %v2947_v55  ;;  %v6540_v55 = vor.u32 %v7668_v42, %v6539_v0  ;;  %v6476_v54 = vor.u32 %v7652_v1, %v6475_v46  ;;  %v6552_v57 = vor.u32 %v7669_v34, %v6549_v4  ;;  %v7666_v26 = vld [vmem:[%s12804_s3 + $0xa4] sm:$0xf0]  ;;  %v6523_v5 = vld [vmem:[%s12804_s3 + $0x90] sm:$0xf]  ;;  %v7648_v1 = vld [vmem:[%s12804_s3 + $0x14] sm:$0xf0] }
 0x2f3   :  { %v2948_v13 = vpop.f32.mrf.mxu0  ;;  %v6532_v44 = vor.u32 %v7666_v26, %v6531_v8  ;;  %v6544_v0 = vor.u32 %v7667_v25, %v6541_v53  ;;  %v7650_v42 = vld [vmem:[%s12804_s3 + $0x24] sm:$0xf0]  ;;  %v6459_v46 = vld [vmem:[%s12804_s3 + $0x10] sm:$0xf]  ;;  %v2086_v53 = vrot.slane %v9874_v50, 7 }
 0x2f4   :  { %3660 = vmatpush.bf16.msrb.mxu1 %v6484_v41  ;;  %v2949_v28 = vadd.f32 %v2948_v13, %v2925_v15  ;;  %3685 = vmatpush.bf16.msrb.mxu3 %v6540_v55  ;;  %v7651_v13 = vld [vmem:[%s12804_s3 + $0x34] sm:$0xf]  ;;  %v6467_v41 = vld [vmem:[%s12804_s3 + $0x20] sm:$0xf]  ;;  %v7649_v15 = vld [vmem:[%s12804_s3 + $0x24] sm:$0xf]  ;;  %v6460_v4 = vor.u32 %v7648_v1, %v6459_v46 }
 0x2f5   :  { %3803 = vmatpush.bf16.msra.mxu0 %v6496_v60  ;;  %3827 = vmatpush.bf16.msra.mxu2 %v6560_v3  ;;  %v6468_v61 = vor.u32 %v7650_v42, %v6467_v41  ;;  %v6469_v55 = vld [vmem:[%s12804_s3 + $0x28] sm:$0xf0]  ;;  %v7665_v60 = vld [vmem:[%s12804_s3 + $0xa4] sm:$0xf]  ;;  %v7664_v3 = vld [vmem:[%s12804_s3 + $0x94] sm:$0xf0] }
 0x2f6   :  { %v6524_v33 = vor.u32 %v7664_v3, %v6523_v5  ;;  %v6451_v41 = vld [vmem:[%s12804_s3] sm:$0xf]  ;;  %v7646_v42 = vld [vmem:[%s12804_s3 + $0x4] sm:$0xf0] }
 0x2f8   :  { %3661 = vmatpush.bf16.msrb.mxu1 %v6476_v54  ;;  %3686 = vmatpush.bf16.msrb.mxu3 %v6532_v44  ;;  %v7663_v54 = vld [vmem:[%s12804_s3 + $0x94] sm:$0xf]  ;;  %v7662_v44 = vld [vmem:[%s12804_s3 + $0x84] sm:$0xf0] }
 0x2f9   :  { %v2972_v38 = vpop.f32.mrf.mxu2  ;;  %3804 = vmatpush.bf16.msra.mxu0 %v6488_v37  ;;  %3828 = vmatpush.bf16.msra.mxu2 %v6552_v57  ;;  %v7647_v37 = vld [vmem:[%s12804_s3 + $0x14] sm:$0xf]  ;;  %v6525_v57 = vld [vmem:[%s12804_s3 + $0x98] sm:$0xf0] }
 0x2fa   :  { %v10662_v17 = vadd.f32 %v2972_v38, %v2949_v28  ;;  %v6472_v28 = vor.u32 %v7649_v15, %v6469_v55  ;;  %v6533_v38 = vld [vmem:[%s12804_s3 + $0xa8] sm:$0xf0]  ;;  %v6528_v26 = vor.u32 %v7663_v54, %v6525_v57  ;;  %v7661_v15 = vld [vmem:[%s12804_s3 + $0x84] sm:$0xf] }
 0x2fb   :  { %v2951_v30 = vpop.f32.mrf.mxu0  ;;  %v6536_v34 = vor.u32 %v7665_v60, %v6533_v38  ;;  %v6517_v55 = vld [vmem:[%s12804_s3 + $0x88] sm:$0xf0] }
 0x2fc   :  { %v2952_v31 = vadd.f32 %v2951_v30, %v10483_v47  ;;  %v6477_v47 = vld [vmem:[%s12804_s3 + $0x38] sm:$0xf0]  ;;  %3662 = vmatpush.bf16.msrb.mxu1 %v6468_v61  ;;  %3687 = vmatpush.bf16.msrb.mxu3 %v6524_v33  ;;  %v6452_v61 = vor.u32 %v7646_v42, %v6451_v41  ;;  %v6520_v3 = vor.u32 %v7661_v15, %v6517_v55  ;;  %v7740_v33 = vld [vmem:[%s12804_s3 + $0x2f4] sm:$0xf0]  ;;  %v6811_v15 = vld [vmem:[%s12804_s3 + $0x2d0] sm:$0xf] }
 0x2fd   :  { %v6480_v23 = vor.u32 %v7651_v13, %v6477_v47  ;;  %3829 = vmatpush.bf16.msra.mxu2 %v6544_v0  ;;  %v6461_v30 = vld [vmem:[%s12804_s3 + $0x18] sm:$0xf0]  ;;  %v2930_v13 = vadd.f32 %v10537_v39, %v10529_v48  ;;  %v7645_v48 = vld [vmem:[%s12804_s3 + $0x4] sm:$0xf]  ;;  %v7736_v55 = vld [vmem:[%s12804_s3 + $0x2d4] sm:$0xf0] }
 0x2fe   :  { %3089 = vmatmul.bf16.vlgmr.msra.gmra.mxu1 %v9792_v2  ;;  %3113 = vmatmul.bf16.vlgmr.msra.gmra.mxu3 %v9794_v58  ;;  %v6464_v8 = vor.u32 %v7647_v37, %v6461_v30  ;;  %v6763_v37 = vld [vmem:[%s12804_s3 + $0x270] sm:$0xf]  ;;  %v2934_v30 = vpop.f32.mrf.mxu3 }
 0x2ff   :  { %6838 = vmatmul.msk.bf16.vlgmr.msrb.gmra.mxu0 %vm10684_vm3, %v10681_v6  ;;  %6840 = vmatmul.msk.bf16.vlgmr.msrb.gmra.mxu2 %vm10684_vm3, %v10689_v20 }
 0x300   :  { %3805 = vmatpush.bf16.msra.mxu0 %v6480_v23  ;;  %3663 = vmatpush.bf16.msrb.mxu1 %v6460_v4  ;;  %v2084_v23 = vrot.slane %v9872_v40, 7  ;;  %v7724_v4 = vld [vmem:[%s12804_s3 + $0x274] sm:$0xf0] }
 0x301   :  { %v2975_v19 = vpop.f32.mrf.mxu2  ;;  %3830 = vmatpush.bf16.msra.mxu2 %v6536_v34  ;;  %v6764_v57 = vor.u32 %v7724_v4, %v6763_v37  ;;  %v7720_v37 = vld [vmem:[%s12804_s3 + $0x254] sm:$0xf0] }
 0x302   :  { %v10726_v22 = vadd.f32 %v2975_v19, %v2952_v31  ;;  %v6515_v31 = vld [vmem:[%s12804_s3 + $0x80] sm:$0xf]  ;;  %v6453_v19 = vld [vmem:[%s12804_s3 + $0x8] sm:$0xf0]  ;;  %v10792_v38 = vsel %vm2073_vm1, %v10681_v6, %v2084_v23 }
 0x303   :  { %v2953_v49 = vpop.f32.mrf.mxu0  ;;  %v6516_v47 = vor.u32 %v7662_v44, %v6515_v31  ;;  %v6456_v5 = vor.u32 %v7645_v48, %v6453_v19  ;;  %v6755_v31 = vld [vmem:[%s12804_s3 + $0x260] sm:$0xf]  ;;  %v2098_v19 = vrot.slane %v9921_v62, 7 }
 0x304   :  { %3806 = vmatpush.bf16.msra.mxu0 %v6472_v28  ;;  %v2954_v25 = vadd.f32 %v2953_v49, %v2930_v13  ;;  %3664 = vmatpush.bf16.msrb.mxu1 %v6452_v61  ;;  %v10798_v49 = vsel %vm2073_vm1, %v10689_v20, %v2086_v53  ;;  %v7722_v13 = vld [vmem:[%s12804_s3 + $0x264] sm:$0xf0]  ;;  %v2096_v61 = vrot.slane %v9919_v29, 7 }
 0x305   :  { %3831 = vmatpush.bf16.msra.mxu2 %v6528_v26  ;;  %3688 = vmatpush.bf16.msrb.mxu3 %v6516_v47  ;;  %v7738_v26 = vld [vmem:[%s12804_s3 + $0x2e4] sm:$0xf0]  ;;  %v2910_v47 = vpop.f32.mrf.mxu1 }
 0x308   :  { %3807 = vmatpush.bf16.msra.mxu0 %v6464_v8  ;;  %v6819_v8 = vld [vmem:[%s12804_s3 + $0x2e0] sm:$0xf]  ;;  %3753 = vmatpush.bf16.msra.mxu1 %v6764_v57  ;;  %v7734_v57 = vld [vmem:[%s12804_s3 + $0x2c4] sm:$0xf0] }
 0x309   :  { %v2977_v0 = vpop.f32.mrf.mxu2  ;;  %3832 = vmatpush.bf16.msra.mxu2 %v6520_v3  ;;  %v6820_v44 = vor.u32 %v7738_v26, %v6819_v8  ;;  %v7723_v3 = vld [vmem:[%s12804_s3 + $0x274] sm:$0xf] }
 0x30a   :  { %v10774_v39 = vadd.f32 %v2977_v0, %v2954_v25  ;;  %v6756_v25 = vor.u32 %v7722_v13, %v6755_v31  ;;  %v2935_v0 = vadd.f32 %v2934_v30, %v2910_v47  ;;  %v6829_v30 = vld [vmem:[%s12804_s3 + $0x2f8] sm:$0xf0]  ;;  %v7721_v31 = vld [vmem:[%s12804_s3 + $0x264] sm:$0xf] }
 0x30b   :  { %v2956_v60 = vpop.f32.mrf.mxu0  ;;  %v7737_v13 = vld [vmem:[%s12804_s3 + $0x2e4] sm:$0xf] }
 0x30c   :  { %v2957_v28 = vadd.f32 %v2956_v60, %v10561_v9  ;;  %3808 = vmatpush.bf16.msra.mxu0 %v6456_v5  ;;  %v6827_v9 = vld [vmem:[%s12804_s3 + $0x2f0] sm:$0xf]  ;;  %3754 = vmatpush.bf16.msra.mxu1 %v6756_v25  ;;  %v6812_v5 = vor.u32 %v7736_v55, %v6811_v15 }
 0x30d   :  { %v6828_v34 = vor.u32 %v7740_v33, %v6827_v9  ;;  %v7739_v9 = vld [vmem:[%s12804_s3 + $0x2f4] sm:$0xf]  ;;  %v10852_v33 = vsel %vm2073_vm1, %v2084_v23, %v2096_v61  ;;  %v6739_v61 = vld [vmem:[%s12804_s3 + $0x240] sm:$0xf]  ;;  %v6795_v15 = vld [vmem:[%s12804_s3 + $0x2b0] sm:$0xf] }
 0x30e   :  { %3094 = vmatmul.bf16.gmra.mxu1 %v9872_v40  ;;  %3118 = vmatmul.bf16.gmra.mxu3 %v9874_v50 }
 0x30f   :  { %3718 = vmatmul.bf16.gmra.mxu0 %v10792_v38  ;;  %3742 = vmatmul.bf16.gmra.mxu2 %v10798_v49 }
 0x310   :  { %3777 = vmatpush.bf16.msra.mxu3 %v6828_v34  ;;  %v10857_v34 = vsel %vm2073_vm1, %v2086_v53, %v2098_v19  ;;  %v6832_v53 = vor.u32 %v7739_v9, %v6829_v30  ;;  %v7718_v19 = vld [vmem:[%s12804_s3 + $0x244] sm:$0xf0] }
 0x311   :  { %v2980_v46 = vpop.f32.mrf.mxu2  ;;  %v6740_v55 = vor.u32 %v7718_v19, %v6739_v61  ;;  %v6787_v61 = vld [vmem:[%s12804_s3 + $0x2a0] sm:$0xf]  ;;  %v7730_v19 = vld [vmem:[%s12804_s3 + $0x2a4] sm:$0xf0] }
 0x312   :  { %v10808_v1 = vadd.f32 %v2980_v46, %v2957_v28  ;;  %v6765_v28 = vld [vmem:[%s12804_s3 + $0x278] sm:$0xf0]  ;;  %v6747_v46 = vld [vmem:[%s12804_s3 + $0x250] sm:$0xf]  ;;  %3921 = vmatpush.bf16.msrb.mxu2 %v6832_v53  ;;  %v6741_v53 = vld [vmem:[%s12804_s3 + $0x248] sm:$0xf0] }
 0x313   :  { %v2958_v54 = vpop.f32.mrf.mxu0  ;;  %v6768_v4 = vor.u32 %v7723_v3, %v6765_v28  ;;  %v6748_v23 = vor.u32 %v7720_v37, %v6747_v46  ;;  %v6749_v3 = vld [vmem:[%s12804_s3 + $0x258] sm:$0xf0]  ;;  %v7735_v46 = vld [vmem:[%s12804_s3 + $0x2d4] sm:$0xf] }
 0x314   :  { %3778 = vmatpush.bf16.msra.mxu3 %v6820_v44  ;;  %v2959_v41 = vadd.f32 %v2958_v54, %v2935_v0  ;;  %v6803_v54 = vld [vmem:[%s12804_s3 + $0x2c0] sm:$0xf]  ;;  %v6757_v44 = vld [vmem:[%s12804_s3 + $0x268] sm:$0xf0]  ;;  %v6813_v37 = vld [vmem:[%s12804_s3 + $0x2d8] sm:$0xf0] }
 0x315   :  { %3897 = vmatpush.bf16.msrb.mxu0 %v6768_v4  ;;  %v6804_v8 = vor.u32 %v7734_v57, %v6803_v54  ;;  %3755 = vmatpush.bf16.msra.mxu1 %v6748_v23  ;;  %v6760_v25 = vor.u32 %v7721_v31, %v6757_v44  ;;  %v6821_v0 = vld [vmem:[%s12804_s3 + $0x2e8] sm:$0xf0]  ;;  %v6816_v4 = vor.u32 %v7735_v46, %v6813_v37  ;;  %v7717_v23 = vld [vmem:[%s12804_s3 + $0x244] sm:$0xf]  ;;  %v6723_v46 = vld [vmem:[%s12804_s3 + $0x220] sm:$0xf] }
 0x316   :  { %v7733_v54 = vld [vmem:[%s12804_s3 + $0x2c4] sm:$0xf]  ;;  %v6744_v31 = vor.u32 %v7717_v23, %v6741_v53  ;;  %v6805_v44 = vld [vmem:[%s12804_s3 + $0x2c8] sm:$0xf0]  ;;  %v7714_v37 = vld [vmem:[%s12804_s3 + $0x224] sm:$0xf0] }
 0x317   :  { %v7713_v23 = vld [vmem:[%s12804_s3 + $0x224] sm:$0xf]  ;;  %v6725_v53 = vld [vmem:[%s12804_s3 + $0x228] sm:$0xf0] }
 0x318   :  { %3779 = vmatpush.bf16.msra.mxu3 %v6812_v5  ;;  %v7719_v5 = vld [vmem:[%s12804_s3 + $0x254] sm:$0xf] }
 0x319   :  { %v2982_v42 = vpop.f32.mrf.mxu2  ;;  %3898 = vmatpush.bf16.msrb.mxu0 %v6760_v25  ;;  %v6752_v9 = vor.u32 %v7719_v5, %v6749_v3  ;;  %3756 = vmatpush.bf16.msra.mxu1 %v6740_v55  ;;  %v7715_v55 = vld [vmem:[%s12804_s3 + $0x234] sm:$0xf] }
 0x31a   :  { %v10828_v48 = vadd.f32 %v2982_v42, %v2959_v41  ;;  %v6824_v42 = vor.u32 %v7737_v13, %v6821_v0  ;;  %v6808_v0 = vor.u32 %v7733_v54, %v6805_v44  ;;  %v7731_v5 = vld [vmem:[%s12804_s3 + $0x2b4] sm:$0xf]  ;;  %v7729_v54 = vld [vmem:[%s12804_s3 + $0x2a4] sm:$0xf]  ;;  %v6728_v44 = vor.u32 %v7713_v23, %v6725_v53 }
 0x31b   :  { %v3042_v60 = vpop.f32.mrf.mxu0  ;;  %v2080_v23 = vrot.slane %v9428_v12, 7  ;;  %v2082_v53 = vrot.slane %v9430_v10, 7 }
 0x31c   :  { %3780 = vmatpush.bf16.msra.mxu3 %v6804_v8  ;;  %3922 = vmatpush.bf16.msrb.mxu2 %v6824_v42  ;;  %v6731_v8 = vld [vmem:[%s12804_s3 + $0x230] sm:$0xf]  ;;  %v10935_v42 = vrot.slane %v9350_v36, 7 }
 0x31d   :  { %3899 = vmatpush.bf16.msrb.mxu0 %v6752_v9 }
 0x31e   :  { %3099 = vmatmul.bf16.gmra.mxu1 %v9919_v29  ;;  %3123 = vmatmul.bf16.gmra.mxu3 %v9921_v62 }
 0x31f   :  { %3723 = vmatmul.bf16.gmra.mxu0 %v10852_v33  ;;  %3747 = vmatmul.bf16.gmra.mxu2 %v10857_v34 }
 0x320   :  { %3923 = vmatpush.bf16.msrb.mxu2 %v6816_v4  ;;  %v6724_v4 = vor.u32 %v7714_v37, %v6723_v46  ;;  %v6771_v37 = vld [vmem:[%s12804_s3 + $0x280] sm:$0xf] }
 0x321   :  { %v3066_v26 = vpop.f32.mrf.mxu2  ;;  %3900 = vmatpush.bf16.msrb.mxu0 %v6744_v31  ;;  %v7728_v31 = vld [vmem:[%s12804_s3 + $0x294] sm:$0xf0] }
 0x322   :  { %v10885_v47 = vadd.f32 %v3066_v26, %v3042_v60  ;;  %v7732_v60 = vld [vmem:[%s12804_s3 + $0x2b4] sm:$0xf0] }
 0x323   :  { %v3044_v41 = vpop.f32.mrf.mxu0  ;;  %v6796_v28 = vor.u32 %v7732_v60, %v6795_v15  ;;  %v7716_v26 = vld [vmem:[%s12804_s3 + $0x234] sm:$0xf0]  ;;  %v6788_v15 = vor.u32 %v7730_v19, %v6787_v61  ;;  %v6733_v60 = vld [vmem:[%s12804_s3 + $0x238] sm:$0xf0] }
 0x324   :  { %v6732_v25 = vor.u32 %v7716_v26, %v6731_v8  ;;  %3924 = vmatpush.bf16.msrb.mxu2 %v6808_v0  ;;  %v6736_v3 = vor.u32 %v7715_v55, %v6733_v60  ;;  %v6779_v26 = vld [vmem:[%s12804_s3 + $0x290] sm:$0xf]  ;;  %v7711_v55 = vld [vmem:[%s12804_s3 + $0x214] sm:$0xf] }
 0x325   :  { %3781 = vmatpush.bf16.msra.mxu3 %v6796_v28  ;;  %v6797_v28 = vld [vmem:[%s12804_s3 + $0x2b8] sm:$0xf0]  ;;  %v6780_v61 = vor.u32 %v7728_v31, %v6779_v26  ;;  %v6707_v26 = vld [vmem:[%s12804_s3 + $0x200] sm:$0xf]  ;;  %v7710_v31 = vld [vmem:[%s12804_s3 + $0x204] sm:$0xf0] }
 0x326   :  { %3757 = vmatpush.bf16.msra.mxu1 %v6732_v25  ;;  %v6800_v9 = vor.u32 %v7731_v5, %v6797_v28  ;;  %3901 = vmatpush.bf16.msrb.mxu0 %v6736_v3  ;;  %v6789_v25 = vld [vmem:[%s12804_s3 + $0x2a8] sm:$0xf0]  ;;  %v6717_v5 = vld [vmem:[%s12804_s3 + $0x218] sm:$0xf0]  ;;  %v7727_v3 = vld [vmem:[%s12804_s3 + $0x294] sm:$0xf] }
 0x327   :  { %v6792_v19 = vor.u32 %v7729_v54, %v6789_v25  ;;  %v6781_v28 = vld [vmem:[%s12804_s3 + $0x298] sm:$0xf0] }
 0x328   :  { %3925 = vmatpush.bf16.msrb.mxu2 %v6800_v9  ;;  %v6720_v9 = vor.u32 %v7711_v55, %v6717_v5  ;;  %v6784_v46 = vor.u32 %v7727_v3, %v6781_v28  ;;  %v7707_v28 = vld [vmem:[%s12804_s3 + $0x1f4] sm:$0xf] }
 0x329   :  { %v3068_v30 = vpop.f32.mrf.mxu2  ;;  %3782 = vmatpush.bf16.msra.mxu3 %v6788_v15  ;;  %v7712_v15 = vld [vmem:[%s12804_s3 + $0x214] sm:$0xf0] }
 0x32a   :  { %v10923_v57 = vadd.f32 %v3068_v30, %v3044_v41  ;;  %v10938_v41 = vrot.slane %v9352_v24, 7  ;;  %3758 = vmatpush.bf16.msra.mxu1 %v6724_v4  ;;  %3902 = vmatpush.bf16.msrb.mxu0 %v6728_v44  ;;  %v7726_v4 = vld [vmem:[%s12804_s3 + $0x284] sm:$0xf0]  ;;  %v7709_v44 = vld [vmem:[%s12804_s3 + $0x204] sm:$0xf] }
 0x32b   :  { %v3047_v13 = vpop.f32.mrf.mxu0 }
 0x32c   :  { %3926 = vmatpush.bf16.msrb.mxu2 %v6792_v19  ;;  %v6709_v19 = vld [vmem:[%s12804_s3 + $0x208] sm:$0xf0]  ;;  %v2083_v3 = vsel %vm2073_vm1, %v10938_v41, %v2082_v53 }
 0x32d   :  { %3783 = vmatpush.bf16.msra.mxu3 %v6780_v61  ;;  %v6708_v61 = vor.u32 %v7710_v31, %v6707_v26  ;;  %v7705_v26 = vld [vmem:[%s12804_s3 + $0x1e4] sm:$0xf]  ;;  %v6693_v31 = vld [vmem:[%s12804_s3 + $0x1e8] sm:$0xf0] }
 0x32e   :  { %6834 = vmatmul.msk.bf16.vlgmr.msrb.gmra.mxu1 %vm10684_vm3, %v10935_v42  ;;  %6836 = vmatmul.msk.bf16.vlgmr.msrb.gmra.mxu3 %vm10684_vm3, %v10938_v41 }
 0x32f   :  { %6846 = vmatmul.msk.bf16.vlgmr.msra.gmra.mxu0 %vm10684_vm3, %v10935_v42  ;;  %6848 = vmatmul.msk.bf16.vlgmr.msra.gmra.mxu2 %vm10684_vm3, %v10938_v41  ;;  %v7691_v41 = vld [vmem:[%s12804_s3 + $0x174] sm:$0xf] }
 0x330   :  { %3903 = vmatpush.bf16.msrb.mxu0 %v6720_v9  ;;  %3927 = vmatpush.bf16.msrb.mxu2 %v6784_v46  ;;  %v6701_v9 = vld [vmem:[%s12804_s3 + $0x1f8] sm:$0xf0] }
 0x331   :  { %v3071_v30 = vpop.f32.mrf.mxu2  ;;  %v6704_v46 = vor.u32 %v7707_v28, %v6701_v9 }
 0x332   :  { %v10985_v8 = vadd.f32 %v3071_v30, %v3047_v13  ;;  %v6715_v13 = vld [vmem:[%s12804_s3 + $0x210] sm:$0xf]  ;;  %v6772_v30 = vor.u32 %v7726_v4, %v6771_v37  ;;  %v6637_v4 = vld [vmem:[%s12804_s3 + $0x178] sm:$0xf0] }
 0x333   :  { %v3049_v0 = vpop.f32.mrf.mxu0  ;;  %v6716_v60 = vor.u32 %v7712_v15, %v6715_v13  ;;  %v7725_v13 = vld [vmem:[%s12804_s3 + $0x284] sm:$0xf]  ;;  %v6773_v15 = vld [vmem:[%s12804_s3 + $0x288] sm:$0xf0] }
 0x334   :  { %3784 = vmatpush.bf16.msra.mxu3 %v6772_v30  ;;  %v6776_v5 = vor.u32 %v7725_v13, %v6773_v15 }
 0x335   :  { %3759 = vmatpush.bf16.msra.mxu1 %v6716_v60  ;;  %v6712_v60 = vor.u32 %v7709_v44, %v6709_v19  ;;  %v7689_v44 = vld [vmem:[%s12804_s3 + $0x164] sm:$0xf]  ;;  %v6629_v19 = vld [vmem:[%s12804_s3 + $0x168] sm:$0xf0] }
 0x336   :  { %3928 = vmatpush.bf16.msrb.mxu2 %v6776_v5  ;;  %v6632_v13 = vor.u32 %v7689_v44, %v6629_v19  ;;  %v7701_v19 = vld [vmem:[%s12804_s3 + $0x1c4] sm:$0xf] }
 0x337   :  { %3904 = vmatpush.bf16.msrb.mxu0 %v6712_v60  ;;  %v2094_v60 = vrot.slane %v9500_v35, 7 }
 0x338   :  { %3873 = vmatpush.bf16.msrb.mxu3 %v6704_v46 }
 0x339   :  { %v3073_v54 = vpop.f32.mrf.mxu2  ;;  %3760 = vmatpush.bf16.msra.mxu1 %v6708_v61  ;;  %v6696_v61 = vor.u32 %v7705_v26, %v6693_v31  ;;  %v7203_v26 = vld [vmem:[%s12804_s3 + $0x7f0] sm:$0xf]  ;;  %v7900_v31 = vld [vmem:[%s12804_s3 + $0x7f4] sm:$0xf0] }
 0x33a   :  { %v11031_v25 = vadd.f32 %v3073_v54, %v3049_v0  ;;  %v2081_v0 = vsel %vm2073_vm1, %v10935_v42, %v2080_v23  ;;  %v6640_v54 = vor.u32 %v7691_v41, %v6637_v4  ;;  %v2095_v4 = vsel %vm2073_vm1, %v2082_v53, %v2094_v60  ;;  %v7131_v60 = vld [vmem:[%s12804_s3 + $0x760] sm:$0xf] }
 0x33b   :  { %v3052_v55 = vpop.f32.mrf.mxu0 }
 0x33c   :  { %3874 = vmatpush.bf16.msrb.mxu3 %v6696_v61  ;;  %v7204_v61 = vor.u32 %v7900_v31, %v7203_v26 }
 0x33d   :  { %3849 = vmatpush.bf16.msrb.mxu1 %v6640_v54  ;;  %v7884_v54 = vld [vmem:[%s12804_s3 + $0x774] sm:$0xf0] }
 0x33e   :  { %3670 = vmatmul.bf16.gmra.mxu1 %v2081_v0  ;;  %3694 = vmatmul.bf16.gmra.mxu3 %v2083_v3 }
 0x33f   :  { %3814 = vmatmul.bf16.gmra.mxu0 %v2081_v0  ;;  %3838 = vmatmul.bf16.gmra.mxu2 %v2083_v3  ;;  %v7703_v0 = vld [vmem:[%s12804_s3 + $0x1d4] sm:$0xf]  ;;  %v6685_v3 = vld [vmem:[%s12804_s3 + $0x1d8] sm:$0xf0] }
 0x340   :  { %v6688_v9 = vor.u32 %v7703_v0, %v6685_v3  ;;  %4594 = vmatpush.bf16.msra.mxu2 %v7204_v61  ;;  %v7882_v0 = vld [vmem:[%s12804_s3 + $0x764] sm:$0xf0]  ;;  %v7195_v3 = vld [vmem:[%s12804_s3 + $0x7e0] sm:$0xf]  ;;  %v7880_v61 = vld [vmem:[%s12804_s3 + $0x754] sm:$0xf0] }
 0x341   :  { %v3076_v37 = vpop.f32.mrf.mxu2  ;;  %3850 = vmatpush.bf16.msrb.mxu1 %v6632_v13  ;;  %v6677_v13 = vld [vmem:[%s12804_s3 + $0x1c8] sm:$0xf0] }
 0x342   :  { %v11052_v42 = vadd.f32 %v3076_v37, %v3052_v55  ;;  %v2092_v55 = vrot.slane %v9498_v16, 7  ;;  %3875 = vmatpush.bf16.msrb.mxu3 %v6688_v9 }
 0x343   :  { %v3054_v30 = vpop.f32.mrf.mxu0 }
 0x344   :  { %v2093_v41 = vsel %vm2073_vm1, %v2080_v23, %v2092_v55  ;;  %v6621_v23 = vld [vmem:[%s12804_s3 + $0x158] sm:$0xf0] }
 0x349   :  { %v3078_v15 = vpop.f32.mrf.mxu2 }
 0x34a   :  { %v11074_v5 = vadd.f32 %v3078_v15, %v3054_v30  ;;  %v7139_v30 = vld [vmem:[%s12804_s3 + $0x770] sm:$0xf]  ;;  %v6680_v15 = vor.u32 %v7701_v19, %v6677_v13 }
 0x34b   :  { %v2994_v28 = vpop.f32.mrf.mxu1  ;;  %v7140_v53 = vor.u32 %v7884_v54, %v7139_v30 }
 0x34c   :  { %v2995_v46 = vadd.f32 %v2994_v28, %v10610_v14  ;;  %v11083_v37 = vpop.f32.mrf.mxu0  ;;  %v7687_v14 = vld [vmem:[%s12804_s3 + $0x154] sm:$0xf]  ;;  %3876 = vmatpush.bf16.msrb.mxu3 %v6680_v15  ;;  %v7187_v15 = vld [vmem:[%s12804_s3 + $0x7d0] sm:$0xf] }
 0x34d   :  { %v6624_v44 = vor.u32 %v7687_v14, %v6621_v23  ;;  %4570 = vmatpush.bf16.msra.mxu0 %v7140_v53  ;;  %v6613_v23 = vld [vmem:[%s12804_s3 + $0x148] sm:$0xf0]  ;;  %v7699_v53 = vld [vmem:[%s12804_s3 + $0x1b4] sm:$0xf] }
 0x34e   :  { %3675 = vmatmul.bf16.gmra.mxu1 %v2093_v41  ;;  %3699 = vmatmul.bf16.gmra.mxu3 %v2095_v4 }
 0x34f   :  { %3819 = vmatmul.bf16.gmra.mxu0 %v2093_v41  ;;  %3843 = vmatmul.bf16.gmra.mxu2 %v2095_v4  ;;  %v7132_v41 = vor.u32 %v7882_v0, %v7131_v60  ;;  %v7898_v4 = vld [vmem:[%s12804_s3 + $0x7e4] sm:$0xf0] }
 0x350   :  { %3851 = vmatpush.bf16.msrb.mxu1 %v6624_v44  ;;  %v7196_v54 = vor.u32 %v7898_v4, %v7195_v3  ;;  %v7123_v44 = vld [vmem:[%s12804_s3 + $0x750] sm:$0xf]  ;;  %v7115_v3 = vld [vmem:[%s12804_s3 + $0x740] sm:$0xf] }
 0x351   :  { %v3018_v55 = vpop.f32.mrf.mxu3  ;;  %4571 = vmatpush.bf16.msra.mxu0 %v7132_v41  ;;  %v7124_v13 = vor.u32 %v7880_v61, %v7123_v44  ;;  %v7878_v41 = vld [vmem:[%s12804_s3 + $0x744] sm:$0xf0]  ;;  %v7179_v4 = vld [vmem:[%s12804_s3 + $0x7c0] sm:$0xf] }
 0x352   :  { %v11120_v28 = vadd.f32 %v3018_v55, %v2995_v46  ;;  %v11122_v9 = vpop.f32.mrf.mxu2  ;;  %v7685_v46 = vld [vmem:[%s12804_s3 + $0x144] sm:$0xf]  ;;  %4595 = vmatpush.bf16.msra.mxu2 %v7196_v54  ;;  %v7896_v55 = vld [vmem:[%s12804_s3 + $0x7d4] sm:$0xf0] }
 0x353   :  { %v2996_v30 = vpop.f32.mrf.mxu1  ;;  %v6616_v31 = vor.u32 %v7685_v46, %v6613_v23  ;;  %v7188_v60 = vor.u32 %v7896_v55, %v7187_v15  ;;  %v7683_v46 = vld [vmem:[%s12804_s3 + $0x134] sm:$0xf]  ;;  %v6605_v23 = vld [vmem:[%s12804_s3 + $0x138] sm:$0xf0]  ;;  %v6661_v15 = vld [vmem:[%s12804_s3 + $0x1a8] sm:$0xf0] }
 0x354   :  { %v2997_v26 = vadd.f32 %v2996_v30, %v10662_v17  ;;  %v11128_v14 = vpop.f32.mrf.mxu0  ;;  %v6669_v17 = vld [vmem:[%s12804_s3 + $0x1b8] sm:$0xf0]  ;;  %v6608_v44 = vor.u32 %v7683_v46, %v6605_v23  ;;  %v7681_v46 = vld [vmem:[%s12804_s3 + $0x124] sm:$0xf]  ;;  %v6597_v23 = vld [vmem:[%s12804_s3 + $0x128] sm:$0xf0] }
 0x355   :  { %v6672_v19 = vor.u32 %v7699_v53, %v6669_v17  ;;  %3852 = vmatpush.bf16.msrb.mxu1 %v6616_v31  ;;  %4572 = vmatpush.bf16.msra.mxu0 %v7124_v13  ;;  %v7116_v53 = vor.u32 %v7878_v41, %v7115_v3  ;;  %v7894_v31 = vld [vmem:[%s12804_s3 + $0x7c4] sm:$0xf0]  ;;  %v7697_v13 = vld [vmem:[%s12804_s3 + $0x1a4] sm:$0xf]  ;;  %v7892_v41 = vld [vmem:[%s12804_s3 + $0x7b4] sm:$0xf0] }
 0x356   :  { %4596 = vmatpush.bf16.msra.mxu2 %v7188_v60  ;;  %v7180_v61 = vor.u32 %v7894_v31, %v7179_v4  ;;  %v6664_v55 = vor.u32 %v7697_v13, %v6661_v15  ;;  %v7107_v60 = vld [vmem:[%s12804_s3 + $0x730] sm:$0xf]  ;;  %v7890_v15 = vld [vmem:[%s12804_s3 + $0x7a4] sm:$0xf0] }
 0x357   :  { %3877 = vmatpush.bf16.msrb.mxu3 %v6672_v19 }
 0x359   :  { %v3020_v0 = vpop.f32.mrf.mxu3  ;;  %4573 = vmatpush.bf16.msra.mxu0 %v7116_v53  ;;  %3853 = vmatpush.bf16.msrb.mxu1 %v6608_v44  ;;  %v6600_v53 = vor.u32 %v7681_v46, %v6597_v23  ;;  %v7091_v46 = vld [vmem:[%s12804_s3 + $0x710] sm:$0xf]  ;;  %v7872_v23 = vld [vmem:[%s12804_s3 + $0x714] sm:$0xf0] }
 0x35a   :  { %v11163_v30 = vadd.f32 %v3020_v0, %v2997_v26  ;;  %v11165_v54 = vpop.f32.mrf.mxu2  ;;  %4597 = vmatpush.bf16.msra.mxu2 %v7180_v61  ;;  %v7171_v0 = vld [vmem:[%s12804_s3 + $0x7b0] sm:$0xf] }
 0x35b   :  { %v2999_v17 = vpop.f32.mrf.mxu1  ;;  %v7172_v4 = vor.u32 %v7892_v41, %v7171_v0  ;;  %3878 = vmatpush.bf16.msrb.mxu3 %v6664_v55  ;;  %v7679_v41 = vld [vmem:[%s12804_s3 + $0x114] sm:$0xf] }
 0x35c   :  { %v3000_v26 = vadd.f32 %v2999_v17, %v10726_v22  ;;  %v11177_v19 = vpop.f32.mrf.mxu0  ;;  %v7876_v22 = vld [vmem:[%s12804_s3 + $0x734] sm:$0xf0]  ;;  %v7163_v17 = vld [vmem:[%s12804_s3 + $0x7a0] sm:$0xf] }
 0x35d   :  { %v7108_v3 = vor.u32 %v7876_v22, %v7107_v60  ;;  %3854 = vmatpush.bf16.msrb.mxu1 %v6600_v53  ;;  %v7164_v60 = vor.u32 %v7890_v15, %v7163_v17  ;;  %v7693_v17 = vld [vmem:[%s12804_s3 + $0x184] sm:$0xf]  ;;  %v6645_v15 = vld [vmem:[%s12804_s3 + $0x188] sm:$0xf0] }
 0x35e   :  { %6842 = vmatmul.msk.bf16.vlgmr.msra.gmra.mxu1 %vm10684_vm3, %v10474_v52  ;;  %6844 = vmatmul.msk.bf16.vlgmr.msra.gmra.mxu3 %vm10684_vm3, %v10481_v45 }
 0x35f   :  { %6854 = vmatmul.msk.bf16.vlgmr.msrb.gmra.mxu0 %vm10684_vm3, %v10474_v52  ;;  %6856 = vmatmul.msk.bf16.vlgmr.msrb.gmra.mxu2 %vm10684_vm3, %v10481_v45  ;;  %v7099_v52 = vld [vmem:[%s12804_s3 + $0x720] sm:$0xf]  ;;  %v7874_v45 = vld [vmem:[%s12804_s3 + $0x724] sm:$0xf0] }
 0x360   :  { %4574 = vmatpush.bf16.msra.mxu0 %v7108_v3  ;;  %4598 = vmatpush.bf16.msra.mxu2 %v7172_v4  ;;  %v7100_v13 = vor.u32 %v7874_v45, %v7099_v52  ;;  %v7695_v3 = vld [vmem:[%s12804_s3 + $0x194] sm:$0xf]  ;;  %v7155_v52 = vld [vmem:[%s12804_s3 + $0x790] sm:$0xf]  ;;  %v7888_v45 = vld [vmem:[%s12804_s3 + $0x794] sm:$0xf0] }
 0x361   :  { %v3023_v31 = vpop.f32.mrf.mxu3 }
 0x362   :  { %v11224_v44 = vadd.f32 %v3023_v31, %v3000_v26  ;;  %v11226_v61 = vpop.f32.mrf.mxu2  ;;  %v6653_v26 = vld [vmem:[%s12804_s3 + $0x198] sm:$0xf0]  ;;  %v7092_v31 = vor.u32 %v7872_v23, %v7091_v46  ;;  %v7870_v23 = vld [vmem:[%s12804_s3 + $0x704] sm:$0xf0] }
 0x363   :  { %v3001_v55 = vpop.f32.mrf.mxu1  ;;  %v6656_v4 = vor.u32 %v7695_v3, %v6653_v26  ;;  %v7677_v3 = vld [vmem:[%s12804_s3 + $0x104] sm:$0xf]  ;;  %v6581_v26 = vld [vmem:[%s12804_s3 + $0x108] sm:$0xf0] }
 0x364   :  { %v3002_v22 = vadd.f32 %v3001_v55, %v10774_v39  ;;  %v11232_v0 = vpop.f32.mrf.mxu0  ;;  %4575 = vmatpush.bf16.msra.mxu0 %v7100_v13  ;;  %4599 = vmatpush.bf16.msra.mxu2 %v7164_v60  ;;  %v6589_v39 = vld [vmem:[%s12804_s3 + $0x118] sm:$0xf0]  ;;  %v7156_v13 = vor.u32 %v7888_v45, %v7155_v52  ;;  %v6648_v55 = vor.u32 %v7693_v17, %v6645_v15  ;;  %v7075_v15 = vld [vmem:[%s12804_s3 + $0x6f0] sm:$0xf] }
 0x365   :  { %v6592_v53 = vor.u32 %v7679_v41, %v6589_v39  ;;  %3879 = vmatpush.bf16.msrb.mxu3 %v6656_v4  ;;  %v7083_v41 = vld [vmem:[%s12804_s3 + $0x700] sm:$0xf]  ;;  %v6584_v46 = vor.u32 %v7677_v3, %v6581_v26 }
 0x366   :  { %v7084_v45 = vor.u32 %v7870_v23, %v7083_v41 }
 0x367   :  { %3855 = vmatpush.bf16.msrb.mxu1 %v6592_v53  ;;  %v7147_v53 = vld [vmem:[%s12804_s3 + $0x780] sm:$0xf] }
 0x368   :  { %4576 = vmatpush.bf16.msra.mxu0 %v7092_v31  ;;  %4600 = vmatpush.bf16.msra.mxu2 %v7156_v13  ;;  %v7886_v31 = vld [vmem:[%s12804_s3 + $0x784] sm:$0xf0] }
 0x369   :  { %v3025_v60 = vpop.f32.mrf.mxu3  ;;  %3880 = vmatpush.bf16.msrb.mxu3 %v6648_v55  ;;  %v7868_v55 = vld [vmem:[%s12804_s3 + $0x6f4] sm:$0xf0] }
 0x36a   :  { %v11273_v4 = vadd.f32 %v3025_v60, %v3002_v22  ;;  %v11275_v39 = vpop.f32.mrf.mxu2  ;;  %v7148_v22 = vor.u32 %v7886_v31, %v7147_v53  ;;  %v7011_v53 = vld [vmem:[%s12804_s3 + $0x670] sm:$0xf] }
 0x36b   :  { %v3004_v52 = vpop.f32.mrf.mxu1  ;;  %3856 = vmatpush.bf16.msrb.mxu1 %v6584_v46 }
 0x36c   :  { %v3005_v17 = vadd.f32 %v3004_v52, %v10808_v1  ;;  %v11287_v13 = vpop.f32.mrf.mxu0  ;;  %4577 = vmatpush.bf16.msra.mxu0 %v7084_v45  ;;  %4601 = vmatpush.bf16.msra.mxu2 %v7148_v22  ;;  %v7076_v1 = vor.u32 %v7868_v55, %v7075_v15  ;;  %v7866_v52 = vld [vmem:[%s12804_s3 + $0x6e4] sm:$0xf0] }
 0x36d   :  { %v7850_v45 = vld [vmem:[%s12804_s3 + $0x664] sm:$0xf0] }
 0x36e   :  { %3766 = vmatmul.bf16.gmra.mxu1 %v10509_v21  ;;  %3790 = vmatmul.bf16.gmra.mxu3 %v10515_v27 }
 0x36f   :  { %3910 = vmatmul.bf16.gmra.mxu0 %v10509_v21  ;;  %3934 = vmatmul.bf16.gmra.mxu2 %v10515_v27  ;;  %v7852_v21 = vld [vmem:[%s12804_s3 + $0x674] sm:$0xf0]  ;;  %v7067_v27 = vld [vmem:[%s12804_s3 + $0x6e0] sm:$0xf] }
 0x370   :  { %4546 = vmatpush.bf16.msra.mxu3 %v7076_v1  ;;  %v7012_v31 = vor.u32 %v7852_v21, %v7011_v53  ;;  %v7068_v22 = vor.u32 %v7866_v52, %v7067_v27  ;;  %v7059_v21 = vld [vmem:[%s12804_s3 + $0x6d0] sm:$0xf]  ;;  %v7864_v27 = vld [vmem:[%s12804_s3 + $0x6d4] sm:$0xf0]  ;;  %v7851_v52 = vld [vmem:[%s12804_s3 + $0x674] sm:$0xf] }
 0x371   :  { %v3028_v60 = vpop.f32.mrf.mxu3 }
 0x372   :  { %v11299_v3 = vadd.f32 %v3028_v60, %v3005_v17  ;;  %v11301_v26 = vpop.f32.mrf.mxu2  ;;  %4522 = vmatpush.bf16.msra.mxu1 %v7012_v31  ;;  %v7060_v31 = vor.u32 %v7864_v27, %v7059_v21 }
 0x373   :  { %v3006_v41 = vpop.f32.mrf.mxu1 }
 0x374   :  { %v3007_v46 = vadd.f32 %v3006_v41, %v10828_v48  ;;  %v11304_v23 = vpop.f32.mrf.mxu0  ;;  %v7003_v48 = vld [vmem:[%s12804_s3 + $0x660] sm:$0xf]  ;;  %4547 = vmatpush.bf16.msra.mxu3 %v7068_v22  ;;  %v7867_v22 = vld [vmem:[%s12804_s3 + $0x6f4] sm:$0xf] }
 0x375   :  { %v7004_v17 = vor.u32 %v7850_v45, %v7003_v48  ;;  %v7013_v45 = vld [vmem:[%s12804_s3 + $0x678] sm:$0xf0] }
 0x377   :  { %4523 = vmatpush.bf16.msra.mxu1 %v7004_v17  ;;  %v7077_v17 = vld [vmem:[%s12804_s3 + $0x6f8] sm:$0xf0] }
 0x378   :  { %4548 = vmatpush.bf16.msra.mxu3 %v7060_v31  ;;  %v7849_v31 = vld [vmem:[%s12804_s3 + $0x664] sm:$0xf] }
 0x379   :  { %v3030_v15 = vpop.f32.mrf.mxu3 }
 0x37a   :  { %v11324_v55 = vadd.f32 %v3030_v15, %v3007_v46  ;;  %v11326_v1 = vpop.f32.mrf.mxu2  ;;  %v6995_v46 = vld [vmem:[%s12804_s3 + $0x650] sm:$0xf]  ;;  %v7016_v15 = vor.u32 %v7851_v52, %v7013_v45  ;;  %v7005_v52 = vld [vmem:[%s12804_s3 + $0x668] sm:$0xf0]  ;;  %v7865_v45 = vld [vmem:[%s12804_s3 + $0x6e4] sm:$0xf] }
 0x37b   :  { %v3090_v60 = vpop.f32.mrf.mxu1 }
 0x37c   :  { %v3091_v41 = vadd.f32 %v3090_v60, %v10885_v47  ;;  %v11329_v53 = vpop.f32.mrf.mxu0  ;;  %v7848_v47 = vld [vmem:[%s12804_s3 + $0x654] sm:$0xf0]  ;;  %v7080_v60 = vor.u32 %v7867_v22, %v7077_v17  ;;  %4666 = vmatpush.bf16.msrb.mxu0 %v7016_v15 }
 0x37d   :  { %v6996_v48 = vor.u32 %v7848_v47, %v6995_v46 }
 0x37e   :  { %3771 = vmatmul.bf16.gmra.mxu1 %v10603_v56  ;;  %3795 = vmatmul.bf16.gmra.mxu3 %v10608_v11 }
 0x37f   :  { %3915 = vmatmul.bf16.gmra.mxu0 %v10603_v56  ;;  %3939 = vmatmul.bf16.gmra.mxu2 %v10608_v11  ;;  %v7051_v56 = vld [vmem:[%s12804_s3 + $0x6c0] sm:$0xf]  ;;  %v7862_v11 = vld [vmem:[%s12804_s3 + $0x6c4] sm:$0xf0] }
 0x380   :  { %4524 = vmatpush.bf16.msra.mxu1 %v6996_v48  ;;  %v7052_v27 = vor.u32 %v7862_v11, %v7051_v56  ;;  %4690 = vmatpush.bf16.msrb.mxu2 %v7080_v60  ;;  %v7008_v48 = vor.u32 %v7849_v31, %v7005_v52  ;;  %v6987_v11 = vld [vmem:[%s12804_s3 + $0x640] sm:$0xf]  ;;  %v7043_v31 = vld [vmem:[%s12804_s3 + $0x6b0] sm:$0xf] }
 0x381   :  { %v3114_v21 = vpop.f32.mrf.mxu3 }
 0x382   :  { %v3115_v46 = vadd.f32 %v3114_v21, %v3091_v41  ;;  %v11365_v47 = vpop.f32.mrf.mxu2  ;;  %v7069_v41 = vld [vmem:[%s12804_s3 + $0x6e8] sm:$0xf0]  ;;  %4549 = vmatpush.bf16.msra.mxu3 %v7052_v27  ;;  %v7846_v21 = vld [vmem:[%s12804_s3 + $0x644] sm:$0xf0]  ;;  %v6997_v27 = vld [vmem:[%s12804_s3 + $0x658] sm:$0xf0]  ;;  %4667 = vmatpush.bf16.msrb.mxu0 %v7008_v48 }
 0x383   :  { %v3092_v22 = vpop.f32.mrf.mxu1  ;;  %v7072_v56 = vor.u32 %v7865_v45, %v7069_v41  ;;  %v6988_v52 = vor.u32 %v7846_v21, %v6987_v11  ;;  %v7061_v41 = vld [vmem:[%s12804_s3 + $0x6d8] sm:$0xf0]  ;;  %v12813_v48 = vrot.slane %v9872_v40, 1 }
 0x384   :  { %v3139_v17 = vadd.f32 %v11083_v37, %v3115_v46  ;;  %v3093_v15 = vadd.f32 %v3092_v22, %v10923_v57  ;;  %v11381_v60 = vpop.f32.mrf.mxu0  ;;  %v7860_v57 = vld [vmem:[%s12804_s3 + $0x6b4] sm:$0xf0]  ;;  %v7847_v37 = vld [vmem:[%s12804_s3 + $0x654] sm:$0xf] }
 0x385   :  { %4691 = vmatpush.bf16.msrb.mxu2 %v7072_v56  ;;  %v7044_v46 = vor.u32 %v7860_v57, %v7043_v31  ;;  %v7000_v45 = vor.u32 %v7847_v37, %v6997_v27  ;;  %v7863_v22 = vld [vmem:[%s12804_s3 + $0x6d4] sm:$0xf]  ;;  %4525 = vmatpush.bf16.msra.mxu1 %v6988_v52  ;;  %v7845_v37 = vld [vmem:[%s12804_s3 + $0x644] sm:$0xf]  ;;  %v2143_v27 = vrot.slane %v9792_v2, 1 }
 0x386   :  { %v11408_v11 = vadd.f32 %v11122_v9, %v3139_v17  ;;  %v7064_v21 = vor.u32 %v7863_v22, %v7061_v41  ;;  %v6989_v9 = vld [vmem:[%s12804_s3 + $0x648] sm:$0xf0]  ;;  %v7861_v17 = vld [vmem:[%s12804_s3 + $0x6c4] sm:$0xf]  ;;  %v2146_v22 = vrot.slane %v9794_v58, 1 }
 0x387   :  { %4550 = vmatpush.bf16.msra.mxu3 %v7044_v46  ;;  %4668 = vmatpush.bf16.msrb.mxu0 %v7000_v45  ;;  %v6979_v41 = vld [vmem:[%s12804_s3 + $0x630] sm:$0xf]  ;;  %v7844_v2 = vld [vmem:[%s12804_s3 + $0x634] sm:$0xf0]  ;;  %v11441_v56 = vsel %vm2136_vm2, %v2143_v27, %v12813_v48  ;;  %v7035_v58 = vld [vmem:[%s12804_s3 + $0x6a0] sm:$0xf] }
 0x388   :  { %v6981_v27 = vld [vmem:[%s12804_s3 + $0x638] sm:$0xf0]  ;;  %v6973_v48 = vld [vmem:[%s12804_s3 + $0x628] sm:$0xf0] }
 0x389   :  { %v3116_v43 = vpop.f32.mrf.mxu3  ;;  %4692 = vmatpush.bf16.msrb.mxu2 %v7064_v21  ;;  %v6992_v21 = vor.u32 %v7845_v37, %v6989_v9  ;;  %v12899_v37 = vrot.slane %v9874_v50, 1 }
 0x38a   :  { %v3117_v31 = vadd.f32 %v3116_v43, %v3093_v15  ;;  %v11412_v57 = vpop.f32.mrf.mxu2  ;;  %v7053_v43 = vld [vmem:[%s12804_s3 + $0x6c8] sm:$0xf0] }
 0x38b   :  { %v3095_v52 = vpop.f32.mrf.mxu1  ;;  %v11458_v9 = vsel %vm2136_vm2, %v2146_v22, %v12899_v37  ;;  %v7842_v22 = vld [vmem:[%s12804_s3 + $0x624] sm:$0xf0]  ;;  %4669 = vmatpush.bf16.msrb.mxu0 %v6992_v21  ;;  %v7841_v37 = vld [vmem:[%s12804_s3 + $0x624] sm:$0xf] }
 0x38c   :  { %v3141_v15 = vadd.f32 %v11128_v14, %v3117_v31  ;;  %v3096_v46 = vadd.f32 %v3095_v52, %v10985_v8  ;;  %v11429_v45 = vpop.f32.mrf.mxu0  ;;  %v6980_v14 = vor.u32 %v7844_v2, %v6979_v41  ;;  %v7056_v8 = vor.u32 %v7861_v17, %v7053_v43  ;;  %v7858_v31 = vld [vmem:[%s12804_s3 + $0x6a4] sm:$0xf0]  ;;  %v7843_v52 = vld [vmem:[%s12804_s3 + $0x634] sm:$0xf]  ;;  %v6971_v43 = vld [vmem:[%s12804_s3 + $0x620] sm:$0xf] }
 0x38d   :  { %v7036_v17 = vor.u32 %v7858_v31, %v7035_v58  ;;  %v7857_v21 = vld [vmem:[%s12804_s3 + $0x6a4] sm:$0xf] }
 0x38e   :  { %6850 = vmatmul.msk.bf16.vlgmr.msrb.gmra.mxu1 %vm10684_vm3, %v10681_v6  ;;  %6852 = vmatmul.msk.bf16.vlgmr.msrb.gmra.mxu3 %vm10684_vm3, %v10689_v20  ;;  %v7859_v6 = vld [vmem:[%s12804_s3 + $0x6b4] sm:$0xf]  ;;  %v11470_v59 = vadd.f32 %v11165_v54, %v3141_v15  ;;  %v7045_v20 = vld [vmem:[%s12804_s3 + $0x6b8] sm:$0xf0]  ;;  %v6984_v54 = vor.u32 %v7843_v52, %v6981_v27  ;;  %v6972_v15 = vor.u32 %v7842_v22, %v6971_v43  ;;  %v7027_v27 = vld [vmem:[%s12804_s3 + $0x690] sm:$0xf] }
 0x38f   :  { %4578 = vmatmul.bf16.vlgmr.msra.gmra.mxu0 %v11441_v56  ;;  %4602 = vmatmul.bf16.vlgmr.msra.gmra.mxu2 %v11458_v9  ;;  %v7048_v2 = vor.u32 %v7859_v6, %v7045_v20  ;;  %v7856_v6 = vld [vmem:[%s12804_s3 + $0x694] sm:$0xf0]  ;;  %v6976_v20 = vor.u32 %v7841_v37, %v6973_v48  ;;  %v6965_v48 = vld [vmem:[%s12804_s3 + $0x618] sm:$0xf0]  ;;  %v7019_v37 = vld [vmem:[%s12804_s3 + $0x680] sm:$0xf] }
 0x390   :  { %4526 = vmatpush.bf16.msra.mxu1 %v6980_v14  ;;  %4693 = vmatpush.bf16.msrb.mxu2 %v7056_v8  ;;  %v7037_v8 = vld [vmem:[%s12804_s3 + $0x6a8] sm:$0xf0]  ;;  %v7028_v43 = vor.u32 %v7856_v6, %v7027_v27  ;;  %v11535_v6 = vrot.slane %v9919_v29, 1  ;;  %v7837_v29 = vld [vmem:[%s12804_s3 + $0x604] sm:$0xf] }
 0x391   :  { %v3119_v41 = vpop.f32.mrf.mxu3  ;;  %4551 = vmatpush.bf16.msra.mxu3 %v7036_v17  ;;  %4670 = vmatpush.bf16.msrb.mxu0 %v6984_v54  ;;  %v7040_v22 = vor.u32 %v7857_v21, %v7037_v8  ;;  %v7839_v54 = vld [vmem:[%s12804_s3 + $0x614] sm:$0xf]  ;;  %v7854_v21 = vld [vmem:[%s12804_s3 + $0x684] sm:$0xf0] }
 0x392   :  { %v3120_v58 = vadd.f32 %v3119_v41, %v3096_v46  ;;  %v11483_v31 = vpop.f32.mrf.mxu2  ;;  %v7855_v41 = vld [vmem:[%s12804_s3 + $0x694] sm:$0xf]  ;;  %v7020_v8 = vor.u32 %v7854_v21, %v7019_v37 }
 0x393   :  { %v3097_v14 = vpop.f32.mrf.mxu1 }
 0x394   :  { %v3144_v46 = vadd.f32 %v11177_v19, %v3120_v58  ;;  %v3098_v17 = vadd.f32 %v3097_v14, %v11031_v25  ;;  %v11499_v52 = vpop.f32.mrf.mxu0  ;;  %4527 = vmatpush.bf16.msra.mxu1 %v6972_v15  ;;  %4694 = vmatpush.bf16.msrb.mxu2 %v7048_v2  ;;  %v6963_v25 = vld [vmem:[%s12804_s3 + $0x610] sm:$0xf]  ;;  %v7840_v19 = vld [vmem:[%s12804_s3 + $0x614] sm:$0xf0]  ;;  %v7029_v2 = vld [vmem:[%s12804_s3 + $0x698] sm:$0xf0]  ;;  %v6968_v14 = vor.u32 %v7839_v54, %v6965_v48 }
 0x395   :  { %v6964_v15 = vor.u32 %v7840_v19, %v6963_v25  ;;  %4552 = vmatpush.bf16.msra.mxu3 %v7028_v43  ;;  %4671 = vmatpush.bf16.msrb.mxu0 %v6976_v20  ;;  %v6955_v19 = vld [vmem:[%s12804_s3 + $0x600] sm:$0xf]  ;;  %v7838_v20 = vld [vmem:[%s12804_s3 + $0x604] sm:$0xf0] }
 0x396   :  { %v11526_v58 = vadd.f32 %v11226_v61, %v3144_v46  ;;  %v11538_v61 = vrot.slane %v9921_v62, 1  ;;  %v7032_v46 = vor.u32 %v7855_v41, %v7029_v2  ;;  %v6956_v62 = vor.u32 %v7838_v20, %v6955_v19 }
 0x398   :  { %4528 = vmatpush.bf16.msra.mxu1 %v6964_v15  ;;  %4695 = vmatpush.bf16.msrb.mxu2 %v7040_v22  ;;  %v7853_v22 = vld [vmem:[%s12804_s3 + $0x684] sm:$0xf]  ;;  %v7021_v15 = vld [vmem:[%s12804_s3 + $0x688] sm:$0xf0] }
 0x399   :  { %v3121_v27 = vpop.f32.mrf.mxu3  ;;  %4553 = vmatpush.bf16.msra.mxu3 %v7020_v8  ;;  %4672 = vmatpush.bf16.msrb.mxu0 %v6968_v14  ;;  %v7024_v21 = vor.u32 %v7853_v22, %v7021_v15  ;;  %v12900_v8 = vrot.slane %v9872_v40, 1  ;;  %v7331_v14 = vld [vmem:[%s12804_s3 + $0x8f0] sm:$0xf]  ;;  %v7323_v22 = vld [vmem:[%s12804_s3 + $0x8e0] sm:$0xf] }
 0x39a   :  { %v3122_v43 = vadd.f32 %v3121_v27, %v3098_v17  ;;  %v11540_v25 = vpop.f32.mrf.mxu2  ;;  %v6957_v17 = vld [vmem:[%s12804_s3 + $0x608] sm:$0xf0] }
 0x39b   :  { %v3100_v54 = vpop.f32.mrf.mxu1  ;;  %v6960_v37 = vor.u32 %v7837_v29, %v6957_v17  ;;  %v11570_v27 = vsel %vm2136_vm2, %v12900_v8, %v11535_v6 }
 0x39c   :  { %v3146_v48 = vadd.f32 %v11232_v0, %v3122_v43  ;;  %v3101_v41 = vadd.f32 %v3100_v54, %v11052_v42  ;;  %v11562_v2 = vpop.f32.mrf.mxu0  ;;  %4696 = vmatpush.bf16.msrb.mxu2 %v7032_v46  ;;  %4529 = vmatpush.bf16.msra.mxu1 %v6956_v62  ;;  %v12901_v42 = vrot.slane %v9874_v50, 1  ;;  %v7916_v62 = vld [vmem:[%s12804_s3 + $0x874] sm:$0xf0] }
 0x39d   :  { %4673 = vmatpush.bf16.msrb.mxu0 %v6960_v37 }
 0x39e   :  { %3862 = vmatmul.bf16.gmra.mxu1 %v10792_v38  ;;  %3886 = vmatmul.bf16.gmra.mxu3 %v10798_v49  ;;  %v11576_v0 = vsel %vm2136_vm2, %v12901_v42, %v11538_v61  ;;  %v7932_v38 = vld [vmem:[%s12804_s3 + $0x8f4] sm:$0xf0]  ;;  %v11585_v49 = vadd.f32 %v11275_v39, %v3146_v48  ;;  %v7267_v39 = vld [vmem:[%s12804_s3 + $0x870] sm:$0xf]  ;;  %v7914_v48 = vld [vmem:[%s12804_s3 + $0x864] sm:$0xf0] }
 0x39f   :  { %4583 = vmatmul.bf16.gmra.mxu0 %v11570_v27  ;;  %4607 = vmatmul.bf16.gmra.mxu2 %v11576_v0  ;;  %v7332_v40 = vor.u32 %v7932_v38, %v7331_v14  ;;  %v7268_v17 = vor.u32 %v7916_v62, %v7267_v39  ;;  %v7333_v62 = vld [vmem:[%s12804_s3 + $0x8f8] sm:$0xf0] }
 0x3a0   :  { %4697 = vmatpush.bf16.msrb.mxu2 %v7024_v21 }
 0x3a1   :  { %v3124_v50 = vpop.f32.mrf.mxu3  ;;  %4642 = vmatpush.bf16.msrb.mxu3 %v7332_v40  ;;  %4618 = vmatpush.bf16.msrb.mxu1 %v7268_v17  ;;  %v7307_v17 = vld [vmem:[%s12804_s3 + $0x8c0] sm:$0xf] }
 0x3a2   :  { %v3125_v46 = vadd.f32 %v3124_v50, %v3101_v41  ;;  %v11589_v43 = vpop.f32.mrf.mxu2 }
 0x3a3   :  { %v3102_v19 = vpop.f32.mrf.mxu1 }
 0x3a4   :  { %v3149_v20 = vadd.f32 %v11287_v13, %v3125_v46  ;;  %v3103_v29 = vadd.f32 %v3102_v19, %v11074_v5  ;;  %v11593_v54 = vpop.f32.mrf.mxu0  ;;  %v7930_v13 = vld [vmem:[%s12804_s3 + $0x8e4] sm:$0xf0]  ;;  %v7259_v5 = vld [vmem:[%s12804_s3 + $0x860] sm:$0xf]  ;;  %v7315_v46 = vld [vmem:[%s12804_s3 + $0x8d0] sm:$0xf] }
 0x3a5   :  { %v7324_v15 = vor.u32 %v7930_v13, %v7323_v22  ;;  %v7260_v37 = vor.u32 %v7914_v48, %v7259_v5  ;;  %v7926_v22 = vld [vmem:[%s12804_s3 + $0x8c4] sm:$0xf0] }
 0x3a6   :  { %v11614_v41 = vadd.f32 %v11301_v26, %v3149_v20  ;;  %v7928_v26 = vld [vmem:[%s12804_s3 + $0x8d4] sm:$0xf0] }
 0x3a7   :  { %4643 = vmatpush.bf16.msrb.mxu3 %v7324_v15  ;;  %4619 = vmatpush.bf16.msrb.mxu1 %v7260_v37  ;;  %v7316_v20 = vor.u32 %v7928_v26, %v7315_v46  ;;  %v7308_v15 = vor.u32 %v7926_v22, %v7307_v17  ;;  %v7913_v26 = vld [vmem:[%s12804_s3 + $0x864] sm:$0xf]  ;;  %v7317_v17 = vld [vmem:[%s12804_s3 + $0x8d8] sm:$0xf0] }
 0x3a9   :  { %v3126_v21 = vpop.f32.mrf.mxu3 }
 0x3aa   :  { %v3127_v8 = vadd.f32 %v3126_v21, %v3103_v29  ;;  %v11616_v42 = vpop.f32.mrf.mxu2 }
 0x3ab   :  { %v3666_v14 = vpop.f32.mrf.mxu1  ;;  %4644 = vmatpush.bf16.msrb.mxu3 %v7316_v20 }
 0x3ac   :  { %v3151_v38 = vadd.f32 %v11304_v23, %v3127_v8  ;;  %v3667_v40 = vadd.f32 %v3666_v14, %v11120_v28  ;;  %v3810_v50 = vpop.f32.mrf.mxu0  ;;  %v7251_v28 = vld [vmem:[%s12804_s3 + $0x850] sm:$0xf]  ;;  %v7912_v23 = vld [vmem:[%s12804_s3 + $0x854] sm:$0xf0] }
 0x3ad   :  { %v3811_v19 = vadd.f32 %v3810_v50, %v11408_v11  ;;  %v7269_v11 = vld [vmem:[%s12804_s3 + $0x878] sm:$0xf0] }
 0x3ae   :  { %3867 = vmatmul.bf16.gmra.mxu1 %v10852_v33  ;;  %3891 = vmatmul.bf16.gmra.mxu3 %v10857_v34  ;;  %v11636_v29 = vadd.f32 %v11326_v1, %v3151_v38  ;;  %v7252_v33 = vor.u32 %v7912_v23, %v7251_v28  ;;  %v7915_v34 = vld [vmem:[%s12804_s3 + $0x874] sm:$0xf] }
 0x3af   :  { %7339 = vmatmul.msk.bf16.gmra.mxu0 %vm2136_vm2, %v11535_v6  ;;  %7340 = vmatmul.msk.bf16.gmra.mxu2 %vm2136_vm2, %v11538_v61  ;;  %v7931_v1 = vld [vmem:[%s12804_s3 + $0x8f4] sm:$0xf]  ;;  %v7272_v39 = vor.u32 %v7915_v34, %v7269_v11  ;;  %v7299_v34 = vld [vmem:[%s12804_s3 + $0x8b0] sm:$0xf]  ;;  %v7924_v11 = vld [vmem:[%s12804_s3 + $0x8b4] sm:$0xf0] }
 0x3b0   :  { %4620 = vmatpush.bf16.msrb.mxu1 %v7252_v33  ;;  %v7336_v5 = vor.u32 %v7931_v1, %v7333_v62  ;;  %4645 = vmatpush.bf16.msrb.mxu3 %v7308_v15  ;;  %v7911_v1 = vld [vmem:[%s12804_s3 + $0x854] sm:$0xf] }
 0x3b1   :  { %v3690_v13 = vpop.f32.mrf.mxu3  ;;  %4762 = vmatpush.bf16.msra.mxu0 %v7272_v39  ;;  %v7300_v39 = vor.u32 %v7924_v11, %v7299_v34  ;;  %v7927_v62 = vld [vmem:[%s12804_s3 + $0x8d4] sm:$0xf]  ;;  %v7291_v11 = vld [vmem:[%s12804_s3 + $0x8a0] sm:$0xf] }
 0x3b2   :  { %v3691_v48 = vadd.f32 %v3690_v13, %v3667_v40  ;;  %v3834_v37 = vpop.f32.mrf.mxu2  ;;  %4786 = vmatpush.bf16.msra.mxu2 %v7336_v5  ;;  %v7261_v40 = vld [vmem:[%s12804_s3 + $0x868] sm:$0xf0]  ;;  %v2138_v13 = vrot.slane %v9428_v12, 1  ;;  %v2141_v5 = vrot.slane %v9430_v10, 1 }
 0x3b3   :  { %v11660_v21 = vadd.f32 %v3834_v37, %v3811_v19  ;;  %v3668_v8 = vpop.f32.mrf.mxu1  ;;  %v7929_v19 = vld [vmem:[%s12804_s3 + $0x8e4] sm:$0xf]  ;;  %v7264_v20 = vor.u32 %v7913_v26, %v7261_v40  ;;  %v2137_v26 = vrot.slane %v9350_v36, 1  ;;  %v2140_v40 = vrot.slane %v9352_v24, 1  ;;  %v7277_v12 = vld [vmem:[%s12804_s3 + $0x888] sm:$0xf0] }
 0x3b4   :  { %v3715_v14 = vadd.f32 %v11329_v53, %v3691_v48  ;;  %v3669_v38 = vadd.f32 %v3668_v8, %v11163_v30  ;;  %v3812_v50 = vpop.f32.mrf.mxu0  ;;  %v7325_v30 = vld [vmem:[%s12804_s3 + $0x8e8] sm:$0xf0]  ;;  %v7243_v53 = vld [vmem:[%s12804_s3 + $0x840] sm:$0xf]  ;;  %v7320_v48 = vor.u32 %v7927_v62, %v7317_v17  ;;  %4646 = vmatpush.bf16.msrb.mxu3 %v7300_v39  ;;  %v7909_v36 = vld [vmem:[%s12804_s3 + $0x844] sm:$0xf] }
 0x3b5   :  { %v3813_v46 = vadd.f32 %v3812_v50, %v11470_v59  ;;  %v7910_v59 = vld [vmem:[%s12804_s3 + $0x844] sm:$0xf0]  ;;  %v7328_v23 = vor.u32 %v7929_v19, %v7325_v30  ;;  %4763 = vmatpush.bf16.msra.mxu0 %v7264_v20  ;;  %v7907_v62 = vld [vmem:[%s12804_s3 + $0x834] sm:$0xf]  ;;  %v7237_v17 = vld [vmem:[%s12804_s3 + $0x838] sm:$0xf0] }
 0x3b6   :  { %v11684_v28 = vadd.f32 %v11365_v47, %v3715_v14  ;;  %v7244_v33 = vor.u32 %v7910_v59, %v7243_v53  ;;  %v7253_v47 = vld [vmem:[%s12804_s3 + $0x858] sm:$0xf0]  ;;  %v7235_v53 = vld [vmem:[%s12804_s3 + $0x830] sm:$0xf]  ;;  %v7245_v59 = vld [vmem:[%s12804_s3 + $0x848] sm:$0xf0] }
 0x3b7   :  { %4787 = vmatpush.bf16.msra.mxu2 %v7328_v23  ;;  %v7256_v15 = vor.u32 %v7911_v1, %v7253_v47  ;;  %v7925_v23 = vld [vmem:[%s12804_s3 + $0x8c4] sm:$0xf]  ;;  %v7922_v1 = vld [vmem:[%s12804_s3 + $0x8a4] sm:$0xf0] }
 0x3b8   :  { %4621 = vmatpush.bf16.msrb.mxu1 %v7244_v33  ;;  %v7248_v33 = vor.u32 %v7909_v36, %v7245_v59  ;;  %v7292_v47 = vor.u32 %v7922_v1, %v7291_v11 }
 0x3b9   :  { %v3692_v22 = vpop.f32.mrf.mxu3  ;;  %4764 = vmatpush.bf16.msra.mxu0 %v7256_v15  ;;  %v7240_v15 = vor.u32 %v7907_v62, %v7237_v17  ;;  %v7919_v62 = vld [vmem:[%s12804_s3 + $0x894] sm:$0xf] }
 0x3ba   :  { %v3693_v37 = vadd.f32 %v3692_v22, %v3669_v38  ;;  %v3836_v8 = vpop.f32.mrf.mxu2  ;;  %v7908_v38 = vld [vmem:[%s12804_s3 + $0x834] sm:$0xf0]  ;;  %v7923_v22 = vld [vmem:[%s12804_s3 + $0x8b4] sm:$0xf]  ;;  %4647 = vmatpush.bf16.msrb.mxu3 %v7292_v47  ;;  %v7221_v47 = vld [vmem:[%s12804_s3 + $0x818] sm:$0xf0] }
 0x3bb   :  { %v11706_v14 = vadd.f32 %v3836_v8, %v3813_v46  ;;  %v3671_v50 = vpop.f32.mrf.mxu1  ;;  %4788 = vmatpush.bf16.msra.mxu2 %v7320_v48  ;;  %v7236_v46 = vor.u32 %v7908_v38, %v7235_v53  ;;  %v7227_v48 = vld [vmem:[%s12804_s3 + $0x820] sm:$0xf]  ;;  %v7920_v53 = vld [vmem:[%s12804_s3 + $0x894] sm:$0xf0] }
 0x3bc   :  { %v3717_v19 = vadd.f32 %v11381_v60, %v3693_v37  ;;  %v3672_v20 = vadd.f32 %v3671_v50, %v11224_v44  ;;  %v3815_v30 = vpop.f32.mrf.mxu0  ;;  %v2139_v44 = vsel %vm2136_vm2, %v2137_v26, %v2138_v13  ;;  %v2142_v60 = vsel %vm2136_vm2, %v2140_v40, %v2141_v5  ;;  %v7906_v37 = vld [vmem:[%s12804_s3 + $0x824] sm:$0xf0] }
 0x3bd   :  { %v3816_v24 = vadd.f32 %v3815_v30, %v11526_v58  ;;  %v7309_v58 = vld [vmem:[%s12804_s3 + $0x8c8] sm:$0xf0]  ;;  %4622 = vmatpush.bf16.msrb.mxu1 %v7236_v46  ;;  %4765 = vmatpush.bf16.msra.mxu0 %v7248_v33  ;;  %v7228_v26 = vor.u32 %v7906_v37, %v7227_v48  ;;  %v7283_v30 = vld [vmem:[%s12804_s3 + $0x890] sm:$0xf] }
 0x3be   :  { %4530 = vmatmul.bf16.vlgmr.msra.gmra.mxu1 %v2139_v44  ;;  %4554 = vmatmul.bf16.vlgmr.msra.gmra.mxu3 %v2142_v60  ;;  %v7312_v34 = vor.u32 %v7925_v23, %v7309_v58  ;;  %v11744_v39 = vadd.f32 %v11412_v57, %v3717_v19  ;;  %v7301_v57 = vld [vmem:[%s12804_s3 + $0x8b8] sm:$0xf0]  ;;  %v7229_v23 = vld [vmem:[%s12804_s3 + $0x828] sm:$0xf0]  ;;  %v7219_v33 = vld [vmem:[%s12804_s3 + $0x810] sm:$0xf] }
 0x3bf   :  { %4674 = vmatmul.bf16.vlgmr.msrb.gmra.mxu0 %v2139_v44  ;;  %4698 = vmatmul.bf16.vlgmr.msrb.gmra.mxu2 %v2142_v60  ;;  %v7304_v50 = vor.u32 %v7923_v22, %v7301_v57  ;;  %v7284_v44 = vor.u32 %v7920_v53, %v7283_v30  ;;  %v7285_v22 = vld [vmem:[%s12804_s3 + $0x898] sm:$0xf0]  ;;  %v7918_v57 = vld [vmem:[%s12804_s3 + $0x884] sm:$0xf0] }
 0x3c0   :  { %4789 = vmatpush.bf16.msra.mxu2 %v7312_v34  ;;  %v7904_v34 = vld [vmem:[%s12804_s3 + $0x814] sm:$0xf0] }
 0x3c1   :  { %v3695_v8 = vpop.f32.mrf.mxu3  ;;  %4766 = vmatpush.bf16.msra.mxu0 %v7240_v15  ;;  %4623 = vmatpush.bf16.msrb.mxu1 %v7228_v26  ;;  %v7220_v1 = vor.u32 %v7904_v34, %v7219_v33  ;;  %v7275_v15 = vld [vmem:[%s12804_s3 + $0x880] sm:$0xf]  ;;  %v7288_v26 = vor.u32 %v7919_v62, %v7285_v22 }
 0x3c2   :  { %v3696_v40 = vadd.f32 %v3695_v8, %v3672_v20  ;;  %v3839_v19 = vpop.f32.mrf.mxu2  ;;  %v7905_v20 = vld [vmem:[%s12804_s3 + $0x824] sm:$0xf]  ;;  %4648 = vmatpush.bf16.msrb.mxu3 %v7284_v44  ;;  %v7276_v37 = vor.u32 %v7918_v57, %v7275_v15 }
 0x3c3   :  { %v11770_v38 = vadd.f32 %v3839_v19, %v3816_v24  ;;  %v3673_v36 = vpop.f32.mrf.mxu1  ;;  %v7921_v24 = vld [vmem:[%s12804_s3 + $0x8a4] sm:$0xf] }
 0x3c4   :  { %v3720_v60 = vadd.f32 %v11429_v45, %v3696_v40  ;;  %v3674_v46 = vadd.f32 %v3673_v36, %v11273_v4  ;;  %v3817_v59 = vpop.f32.mrf.mxu0  ;;  %4790 = vmatpush.bf16.msra.mxu2 %v7304_v50  ;;  %v7232_v4 = vor.u32 %v7905_v20, %v7229_v23  ;;  %v7293_v45 = vld [vmem:[%s12804_s3 + $0x8a8] sm:$0xf0]  ;;  %v11818_v50 = vrot.slane %v9500_v35, 1  ;;  %v7902_v35 = vld [vmem:[%s12804_s3 + $0x804] sm:$0xf0] }
 0x3c5   :  { %v3818_v58 = vadd.f32 %v3817_v59, %v11585_v49  ;;  %v7296_v11 = vor.u32 %v7921_v24, %v7293_v45  ;;  %v7903_v49 = vld [vmem:[%s12804_s3 + $0x814] sm:$0xf]  ;;  %4624 = vmatpush.bf16.msrb.mxu1 %v7220_v1  ;;  %v7213_v23 = vld [vmem:[%s12804_s3 + $0x808] sm:$0xf0]  ;;  %v7205_v24 = vld [vmem:[%s12804_s3 + $0x7f8] sm:$0xf0] }
 0x3c6   :  { %v11803_v17 = vadd.f32 %v11483_v31, %v3720_v60  ;;  %4767 = vmatpush.bf16.msra.mxu0 %v7232_v4  ;;  %v7224_v48 = vor.u32 %v7903_v49, %v7221_v47  ;;  %v11815_v31 = vrot.slane %v9498_v16, 1  ;;  %4649 = vmatpush.bf16.msrb.mxu3 %v7276_v37  ;;  %v7211_v16 = vld [vmem:[%s12804_s3 + $0x800] sm:$0xf]  ;;  %v7141_v1 = vld [vmem:[%s12804_s3 + $0x778] sm:$0xf0] }
 0x3c7   :  { %v7212_v20 = vor.u32 %v7902_v35, %v7211_v16  ;;  %v7897_v57 = vld [vmem:[%s12804_s3 + $0x7e4] sm:$0xf] }
 0x3c8   :  { %4791 = vmatpush.bf16.msra.mxu2 %v7296_v11  ;;  %v7883_v11 = vld [vmem:[%s12804_s3 + $0x774] sm:$0xf]  ;;  %v7881_v37 = vld [vmem:[%s12804_s3 + $0x764] sm:$0xf] }
 0x3c9   :  { %v3697_v8 = vpop.f32.mrf.mxu3  ;;  %4625 = vmatpush.bf16.msrb.mxu1 %v7212_v20  ;;  %v7144_v47 = vor.u32 %v7883_v11, %v7141_v1  ;;  %v7181_v20 = vld [vmem:[%s12804_s3 + $0x7c8] sm:$0xf0]  ;;  %v7875_v11 = vld [vmem:[%s12804_s3 + $0x734] sm:$0xf]  ;;  %v7109_v1 = vld [vmem:[%s12804_s3 + $0x738] sm:$0xf0] }
 0x3ca   :  { %v3698_v40 = vadd.f32 %v3697_v8, %v3674_v46  ;;  %v3841_v19 = vpop.f32.mrf.mxu2  ;;  %4768 = vmatpush.bf16.msra.mxu0 %v7224_v48  ;;  %v7901_v46 = vld [vmem:[%s12804_s3 + $0x804] sm:$0xf]  ;;  %v7197_v48 = vld [vmem:[%s12804_s3 + $0x7e8] sm:$0xf0] }
 0x3cb   :  { %v11820_v30 = vadd.f32 %v3841_v19, %v3818_v58  ;;  %v3676_v53 = vpop.f32.mrf.mxu1 }
 0x3cc   :  { %v3722_v36 = vadd.f32 %v11499_v52, %v3698_v40  ;;  %v3677_v44 = vadd.f32 %v3676_v53, %v11299_v3  ;;  %v3820_v60 = vpop.f32.mrf.mxu0  ;;  %v2156_v3 = vsel %vm2136_vm2, %v2138_v13, %v11815_v31  ;;  %v2158_v52 = vsel %vm2136_vm2, %v2141_v5, %v11818_v50  ;;  %4792 = vmatpush.bf16.msra.mxu2 %v7288_v26  ;;  %v7899_v5 = vld [vmem:[%s12804_s3 + $0x7f4] sm:$0xf] }
 0x3cd   :  { %v3821_v59 = vadd.f32 %v3820_v60, %v11614_v41  ;;  %v7917_v41 = vld [vmem:[%s12804_s3 + $0x884] sm:$0xf]  ;;  %v7216_v13 = vor.u32 %v7901_v46, %v7213_v23  ;;  %v7208_v4 = vor.u32 %v7899_v5, %v7205_v24  ;;  %4714 = vmatpush.bf16.msra.mxu1 %v7144_v47  ;;  %v7200_v26 = vor.u32 %v7897_v57, %v7197_v48 }
 0x3ce   :  { %4535 = vmatmul.bf16.gmra.mxu1 %v2156_v3  ;;  %4559 = vmatmul.bf16.gmra.mxu3 %v2158_v52  ;;  %v7280_v10 = vor.u32 %v7917_v41, %v7277_v12  ;;  %v11858_v58 = vadd.f32 %v11540_v25, %v3722_v36  ;;  %v7112_v47 = vor.u32 %v7875_v11, %v7109_v1 }
 0x3cf   :  { %4679 = vmatmul.bf16.gmra.mxu0 %v2156_v3  ;;  %4703 = vmatmul.bf16.gmra.mxu2 %v2158_v52  ;;  %v7125_v3 = vld [vmem:[%s12804_s3 + $0x758] sm:$0xf0] }
 0x3d0   :  { %4769 = vmatpush.bf16.msra.mxu0 %v7216_v13  ;;  %4793 = vmatpush.bf16.msra.mxu2 %v7280_v10  ;;  %v7117_v13 = vld [vmem:[%s12804_s3 + $0x748] sm:$0xf0]  ;;  %v7891_v10 = vld [vmem:[%s12804_s3 + $0x7b4] sm:$0xf] }
 0x3d1   :  { %v3700_v45 = vpop.f32.mrf.mxu3  ;;  %4738 = vmatpush.bf16.msra.mxu3 %v7208_v4  ;;  %v7173_v4 = vld [vmem:[%s12804_s3 + $0x7b8] sm:$0xf0] }
 0x3d2   :  { %v3701_v33 = vadd.f32 %v3700_v45, %v3677_v44  ;;  %v3844_v34 = vpop.f32.mrf.mxu2  ;;  %v7895_v44 = vld [vmem:[%s12804_s3 + $0x7d4] sm:$0xf] }
 0x3d3   :  { %v11866_v25 = vadd.f32 %v3844_v34, %v3821_v59  ;;  %v3678_v49 = vpop.f32.mrf.mxu1  ;;  %v7879_v59 = vld [vmem:[%s12804_s3 + $0x754] sm:$0xf] }
 0x3d4   :  { %v3725_v62 = vadd.f32 %v11562_v2, %v3701_v33  ;;  %v3679_v22 = vadd.f32 %v3678_v49, %v11324_v55  ;;  %v3822_v15 = vpop.f32.mrf.mxu0  ;;  %v7133_v55 = vld [vmem:[%s12804_s3 + $0x768] sm:$0xf0] }
 0x3d5   :  { %v3823_v8 = vadd.f32 %v3822_v15, %v11636_v29  ;;  %v7136_v2 = vor.u32 %v7881_v37, %v7133_v55  ;;  %4739 = vmatpush.bf16.msra.mxu3 %v7200_v26  ;;  %v7189_v29 = vld [vmem:[%s12804_s3 + $0x7d8] sm:$0xf0]  ;;  %v7165_v15 = vld [vmem:[%s12804_s3 + $0x7a8] sm:$0xf0] }
 0x3d6   :  { %v11884_v40 = vadd.f32 %v11589_v43, %v3725_v62  ;;  %v7192_v35 = vor.u32 %v7895_v44, %v7189_v29  ;;  %v7101_v37 = vld [vmem:[%s12804_s3 + $0x728] sm:$0xf0]  ;;  %v7093_v29 = vld [vmem:[%s12804_s3 + $0x718] sm:$0xf0] }
 0x3d7   :  { %4715 = vmatpush.bf16.msra.mxu1 %v7136_v2 }
 0x3d9   :  { %v3702_v19 = vpop.f32.mrf.mxu3  ;;  %4740 = vmatpush.bf16.msra.mxu3 %v7192_v35 }
 0x3da   :  { %v3703_v53 = vadd.f32 %v3702_v19, %v3679_v22  ;;  %v3846_v36 = vpop.f32.mrf.mxu2  ;;  %v7889_v22 = vld [vmem:[%s12804_s3 + $0x7a4] sm:$0xf] }
 0x3db   :  { %v11892_v60 = vadd.f32 %v3846_v36, %v3823_v8  ;;  %v3762_v16 = vpop.f32.mrf.mxu1  ;;  %v7168_v57 = vor.u32 %v7889_v22, %v7165_v15  ;;  %v7871_v36 = vld [vmem:[%s12804_s3 + $0x714] sm:$0xf] }
 0x3dc   :  { %v3727_v43 = vadd.f32 %v11593_v54, %v3703_v53  ;;  %v3763_v46 = vadd.f32 %v3762_v16, %v11684_v28  ;;  %v7128_v54 = vor.u32 %v7879_v59, %v7125_v3  ;;  %v7893_v28 = vld [vmem:[%s12804_s3 + $0x7c4] sm:$0xf]  ;;  %v11931_v5 = vpop.f32.mrf.mxu0  ;;  %v7157_v53 = vld [vmem:[%s12804_s3 + $0x798] sm:$0xf0]  ;;  %v7149_v16 = vld [vmem:[%s12804_s3 + $0x788] sm:$0xf0]  ;;  %v7096_v35 = vor.u32 %v7871_v36, %v7093_v29 }
 0x3dd   :  { %v7184_v23 = vor.u32 %v7893_v28, %v7181_v20 }
 0x3de   :  { %7337 = vmatmul.msk.bf16.gmra.mxu1 %vm2136_vm2, %v11815_v31  ;;  %7338 = vmatmul.msk.bf16.gmra.mxu3 %vm2136_vm2, %v11818_v50  ;;  %v11907_v52 = vadd.f32 %v11616_v42, %v3727_v43 }
 0x3df   :  { %7343 = vmatmul.msk.bf16.gmra.mxu0 %vm2136_vm2, %v11815_v31  ;;  %7344 = vmatmul.msk.bf16.gmra.mxu2 %vm2136_vm2, %v11818_v50  ;;  %v7877_v50 = vld [vmem:[%s12804_s3 + $0x744] sm:$0xf] }
 0x3e0   :  { %4716 = vmatpush.bf16.msra.mxu1 %v7128_v54  ;;  %4741 = vmatpush.bf16.msra.mxu3 %v7184_v23  ;;  %v7120_v24 = vor.u32 %v7877_v50, %v7117_v13  ;;  %v7869_v23 = vld [vmem:[%s12804_s3 + $0x704] sm:$0xf] }
 0x3e1   :  { %v3786_v41 = vpop.f32.mrf.mxu3 }
 0x3e2   :  { %v11919_v42 = vadd.f32 %v3786_v41, %v3763_v46  ;;  %v11936_v45 = vpop.f32.mrf.mxu2  ;;  %v7085_v41 = vld [vmem:[%s12804_s3 + $0x708] sm:$0xf0] }
 0x3e3   :  { %v3764_v12 = vpop.f32.mrf.mxu1 }
 0x3e4   :  { %v3765_v31 = vadd.f32 %v3764_v12, %v11744_v39  ;;  %v7176_v39 = vor.u32 %v7891_v10, %v7173_v4  ;;  %4717 = vmatpush.bf16.msra.mxu1 %v7120_v24  ;;  %v11955_v48 = vpop.f32.mrf.mxu0  ;;  %v7088_v12 = vor.u32 %v7869_v23, %v7085_v41 }
 0x3e6   :  { %4742 = vmatpush.bf16.msra.mxu3 %v7176_v39 }
 0x3e8   :  { %4718 = vmatpush.bf16.msra.mxu1 %v7112_v47 }
 0x3e9   :  { %v3788_v33 = vpop.f32.mrf.mxu3 }
 0x3ea   :  { %v11938_v34 = vadd.f32 %v3788_v33, %v3765_v31  ;;  %4743 = vmatpush.bf16.msra.mxu3 %v7168_v57  ;;  %v11965_v26 = vpop.f32.mrf.mxu2 }
 0x3eb   :  { %v3767_v49 = vpop.f32.mrf.mxu1 }
 0x3ec   :  { %v3768_v62 = vadd.f32 %v3767_v49, %v11803_v17  ;;  %v7873_v17 = vld [vmem:[%s12804_s3 + $0x724] sm:$0xf]  ;;  %v11988_v43 = vpop.f32.mrf.mxu0 }
 0x3ed   :  { %v7104_v8 = vor.u32 %v7873_v17, %v7101_v37 }
 0x3ee   :  { %4626 = vmatmul.bf16.vlgmr.msrb.gmra.mxu1 %v10521_v63  ;;  %4650 = vmatmul.bf16.vlgmr.msrb.gmra.mxu3 %v10526_v7 }
 0x3ef   :  { %4770 = vmatmul.bf16.vlgmr.msra.gmra.mxu0 %v10521_v63  ;;  %4794 = vmatmul.bf16.vlgmr.msra.gmra.mxu2 %v10526_v7  ;;  %v7887_v7 = vld [vmem:[%s12804_s3 + $0x794] sm:$0xf] }
 0x3f0   :  { %4719 = vmatpush.bf16.msra.mxu1 %v7104_v8  ;;  %v7160_v44 = vor.u32 %v7887_v7, %v7157_v53 }
 0x3f1   :  { %v3791_v55 = vpop.f32.mrf.mxu3 }
 0x3f2   :  { %v11967_v2 = vadd.f32 %v3791_v55, %v3768_v62  ;;  %4744 = vmatpush.bf16.msra.mxu3 %v7160_v44  ;;  %v11992_v54 = vpop.f32.mrf.mxu2 }
 0x3f3   :  { %v3769_v19 = vpop.f32.mrf.mxu1 }
 0x3f4   :  { %v3770_v63 = vadd.f32 %v3769_v19, %v11858_v58  ;;  %v7885_v58 = vld [vmem:[%s12804_s3 + $0x784] sm:$0xf]  ;;  %4720 = vmatpush.bf16.msra.mxu1 %v7096_v35  ;;  %v3913_v50 = vpop.f32.mrf.mxu0 }
 0x3f5   :  { %v7152_v59 = vor.u32 %v7885_v58, %v7149_v16 }
 0x3f7   :  { %4745 = vmatpush.bf16.msra.mxu3 %v7152_v59 }
 0x3f8   :  { %4721 = vmatpush.bf16.msra.mxu1 %v7088_v12 }
 0x3f9   :  { %v3793_v46 = vpop.f32.mrf.mxu3 }
 0x3fa   :  { %v11990_v3 = vadd.f32 %v3793_v46, %v3770_v63  ;;  %v3937_v24 = vpop.f32.mrf.mxu2 }
 0x3fb   :  { %v3772_v28 = vpop.f32.mrf.mxu1 }
 0x3fc   :  { %v3773_v20 = vadd.f32 %v3772_v28, %v11884_v40  ;;  %v3916_v11 = vpop.f32.mrf.mxu0 }
 0x3fe   :  { %4631 = vmatmul.bf16.gmra.mxu1 %v10619_v51  ;;  %4655 = vmatmul.bf16.gmra.mxu3 %v10625_v32 }
 0x3ff   :  { %4775 = vmatmul.bf16.gmra.mxu0 %v10619_v51  ;;  %4799 = vmatmul.bf16.gmra.mxu2 %v10625_v32  ;;  %v12902_v51 = vld [vmem:[#allocation5_spill] sm:$0xff] }
 0x401   :  { %v3796_v31 = vpop.f32.mrf.mxu3 }
 0x402   :  { %v12005_v40 = vadd.f32 %v3796_v31, %v3773_v20  ;;  %v3940_v32 = vpop.f32.mrf.mxu2 }
 0x403   :  { %v3774_v13 = vpop.f32.mrf.mxu1 }
 0x404   :  { %v3775_v10 = vadd.f32 %v3774_v13, %v11907_v52  ;;  %v3918_v49 = vpop.f32.mrf.mxu0 }
 0x409   :  { %v3798_v4 = vpop.f32.mrf.mxu3 }
 0x40a   :  { %v12008_v39 = vadd.f32 %v3798_v4, %v3775_v10  ;;  %v3942_v47 = vpop.f32.mrf.mxu2 }
 0x40b   :  { %v12010_v33 = vpop.f32.mrf.mxu1 }
 0x40c   :  { %v4579_v15 = vpop.f32.mrf.mxu0 }
 0x40e   :  { %7341 = vmatmul.msk.bf16.gmra.mxu1 %vm2136_vm2, %v10587_v18  ;;  %7342 = vmatmul.msk.bf16.gmra.mxu3 %vm2136_vm2, %v12902_v51 }
 0x40f   :  { %7347 = vmatmul.msk.bf16.gmra.mxu0 %vm2136_vm2, %v10587_v18  ;;  %7348 = vmatmul.msk.bf16.gmra.mxu2 %vm2136_vm2, %v12902_v51 }
 0x411   :  { %v12020_v52 = vpop.f32.mrf.mxu3 }
 0x412   :  { %v4603_v18 = vpop.f32.mrf.mxu2 }
 0x413   :  { %v12022_v1 = vpop.f32.mrf.mxu1 }
 0x414   :  { %v4581_v19 = vpop.f32.mrf.mxu0 }
 0x419   :  { %v12024_v62 = vpop.f32.mrf.mxu3 }
 0x41a   :  { %v4605_v36 = vpop.f32.mrf.mxu2 }
 0x41b   :  { %v12026_v22 = vpop.f32.mrf.mxu1 }
 0x41c   :  { %v4584_v16 = vpop.f32.mrf.mxu0 }
 0x41e   :  { %4722 = vmatmul.bf16.vlgmr.msra.gmra.mxu1 %v11441_v56  ;;  %4746 = vmatmul.bf16.vlgmr.msra.gmra.mxu3 %v11458_v9 }
 0x421   :  { %v12030_v57 = vpop.f32.mrf.mxu3 }
 0x422   :  { %v4608_v46 = vpop.f32.mrf.mxu2 }
 0x423   :  { %v3865_v17 = vpop.f32.mrf.mxu1 }
 0x424   :  { %v3866_v37 = vadd.f32 %v3865_v17, %v11820_v30 }
 0x429   :  { %v3889_v8 = vpop.f32.mrf.mxu3 }
 0x42a   :  { %v3890_v55 = vadd.f32 %v3889_v8, %v3866_v37 }
 0x42b   :  { %v3868_v63 = vpop.f32.mrf.mxu1 }
 0x42c   :  { %v3914_v7 = vadd.f32 %v3913_v50, %v3890_v55  ;;  %v3869_v53 = vadd.f32 %v3868_v63, %v11866_v25 }
 0x42e   :  { %v12034_v44 = vadd.f32 %v3937_v24, %v3914_v7  ;;  %4727 = vmatmul.bf16.gmra.mxu1 %v11570_v27  ;;  %4751 = vmatmul.bf16.gmra.mxu3 %v11576_v0  ;;  %v4586_v27 = vpop.f32.mrf.mxu0  ;;  %v4610_v0 = vpop.f32.mrf.mxu2 }
 0x431   :  { %v3892_v56 = vpop.f32.mrf.mxu3 }
 0x432   :  { %v3893_v9 = vadd.f32 %v3892_v56, %v3869_v53  ;;  %v4877_v56 = vld [vmem:[%s12806_s5 + $0x78] sm:$0xff] }
 0x433   :  { %v3870_v29 = vpop.f32.mrf.mxu1  ;;  %4918 = vmatpush.msrb.mxu3 %v4877_v56  ;;  %v7376_v56 = vld [vmem:[%s12806_s5 + $0x158] sm:$0xff] }
 0x434   :  { %v3917_v58 = vadd.f32 %v3916_v11, %v3893_v9  ;;  %v3871_v30 = vadd.f32 %v3870_v29, %v11892_v60  ;;  %v7363_v9 = vld [vmem:[%s12806_s5 + $0xf0] sm:$0xff] }
 0x435   :  { %v4876_v29 = vld [vmem:[%s12806_s5 + $0x70] sm:$0xff] }
 0x436   :  { %v12039_v35 = vadd.f32 %v3940_v32, %v3917_v58  ;;  %v4589_v13 = vpop.f32.mrf.mxu0  ;;  %v4613_v4 = vpop.f32.mrf.mxu2  ;;  %v7362_v58 = vld [vmem:[%s12806_s5 + $0xe8] sm:$0xff]  ;;  %4919 = vmatpush.msrb.mxu3 %v4876_v29  ;;  %v7393_v29 = vld [vmem:[%s12806_s5 + $0x1e0] sm:$0xff] }
 0x439   :  { %v3894_v59 = vpop.f32.mrf.mxu3 }
 0x43a   :  { %v3895_v28 = vadd.f32 %v3894_v59, %v3871_v30  ;;  %v7361_v59 = vld [vmem:[%s12806_s5 + $0xe0] sm:$0xff] }
 0x43b   :  { %v4531_v25 = vpop.f32.mrf.mxu1 }
 0x43c   :  { %v3919_v20 = vadd.f32 %v3918_v49, %v3895_v28  ;;  %v7380_v28 = vld [vmem:[%s12806_s5 + $0x178] sm:$0xff] }
 0x43d   :  { %4959 = vmatpush.msrb.mxu0 %v7380_v28  ;;  %v4868_v28 = vld [vmem:[%s12806_s5 + $0x30] sm:$0xff] }
 0x43e   :  { %v12041_v23 = vadd.f32 %v3942_v47, %v3919_v20  ;;  %7345 = vmatmul.msk.bf16.gmra.mxu1 %vm2136_vm2, %v11535_v6  ;;  %7346 = vmatmul.msk.bf16.gmra.mxu3 %vm2136_vm2, %v11538_v61  ;;  %v12051_v47 = vpop.f32.mrf.mxu0  ;;  %v12053_v37 = vpop.f32.mrf.mxu2  ;;  %v4874_v20 = vld [vmem:[%s12806_s5 + $0x60] sm:$0xff] }
 0x441   :  { %v4555_v41 = vpop.f32.mrf.mxu3 }
 0x442   :  { %v4556_v60 = vadd.f32 %v4555_v41, %v4531_v25 }
 0x443   :  { %v4533_v12 = vpop.f32.mrf.mxu1 }
 0x444   :  { %v4580_v31 = vadd.f32 %v4579_v15, %v4556_v60  ;;  %v7364_v15 = vld [vmem:[%s12806_s5 + $0xf8] sm:$0xff] }
 0x445   :  { %4898 = vmatpush.msrb.mxu1 %v7364_v15  ;;  %v7377_v15 = vld [vmem:[%s12806_s5 + $0x160] sm:$0xff] }
 0x446   :  { %v12047_v50 = vadd.f32 %v4603_v18, %v4580_v31  ;;  %v12060_v7 = vpop.f32.mrf.mxu0  ;;  %v7379_v31 = vld [vmem:[%s12806_s5 + $0x170] sm:$0xff] }
 0x447   :  { %4899 = vmatpush.msrb.mxu1 %v7363_v9  ;;  %4960 = vmatpush.msrb.mxu0 %v7379_v31 }
 0x449   :  { %v4557_v10 = vpop.f32.mrf.mxu3  ;;  %4900 = vmatpush.msrb.mxu1 %v7362_v58  ;;  %v7356_v58 = vld [vmem:[%s12806_s5 + $0xb8] sm:$0xff] }
 0x44a   :  { %v4558_v24 = vadd.f32 %v4557_v10, %v4533_v12  ;;  %v4873_v12 = vld [vmem:[%s12806_s5 + $0x58] sm:$0xff]  ;;  %v7359_v10 = vld [vmem:[%s12806_s5 + $0xd0] sm:$0xff] }
 0x44b   :  { %v4536_v11 = vpop.f32.mrf.mxu1  ;;  %4901 = vmatpush.msrb.mxu1 %v7361_v59 }
 0x44c   :  { %v4582_v51 = vadd.f32 %v4581_v19, %v4558_v24  ;;  %v4872_v24 = vld [vmem:[%s12806_s5 + $0x50] sm:$0xff] }
 0x44e   :  { %v12049_v32 = vadd.f32 %v4605_v36, %v4582_v51  ;;  %v12064_v36 = vpop.f32.mrf.mxu2  ;;  %v12095_v60 = vpop.f32.mrf.mxu0 }
 0x451   :  { %v4560_v6 = vpop.f32.mrf.mxu3 }
 0x452   :  { %v4561_v49 = vadd.f32 %v4560_v6, %v4536_v11  ;;  %v7395_v6 = vld [vmem:[%s12806_s5 + $0x1f0] sm:$0xff] }
 0x453   :  { %v4538_v61 = vpop.f32.mrf.mxu1 }
 0x454   :  { %v4585_v17 = vadd.f32 %v4584_v16, %v4561_v49  ;;  %v4875_v16 = vld [vmem:[%s12806_s5 + $0x68] sm:$0xff] }
 0x455   :  { %4920 = vmatpush.msrb.mxu3 %v4875_v16  ;;  %v7358_v49 = vld [vmem:[%s12806_s5 + $0xc8] sm:$0xff]  ;;  %v7375_v16 = vld [vmem:[%s12806_s5 + $0x150] sm:$0xff] }
 0x456   :  { %v12055_v8 = vadd.f32 %v4608_v46, %v4585_v17  ;;  %v12115_v11 = vpop.f32.mrf.mxu2 }
 0x457   :  { %4921 = vmatpush.msrb.mxu3 %v4874_v20  ;;  %v12170_v20 = vpop.f32.mrf.mxu0 }
 0x459   :  { %v4562_v18 = vpop.f32.mrf.mxu3  ;;  %4922 = vmatpush.msrb.mxu3 %v4873_v12  ;;  %v4867_v12 = vld [vmem:[%s12806_s5 + $0x28] sm:$0xff] }
 0x45a   :  { %v4563_v55 = vadd.f32 %v4562_v18, %v4538_v61  ;;  %v4871_v61 = vld [vmem:[%s12806_s5 + $0x48] sm:$0xff] }
 0x45b   :  { %v4541_v19 = vpop.f32.mrf.mxu1  ;;  %4923 = vmatpush.msrb.mxu3 %v4872_v24  ;;  %v7394_v18 = vld [vmem:[%s12806_s5 + $0x1e8] sm:$0xff]  ;;  %v7353_v24 = vld [vmem:[%s12806_s5 + $0xa0] sm:$0xff] }
 0x45c   :  { %v4587_v63 = vadd.f32 %v4586_v27, %v4563_v55  ;;  %v7357_v55 = vld [vmem:[%s12806_s5 + $0xc0] sm:$0xff] }
 0x45d   :  { %4924 = vmatpush.msrb.mxu3 %v4871_v61 }
 0x45e   :  { %v12062_v53 = vadd.f32 %v4610_v0, %v4587_v63  ;;  %v7360_v0 = vld [vmem:[%s12806_s5 + $0xd8] sm:$0xff]  ;;  %v4870_v63 = vld [vmem:[%s12806_s5 + $0x40] sm:$0xff] }
 0x45f   :  { %4902 = vmatpush.msrb.mxu1 %v7360_v0  ;;  %4925 = vmatpush.msrb.mxu3 %v4870_v63  ;;  %v7354_v0 = vld [vmem:[%s12806_s5 + $0xa8] sm:$0xff]  ;;  %v7351_v63 = vld [vmem:[%s12806_s5 + $0x90] sm:$0xff] }
 0x461   :  { %v4565_v30 = vpop.f32.mrf.mxu3  ;;  %4903 = vmatpush.msrb.mxu1 %v7359_v10  ;;  %v7390_v10 = vld [vmem:[%s12806_s5 + $0x1c8] sm:$0xff] }
 0x462   :  { %v4566_v46 = vadd.f32 %v4565_v30, %v4541_v19 }
 0x463   :  { %v4543_v25 = vpop.f32.mrf.mxu1  ;;  %4904 = vmatpush.msrb.mxu1 %v7358_v49  ;;  %v7372_v49 = vld [vmem:[%s12806_s5 + $0x138] sm:$0xff] }
 0x464   :  { %v4590_v27 = vadd.f32 %v4589_v13, %v4566_v46  ;;  %v7396_v13 = vld [vmem:[%s12806_s5 + $0x1f8] sm:$0xff] }
 0x465   :  { %5000 = vmatpush.msrb.mxu2 %v7396_v13  ;;  %4905 = vmatpush.msrb.mxu1 %v7357_v55  ;;  %v7392_v46 = vld [vmem:[%s12806_s5 + $0x1d8] sm:$0xff]  ;;  %v7373_v13 = vld [vmem:[%s12806_s5 + $0x140] sm:$0xff] }
 0x466   :  { %v12093_v41 = vadd.f32 %v4613_v4, %v4590_v27  ;;  %v7378_v4 = vld [vmem:[%s12806_s5 + $0x168] sm:$0xff]  ;;  %v7388_v55 = vld [vmem:[%s12806_s5 + $0x1b8] sm:$0xff] }
 0x467   :  { %4961 = vmatpush.msrb.mxu0 %v7378_v4  ;;  %5001 = vmatpush.msrb.mxu2 %v7395_v6  ;;  %v12190_v4 = vpop.f32.mrf.mxu2  ;;  %v4866_v6 = vld [vmem:[%s12806_s5 + $0x20] sm:$0xff] }
 0x468   :  { %4906 = vmatpush.msrb.mxu1 %v7356_v58  ;;  %v7350_v58 = vld [vmem:[%s12806_s5 + $0x88] sm:$0xff] }
 0x469   :  { %v4567_v51 = vpop.f32.mrf.mxu3  ;;  %4962 = vmatpush.msrb.mxu0 %v7377_v15  ;;  %5002 = vmatpush.msrb.mxu2 %v7394_v18  ;;  %v7352_v15 = vld [vmem:[%s12806_s5 + $0x98] sm:$0xff]  ;;  %v7371_v18 = vld [vmem:[%s12806_s5 + $0x130] sm:$0xff] }
 0x46a   :  { %v4568_v17 = vadd.f32 %v4567_v51, %v4543_v25  ;;  %v7374_v25 = vld [vmem:[%s12806_s5 + $0x148] sm:$0xff] }
 0x46b   :  { %v4627_v19 = vpop.f32.mrf.mxu1  ;;  %4963 = vmatpush.msrb.mxu0 %v7376_v56  ;;  %5003 = vmatpush.msrb.mxu2 %v7393_v29  ;;  %v4864_v56 = vld [vmem:[%s12806_s5 + $0x10] sm:$0xff] }
 0x46c   :  { %v4592_v9 = vadd.f32 %v12051_v47, %v4568_v17  ;;  %v4869_v47 = vld [vmem:[%s12806_s5 + $0x38] sm:$0xff]  ;;  %v4628_v59 = vadd.f32 %v4627_v19, %v12047_v50  ;;  %v7391_v50 = vld [vmem:[%s12806_s5 + $0x1d0] sm:$0xff]  ;;  %v7389_v17 = vld [vmem:[%s12806_s5 + $0x1c0] sm:$0xff] }
 0x46d   :  { %4926 = vmatpush.msrb.mxu3 %v4869_v47  ;;  %4964 = vmatpush.msrb.mxu0 %v7375_v16  ;;  %v4863_v47 = vld [vmem:[%s12806_s5 + $0x8] sm:$0xff] }
 0x46e   :  { %v12149_v30 = vadd.f32 %v12053_v37, %v4592_v9  ;;  %v7355_v37 = vld [vmem:[%s12806_s5 + $0xb0] sm:$0xff]  ;;  %5004 = vmatpush.msrb.mxu2 %v7392_v46  ;;  %v7370_v9 = vld [vmem:[%s12806_s5 + $0x128] sm:$0xff]  ;;  %v7369_v46 = vld [vmem:[%s12806_s5 + $0x120] sm:$0xff] }
 0x46f   :  { %4907 = vmatpush.msrb.mxu1 %v7355_v37  ;;  %4927 = vmatpush.msrb.mxu3 %v4868_v28  ;;  %v7349_v37 = vld [vmem:[%s12806_s5 + $0x80] sm:$0xff]  ;;  %v12244_v28 = vpop.f32.mrf.mxu0 }
 0x470   :  { %4965 = vmatpush.msrb.mxu0 %v7374_v25  ;;  %5005 = vmatpush.msrb.mxu2 %v7391_v50  ;;  %v7368_v50 = vld [vmem:[%s12806_s5 + $0x118] sm:$0xff] }
 0x471   :  { %v4651_v27 = vpop.f32.mrf.mxu3  ;;  %4908 = vmatpush.msrb.mxu1 %v7354_v0  ;;  %4928 = vmatpush.msrb.mxu3 %v4867_v12  ;;  %v7385_v12 = vld [vmem:[%s12806_s5 + $0x1a0] sm:$0xff] }
 0x472   :  { %v4652_v31 = vadd.f32 %v4651_v27, %v4628_v59  ;;  %4966 = vmatpush.msrb.mxu0 %v7373_v13  ;;  %5006 = vmatpush.msrb.mxu2 %v7390_v10  ;;  %v7386_v59 = vld [vmem:[%s12806_s5 + $0x1a8] sm:$0xff]  ;;  %v4862_v27 = vld [vmem:[%s12806_s5] sm:$0xff]  ;;  %v12261_v13 = vpop.f32.mrf.mxu2  ;;  %v7428_v10 = vld [vmem:[%s12806_s5 + $0x2f8] sm:$0xff] }
 0x473   :  { %v4629_v51 = vpop.f32.mrf.mxu1  ;;  %4909 = vmatpush.msrb.mxu1 %v7353_v24  ;;  %4929 = vmatpush.msrb.mxu3 %v4866_v6  ;;  %v7384_v24 = vld [vmem:[%s12806_s5 + $0x198] sm:$0xff] }
 0x474   :  { %v12199_v61 = vadd.f32 %v4652_v31, %v11919_v42  ;;  %4967 = vmatpush.msrb.mxu0 %v7372_v49  ;;  %5007 = vmatpush.msrb.mxu2 %v7389_v17  ;;  %v4865_v42 = vld [vmem:[%s12806_s5 + $0x18] sm:$0xff]  ;;  %v4630_v19 = vadd.f32 %v4629_v51, %v12049_v32  ;;  %v7387_v32 = vld [vmem:[%s12806_s5 + $0x1b0] sm:$0xff]  ;;  %v7366_v17 = vld [vmem:[%s12806_s5 + $0x108] sm:$0xff] }
 0x475   :  { %4910 = vmatpush.msrb.mxu1 %v7352_v15  ;;  %4930 = vmatpush.msrb.mxu3 %v4865_v42  ;;  %v7412_v31 = vld [vmem:[%s12806_s5 + $0x278] sm:$0xff]  ;;  %v7411_v51 = vld [vmem:[%s12806_s5 + $0x270] sm:$0xff] }
 0x476   :  { %4968 = vmatpush.msrb.mxu0 %v7371_v18  ;;  %5008 = vmatpush.msrb.mxu2 %v7388_v55  ;;  %v7427_v49 = vld [vmem:[%s12806_s5 + $0x2f0] sm:$0xff]  ;;  %v7426_v18 = vld [vmem:[%s12806_s5 + $0x2e8] sm:$0xff]  ;;  %v7365_v55 = vld [vmem:[%s12806_s5 + $0x100] sm:$0xff] }
 0x477   :  { %4911 = vmatpush.msrb.mxu1 %v7351_v63  ;;  %4931 = vmatpush.msrb.mxu3 %v4864_v56  ;;  %v7383_v15 = vld [vmem:[%s12806_s5 + $0x190] sm:$0xff]  ;;  %v7382_v63 = vld [vmem:[%s12806_s5 + $0x188] sm:$0xff]  ;;  %v7409_v56 = vld [vmem:[%s12806_s5 + $0x260] sm:$0xff] }
 0x478   :  { %4969 = vmatpush.msrb.mxu0 %v7370_v9  ;;  %5009 = vmatpush.msrb.mxu2 %v7387_v32  ;;  %v7444_v32 = vld [vmem:[%s12806_s5 + $0x378] sm:$0xff] }
 0x479   :  { %v4653_v29 = vpop.f32.mrf.mxu3  ;;  %4912 = vmatpush.msrb.mxu1 %v7350_v58  ;;  %4932 = vmatpush.msrb.mxu3 %v4863_v47  ;;  %v7381_v47 = vld [vmem:[%s12806_s5 + $0x180] sm:$0xff] }
 0x47a   :  { %v4654_v16 = vadd.f32 %v4653_v29, %v4630_v19  ;;  %4970 = vmatpush.msrb.mxu0 %v7369_v46  ;;  %5010 = vmatpush.msrb.mxu2 %v7386_v59  ;;  %v7425_v29 = vld [vmem:[%s12806_s5 + $0x2e0] sm:$0xff]  ;;  %v12315_v46 = vpop.f32.mrf.mxu0  ;;  %v7424_v59 = vld [vmem:[%s12806_s5 + $0x2d8] sm:$0xff] }
 0x47b   :  { %v4632_v25 = vpop.f32.mrf.mxu1  ;;  %4913 = vmatpush.msrb.mxu1 %v7349_v37  ;;  %4933 = vmatpush.msrb.mxu3 %v4862_v27  ;;  %v7460_v37 = vld [vmem:[%s12806_s5 + $0x3f8] sm:$0xff]  ;;  %v7407_v27 = vld [vmem:[%s12806_s5 + $0x250] sm:$0xff] }
 0x47c   :  { %v12253_v0 = vadd.f32 %v4654_v16, %v11938_v34  ;;  %4971 = vmatpush.msrb.mxu0 %v7368_v50  ;;  %5011 = vmatpush.msrb.mxu2 %v7385_v12  ;;  %v7367_v34 = vld [vmem:[%s12806_s5 + $0x110] sm:$0xff]  ;;  %v4633_v6 = vadd.f32 %v4632_v25, %v12055_v8  ;;  %v7410_v8 = vld [vmem:[%s12806_s5 + $0x268] sm:$0xff]  ;;  %v7408_v16 = vld [vmem:[%s12806_s5 + $0x258] sm:$0xff]  ;;  %v12326_v25 = vpop.f32.mrf.mxu2 }
 0x47d   :  { %5042 = vmatpush.msra.mxu1 %v7412_v31  ;;  %5083 = vmatpush.msra.mxu3 %v7428_v10  ;;  %v7423_v12 = vld [vmem:[%s12806_s5 + $0x2d0] sm:$0xff]  ;;  %v7442_v31 = vld [vmem:[%s12806_s5 + $0x368] sm:$0xff] }
 0x47e   :  { %4972 = vmatpush.msrb.mxu0 %v7367_v34  ;;  %5012 = vmatpush.msrb.mxu2 %v7384_v24  ;;  %v7459_v10 = vld [vmem:[%s12806_s5 + $0x3f0] sm:$0xff] }
 0x47f   :  { %5043 = vmatpush.msra.mxu1 %v7411_v51  ;;  %5084 = vmatpush.msra.mxu3 %v7427_v49  ;;  %v7422_v51 = vld [vmem:[%s12806_s5 + $0x2c8] sm:$0xff] }
 0x480   :  { %4973 = vmatpush.msrb.mxu0 %v7366_v17  ;;  %5013 = vmatpush.msrb.mxu2 %v7383_v15  ;;  %v7458_v49 = vld [vmem:[%s12806_s5 + $0x3e8] sm:$0xff]  ;;  %v7405_v15 = vld [vmem:[%s12806_s5 + $0x240] sm:$0xff] }
 0x481   :  { %v4656_v42 = vpop.f32.mrf.mxu3  ;;  %5044 = vmatpush.msra.mxu1 %v7410_v8  ;;  %5085 = vmatpush.msra.mxu3 %v7426_v18  ;;  %v7421_v8 = vld [vmem:[%s12806_s5 + $0x2c0] sm:$0xff]  ;;  %v7440_v18 = vld [vmem:[%s12806_s5 + $0x358] sm:$0xff] }
 0x482   :  { %v4657_v19 = vadd.f32 %v4656_v42, %v4633_v6  ;;  %4974 = vmatpush.msrb.mxu0 %v7365_v55  ;;  %5014 = vmatpush.msrb.mxu2 %v7382_v63  ;;  %v7441_v6 = vld [vmem:[%s12806_s5 + $0x360] sm:$0xff]  ;;  %v7439_v63 = vld [vmem:[%s12806_s5 + $0x350] sm:$0xff] }
 0x483   :  { %v4634_v9 = vpop.f32.mrf.mxu1  ;;  %5045 = vmatpush.msra.mxu1 %v7409_v56  ;;  %5086 = vmatpush.msra.mxu3 %v7425_v29  ;;  %v7457_v55 = vld [vmem:[%s12806_s5 + $0x3e0] sm:$0xff]  ;;  %v7456_v56 = vld [vmem:[%s12806_s5 + $0x3d8] sm:$0xff]  ;;  %v7403_v29 = vld [vmem:[%s12806_s5 + $0x230] sm:$0xff] }
 0x484   :  { %v12307_v58 = vadd.f32 %v4657_v19, %v11967_v2  ;;  %v7443_v2 = vld [vmem:[%s12806_s5 + $0x370] sm:$0xff]  ;;  %5125 = vmatpush.msra.mxu0 %v7444_v32  ;;  %5015 = vmatpush.msrb.mxu2 %v7381_v47  ;;  %v4635_v50 = vadd.f32 %v4634_v9, %v12062_v53  ;;  %v7406_v53 = vld [vmem:[%s12806_s5 + $0x248] sm:$0xff]  ;;  %v7420_v19 = vld [vmem:[%s12806_s5 + $0x2b8] sm:$0xff]  ;;  %v12380_v9 = vpop.f32.mrf.mxu0 }
 0x485   :  { %5046 = vmatpush.msra.mxu1 %v7408_v16  ;;  %5087 = vmatpush.msra.mxu3 %v7424_v59  ;;  %v7419_v47 = vld [vmem:[%s12806_s5 + $0x2b0] sm:$0xff]  ;;  %v7438_v16 = vld [vmem:[%s12806_s5 + $0x348] sm:$0xff] }
 0x486   :  { %5126 = vmatpush.msra.mxu0 %v7443_v2  ;;  %5166 = vmatpush.msra.mxu2 %v7460_v37  ;;  %v7455_v59 = vld [vmem:[%s12806_s5 + $0x3d0] sm:$0xff]  ;;  %v12395_v2 = vpop.f32.mrf.mxu2 }
 0x487   :  { %5047 = vmatpush.msra.mxu1 %v7407_v27  ;;  %5088 = vmatpush.msra.mxu3 %v7423_v12  ;;  %v7437_v12 = vld [vmem:[%s12806_s5 + $0x340] sm:$0xff] }
 0x488   :  { %5127 = vmatpush.msra.mxu0 %v7442_v31  ;;  %5167 = vmatpush.msra.mxu2 %v7459_v10  ;;  %v7454_v31 = vld [vmem:[%s12806_s5 + $0x3c8] sm:$0xff] }
 0x489   :  { %v4658_v34 = vpop.f32.mrf.mxu3  ;;  %5048 = vmatpush.msra.mxu1 %v7406_v53  ;;  %5089 = vmatpush.msra.mxu3 %v7422_v51  ;;  %v7436_v51 = vld [vmem:[%s12806_s5 + $0x338] sm:$0xff] }
 0x48a   :  { %v4659_v24 = vadd.f32 %v4658_v34, %v4635_v50  ;;  %5128 = vmatpush.msra.mxu0 %v7441_v6  ;;  %5168 = vmatpush.msra.mxu2 %v7458_v49  ;;  %v7418_v50 = vld [vmem:[%s12806_s5 + $0x2a8] sm:$0xff]  ;;  %v7401_v34 = vld [vmem:[%s12806_s5 + $0x220] sm:$0xff]  ;;  %v7416_v49 = vld [vmem:[%s12806_s5 + $0x298] sm:$0xff] }
 0x48b   :  { %v4637_v17 = vpop.f32.mrf.mxu1  ;;  %5049 = vmatpush.msra.mxu1 %v7405_v15  ;;  %5090 = vmatpush.msra.mxu3 %v7421_v8  ;;  %v7453_v6 = vld [vmem:[%s12806_s5 + $0x3c0] sm:$0xff]  ;;  %v7452_v15 = vld [vmem:[%s12806_s5 + $0x3b8] sm:$0xff]  ;;  %v7399_v8 = vld [vmem:[%s12806_s5 + $0x210] sm:$0xff] }
 0x48c   :  { %v12357_v42 = vadd.f32 %v4659_v24, %v11990_v3  ;;  %v7404_v3 = vld [vmem:[%s12806_s5 + $0x238] sm:$0xff]  ;;  %5129 = vmatpush.msra.mxu0 %v7440_v18  ;;  %5169 = vmatpush.msra.mxu2 %v7457_v55  ;;  %v4638_v32 = vadd.f32 %v4637_v17, %v12093_v41  ;;  %v7402_v41 = vld [vmem:[%s12806_s5 + $0x228] sm:$0xff]  ;;  %v7417_v24 = vld [vmem:[%s12806_s5 + $0x2a0] sm:$0xff] }
 0x48d   :  { %5050 = vmatpush.msra.mxu1 %v7404_v3  ;;  %5091 = vmatpush.msra.mxu3 %v7420_v19  ;;  %v7435_v17 = vld [vmem:[%s12806_s5 + $0x330] sm:$0xff]  ;;  %v7434_v3 = vld [vmem:[%s12806_s5 + $0x328] sm:$0xff] }
 0x48e   :  { %5130 = vmatpush.msra.mxu0 %v7439_v63  ;;  %5170 = vmatpush.msra.mxu2 %v7456_v56  ;;  %v7415_v55 = vld [vmem:[%s12806_s5 + $0x290] sm:$0xff]  ;;  %v4771_v63 = vpop.f32.mrf.mxu0 }
 0x48f   :  { %5051 = vmatpush.msra.mxu1 %v7403_v29  ;;  %5092 = vmatpush.msra.mxu3 %v7419_v47  ;;  %v7451_v19 = vld [vmem:[%s12806_s5 + $0x3b0] sm:$0xff]  ;;  %v7433_v47 = vld [vmem:[%s12806_s5 + $0x320] sm:$0xff] }
 0x490   :  { %5131 = vmatpush.msra.mxu0 %v7438_v16  ;;  %5171 = vmatpush.msra.mxu2 %v7455_v59  ;;  %v7450_v16 = vld [vmem:[%s12806_s5 + $0x3a8] sm:$0xff]  ;;  %v4795_v59 = vpop.f32.mrf.mxu2 }
 0x491   :  { %v4661_v37 = vpop.f32.mrf.mxu3  ;;  %5052 = vmatpush.msra.mxu1 %v7402_v41  ;;  %5093 = vmatpush.msra.mxu3 %v7418_v50  ;;  %v7397_v41 = vld [vmem:[%s12806_s5 + $0x200] sm:$0xff] }
 0x492   :  { %v4662_v27 = vadd.f32 %v4661_v37, %v4638_v32  ;;  %5132 = vmatpush.msra.mxu0 %v7437_v12  ;;  %5172 = vmatpush.msra.mxu2 %v7454_v31  ;;  %v7414_v32 = vld [vmem:[%s12806_s5 + $0x288] sm:$0xff]  ;;  %v7413_v12 = vld [vmem:[%s12806_s5 + $0x280] sm:$0xff]  ;;  %v7432_v31 = vld [vmem:[%s12806_s5 + $0x318] sm:$0xff] }
 0x493   :  { %v4639_v10 = vpop.f32.mrf.mxu1  ;;  %5053 = vmatpush.msra.mxu1 %v7401_v34  ;;  %5094 = vmatpush.msra.mxu3 %v7417_v24  ;;  %v7448_v34 = vld [vmem:[%s12806_s5 + $0x398] sm:$0xff] }
 0x494   :  { %v12413_v53 = vadd.f32 %v4662_v27, %v12005_v40  ;;  %v7400_v40 = vld [vmem:[%s12806_s5 + $0x218] sm:$0xff]  ;;  %5133 = vmatpush.msra.mxu0 %v7436_v51  ;;  %5173 = vmatpush.msra.mxu2 %v7453_v6  ;;  %v4640_v18 = vadd.f32 %v4639_v10, %v12149_v30  ;;  %v7398_v30 = vld [vmem:[%s12806_s5 + $0x208] sm:$0xff]  ;;  %v3859_v27 = vadd.f32 %v12010_v33, %v11660_v21  ;;  %v7449_v10 = vld [vmem:[%s12806_s5 + $0x3a0] sm:$0xff] }
 0x495   :  { %5054 = vmatpush.msra.mxu1 %v7400_v40  ;;  %5095 = vmatpush.msra.mxu3 %v7416_v49  ;;  %v7431_v33 = vld [vmem:[%s12806_s5 + $0x310] sm:$0xff]  ;;  %v7429_v49 = vld [vmem:[%s12806_s5 + $0x300] sm:$0xff] }
 0x496   :  { %5134 = vmatpush.msra.mxu0 %v7435_v17  ;;  %5174 = vmatpush.msra.mxu2 %v7452_v15  ;;  %v3883_v21 = vadd.f32 %v12020_v52, %v3859_v27  ;;  %v7430_v52 = vld [vmem:[%s12806_s5 + $0x308] sm:$0xff]  ;;  %v3861_v15 = vadd.f32 %v12022_v1, %v11706_v14  ;;  %v4702_v14 = vadd.f32 %v12115_v11, %v12095_v60 }
 0x497   :  { %5055 = vmatpush.msra.mxu1 %v7399_v8  ;;  %5096 = vmatpush.msra.mxu3 %v7415_v55  ;;  %v7446_v17 = vld [vmem:[%s12806_s5 + $0x388] sm:$0xff]  ;;  %v4773_v8 = vpop.f32.mrf.mxu0 }
 0x498   :  { %5135 = vmatpush.msra.mxu0 %v7434_v3  ;;  %5175 = vmatpush.msra.mxu2 %v7451_v19  ;;  %v3907_v6 = vadd.f32 %v11931_v5, %v3883_v21  ;;  %v7445_v5 = vld [vmem:[%s12806_s5 + $0x380] sm:$0xff]  ;;  %v3885_v19 = vadd.f32 %v12024_v62, %v3861_v15 }
 0x499   :  { %v4663_v56 = vpop.f32.mrf.mxu3  ;;  %5056 = vmatpush.msra.mxu1 %v7398_v30  ;;  %5097 = vmatpush.msra.mxu3 %v7414_v32 }
 0x49a   :  { %v4664_v29 = vadd.f32 %v4663_v56, %v4640_v18  ;;  %5136 = vmatpush.msra.mxu0 %v7433_v47  ;;  %5176 = vmatpush.msra.mxu2 %v7450_v16  ;;  %v4797_v56 = vpop.f32.mrf.mxu2  ;;  %v3931_v30 = vadd.f32 %v11936_v45, %v3907_v6  ;;  %v3909_v16 = vadd.f32 %v11955_v48, %v3885_v19 }
 0x49b   :  { %v4723_v37 = vpop.f32.mrf.mxu1  ;;  %5057 = vmatpush.msra.mxu1 %v7397_v41  ;;  %5098 = vmatpush.msra.mxu3 %v7413_v12  ;;  %v3864_v45 = vadd.f32 %v12026_v22, %v11770_v38 }
 0x49c   :  { %v12467_v50 = vadd.f32 %v4664_v29, %v12008_v39  ;;  %v4700_v39 = vadd.f32 %v12064_v36, %v12060_v7  ;;  %5137 = vmatpush.msra.mxu0 %v7432_v31  ;;  %5177 = vmatpush.msra.mxu2 %v7449_v10  ;;  %v7447_v7 = vld [vmem:[%s12806_s5 + $0x390] sm:$0xff]  ;;  %v4822_v36 = vld [vmem:[%s12805_s4] sm:$0x3]  ;;  %v4705_v10 = vadd.f32 %v12190_v4, %v12170_v20 }
 0x49d   :  { %v12505_v55 = vperm.slane %v4822_v36, 0  ;;  %v12514_v1 = vperm.slane %v4822_v36, 1 }
 0x49e   :  { %v4724_v24 = vadd.f32 %v4723_v37, %v4700_v39  ;;  %5138 = vmatpush.msra.mxu0 %v7431_v33  ;;  %5178 = vmatpush.msra.mxu2 %v7448_v34 }
 0x49f   :  { %v4776_v31 = vpop.f32.mrf.mxu0  ;;  %v4830_v33 = vadd.f32 %v12505_v55, %v12253_v0 }
 0x4a0   :  { %5139 = vmatpush.msra.mxu0 %v7430_v52  ;;  %5179 = vmatpush.msra.mxu2 %v7447_v7 }
 0x4a1   :  { %v4747_v51 = vpop.f32.mrf.mxu3  ;;  %v4842_v4 = vmax.f32 %v4830_v33, 0.0  ;;  %v7523_v33 = vld [vmem:[%s12806_s5 + $0x5f0] sm:$0xff] }
 0x4a2   :  { %v4748_v40 = vadd.f32 %v4747_v51, %v4724_v24  ;;  %5140 = vmatpush.msra.mxu0 %v7429_v49  ;;  %5180 = vmatpush.msra.mxu2 %v7446_v17  ;;  %v4800_v39 = vpop.f32.mrf.mxu2  ;;  %v4707_v17 = vadd.f32 %v12261_v13, %v12244_v28  ;;  %v7474_v13 = vld [vmem:[%s12806_s5 + $0x468] sm:$0xff] }
 0x4a3   :  { %v4725_v18 = vpop.f32.mrf.mxu1 }
 0x4a4   :  { %v4772_v3 = vadd.f32 %v4771_v63, %v4748_v40  ;;  %5181 = vmatpush.msra.mxu2 %v7445_v5  ;;  %v4828_v63 = vadd.f32 %v12505_v55, %v12199_v61  ;;  %v4726_v47 = vadd.f32 %v4725_v18, %v4702_v14  ;;  %v3888_v61 = vadd.f32 %v12030_v57, %v3864_v45  ;;  %v7492_v57 = vld [vmem:[%s12806_s5 + $0x4f8] sm:$0xff]  ;;  %v7475_v18 = vld [vmem:[%s12806_s5 + $0x470] sm:$0xff] }
 0x4a5   :  { %v7476_v40 = vld [vmem:[%s12806_s5 + $0x478] sm:$0xff] }
 0x4a6   :  { %v4796_v29 = vadd.f32 %v4795_v59, %v4772_v3  ;;  %v4840_v60 = vmax.f32 %v4828_v63, 0.0  ;;  %v3933_v59 = vadd.f32 %v11965_v26, %v3909_v16  ;;  %v3912_v52 = vadd.f32 %v11988_v43, %v3888_v61  ;;  %v7491_v43 = vld [vmem:[%s12806_s5 + $0x4f0] sm:$0xff]  ;;  %v7490_v3 = vld [vmem:[%s12806_s5 + $0x4e8] sm:$0xff]  ;;  %v7508_v16 = vld [vmem:[%s12806_s5 + $0x578] sm:$0xff] }
 0x4a7   :  { %v4778_v5 = vpop.f32.mrf.mxu0  ;;  %v4710_v61 = vadd.f32 %v12326_v25, %v12315_v46  ;;  %v7486_v46 = vld [vmem:[%s12806_s5 + $0x4c8] sm:$0xff]  ;;  %v4834_v25 = vadd.f32 %v12505_v55, %v12357_v42 }
 0x4a8   :  { %v4811_v32 = vadd.f32 %v4796_v29, %v3931_v30  ;;  %v3936_v49 = vadd.f32 %v11992_v54, %v3912_v52  ;;  %v4832_v54 = vadd.f32 %v12505_v55, %v12307_v58  ;;  %v7489_v30 = vld [vmem:[%s12806_s5 + $0x4e0] sm:$0xff]  ;;  %v7522_v42 = vld [vmem:[%s12806_s5 + $0x5e8] sm:$0xff] }
 0x4a9   :  { %v4749_v37 = vpop.f32.mrf.mxu3  ;;  %v7473_v58 = vld [vmem:[%s12806_s5 + $0x460] sm:$0xff] }
 0x4aa   :  { %v4829_v62 = vadd.f32 %v12514_v1, %v4811_v32  ;;  %v4750_v41 = vadd.f32 %v4749_v37, %v4726_v47  ;;  %v4802_v14 = vpop.f32.mrf.mxu2  ;;  %v7505_v52 = vld [vmem:[%s12806_s5 + $0x560] sm:$0xff] }
 0x4ab   :  { %v4728_v27 = vpop.f32.mrf.mxu1 }
 0x4ac   :  { %v4841_v11 = vmax.f32 %v4829_v62, 0.0  ;;  %v4774_v12 = vadd.f32 %v4773_v8, %v4750_v41  ;;  %v4729_v38 = vadd.f32 %v4728_v27, %v4705_v10  ;;  %v7488_v62 = vld [vmem:[%s12806_s5 + $0x4d8] sm:$0xff]  ;;  %v4844_v41 = vmax.f32 %v4832_v54, 0.0 }
 0x4ae   :  { %v4852_v48 = vmax.f32 %v4840_v60, %v4841_v11  ;;  %v4798_v21 = vadd.f32 %v4797_v56, %v4774_v12  ;;  %v7472_v11 = vld [vmem:[%s12806_s5 + $0x458] sm:$0xff]  ;;  %v7507_v12 = vld [vmem:[%s12806_s5 + $0x570] sm:$0xff] }
 0x4b0   :  { %v4859_v34 = vrot.slane %v4852_v48, 2  ;;  %v4813_v24 = vadd.f32 %v4798_v21, %v3933_v59  ;;  %v7524_v59 = vld [vmem:[%s12806_s5 + $0x5f8] sm:$0xff]  ;;  %v7471_v21 = vld [vmem:[%s12806_s5 + $0x450] sm:$0xff] }
 0x4b1   :  { %v4752_v22 = vpop.f32.mrf.mxu3 }
 0x4b2   :  { %v4831_v26 = vadd.f32 %v12514_v1, %v4813_v24  ;;  %v4753_v7 = vadd.f32 %v4752_v22, %v4729_v38  ;;  %v4861_v36 = vmax.f32 %v4852_v48, %v4859_v34  ;;  %v7470_v22 = vld [vmem:[%s12806_s5 + $0x448] sm:$0xff] }
 0x4b3   :  { %v4730_v20 = vpop.f32.mrf.mxu1 }
 0x4b4   :  { %v4843_v51 = vmax.f32 %v4831_v26, 0.0  ;;  %v4777_v6 = vadd.f32 %v4776_v31, %v4753_v7  ;;  %4934 = vmatmul.f32.vlgmr.msrb.gmra.mxu3 %v4861_v36  ;;  %v4896_v0 = vrot.slane %v4861_v36, 4  ;;  %v4731_v28 = vadd.f32 %v4730_v20, %v4707_v17  ;;  %v7487_v31 = vld [vmem:[%s12806_s5 + $0x4d0] sm:$0xff]  ;;  %v4781_v26 = vpop.f32.mrf.mxu0  ;;  %v7469_v20 = vld [vmem:[%s12806_s5 + $0x440] sm:$0xff] }
 0x4b5   :  { %5249 = vmatpush.msrb.mxu3 %v7492_v57 }
 0x4b6   :  { %v4853_v15 = vmax.f32 %v4842_v4, %v4843_v51  ;;  %v4801_v8 = vadd.f32 %v4800_v39, %v4777_v6  ;;  %4914 = vmatmul.f32.vlgmr.msrb.gmra.mxu1 %v4896_v0  ;;  %v7506_v39 = vld [vmem:[%s12806_s5 + $0x568] sm:$0xff]  ;;  %v7485_v4 = vld [vmem:[%s12806_s5 + $0x4c0] sm:$0xff]  ;;  %v4805_v51 = vpop.f32.mrf.mxu2  ;;  %v7504_v6 = vld [vmem:[%s12806_s5 + $0x558] sm:$0xff] }
 0x4b7   :  { %5208 = vmatpush.msrb.mxu1 %v7476_v40  ;;  %5250 = vmatpush.msrb.mxu3 %v7491_v43  ;;  %v7521_v0 = vld [vmem:[%s12806_s5 + $0x5e0] sm:$0xff]  ;;  %v4846_v40 = vmax.f32 %v4834_v25, 0.0  ;;  %v7516_v25 = vld [vmem:[%s12806_s5 + $0x5b8] sm:$0xff] }
 0x4b8   :  { %v4939_v19 = vrot.slane %v4853_v15, 2  ;;  %v4815_v56 = vadd.f32 %v4801_v8, %v3936_v49 }
 0x4b9   :  { %5209 = vmatpush.msrb.mxu1 %v7475_v18  ;;  %v4754_v29 = vpop.f32.mrf.mxu3  ;;  %5251 = vmatpush.msrb.mxu3 %v7490_v3  ;;  %v7484_v18 = vld [vmem:[%s12806_s5 + $0x4b8] sm:$0xff]  ;;  %v7503_v3 = vld [vmem:[%s12806_s5 + $0x550] sm:$0xff] }
 0x4ba   :  { %v4833_v63 = vadd.f32 %v12514_v1, %v4815_v56  ;;  %v4755_v32 = vadd.f32 %v4754_v29, %v4731_v28  ;;  %v4941_v47 = vmax.f32 %v4853_v15, %v4939_v19  ;;  %v7468_v15 = vld [vmem:[%s12806_s5 + $0x438] sm:$0xff]  ;;  %v7467_v28 = vld [vmem:[%s12806_s5 + $0x430] sm:$0xff] }
 0x4bb   :  { %5210 = vmatpush.msrb.mxu1 %v7474_v13  ;;  %v4733_v37 = vpop.f32.mrf.mxu1  ;;  %5252 = vmatpush.msrb.mxu3 %v7489_v30  ;;  %v7520_v56 = vld [vmem:[%s12806_s5 + $0x5d8] sm:$0xff]  ;;  %v7483_v13 = vld [vmem:[%s12806_s5 + $0x4b0] sm:$0xff] }
 0x4bc   :  { %v4845_v27 = vmax.f32 %v4833_v63, 0.0  ;;  %v4779_v45 = vadd.f32 %v4778_v5, %v4755_v32  ;;  %4975 = vmatmul.f32.vlgmr.msrb.gmra.mxu0 %v4941_v47  ;;  %v4998_v60 = vrot.slane %v4941_v47, 4  ;;  %v4734_v38 = vadd.f32 %v4733_v37, %v4710_v61  ;;  %v7519_v63 = vld [vmem:[%s12806_s5 + $0x5d0] sm:$0xff]  ;;  %v7466_v32 = vld [vmem:[%s12806_s5 + $0x428] sm:$0xff] }
 0x4bd   :  { %5211 = vmatpush.msrb.mxu1 %v7473_v58  ;;  %5291 = vmatpush.msrb.mxu0 %v7508_v16  ;;  %v4712_v5 = vadd.f32 %v12395_v2, %v12380_v9  ;;  %v7502_v9 = vld [vmem:[%s12806_s5 + $0x548] sm:$0xff]  ;;  %v4836_v2 = vadd.f32 %v12505_v55, %v12413_v53 }
 0x4be   :  { %v4854_v10 = vmax.f32 %v4844_v41, %v4845_v27  ;;  %v4803_v48 = vadd.f32 %v4802_v14, %v4779_v45  ;;  %5016 = vmatmul.f32.vlgmr.msrb.gmra.mxu2 %v4998_v60  ;;  %5253 = vmatpush.msrb.mxu3 %v7488_v62  ;;  %v7482_v53 = vld [vmem:[%s12806_s5 + $0x4a8] sm:$0xff]  ;;  %v4783_v41 = vpop.f32.mrf.mxu0  ;;  %v7465_v27 = vld [vmem:[%s12806_s5 + $0x420] sm:$0xff] }
 0x4bf   :  { %5212 = vmatpush.msrb.mxu1 %v7472_v11  ;;  %5292 = vmatpush.msrb.mxu0 %v7507_v12  ;;  %v7518_v37 = vld [vmem:[%s12806_s5 + $0x5c8] sm:$0xff]  ;;  %v7481_v45 = vld [vmem:[%s12806_s5 + $0x4a0] sm:$0xff]  ;;  %v4848_v60 = vmax.f32 %v4836_v2, 0.0  ;;  %v5370_v2 = vld [vmem:[%s12808_s7 + $0x58] sm:$0xff] }
 0x4c0   :  { %v5022_v34 = vrot.slane %v4854_v10, 2  ;;  %v4817_v24 = vadd.f32 %v4803_v48, %v12034_v44  ;;  %5332 = vmatpush.msrb.mxu2 %v7524_v59  ;;  %5254 = vmatpush.msrb.mxu3 %v7487_v31  ;;  %v7500_v59 = vld [vmem:[%s12806_s5 + $0x538] sm:$0xff]  ;;  %v7517_v31 = vld [vmem:[%s12806_s5 + $0x5c0] sm:$0xff] }
 0x4c1   :  { %5213 = vmatpush.msrb.mxu1 %v7471_v21  ;;  %v4757_v7 = vpop.f32.mrf.mxu3  ;;  %5293 = vmatpush.msrb.mxu0 %v7506_v39  ;;  %v7464_v48 = vld [vmem:[%s12806_s5 + $0x418] sm:$0xff] }
 0x4c2   :  { %v4835_v44 = vadd.f32 %v12514_v1, %v4817_v24  ;;  %v4758_v36 = vadd.f32 %v4757_v7, %v4734_v38  ;;  %5333 = vmatpush.msrb.mxu2 %v7523_v33  ;;  %5255 = vmatpush.msrb.mxu3 %v7486_v46  ;;  %v5024_v57 = vmax.f32 %v4854_v10, %v5022_v34  ;;  %v4807_v10 = vpop.f32.mrf.mxu2  ;;  %v7480_v33 = vld [vmem:[%s12806_s5 + $0x498] sm:$0xff]  ;;  %v7499_v46 = vld [vmem:[%s12806_s5 + $0x530] sm:$0xff] }
 0x4c3   :  { %5214 = vmatpush.msrb.mxu1 %v7470_v22  ;;  %5294 = vmatpush.msrb.mxu0 %v7505_v52  ;;  %v4735_v8 = vpop.f32.mrf.mxu1  ;;  %v7463_v34 = vld [vmem:[%s12806_s5 + $0x410] sm:$0xff]  ;;  %v4838_v24 = vadd.f32 %v12505_v55, %v12467_v50  ;;  %v7478_v55 = vld [vmem:[%s12806_s5 + $0x488] sm:$0xff] }
 0x4c4   :  { %v4847_v43 = vmax.f32 %v4835_v44, 0.0  ;;  %v4782_v49 = vadd.f32 %v4781_v26, %v4758_v36  ;;  %5334 = vmatpush.msrb.mxu2 %v7522_v42  ;;  %5058 = vmatmul.f32.vlgmr.msra.gmra.mxu1 %v5024_v57  ;;  %v5081_v17 = vrot.slane %v5024_v57, 4  ;;  %v4736_v29 = vadd.f32 %v4735_v8, %v4712_v5  ;;  %v7479_v52 = vld [vmem:[%s12806_s5 + $0x490] sm:$0xff]  ;;  %v7498_v26 = vld [vmem:[%s12806_s5 + $0x528] sm:$0xff]  ;;  %v7497_v42 = vld [vmem:[%s12806_s5 + $0x520] sm:$0xff] }
 0x4c5   :  { %5215 = vmatpush.msrb.mxu1 %v7469_v20  ;;  %5256 = vmatpush.msrb.mxu3 %v7485_v4  ;;  %v7515_v7 = vld [vmem:[%s12806_s5 + $0x5b0] sm:$0xff]  ;;  %v7514_v36 = vld [vmem:[%s12806_s5 + $0x5a8] sm:$0xff]  ;;  %v4850_v57 = vmax.f32 %v4838_v24, 0.0  ;;  %v7477_v4 = vld [vmem:[%s12806_s5 + $0x480] sm:$0xff] }
 0x4c6   :  { %v4855_v54 = vmax.f32 %v4846_v40, %v4847_v43  ;;  %v4806_v19 = vadd.f32 %v4805_v51, %v4782_v49  ;;  %5295 = vmatpush.msrb.mxu0 %v7504_v6  ;;  %5335 = vmatpush.msrb.mxu2 %v7521_v0  ;;  %v7496_v51 = vld [vmem:[%s12806_s5 + $0x518] sm:$0xff]  ;;  %v7513_v6 = vld [vmem:[%s12806_s5 + $0x5a0] sm:$0xff]  ;;  %v7495_v43 = vld [vmem:[%s12806_s5 + $0x510] sm:$0xff] }
 0x4c7   :  { %5099 = vmatmul.f32.vlgmr.msra.gmra.mxu3 %v5081_v17  ;;  %5216 = vmatpush.msrb.mxu1 %v7468_v15  ;;  %v7512_v49 = vld [vmem:[%s12806_s5 + $0x598] sm:$0xff]  ;;  %v7494_v15 = vld [vmem:[%s12806_s5 + $0x508] sm:$0xff]  ;;  %v7511_v8 = vld [vmem:[%s12806_s5 + $0x590] sm:$0xff] }
 0x4c8   :  { %v5105_v30 = vrot.slane %v4855_v54, 2  ;;  %v4819_v14 = vadd.f32 %v4806_v19, %v12039_v35  ;;  %5257 = vmatpush.msrb.mxu3 %v7484_v18  ;;  %5296 = vmatpush.msrb.mxu0 %v7503_v3  ;;  %v7501_v35 = vld [vmem:[%s12806_s5 + $0x540] sm:$0xff]  ;;  %v7510_v5 = vld [vmem:[%s12806_s5 + $0x588] sm:$0xff] }
 0x4c9   :  { %5336 = vmatpush.msrb.mxu2 %v7520_v56  ;;  %5217 = vmatpush.msrb.mxu1 %v7467_v28  ;;  %v4759_v47 = vpop.f32.mrf.mxu3  ;;  %v7493_v3 = vld [vmem:[%s12806_s5 + $0x500] sm:$0xff]  ;;  %v5374_v56 = vld [vmem:[%s12808_s7 + $0x78] sm:$0xff]  ;;  %v5373_v28 = vld [vmem:[%s12808_s7 + $0x70] sm:$0xff] }
 0x4ca   :  { %v4837_v58 = vadd.f32 %v12514_v1, %v4819_v14  ;;  %v4760_v16 = vadd.f32 %v4759_v47, %v4736_v29  ;;  %5258 = vmatpush.msrb.mxu3 %v7483_v13  ;;  %5297 = vmatpush.msrb.mxu0 %v7502_v9  ;;  %v5107_v62 = vmax.f32 %v4855_v54, %v5105_v30  ;;  %v7509_v54 = vld [vmem:[%s12806_s5 + $0x580] sm:$0xff]  ;;  %v5372_v13 = vld [vmem:[%s12808_s7 + $0x68] sm:$0xff]  ;;  %v5369_v30 = vld [vmem:[%s12808_s7 + $0x50] sm:$0xff] }
 0x4cb   :  { %5337 = vmatpush.msrb.mxu2 %v7519_v63  ;;  %5218 = vmatpush.msrb.mxu1 %v7466_v32  ;;  %v5371_v9 = vld [vmem:[%s12808_s7 + $0x60] sm:$0xff]  ;;  %v5368_v14 = vld [vmem:[%s12808_s7 + $0x48] sm:$0xff]  ;;  %v5366_v63 = vld [vmem:[%s12808_s7 + $0x38] sm:$0xff] }
 0x4cc   :  { %v4849_v11 = vmax.f32 %v4837_v58, 0.0  ;;  %v4784_v12 = vadd.f32 %v4783_v41, %v4760_v16  ;;  %5259 = vmatpush.msrb.mxu3 %v7482_v53  ;;  %5298 = vmatpush.msrb.mxu0 %v7501_v35  ;;  %v5164_v61 = vrot.slane %v5107_v62, 4  ;;  %v5367_v29 = vld [vmem:[%s12808_s7 + $0x40] sm:$0xff]  ;;  %v5365_v32 = vld [vmem:[%s12808_s7 + $0x30] sm:$0xff]  ;;  %v5364_v47 = vld [vmem:[%s12808_s7 + $0x28] sm:$0xff] }
 0x4cd   :  { %5338 = vmatpush.msrb.mxu2 %v7518_v37  ;;  %5141 = vmatmul.f32.vlgmr.msra.gmra.mxu0 %v5107_v62  ;;  %v5363_v53 = vld [vmem:[%s12808_s7 + $0x20] sm:$0xff]  ;;  %v5362_v37 = vld [vmem:[%s12808_s7 + $0x18] sm:$0xff]  ;;  %v5361_v41 = vld [vmem:[%s12808_s7 + $0x10] sm:$0xff] }
 0x4ce   :  { %v4856_v21 = vmax.f32 %v4848_v60, %v4849_v11  ;;  %v4808_v39 = vadd.f32 %v4807_v10, %v4784_v12  ;;  %5219 = vmatpush.msrb.mxu1 %v7465_v27  ;;  %5260 = vmatpush.msrb.mxu3 %v7481_v45  ;;  %v5360_v27 = vld [vmem:[%s12808_s7 + $0x8] sm:$0xff]  ;;  %v5359_v11 = vld [vmem:[%s12808_s7] sm:$0xff] }
 0x4cf   :  { %5299 = vmatpush.msrb.mxu0 %v7500_v59  ;;  %5339 = vmatpush.msrb.mxu2 %v7517_v31 }
 0x4d0   :  { %v5188_v38 = vrot.slane %v4856_v21, 2  ;;  %v4821_v22 = vadd.f32 %v4808_v39, %v12041_v23  ;;  %5182 = vmatmul.f32.vlgmr.msra.gmra.mxu2 %v5164_v61  ;;  %5220 = vmatpush.msrb.mxu1 %v7464_v48  ;;  %v7462_v23 = vld [vmem:[%s12806_s5 + $0x408] sm:$0xff] }
 0x4d1   :  { %5261 = vmatpush.msrb.mxu3 %v7480_v33  ;;  %5300 = vmatpush.msrb.mxu0 %v7499_v46 }
 0x4d2   :  { %v4839_v50 = vadd.f32 %v12514_v1, %v4821_v22  ;;  %5340 = vmatpush.msrb.mxu2 %v7516_v25  ;;  %5221 = vmatpush.msrb.mxu1 %v7463_v34  ;;  %v5190_v44 = vmax.f32 %v4856_v21, %v5188_v38  ;;  %v7461_v1 = vld [vmem:[%s12806_s5 + $0x400] sm:$0xff] }
 0x4d3   :  { %5262 = vmatpush.msrb.mxu3 %v7479_v52  ;;  %5301 = vmatpush.msrb.mxu0 %v7498_v26  ;;  %v7934_v52 = vld [vmem:[%s12807_s6] ss:$0 sm:$0xff] }
 0x4d4   :  { %v4851_v20 = vmax.f32 %v4839_v50, 0.0  ;;  %5341 = vmatpush.msrb.mxu2 %v7515_v7  ;;  %5222 = vmatpush.msrb.mxu1 %v7462_v23  ;;  %v5247_v0 = vrot.slane %v5190_v44, 4 }
 0x4d5   :  { %5263 = vmatpush.msrb.mxu3 %v7478_v55  ;;  %5302 = vmatpush.msrb.mxu0 %v7497_v42  ;;  %v7935_v55 = vld [vmem:[%s12809_s8] ss:$0 sm:$0xff] }
 0x4d6   :  { %v4857_v40 = vmax.f32 %v4850_v57, %v4851_v20  ;;  %5342 = vmatpush.msrb.mxu2 %v7514_v36  ;;  %5223 = vmatpush.msrb.mxu1 %v7461_v1 }
 0x4d7   :  { %5224 = vmatmul.f32.vlgmr.msrb.gmra.mxu1 %v5190_v44  ;;  %5264 = vmatpush.msrb.mxu3 %v7477_v4 }
 0x4d8   :  { %v5271_v17 = vrot.slane %v4857_v40, 2  ;;  %5303 = vmatpush.msrb.mxu0 %v7496_v51  ;;  %5343 = vmatpush.msrb.mxu2 %v7513_v6 }
 0x4d9   :  { %5265 = vmatmul.f32.vlgmr.msrb.gmra.mxu3 %v5247_v0  ;;  %5379 = vmatpush.msra.mxu1 %v5374_v56 }
 0x4da   :  { %5304 = vmatpush.msrb.mxu0 %v7495_v43  ;;  %5344 = vmatpush.msrb.mxu2 %v7512_v49  ;;  %v5273_v18 = vmax.f32 %v4857_v40, %v5271_v17 }
 0x4db   :  { %5380 = vmatpush.msra.mxu1 %v5373_v28 }
 0x4dc   :  { %5305 = vmatpush.msrb.mxu0 %v7494_v15  ;;  %5345 = vmatpush.msrb.mxu2 %v7511_v8  ;;  %v5330_v19 = vrot.slane %v5273_v18, 4 }
 0x4dd   :  { %5381 = vmatpush.msra.mxu1 %v5372_v13 }
 0x4de   :  { %5306 = vmatpush.msrb.mxu0 %v7493_v3  ;;  %5346 = vmatpush.msrb.mxu2 %v7510_v5 }
 0x4df   :  { %5307 = vmatmul.f32.vlgmr.msrb.gmra.mxu0 %v5273_v18  ;;  %5382 = vmatpush.msra.mxu1 %v5371_v9 }
 0x4e0   :  { %5347 = vmatpush.msrb.mxu2 %v7509_v54 }
 0x4e1   :  { %5348 = vmatmul.f32.vlgmr.msrb.gmra.mxu2 %v5330_v19  ;;  %5383 = vmatpush.msra.mxu1 %v5370_v2 }
 0x4e3   :  { %5384 = vmatpush.msra.mxu1 %v5369_v30 }
 0x4e5   :  { %5385 = vmatpush.msra.mxu1 %v5368_v14 }
 0x4e7   :  { %5386 = vmatpush.msra.mxu1 %v5367_v29 }
 0x4e9   :  { %5387 = vmatpush.msra.mxu1 %v5366_v63 }
 0x4eb   :  { %5388 = vmatpush.msra.mxu1 %v5365_v32 }
 0x4ed   :  { %5389 = vmatpush.msra.mxu1 %v5364_v47 }
 0x4ef   :  { %5390 = vmatpush.msra.mxu1 %v5363_v53 }
 0x4f1   :  { %5391 = vmatpush.msra.mxu1 %v5362_v37 }
 0x4f3   :  { %5392 = vmatpush.msra.mxu1 %v5361_v41 }
 0x4f5   :  { %5393 = vmatpush.msra.mxu1 %v5360_v27 }
 0x4f7   :  { %5394 = vmatpush.msra.mxu1 %v5359_v11 }
 0x533   :  { %v4915_v58 = vpop.f32.mrf.mxu1 }
 0x537   :  { %v4935_v35 = vpop.f32.mrf.mxu3 }
 0x538   :  { %v4936_v16 = vadd.f32 %v4935_v35, %v4915_v58 }
 0x539   :  { %v4976_v62 = vpop.f32.mrf.mxu0 }
 0x53a   :  { %v4979_v60 = vadd.f32 %v4976_v62, %v4936_v16 }
 0x541   :  { %v5017_v45 = vpop.f32.mrf.mxu2  ;;  %v5059_v59 = vpop.f32.mrf.mxu1 }
 0x542   :  { %v5020_v12 = vadd.f32 %v5017_v45, %v4979_v60 }
 0x544   :  { %v5062_v61 = vadd.f32 %v5059_v59, %v5020_v12 }
 0x54a   :  { %v5100_v31 = vpop.f32.mrf.mxu3  ;;  %v5142_v48 = vpop.f32.mrf.mxu0 }
 0x54b   :  { %v5103_v10 = vadd.f32 %v5100_v31, %v5062_v61 }
 0x54d   :  { %v5145_v39 = vadd.f32 %v5142_v48, %v5103_v10 }
 0x553   :  { %v5183_v21 = vpop.f32.mrf.mxu2 }
 0x554   :  { %v5186_v33 = vadd.f32 %v5183_v21, %v5145_v39  ;;  %v5225_v46 = vpop.f32.mrf.mxu1 }
 0x556   :  { %v5228_v34 = vadd.f32 %v5225_v46, %v5186_v33 }
 0x55c   :  { %v5266_v25 = vpop.f32.mrf.mxu3  ;;  %v5308_v38 = vpop.f32.mrf.mxu0 }
 0x55d   :  { %v5269_v24 = vadd.f32 %v5266_v25, %v5228_v34 }
 0x55f   :  { %v5311_v22 = vadd.f32 %v5308_v38, %v5269_v24 }
 0x564   :  { %v5349_v26 = vpop.f32.mrf.mxu2 }
 0x565   :  { %v5352_v7 = vadd.f32 %v5349_v26, %v5311_v22 }
 0x567   :  { %v5357_v23 = vadd.f32 %v7934_v52, %v5352_v7 }
 0x569   :  { %v5358_v50 = vmax.f32 %v5357_v23, 0.0 }
 0x56b   :  { %5395 = vmatmul.f32.vlgmr.msra.gmra.mxu1 %v5358_v50 }
 0x5e8   :  { %v5396_v42 = vpop.f32.mrf.mxu1 }
 0x5e9   :  { %v5397_v44 = vadd.f32 %v7935_v55, %v5396_v42 }
 0x5eb   :  { %5400 = vst.msk [vmem:[#allocation2] sm:$0x3] %vm5399_vm4, %v5397_v44 }
 0x5ec   :  { %5411 = dma.vmem_to_hbm [thread:$0]  %s5407_s12, 32, %s5409_s14, [#allocation3]  }
 0x5ed   :  { %7961 = dma.done.wait [#allocation3], 32  }
 0x5ee   :  { %7962 = vsyncadd [#allocation3], 4294967264 }
 0x5ef   :  { %5416 = vsyncpa [#allocation3], 1 }

</bundles_post_ra>
